<compile_context>
chip_gen: v5e
topology: v5e:2x2
jax: 0.10.0
libtpu: 0.0.40
codegen_flags: <defaults>
</compile_context>

<pallas_src>
import functools

import jax
import jax.numpy as jnp
from jax import lax
from jax.experimental import pallas as pl
from jax.experimental.pallas import tpu as pltpu

D_MODEL = 256
NHEADS = 8
HEAD_DIM = D_MODEL // NHEADS            # 32
POS_HEAD_DIM = D_MODEL // (2 * NHEADS)  # 16
POS_DIM = D_MODEL // 2                  # 128
QSE_DIM = D_MODEL // 2 * 5              # 640
DIM_FF = 512
LN_EPS = 1e-5
BF16 = jnp.bfloat16
NEG_INF = -1e9

_DN_QKT = (((1,), (1,)), ((), ()))  # contract last dims: (M,D) x (N,D) -> (M,N)


# -------------------- in-kernel helpers --------------------
def _linear(x_f32, w_bf16, b_f32):
    # bf16 operands on the MXU, f32 accumulation, f32 bias add.
    return jnp.dot(x_f32.astype(BF16), w_bf16,
                   preferred_element_type=jnp.float32) + b_f32


def _layernorm(x, g, b):
    mu = jnp.mean(x, axis=-1, keepdims=True)
    xc = x - mu
    var = jnp.mean(xc * xc, axis=-1, keepdims=True)
    return xc * lax.rsqrt(var + LN_EPS) * g + b


def _softmax(x):
    # One softmax over the whole head-stacked score block (f32, exact).
    m = jnp.max(x, axis=-1, keepdims=True)
    e = jnp.exp(x - m)
    return e / jnp.sum(e, axis=-1, keepdims=True)


def _mod(i, n):
    # i mod n for a Python-int n; use bitwise AND when n is a power of two.
    if n & (n - 1) == 0:
        return lax.bitwise_and(i, n - 1)
    return lax.rem(i, n)


def _batch_bias(rows, cols, batch):
    """Additive score bias for batch-interleaved rows (index = l*batch + b):
    0 where row/col belong to the same batch element, NEG_INF elsewhere.
    Works for the head-stacked row layout because rows % batch is preserved."""
    if batch == 1:
        return jnp.zeros((rows, cols), jnp.float32)
    rb = _mod(lax.broadcasted_iota(jnp.int32, (rows, cols), 0), batch)
    cb = _mod(lax.broadcasted_iota(jnp.int32, (rows, cols), 1), batch)
    return jnp.where(rb == cb, 0.0, NEG_INF).astype(jnp.float32)


def _self_scores(qk_bf):
    """Per-head 32-lane contractions, stacked along sublanes: (H*nq, nq)."""
    parts = []
    for h in range(NHEADS):
        sl = slice(h * HEAD_DIM, (h + 1) * HEAD_DIM)
        parts.append(lax.dot_general(qk_bf[:, sl], qk_bf[:, sl], _DN_QKT,
                                     preferred_element_type=jnp.float32))
    return jnp.concatenate(parts, axis=0)


def _cross_scores(qc_bf, qp_bf, kc_bf, kp_bf):
    """Modulated cross-attn scores: per head, content(32) + pos_x(16) + pos_y(16)
    lane contractions, stacked along sublanes: (H*nq, nk)."""
    parts = []
    for h in range(NHEADS):
        c = slice(h * HEAD_DIM, (h + 1) * HEAD_DIM)
        x = slice(h * POS_HEAD_DIM, (h + 1) * POS_HEAD_DIM)
        y = slice(POS_DIM + h * POS_HEAD_DIM, POS_DIM + (h + 1) * POS_HEAD_DIM)
        s = (lax.dot_general(qc_bf[:, c], kc_bf[:, c], _DN_QKT,
                             preferred_element_type=jnp.float32)
             + lax.dot_general(qp_bf[:, x], kp_bf[:, x], _DN_QKT,
                               preferred_element_type=jnp.float32)
             + lax.dot_general(qp_bf[:, y], kp_bf[:, y], _DN_QKT,
                               preferred_element_type=jnp.float32))
        parts.append(s)
    return jnp.concatenate(parts, axis=0)


def _attn_pv(p_bf, v_bf, lane_masks):
    """p_bf: (H*nq, nk) head-stacked probabilities (bf16); v_bf: (nk, 256).
    Returns (nq, 256) f32 == concat_h(P_h @ V_h): each head's value lanes are
    selected with a boolean lane mask (no cross-lane relayouts), and summing
    the per-head matmuls reproduces the concatenated multi-head output."""
    nq = p_bf.shape[0] // NHEADS
    acc = jnp.zeros((nq, D_MODEL), jnp.float32)
    zero = jnp.zeros((), v_bf.dtype)
    for h in range(NHEADS):
        v_h = jnp.where(lane_masks[h], v_bf, zero)
        acc = acc + jnp.dot(p_bf[h * nq:(h + 1) * nq], v_h,
                            preferred_element_type=jnp.float32)
    return acc


# -------------------- the fused decoder-layer kernel --------------------
def decoder_layer_kernel(
    tgt_ref, mem_ref, qse_ref, pos_ref,
    w_qp1_ref, b_qp1_ref, w_qp2_ref, b_qp2_ref,
    w_sa_ref, b_sa_ref, g1_ref, be1_ref,
    w_cm1_ref, b_cm1_ref, w_cm2_ref, b_cm2_ref,
    w_ca_ref, b_ca_ref, g2_ref, be2_ref,
    w_l1_ref, b_l1_ref, w_l2_ref, b_l2_ref, g3_ref, be3_ref,
    out_ref, *, batch,
):
    nq = tgt_ref.shape[0]   # num_queries * batch (batch-interleaved rows)
    nk = mem_ref.shape[0]   # (h*w) * batch

    tgt = tgt_ref[...]      # f32 residual stream
    mem = mem_ref[...]
    qse = qse_ref[...]
    pos = pos_ref[...]

    # Per-head value lane masks (built once).
    lane = lax.broadcasted_iota(jnp.int32, (1, D_MODEL), 1)
    lane_masks = [(lane >= h * HEAD_DIM) & (lane < (h + 1) * HEAD_DIM)
                  for h in range(NHEADS)]

    # Same-batch score biases for the head-stacked score blocks.
    sa_bias = _batch_bias(NHEADS * nq, nq, batch)
    ca_bias = _batch_bias(NHEADS * nq, nk, batch)

    # ---- sa_qpos_proj: MLP 640 -> 256 -> 256 ----
    hid = jnp.maximum(_linear(qse, w_qp1_ref[...], b_qp1_ref[...]), 0.0)
    query_pos = _linear(hid, w_qp2_ref[...], b_qp2_ref[...])
    qk = tgt + query_pos                                   # q = k

    # ---- self attention (embed 256, 8 heads x 32) ----
    qk_bf = qk.astype(BF16)
    v_bf = tgt.astype(BF16)
    s = _self_scores(qk_bf) * (1.0 / HEAD_DIM ** 0.5) + sa_bias
    p = _softmax(s).astype(BF16)
    sa = _attn_pv(p, v_bf, lane_masks)
    tgt2 = _linear(sa, w_sa_ref[...], b_sa_ref[...])
    tgt = _layernorm(tgt + tgt2, g1_ref[...], be1_ref[...])          # norm1

    # ---- ca_qcontent_modulated_proj: MLP 256 -> 256 -> 256 ----
    hid = jnp.maximum(_linear(tgt, w_cm1_ref[...], b_cm1_ref[...]), 0.0)
    qcm = _linear(hid, w_cm2_ref[...], b_cm2_ref[...])

    # ---- modulated cross attention (embed 512, 8 heads x 64, v head 32) ----
    qc_bf = tgt.astype(BF16)                               # content queries
    qp_bf = (qse[:, :2 * POS_DIM] * qcm).astype(BF16)      # [pos_x | pos_y] queries
    kc_bf = mem.astype(BF16)                               # content keys == values
    kp_bf = pos.astype(BF16)                               # [pos_x | pos_y] keys
    s = (_cross_scores(qc_bf, qp_bf, kc_bf, kp_bf)
         * (1.0 / (2 * HEAD_DIM) ** 0.5) + ca_bias)
    p = _softmax(s).astype(BF16)
    ca = _attn_pv(p, kc_bf, lane_masks)
    tgt2 = _linear(ca, w_ca_ref[...], b_ca_ref[...])
    tgt = _layernorm(tgt + tgt2, g2_ref[...], be2_ref[...])          # norm2

    # ---- feed-forward 256 -> 512 -> 256 ----
    hid = jnp.maximum(_linear(tgt, w_l1_ref[...], b_l1_ref[...]), 0.0)
    tgt2 = _linear(hid, w_l2_ref[...], b_l2_ref[...])
    out_ref[...] = _layernorm(tgt + tgt2, g3_ref[...], be3_ref[...]) # norm3


# -------------------- wrapper --------------------
def transformer_decoder_layer(tgt, memory, qse, pos, params):
    """tgt:(Q,B,256) memory:(HW,B,256) qse:(Q,B,640) pos:(HW,B,256) -> (Q,B,256)."""
    Q, B, C = tgt.shape
    HW = memory.shape[0]
    assert C == D_MODEL and qse.shape[-1] == QSE_DIM

    # Collapse (L, B, C) -> (L*B, C): a pure dim-collapse of the row-major
    # layout (no transpose, no extra HBM round trip).  Rows interleave as
    # l*B + b; the kernel keeps attention batch-correct with an additive
    # same-batch score mask, so the whole batch runs in ONE grid step with
    # fat (L*B, 256) matmuls.
    nq, nk = Q * B, HW * B
    tgt2 = tgt.reshape(nq, C)
    mem2 = memory.reshape(nk, C)
    qse2 = qse.reshape(nq, QSE_DIM)
    pos2 = pos.reshape(nk, C)

    def full_spec(shape):
        n = len(shape)
        return pl.BlockSpec(shape, lambda *_: (0,) * n)

    in_specs = ([full_spec(tgt2.shape), full_spec(mem2.shape),
                 full_spec(qse2.shape), full_spec(pos2.shape)]
                + [full_spec(p.shape) for p in params])

    # Advisory cost hint for XLA's scheduler around this small custom call.
    lin_flops = 2 * nq * (QSE_DIM * C + 5 * C * C + 2 * C * DIM_FF)
    attn_flops = (2 * NHEADS * nq * nq * (HEAD_DIM + C)
                  + 2 * NHEADS * nq * nk * (2 * HEAD_DIM + C))
    w_bytes = sum(int(p.size) * p.dtype.itemsize for p in params)
    act_bytes = 4 * (tgt2.size + mem2.size + qse2.size + pos2.size + nq * C)
    cost = pl.CostEstimate(flops=int(lin_flops + attn_flops),
                           transcendentals=int(NHEADS * nq * (nq + nk)),
                           bytes_accessed=int(w_bytes + act_bytes))

    out = pl.pallas_call(
        functools.partial(decoder_layer_kernel, batch=B),
        out_shape=jax.ShapeDtypeStruct((nq, C), jnp.float32),
        grid_spec=pltpu.PrefetchScalarGridSpec(
            num_scalar_prefetch=0,
            grid=(1,),                       # single step: best on 1-TC v5e/v6e
            in_specs=in_specs,
            out_specs=full_spec((nq, C)),
        ),
        compiler_params=pltpu.CompilerParams(
            dimension_semantics=("arbitrary",),
        ),
        cost_estimate=cost,
    )(tgt2, mem2, qse2, pos2, *params)

    return out.reshape(Q, B, C)


# -------------------- deterministic parameter init --------------------
def init_params(key):
    ks = jax.random.split(key, 8)

    def lin(k, fi, fo):
        kw, kb = jax.random.split(k)
        s = (1.0 / fi) ** 0.5
        # Weight matrices stored in bf16 ONCE at init (MXU-native operand
        # dtype; avoids a per-forward cast + HBM round trip).
        w = jax.random.uniform(kw, (fi, fo), jnp.float32, -s, s).astype(BF16)
        b = jax.random.uniform(kb, (1, fo), jnp.float32, -s, s)
        return w, b

    ones = jnp.ones((1, D_MODEL), jnp.float32)
    zeros = jnp.zeros((1, D_MODEL), jnp.float32)

    w_qp1, b_qp1 = lin(ks[0], QSE_DIM, D_MODEL)
    w_qp2, b_qp2 = lin(ks[1], D_MODEL, D_MODEL)
    w_sa, b_sa = lin(ks[2], D_MODEL, D_MODEL)
    w_cm1, b_cm1 = lin(ks[3], D_MODEL, D_MODEL)
    w_cm2, b_cm2 = lin(ks[4], D_MODEL, D_MODEL)
    w_ca, b_ca = lin(ks[5], D_MODEL, D_MODEL)
    w_l1, b_l1 = lin(ks[6], D_MODEL, DIM_FF)
    w_l2, b_l2 = lin(ks[7], DIM_FF, D_MODEL)

    return [
        w_qp1, b_qp1, w_qp2, b_qp2,
        w_sa, b_sa, ones, zeros,
        w_cm1, b_cm1, w_cm2, b_cm2,
        w_ca, b_ca, ones, zeros,
        w_l1, b_l1, w_l2, b_l2, ones, zeros,
    ]


# -------------------- pure-JAX reference (for self-check) --------------------
def reference_forward(tgt, memory, qse, pos, params, operand_dtype=jnp.float32):
    """operand_dtype=f32: PyTorch-semantics reference (weights are the stored
       bf16 weights, activations f32).  operand_dtype=bf16: same numerics
       recipe as the kernel (bf16 matmul operands, f32 accumulation)."""
    (w_qp1, b_qp1, w_qp2, b_qp2, w_sa, b_sa, g1, be1,
     w_cm1, b_cm1, w_cm2, b_cm2, w_ca, b_ca, g2, be2,
     w_l1, b_l1, w_l2, b_l2, g3, be3) = params

    cv = lambda x: x.astype(operand_dtype)
    hp = dict(preferred_element_type=jnp.float32, precision=lax.Precision.HIGHEST)
    lin = lambda x, w, b: jnp.einsum('...i,io->...o', cv(x), cv(w), **hp) + b[0]
    relu = lambda x: jnp.maximum(x, 0.0)

    def ln(x, g, b):
        mu = x.mean(-1, keepdims=True)
        var = ((x - mu) ** 2).mean(-1, keepdims=True)
        return (x - mu) / jnp.sqrt(var + LN_EPS) * g[0] + b[0]

    Q, B, C = tgt.shape
    HW = memory.shape[0]
    H, hd, phd = NHEADS, HEAD_DIM, POS_HEAD_DIM

    def mha(q, k, v, head_dim, w_out, b_out):
        s = jnp.einsum('qbhd,kbhd->bhqk', cv(q), cv(k), **hp) / (head_dim ** 0.5)
        p = jax.nn.softmax(s, axis=-1)
        o = jnp.einsum('bhqk,kbhe->qbhe', cv(p), cv(v), **hp)
        return lin(o.reshape(o.shape[0], B, -1), w_out, b_out)

    query_pos = lin(relu(lin(qse, w_qp1, b_qp1)), w_qp2, b_qp2)
    qk = tgt + query_pos
    tgt2 = mha(qk.reshape(Q, B, H, hd), qk.reshape(Q, B, H, hd),
               tgt.reshape(Q, B, H, hd), hd, w_sa, b_sa)
    t = ln(tgt + tgt2, g1, be1)

    qcm = lin(relu(lin(t, w_cm1, b_cm1)), w_cm2, b_cm2)
    q_pos_x = (qse[..., :128] * qcm[..., :128]).reshape(Q, B, H, phd)
    q_pos_y = (qse[..., 128:256] * qcm[..., 128:]).reshape(Q, B, H, phd)
    q2 = jnp.concatenate([t.reshape(Q, B, H, hd), q_pos_x, q_pos_y], axis=-1)
    k2 = jnp.concatenate([memory.reshape(HW, B, H, hd),
                          pos[..., :128].reshape(HW, B, H, phd),
                          pos[..., 128:].reshape(HW, B, H, phd)], axis=-1)
    tgt2 = mha(q2, k2, memory.reshape(HW, B, H, hd), 2 * hd, w_ca, b_ca)
    t = ln(t + tgt2, g2, be2)

    tgt2 = lin(relu(lin(t, w_l1, b_l1)), w_l2, b_l2)
    return ln(t + tgt2, g3, be3)


if __name__ == "__main__":
    key = jax.random.PRNGKey(0)
    k1, k2, k3, k4, kp = jax.random.split(key, 5)

    Q, B, HW = 16, 2, 32  # num_queries=16, batch=2, memory length=32 (h=4, w=8)
    tgt = jax.random.normal(k1, (Q, B, D_MODEL), jnp.float32)
    memory = jax.random.normal(k2, (HW, B, D_MODEL), jnp.float32)
    qse = jax.random.normal(k3, (Q, B, QSE_DIM), jnp.float32)   # sine box embed
    pos = jax.random.normal(k4, (HW, B, D_MODEL), jnp.float32)  # memory pos embed
    params = init_params(kp)

    out = transformer_decoder_layer(tgt, memory, qse, pos, params)
    out = jax.block_until_ready(out)

    assert out.shape == (Q, B, D_MODEL)
    assert bool(jnp.isfinite(out).all())

    # Tight check vs a reference using the same bf16 matmul operands
    # (remaining diffs: f32 accumulation order only).
    ref_bf16 = reference_forward(tgt, memory, qse, pos, params, jnp.bfloat16)
    err_bf16 = float(jnp.max(jnp.abs(out - ref_bf16)))
    assert err_bf16 < 5e-2, f"kernel vs bf16-operand reference mismatch: {err_bf16}"

    # Loose check vs the f32-activation reference (bf16 MXU operands introduce
    # ~0.5-1% relative error per sub-layer).
    ref_f32 = reference_forward(tgt, memory, qse, pos, params, jnp.float32)
    err_f32 = float(jnp.max(jnp.abs(out - ref_f32)))
    assert err_f32 < 2e-1, f"kernel vs f32 reference mismatch: {err_f32}"

    print("KERNEL_OK")
</pallas_src>

<mosaic_0001>
module attributes {stable_mosaic.version = 11 : i64} {
  func.func @decoder_layer_kernel(%arg0: i32, %arg1: memref<32x256xf32, #tpu.memory_space<vmem>>, %arg2: memref<64x256xf32, #tpu.memory_space<vmem>>, %arg3: memref<32x640xf32, #tpu.memory_space<vmem>>, %arg4: memref<64x256xf32, #tpu.memory_space<vmem>>, %arg5: memref<640x256xbf16, #tpu.memory_space<vmem>>, %arg6: memref<1x256xf32, #tpu.memory_space<vmem>>, %arg7: memref<256x256xbf16, #tpu.memory_space<vmem>>, %arg8: memref<1x256xf32, #tpu.memory_space<vmem>>, %arg9: memref<256x256xbf16, #tpu.memory_space<vmem>>, %arg10: memref<1x256xf32, #tpu.memory_space<vmem>>, %arg11: memref<1x256xf32, #tpu.memory_space<vmem>>, %arg12: memref<1x256xf32, #tpu.memory_space<vmem>>, %arg13: memref<256x256xbf16, #tpu.memory_space<vmem>>, %arg14: memref<1x256xf32, #tpu.memory_space<vmem>>, %arg15: memref<256x256xbf16, #tpu.memory_space<vmem>>, %arg16: memref<1x256xf32, #tpu.memory_space<vmem>>, %arg17: memref<256x256xbf16, #tpu.memory_space<vmem>>, %arg18: memref<1x256xf32, #tpu.memory_space<vmem>>, %arg19: memref<1x256xf32, #tpu.memory_space<vmem>>, %arg20: memref<1x256xf32, #tpu.memory_space<vmem>>, %arg21: memref<256x512xbf16, #tpu.memory_space<vmem>>, %arg22: memref<1x512xf32, #tpu.memory_space<vmem>>, %arg23: memref<512x256xbf16, #tpu.memory_space<vmem>>, %arg24: memref<1x256xf32, #tpu.memory_space<vmem>>, %arg25: memref<1x256xf32, #tpu.memory_space<vmem>>, %arg26: memref<1x256xf32, #tpu.memory_space<vmem>>, %arg27: memref<32x256xf32, #tpu.memory_space<vmem>>) attributes {dimension_semantics = [#tpu.dimension_semantics<arbitrary>], iteration_bounds = array<i64: 1>, scalar_prefetch = 0 : i64, scratch_operands = 0 : i64, tpu.core_type = #tpu.core_type<tc>, window_params = [{pipeline_mode = #tpu.pipeline_mode<synchronous>, transform_indices = @transform_0, window_bounds = array<i64: 32, 256>}, {pipeline_mode = #tpu.pipeline_mode<synchronous>, transform_indices = @transform_1, window_bounds = array<i64: 64, 256>}, {pipeline_mode = #tpu.pipeline_mode<synchronous>, transform_indices = @transform_2, window_bounds = array<i64: 32, 640>}, {pipeline_mode = #tpu.pipeline_mode<synchronous>, transform_indices = @transform_3, window_bounds = array<i64: 64, 256>}, {pipeline_mode = #tpu.pipeline_mode<synchronous>, transform_indices = @transform_4, window_bounds = array<i64: 640, 256>}, {pipeline_mode = #tpu.pipeline_mode<synchronous>, transform_indices = @transform_5, window_bounds = array<i64: 1, 256>}, {pipeline_mode = #tpu.pipeline_mode<synchronous>, transform_indices = @transform_6, window_bounds = array<i64: 256, 256>}, {pipeline_mode = #tpu.pipeline_mode<synchronous>, transform_indices = @transform_7, window_bounds = array<i64: 1, 256>}, {pipeline_mode = #tpu.pipeline_mode<synchronous>, transform_indices = @transform_8, window_bounds = array<i64: 256, 256>}, {pipeline_mode = #tpu.pipeline_mode<synchronous>, transform_indices = @transform_9, window_bounds = array<i64: 1, 256>}, {pipeline_mode = #tpu.pipeline_mode<synchronous>, transform_indices = @transform_10, window_bounds = array<i64: 1, 256>}, {pipeline_mode = #tpu.pipeline_mode<synchronous>, transform_indices = @transform_11, window_bounds = array<i64: 1, 256>}, {pipeline_mode = #tpu.pipeline_mode<synchronous>, transform_indices = @transform_12, window_bounds = array<i64: 256, 256>}, {pipeline_mode = #tpu.pipeline_mode<synchronous>, transform_indices = @transform_13, window_bounds = array<i64: 1, 256>}, {pipeline_mode = #tpu.pipeline_mode<synchronous>, transform_indices = @transform_14, window_bounds = array<i64: 256, 256>}, {pipeline_mode = #tpu.pipeline_mode<synchronous>, transform_indices = @transform_15, window_bounds = array<i64: 1, 256>}, {pipeline_mode = #tpu.pipeline_mode<synchronous>, transform_indices = @transform_16, window_bounds = array<i64: 256, 256>}, {pipeline_mode = #tpu.pipeline_mode<synchronous>, transform_indices = @transform_17, window_bounds = array<i64: 1, 256>}, {pipeline_mode = #tpu.pipeline_mode<synchronous>, transform_indices = @transform_18, window_bounds = array<i64: 1, 256>}, {pipeline_mode = #tpu.pipeline_mode<synchronous>, transform_indices = @transform_19, window_bounds = array<i64: 1, 256>}, {pipeline_mode = #tpu.pipeline_mode<synchronous>, transform_indices = @transform_20, window_bounds = array<i64: 256, 512>}, {pipeline_mode = #tpu.pipeline_mode<synchronous>, transform_indices = @transform_21, window_bounds = array<i64: 1, 512>}, {pipeline_mode = #tpu.pipeline_mode<synchronous>, transform_indices = @transform_22, window_bounds = array<i64: 512, 256>}, {pipeline_mode = #tpu.pipeline_mode<synchronous>, transform_indices = @transform_23, window_bounds = array<i64: 1, 256>}, {pipeline_mode = #tpu.pipeline_mode<synchronous>, transform_indices = @transform_24, window_bounds = array<i64: 1, 256>}, {pipeline_mode = #tpu.pipeline_mode<synchronous>, transform_indices = @transform_25, window_bounds = array<i64: 1, 256>}, {pipeline_mode = #tpu.pipeline_mode<synchronous>, transform_indices = @transform_26, window_bounds = array<i64: 32, 256>}]} {
    %c0 = arith.constant 0 : index
    %c0_0 = arith.constant 0 : index
    %0 = vector.load %arg1[%c0, %c0_0] : memref<32x256xf32, #tpu.memory_space<vmem>>, vector<32x256xf32>
    %c0_1 = arith.constant 0 : index
    %c0_2 = arith.constant 0 : index
    %1 = vector.load %arg2[%c0_1, %c0_2] : memref<64x256xf32, #tpu.memory_space<vmem>>, vector<64x256xf32>
    %c0_3 = arith.constant 0 : index
    %c0_4 = arith.constant 0 : index
    %2 = vector.load %arg3[%c0_3, %c0_4] : memref<32x640xf32, #tpu.memory_space<vmem>>, vector<32x640xf32>
    %c0_5 = arith.constant 0 : index
    %c0_6 = arith.constant 0 : index
    %3 = vector.load %arg4[%c0_5, %c0_6] : memref<64x256xf32, #tpu.memory_space<vmem>>, vector<64x256xf32>
    %4 = tpu.iota {dimensions = array<i32: 1>} : vector<1x256xi32>
    %c0_i32 = arith.constant 0 : i32
    %5 = vector.broadcast %c0_i32 : i32 to vector<1x256xi32>
    %6 = arith.cmpi sge, %4, %5 : vector<1x256xi32>
    %c32_i32 = arith.constant 32 : i32
    %7 = vector.broadcast %c32_i32 : i32 to vector<1x256xi32>
    %8 = arith.cmpi slt, %4, %7 : vector<1x256xi32>
    %9 = arith.andi %6, %8 : vector<1x256xi1>
    %c32_i32_7 = arith.constant 32 : i32
    %10 = vector.broadcast %c32_i32_7 : i32 to vector<1x256xi32>
    %11 = arith.cmpi sge, %4, %10 : vector<1x256xi32>
    %c64_i32 = arith.constant 64 : i32
    %12 = vector.broadcast %c64_i32 : i32 to vector<1x256xi32>
    %13 = arith.cmpi slt, %4, %12 : vector<1x256xi32>
    %14 = arith.andi %11, %13 : vector<1x256xi1>
    %c64_i32_8 = arith.constant 64 : i32
    %15 = vector.broadcast %c64_i32_8 : i32 to vector<1x256xi32>
    %16 = arith.cmpi sge, %4, %15 : vector<1x256xi32>
    %c96_i32 = arith.constant 96 : i32
    %17 = vector.broadcast %c96_i32 : i32 to vector<1x256xi32>
    %18 = arith.cmpi slt, %4, %17 : vector<1x256xi32>
    %19 = arith.andi %16, %18 : vector<1x256xi1>
    %c96_i32_9 = arith.constant 96 : i32
    %20 = vector.broadcast %c96_i32_9 : i32 to vector<1x256xi32>
    %21 = arith.cmpi sge, %4, %20 : vector<1x256xi32>
    %c128_i32 = arith.constant 128 : i32
    %22 = vector.broadcast %c128_i32 : i32 to vector<1x256xi32>
    %23 = arith.cmpi slt, %4, %22 : vector<1x256xi32>
    %24 = arith.andi %21, %23 : vector<1x256xi1>
    %c128_i32_10 = arith.constant 128 : i32
    %25 = vector.broadcast %c128_i32_10 : i32 to vector<1x256xi32>
    %26 = arith.cmpi sge, %4, %25 : vector<1x256xi32>
    %c160_i32 = arith.constant 160 : i32
    %27 = vector.broadcast %c160_i32 : i32 to vector<1x256xi32>
    %28 = arith.cmpi slt, %4, %27 : vector<1x256xi32>
    %29 = arith.andi %26, %28 : vector<1x256xi1>
    %c160_i32_11 = arith.constant 160 : i32
    %30 = vector.broadcast %c160_i32_11 : i32 to vector<1x256xi32>
    %31 = arith.cmpi sge, %4, %30 : vector<1x256xi32>
    %c192_i32 = arith.constant 192 : i32
    %32 = vector.broadcast %c192_i32 : i32 to vector<1x256xi32>
    %33 = arith.cmpi slt, %4, %32 : vector<1x256xi32>
    %34 = arith.andi %31, %33 : vector<1x256xi1>
    %c192_i32_12 = arith.constant 192 : i32
    %35 = vector.broadcast %c192_i32_12 : i32 to vector<1x256xi32>
    %36 = arith.cmpi sge, %4, %35 : vector<1x256xi32>
    %c224_i32 = arith.constant 224 : i32
    %37 = vector.broadcast %c224_i32 : i32 to vector<1x256xi32>
    %38 = arith.cmpi slt, %4, %37 : vector<1x256xi32>
    %39 = arith.andi %36, %38 : vector<1x256xi1>
    %c224_i32_13 = arith.constant 224 : i32
    %40 = vector.broadcast %c224_i32_13 : i32 to vector<1x256xi32>
    %41 = arith.cmpi sge, %4, %40 : vector<1x256xi32>
    %c256_i32 = arith.constant 256 : i32
    %42 = vector.broadcast %c256_i32 : i32 to vector<1x256xi32>
    %43 = arith.cmpi slt, %4, %42 : vector<1x256xi32>
    %44 = arith.andi %41, %43 : vector<1x256xi1>
    %45 = tpu.iota {dimensions = array<i32: 0>} : vector<256x32xi32>
    %c1_i32 = arith.constant 1 : i32
    %46 = vector.broadcast %c1_i32 : i32 to vector<256x32xi32>
    %47 = arith.andi %45, %46 : vector<256x32xi32>
    %48 = tpu.iota {dimensions = array<i32: 1>} : vector<256x32xi32>
    %c1_i32_14 = arith.constant 1 : i32
    %49 = vector.broadcast %c1_i32_14 : i32 to vector<256x32xi32>
    %50 = arith.andi %48, %49 : vector<256x32xi32>
    %51 = arith.cmpi eq, %47, %50 : vector<256x32xi32>
    %cst = arith.constant 0.000000e+00 : f32
    %cst_15 = arith.constant -1.000000e+09 : f32
    %52 = vector.broadcast %cst : f32 to vector<256x32xf32>
    %53 = vector.broadcast %cst_15 : f32 to vector<256x32xf32>
    %54 = arith.select %51, %52, %53 : vector<256x32xi1>, vector<256x32xf32>
    %55 = tpu.iota {dimensions = array<i32: 0>} : vector<256x64xi32>
    %c1_i32_16 = arith.constant 1 : i32
    %56 = vector.broadcast %c1_i32_16 : i32 to vector<256x64xi32>
    %57 = arith.andi %55, %56 : vector<256x64xi32>
    %58 = tpu.iota {dimensions = array<i32: 1>} : vector<256x64xi32>
    %c1_i32_17 = arith.constant 1 : i32
    %59 = vector.broadcast %c1_i32_17 : i32 to vector<256x64xi32>
    %60 = arith.andi %58, %59 : vector<256x64xi32>
    %61 = arith.cmpi eq, %57, %60 : vector<256x64xi32>
    %cst_18 = arith.constant 0.000000e+00 : f32
    %cst_19 = arith.constant -1.000000e+09 : f32
    %62 = vector.broadcast %cst_18 : f32 to vector<256x64xf32>
    %63 = vector.broadcast %cst_19 : f32 to vector<256x64xf32>
    %64 = arith.select %61, %62, %63 : vector<256x64xi1>, vector<256x64xf32>
    %c0_20 = arith.constant 0 : index
    %c0_21 = arith.constant 0 : index
    %65 = vector.load %arg5[%c0_20, %c0_21] : memref<640x256xbf16, #tpu.memory_space<vmem>>, vector<640x256xbf16>
    %c0_22 = arith.constant 0 : index
    %c0_23 = arith.constant 0 : index
    %66 = vector.load %arg6[%c0_22, %c0_23] : memref<1x256xf32, #tpu.memory_space<vmem>>, vector<1x256xf32>
    %67 = arith.truncf %2 : vector<32x640xf32> to vector<32x640xbf16>
    %cst_24 = arith.constant dense<0.000000e+00> : vector<32x256xf32>
    %68 = tpu.matmul %67, %65, %cst_24 {dimension_numbers = #tpu.dot_dimension_numbers<[1], [0], [0], [1], [0, 0, 1, 1], [], []>} : vector<32x640xbf16>, vector<640x256xbf16>, vector<32x256xf32> -> vector<32x256xf32>
    %69 = vector.broadcast %66 : vector<1x256xf32> to vector<32x256xf32>
    %70 = arith.addf %68, %69 : vector<32x256xf32>
    %cst_25 = arith.constant 0.000000e+00 : f32
    %71 = vector.broadcast %cst_25 : f32 to vector<32x256xf32>
    %72 = arith.maximumf %70, %71 : vector<32x256xf32>
    %c0_26 = arith.constant 0 : index
    %c0_27 = arith.constant 0 : index
    %73 = vector.load %arg7[%c0_26, %c0_27] : memref<256x256xbf16, #tpu.memory_space<vmem>>, vector<256x256xbf16>
    %c0_28 = arith.constant 0 : index
    %c0_29 = arith.constant 0 : index
    %74 = vector.load %arg8[%c0_28, %c0_29] : memref<1x256xf32, #tpu.memory_space<vmem>>, vector<1x256xf32>
    %75 = arith.truncf %72 : vector<32x256xf32> to vector<32x256xbf16>
    %cst_30 = arith.constant dense<0.000000e+00> : vector<32x256xf32>
    %76 = tpu.matmul %75, %73, %cst_30 {dimension_numbers = #tpu.dot_dimension_numbers<[1], [0], [0], [1], [0, 0, 1, 1], [], []>} : vector<32x256xbf16>, vector<256x256xbf16>, vector<32x256xf32> -> vector<32x256xf32>
    %77 = vector.broadcast %74 : vector<1x256xf32> to vector<32x256xf32>
    %78 = arith.addf %76, %77 : vector<32x256xf32>
    %79 = arith.addf %0, %78 : vector<32x256xf32>
    %80 = arith.truncf %79 : vector<32x256xf32> to vector<32x256xbf16>
    %81 = arith.truncf %0 : vector<32x256xf32> to vector<32x256xbf16>
    %82 = vector.extract_strided_slice %80 {offsets = [0, 0], sizes = [32, 32], strides = [1, 1]} : vector<32x256xbf16> to vector<32x32xbf16>
    %83 = vector.extract_strided_slice %80 {offsets = [0, 0], sizes = [32, 32], strides = [1, 1]} : vector<32x256xbf16> to vector<32x32xbf16>
    %cst_31 = arith.constant dense<0.000000e+00> : vector<32x32xf32>
    %84 = tpu.matmul %82, %83, %cst_31 {dimension_numbers = #tpu.dot_dimension_numbers<[1], [1], [0], [0], [0, 0, 1, 0], [], []>} : vector<32x32xbf16>, vector<32x32xbf16>, vector<32x32xf32> -> vector<32x32xf32>
    %85 = vector.extract_strided_slice %80 {offsets = [0, 32], sizes = [32, 32], strides = [1, 1]} : vector<32x256xbf16> to vector<32x32xbf16>
    %86 = vector.extract_strided_slice %80 {offsets = [0, 32], sizes = [32, 32], strides = [1, 1]} : vector<32x256xbf16> to vector<32x32xbf16>
    %cst_32 = arith.constant dense<0.000000e+00> : vector<32x32xf32>
    %87 = tpu.matmul %85, %86, %cst_32 {dimension_numbers = #tpu.dot_dimension_numbers<[1], [1], [0], [0], [0, 0, 1, 0], [], []>} : vector<32x32xbf16>, vector<32x32xbf16>, vector<32x32xf32> -> vector<32x32xf32>
    %88 = vector.extract_strided_slice %80 {offsets = [0, 64], sizes = [32, 32], strides = [1, 1]} : vector<32x256xbf16> to vector<32x32xbf16>
    %89 = vector.extract_strided_slice %80 {offsets = [0, 64], sizes = [32, 32], strides = [1, 1]} : vector<32x256xbf16> to vector<32x32xbf16>
    %cst_33 = arith.constant dense<0.000000e+00> : vector<32x32xf32>
    %90 = tpu.matmul %88, %89, %cst_33 {dimension_numbers = #tpu.dot_dimension_numbers<[1], [1], [0], [0], [0, 0, 1, 0], [], []>} : vector<32x32xbf16>, vector<32x32xbf16>, vector<32x32xf32> -> vector<32x32xf32>
    %91 = vector.extract_strided_slice %80 {offsets = [0, 96], sizes = [32, 32], strides = [1, 1]} : vector<32x256xbf16> to vector<32x32xbf16>
    %92 = vector.extract_strided_slice %80 {offsets = [0, 96], sizes = [32, 32], strides = [1, 1]} : vector<32x256xbf16> to vector<32x32xbf16>
    %cst_34 = arith.constant dense<0.000000e+00> : vector<32x32xf32>
    %93 = tpu.matmul %91, %92, %cst_34 {dimension_numbers = #tpu.dot_dimension_numbers<[1], [1], [0], [0], [0, 0, 1, 0], [], []>} : vector<32x32xbf16>, vector<32x32xbf16>, vector<32x32xf32> -> vector<32x32xf32>
    %94 = vector.extract_strided_slice %80 {offsets = [0, 128], sizes = [32, 32], strides = [1, 1]} : vector<32x256xbf16> to vector<32x32xbf16>
    %95 = vector.extract_strided_slice %80 {offsets = [0, 128], sizes = [32, 32], strides = [1, 1]} : vector<32x256xbf16> to vector<32x32xbf16>
    %cst_35 = arith.constant dense<0.000000e+00> : vector<32x32xf32>
    %96 = tpu.matmul %94, %95, %cst_35 {dimension_numbers = #tpu.dot_dimension_numbers<[1], [1], [0], [0], [0, 0, 1, 0], [], []>} : vector<32x32xbf16>, vector<32x32xbf16>, vector<32x32xf32> -> vector<32x32xf32>
    %97 = vector.extract_strided_slice %80 {offsets = [0, 160], sizes = [32, 32], strides = [1, 1]} : vector<32x256xbf16> to vector<32x32xbf16>
    %98 = vector.extract_strided_slice %80 {offsets = [0, 160], sizes = [32, 32], strides = [1, 1]} : vector<32x256xbf16> to vector<32x32xbf16>
    %cst_36 = arith.constant dense<0.000000e+00> : vector<32x32xf32>
    %99 = tpu.matmul %97, %98, %cst_36 {dimension_numbers = #tpu.dot_dimension_numbers<[1], [1], [0], [0], [0, 0, 1, 0], [], []>} : vector<32x32xbf16>, vector<32x32xbf16>, vector<32x32xf32> -> vector<32x32xf32>
    %100 = vector.extract_strided_slice %80 {offsets = [0, 192], sizes = [32, 32], strides = [1, 1]} : vector<32x256xbf16> to vector<32x32xbf16>
    %101 = vector.extract_strided_slice %80 {offsets = [0, 192], sizes = [32, 32], strides = [1, 1]} : vector<32x256xbf16> to vector<32x32xbf16>
    %cst_37 = arith.constant dense<0.000000e+00> : vector<32x32xf32>
    %102 = tpu.matmul %100, %101, %cst_37 {dimension_numbers = #tpu.dot_dimension_numbers<[1], [1], [0], [0], [0, 0, 1, 0], [], []>} : vector<32x32xbf16>, vector<32x32xbf16>, vector<32x32xf32> -> vector<32x32xf32>
    %103 = vector.extract_strided_slice %80 {offsets = [0, 224], sizes = [32, 32], strides = [1, 1]} : vector<32x256xbf16> to vector<32x32xbf16>
    %104 = vector.extract_strided_slice %80 {offsets = [0, 224], sizes = [32, 32], strides = [1, 1]} : vector<32x256xbf16> to vector<32x32xbf16>
    %cst_38 = arith.constant dense<0.000000e+00> : vector<32x32xf32>
    %105 = tpu.matmul %103, %104, %cst_38 {dimension_numbers = #tpu.dot_dimension_numbers<[1], [1], [0], [0], [0, 0, 1, 0], [], []>} : vector<32x32xbf16>, vector<32x32xbf16>, vector<32x32xf32> -> vector<32x32xf32>
    %106 = tpu.concatenate %84, %87, %90, %93, %96, %99, %102, %105 in 0 : vector<32x32xf32>, vector<32x32xf32>, vector<32x32xf32>, vector<32x32xf32>, vector<32x32xf32>, vector<32x32xf32>, vector<32x32xf32>, vector<32x32xf32> -> vector<256x32xf32>
    %cst_39 = arith.constant 0.176776692 : f32
    %107 = vector.broadcast %cst_39 : f32 to vector<256x32xf32>
    %108 = arith.mulf %106, %107 : vector<256x32xf32>
    %109 = arith.addf %108, %54 : vector<256x32xf32>
    %cst_40 = arith.constant dense<0xFF800000> : vector<256xf32>
    %110 = vector.multi_reduction <maximumf>, %109, %cst_40 [1] : vector<256x32xf32> to vector<256xf32>
    %111 = vector.shape_cast %110 : vector<256xf32> to vector<256x1xf32>
    %112 = vector.broadcast %111 : vector<256x1xf32> to vector<256x32xf32>
    %113 = arith.subf %109, %112 : vector<256x32xf32>
    %114 = math.exp %113 : vector<256x32xf32>
    %cst_41 = arith.constant dense<0.000000e+00> : vector<256xf32>
    %115 = vector.multi_reduction <add>, %114, %cst_41 [1] : vector<256x32xf32> to vector<256xf32>
    %116 = vector.shape_cast %115 : vector<256xf32> to vector<256x1xf32>
    %117 = vector.broadcast %116 : vector<256x1xf32> to vector<256x32xf32>
    %118 = arith.divf %114, %117 : vector<256x32xf32>
    %119 = arith.truncf %118 : vector<256x32xf32> to vector<256x32xbf16>
    %cst_42 = arith.constant 0.000000e+00 : f32
    %120 = vector.broadcast %cst_42 : f32 to vector<32x256xf32>
    %cst_43 = arith.constant 0.000000e+00 : bf16
    %121 = vector.shape_cast %9 : vector<1x256xi1> to vector<1x256xi1>
    %122 = vector.broadcast %121 : vector<1x256xi1> to vector<32x256xi1>
    %123 = vector.broadcast %cst_43 : bf16 to vector<32x256xbf16>
    %124 = arith.select %122, %81, %123 : vector<32x256xi1>, vector<32x256xbf16>
    %125 = vector.extract_strided_slice %119 {offsets = [0, 0], sizes = [32, 32], strides = [1, 1]} : vector<256x32xbf16> to vector<32x32xbf16>
    %cst_44 = arith.constant dense<0.000000e+00> : vector<32x256xf32>
    %126 = tpu.matmul %125, %124, %cst_44 {dimension_numbers = #tpu.dot_dimension_numbers<[1], [0], [0], [1], [0, 0, 1, 1], [], []>} : vector<32x32xbf16>, vector<32x256xbf16>, vector<32x256xf32> -> vector<32x256xf32>
    %127 = arith.addf %120, %126 : vector<32x256xf32>
    %cst_45 = arith.constant 0.000000e+00 : bf16
    %128 = vector.shape_cast %14 : vector<1x256xi1> to vector<1x256xi1>
    %129 = vector.broadcast %128 : vector<1x256xi1> to vector<32x256xi1>
    %130 = vector.broadcast %cst_45 : bf16 to vector<32x256xbf16>
    %131 = arith.select %129, %81, %130 : vector<32x256xi1>, vector<32x256xbf16>
    %132 = vector.extract_strided_slice %119 {offsets = [32, 0], sizes = [32, 32], strides = [1, 1]} : vector<256x32xbf16> to vector<32x32xbf16>
    %cst_46 = arith.constant dense<0.000000e+00> : vector<32x256xf32>
    %133 = tpu.matmul %132, %131, %cst_46 {dimension_numbers = #tpu.dot_dimension_numbers<[1], [0], [0], [1], [0, 0, 1, 1], [], []>} : vector<32x32xbf16>, vector<32x256xbf16>, vector<32x256xf32> -> vector<32x256xf32>
    %134 = arith.addf %127, %133 : vector<32x256xf32>
    %cst_47 = arith.constant 0.000000e+00 : bf16
    %135 = vector.shape_cast %19 : vector<1x256xi1> to vector<1x256xi1>
    %136 = vector.broadcast %135 : vector<1x256xi1> to vector<32x256xi1>
    %137 = vector.broadcast %cst_47 : bf16 to vector<32x256xbf16>
    %138 = arith.select %136, %81, %137 : vector<32x256xi1>, vector<32x256xbf16>
    %139 = vector.extract_strided_slice %119 {offsets = [64, 0], sizes = [32, 32], strides = [1, 1]} : vector<256x32xbf16> to vector<32x32xbf16>
    %cst_48 = arith.constant dense<0.000000e+00> : vector<32x256xf32>
    %140 = tpu.matmul %139, %138, %cst_48 {dimension_numbers = #tpu.dot_dimension_numbers<[1], [0], [0], [1], [0, 0, 1, 1], [], []>} : vector<32x32xbf16>, vector<32x256xbf16>, vector<32x256xf32> -> vector<32x256xf32>
    %141 = arith.addf %134, %140 : vector<32x256xf32>
    %cst_49 = arith.constant 0.000000e+00 : bf16
    %142 = vector.shape_cast %24 : vector<1x256xi1> to vector<1x256xi1>
    %143 = vector.broadcast %142 : vector<1x256xi1> to vector<32x256xi1>
    %144 = vector.broadcast %cst_49 : bf16 to vector<32x256xbf16>
    %145 = arith.select %143, %81, %144 : vector<32x256xi1>, vector<32x256xbf16>
    %146 = vector.extract_strided_slice %119 {offsets = [96, 0], sizes = [32, 32], strides = [1, 1]} : vector<256x32xbf16> to vector<32x32xbf16>
    %cst_50 = arith.constant dense<0.000000e+00> : vector<32x256xf32>
    %147 = tpu.matmul %146, %145, %cst_50 {dimension_numbers = #tpu.dot_dimension_numbers<[1], [0], [0], [1], [0, 0, 1, 1], [], []>} : vector<32x32xbf16>, vector<32x256xbf16>, vector<32x256xf32> -> vector<32x256xf32>
    %148 = arith.addf %141, %147 : vector<32x256xf32>
    %cst_51 = arith.constant 0.000000e+00 : bf16
    %149 = vector.shape_cast %29 : vector<1x256xi1> to vector<1x256xi1>
    %150 = vector.broadcast %149 : vector<1x256xi1> to vector<32x256xi1>
    %151 = vector.broadcast %cst_51 : bf16 to vector<32x256xbf16>
    %152 = arith.select %150, %81, %151 : vector<32x256xi1>, vector<32x256xbf16>
    %153 = vector.extract_strided_slice %119 {offsets = [128, 0], sizes = [32, 32], strides = [1, 1]} : vector<256x32xbf16> to vector<32x32xbf16>
    %cst_52 = arith.constant dense<0.000000e+00> : vector<32x256xf32>
    %154 = tpu.matmul %153, %152, %cst_52 {dimension_numbers = #tpu.dot_dimension_numbers<[1], [0], [0], [1], [0, 0, 1, 1], [], []>} : vector<32x32xbf16>, vector<32x256xbf16>, vector<32x256xf32> -> vector<32x256xf32>
    %155 = arith.addf %148, %154 : vector<32x256xf32>
    %cst_53 = arith.constant 0.000000e+00 : bf16
    %156 = vector.shape_cast %34 : vector<1x256xi1> to vector<1x256xi1>
    %157 = vector.broadcast %156 : vector<1x256xi1> to vector<32x256xi1>
    %158 = vector.broadcast %cst_53 : bf16 to vector<32x256xbf16>
    %159 = arith.select %157, %81, %158 : vector<32x256xi1>, vector<32x256xbf16>
    %160 = vector.extract_strided_slice %119 {offsets = [160, 0], sizes = [32, 32], strides = [1, 1]} : vector<256x32xbf16> to vector<32x32xbf16>
    %cst_54 = arith.constant dense<0.000000e+00> : vector<32x256xf32>
    %161 = tpu.matmul %160, %159, %cst_54 {dimension_numbers = #tpu.dot_dimension_numbers<[1], [0], [0], [1], [0, 0, 1, 1], [], []>} : vector<32x32xbf16>, vector<32x256xbf16>, vector<32x256xf32> -> vector<32x256xf32>
    %162 = arith.addf %155, %161 : vector<32x256xf32>
    %cst_55 = arith.constant 0.000000e+00 : bf16
    %163 = vector.shape_cast %39 : vector<1x256xi1> to vector<1x256xi1>
    %164 = vector.broadcast %163 : vector<1x256xi1> to vector<32x256xi1>
    %165 = vector.broadcast %cst_55 : bf16 to vector<32x256xbf16>
    %166 = arith.select %164, %81, %165 : vector<32x256xi1>, vector<32x256xbf16>
    %167 = vector.extract_strided_slice %119 {offsets = [192, 0], sizes = [32, 32], strides = [1, 1]} : vector<256x32xbf16> to vector<32x32xbf16>
    %cst_56 = arith.constant dense<0.000000e+00> : vector<32x256xf32>
    %168 = tpu.matmul %167, %166, %cst_56 {dimension_numbers = #tpu.dot_dimension_numbers<[1], [0], [0], [1], [0, 0, 1, 1], [], []>} : vector<32x32xbf16>, vector<32x256xbf16>, vector<32x256xf32> -> vector<32x256xf32>
    %169 = arith.addf %162, %168 : vector<32x256xf32>
    %cst_57 = arith.constant 0.000000e+00 : bf16
    %170 = vector.shape_cast %44 : vector<1x256xi1> to vector<1x256xi1>
    %171 = vector.broadcast %170 : vector<1x256xi1> to vector<32x256xi1>
    %172 = vector.broadcast %cst_57 : bf16 to vector<32x256xbf16>
    %173 = arith.select %171, %81, %172 : vector<32x256xi1>, vector<32x256xbf16>
    %174 = vector.extract_strided_slice %119 {offsets = [224, 0], sizes = [32, 32], strides = [1, 1]} : vector<256x32xbf16> to vector<32x32xbf16>
    %cst_58 = arith.constant dense<0.000000e+00> : vector<32x256xf32>
    %175 = tpu.matmul %174, %173, %cst_58 {dimension_numbers = #tpu.dot_dimension_numbers<[1], [0], [0], [1], [0, 0, 1, 1], [], []>} : vector<32x32xbf16>, vector<32x256xbf16>, vector<32x256xf32> -> vector<32x256xf32>
    %176 = arith.addf %169, %175 : vector<32x256xf32>
    %c0_59 = arith.constant 0 : index
    %c0_60 = arith.constant 0 : index
    %177 = vector.load %arg9[%c0_59, %c0_60] : memref<256x256xbf16, #tpu.memory_space<vmem>>, vector<256x256xbf16>
    %c0_61 = arith.constant 0 : index
    %c0_62 = arith.constant 0 : index
    %178 = vector.load %arg10[%c0_61, %c0_62] : memref<1x256xf32, #tpu.memory_space<vmem>>, vector<1x256xf32>
    %179 = arith.truncf %176 : vector<32x256xf32> to vector<32x256xbf16>
    %cst_63 = arith.constant dense<0.000000e+00> : vector<32x256xf32>
    %180 = tpu.matmul %179, %177, %cst_63 {dimension_numbers = #tpu.dot_dimension_numbers<[1], [0], [0], [1], [0, 0, 1, 1], [], []>} : vector<32x256xbf16>, vector<256x256xbf16>, vector<32x256xf32> -> vector<32x256xf32>
    %181 = vector.broadcast %178 : vector<1x256xf32> to vector<32x256xf32>
    %182 = arith.addf %180, %181 : vector<32x256xf32>
    %183 = arith.addf %0, %182 : vector<32x256xf32>
    %c0_64 = arith.constant 0 : index
    %c0_65 = arith.constant 0 : index
    %184 = vector.load %arg11[%c0_64, %c0_65] : memref<1x256xf32, #tpu.memory_space<vmem>>, vector<1x256xf32>
    %c0_66 = arith.constant 0 : index
    %c0_67 = arith.constant 0 : index
    %185 = vector.load %arg12[%c0_66, %c0_67] : memref<1x256xf32, #tpu.memory_space<vmem>>, vector<1x256xf32>
    %cst_68 = arith.constant dense<0.000000e+00> : vector<32xf32>
    %186 = vector.multi_reduction <add>, %183, %cst_68 [1] : vector<32x256xf32> to vector<32xf32>
    %187 = vector.shape_cast %186 : vector<32xf32> to vector<32x1xf32>
    %cst_69 = arith.constant 2.560000e+02 : f32
    %188 = vector.broadcast %cst_69 : f32 to vector<32x1xf32>
    %189 = arith.divf %187, %188 : vector<32x1xf32>
    %190 = vector.broadcast %189 : vector<32x1xf32> to vector<32x256xf32>
    %191 = arith.subf %183, %190 : vector<32x256xf32>
    %192 = arith.mulf %191, %191 : vector<32x256xf32>
    %cst_70 = arith.constant dense<0.000000e+00> : vector<32xf32>
    %193 = vector.multi_reduction <add>, %192, %cst_70 [1] : vector<32x256xf32> to vector<32xf32>
    %194 = vector.shape_cast %193 : vector<32xf32> to vector<32x1xf32>
    %cst_71 = arith.constant 2.560000e+02 : f32
    %195 = vector.broadcast %cst_71 : f32 to vector<32x1xf32>
    %196 = arith.divf %194, %195 : vector<32x1xf32>
    %cst_72 = arith.constant 9.99999974E-6 : f32
    %197 = vector.broadcast %cst_72 : f32 to vector<32x1xf32>
    %198 = arith.addf %196, %197 : vector<32x1xf32>
    %199 = math.rsqrt %198 : vector<32x1xf32>
    %200 = vector.broadcast %199 : vector<32x1xf32> to vector<32x256xf32>
    %201 = arith.mulf %191, %200 : vector<32x256xf32>
    %202 = vector.broadcast %184 : vector<1x256xf32> to vector<32x256xf32>
    %203 = arith.mulf %201, %202 : vector<32x256xf32>
    %204 = vector.broadcast %185 : vector<1x256xf32> to vector<32x256xf32>
    %205 = arith.addf %203, %204 : vector<32x256xf32>
    %c0_73 = arith.constant 0 : index
    %c0_74 = arith.constant 0 : index
    %206 = vector.load %arg13[%c0_73, %c0_74] : memref<256x256xbf16, #tpu.memory_space<vmem>>, vector<256x256xbf16>
    %c0_75 = arith.constant 0 : index
    %c0_76 = arith.constant 0 : index
    %207 = vector.load %arg14[%c0_75, %c0_76] : memref<1x256xf32, #tpu.memory_space<vmem>>, vector<1x256xf32>
    %208 = arith.truncf %205 : vector<32x256xf32> to vector<32x256xbf16>
    %cst_77 = arith.constant dense<0.000000e+00> : vector<32x256xf32>
    %209 = tpu.matmul %208, %206, %cst_77 {dimension_numbers = #tpu.dot_dimension_numbers<[1], [0], [0], [1], [0, 0, 1, 1], [], []>} : vector<32x256xbf16>, vector<256x256xbf16>, vector<32x256xf32> -> vector<32x256xf32>
    %210 = vector.broadcast %207 : vector<1x256xf32> to vector<32x256xf32>
    %211 = arith.addf %209, %210 : vector<32x256xf32>
    %cst_78 = arith.constant 0.000000e+00 : f32
    %212 = vector.broadcast %cst_78 : f32 to vector<32x256xf32>
    %213 = arith.maximumf %211, %212 : vector<32x256xf32>
    %c0_79 = arith.constant 0 : index
    %c0_80 = arith.constant 0 : index
    %214 = vector.load %arg15[%c0_79, %c0_80] : memref<256x256xbf16, #tpu.memory_space<vmem>>, vector<256x256xbf16>
    %c0_81 = arith.constant 0 : index
    %c0_82 = arith.constant 0 : index
    %215 = vector.load %arg16[%c0_81, %c0_82] : memref<1x256xf32, #tpu.memory_space<vmem>>, vector<1x256xf32>
    %216 = arith.truncf %213 : vector<32x256xf32> to vector<32x256xbf16>
    %cst_83 = arith.constant dense<0.000000e+00> : vector<32x256xf32>
    %217 = tpu.matmul %216, %214, %cst_83 {dimension_numbers = #tpu.dot_dimension_numbers<[1], [0], [0], [1], [0, 0, 1, 1], [], []>} : vector<32x256xbf16>, vector<256x256xbf16>, vector<32x256xf32> -> vector<32x256xf32>
    %218 = vector.broadcast %215 : vector<1x256xf32> to vector<32x256xf32>
    %219 = arith.addf %217, %218 : vector<32x256xf32>
    %220 = arith.truncf %205 : vector<32x256xf32> to vector<32x256xbf16>
    %221 = vector.extract_strided_slice %2 {offsets = [0, 0], sizes = [32, 256], strides = [1, 1]} : vector<32x640xf32> to vector<32x256xf32>
    %222 = arith.mulf %221, %219 : vector<32x256xf32>
    %223 = arith.truncf %222 : vector<32x256xf32> to vector<32x256xbf16>
    %224 = arith.truncf %1 : vector<64x256xf32> to vector<64x256xbf16>
    %225 = arith.truncf %3 : vector<64x256xf32> to vector<64x256xbf16>
    %226 = vector.extract_strided_slice %220 {offsets = [0, 0], sizes = [32, 32], strides = [1, 1]} : vector<32x256xbf16> to vector<32x32xbf16>
    %227 = vector.extract_strided_slice %224 {offsets = [0, 0], sizes = [64, 32], strides = [1, 1]} : vector<64x256xbf16> to vector<64x32xbf16>
    %cst_84 = arith.constant dense<0.000000e+00> : vector<32x64xf32>
    %228 = tpu.matmul %226, %227, %cst_84 {dimension_numbers = #tpu.dot_dimension_numbers<[1], [1], [0], [0], [0, 0, 1, 0], [], []>} : vector<32x32xbf16>, vector<64x32xbf16>, vector<32x64xf32> -> vector<32x64xf32>
    %229 = vector.extract_strided_slice %223 {offsets = [0, 0], sizes = [32, 16], strides = [1, 1]} : vector<32x256xbf16> to vector<32x16xbf16>
    %230 = vector.extract_strided_slice %225 {offsets = [0, 0], sizes = [64, 16], strides = [1, 1]} : vector<64x256xbf16> to vector<64x16xbf16>
    %cst_85 = arith.constant dense<0.000000e+00> : vector<32x64xf32>
    %231 = tpu.matmul %229, %230, %cst_85 {dimension_numbers = #tpu.dot_dimension_numbers<[1], [1], [0], [0], [0, 0, 1, 0], [], []>} : vector<32x16xbf16>, vector<64x16xbf16>, vector<32x64xf32> -> vector<32x64xf32>
    %232 = arith.addf %228, %231 : vector<32x64xf32>
    %233 = vector.extract_strided_slice %223 {offsets = [0, 128], sizes = [32, 16], strides = [1, 1]} : vector<32x256xbf16> to vector<32x16xbf16>
    %234 = vector.extract_strided_slice %225 {offsets = [0, 128], sizes = [64, 16], strides = [1, 1]} : vector<64x256xbf16> to vector<64x16xbf16>
    %cst_86 = arith.constant dense<0.000000e+00> : vector<32x64xf32>
    %235 = tpu.matmul %233, %234, %cst_86 {dimension_numbers = #tpu.dot_dimension_numbers<[1], [1], [0], [0], [0, 0, 1, 0], [], []>} : vector<32x16xbf16>, vector<64x16xbf16>, vector<32x64xf32> -> vector<32x64xf32>
    %236 = arith.addf %232, %235 : vector<32x64xf32>
    %237 = vector.extract_strided_slice %220 {offsets = [0, 32], sizes = [32, 32], strides = [1, 1]} : vector<32x256xbf16> to vector<32x32xbf16>
    %238 = vector.extract_strided_slice %224 {offsets = [0, 32], sizes = [64, 32], strides = [1, 1]} : vector<64x256xbf16> to vector<64x32xbf16>
    %cst_87 = arith.constant dense<0.000000e+00> : vector<32x64xf32>
    %239 = tpu.matmul %237, %238, %cst_87 {dimension_numbers = #tpu.dot_dimension_numbers<[1], [1], [0], [0], [0, 0, 1, 0], [], []>} : vector<32x32xbf16>, vector<64x32xbf16>, vector<32x64xf32> -> vector<32x64xf32>
    %240 = vector.extract_strided_slice %223 {offsets = [0, 16], sizes = [32, 16], strides = [1, 1]} : vector<32x256xbf16> to vector<32x16xbf16>
    %241 = vector.extract_strided_slice %225 {offsets = [0, 16], sizes = [64, 16], strides = [1, 1]} : vector<64x256xbf16> to vector<64x16xbf16>
    %cst_88 = arith.constant dense<0.000000e+00> : vector<32x64xf32>
    %242 = tpu.matmul %240, %241, %cst_88 {dimension_numbers = #tpu.dot_dimension_numbers<[1], [1], [0], [0], [0, 0, 1, 0], [], []>} : vector<32x16xbf16>, vector<64x16xbf16>, vector<32x64xf32> -> vector<32x64xf32>
    %243 = arith.addf %239, %242 : vector<32x64xf32>
    %244 = vector.extract_strided_slice %223 {offsets = [0, 144], sizes = [32, 16], strides = [1, 1]} : vector<32x256xbf16> to vector<32x16xbf16>
    %245 = vector.extract_strided_slice %225 {offsets = [0, 144], sizes = [64, 16], strides = [1, 1]} : vector<64x256xbf16> to vector<64x16xbf16>
    %cst_89 = arith.constant dense<0.000000e+00> : vector<32x64xf32>
    %246 = tpu.matmul %244, %245, %cst_89 {dimension_numbers = #tpu.dot_dimension_numbers<[1], [1], [0], [0], [0, 0, 1, 0], [], []>} : vector<32x16xbf16>, vector<64x16xbf16>, vector<32x64xf32> -> vector<32x64xf32>
    %247 = arith.addf %243, %246 : vector<32x64xf32>
    %248 = vector.extract_strided_slice %220 {offsets = [0, 64], sizes = [32, 32], strides = [1, 1]} : vector<32x256xbf16> to vector<32x32xbf16>
    %249 = vector.extract_strided_slice %224 {offsets = [0, 64], sizes = [64, 32], strides = [1, 1]} : vector<64x256xbf16> to vector<64x32xbf16>
    %cst_90 = arith.constant dense<0.000000e+00> : vector<32x64xf32>
    %250 = tpu.matmul %248, %249, %cst_90 {dimension_numbers = #tpu.dot_dimension_numbers<[1], [1], [0], [0], [0, 0, 1, 0], [], []>} : vector<32x32xbf16>, vector<64x32xbf16>, vector<32x64xf32> -> vector<32x64xf32>
    %251 = vector.extract_strided_slice %223 {offsets = [0, 32], sizes = [32, 16], strides = [1, 1]} : vector<32x256xbf16> to vector<32x16xbf16>
    %252 = vector.extract_strided_slice %225 {offsets = [0, 32], sizes = [64, 16], strides = [1, 1]} : vector<64x256xbf16> to vector<64x16xbf16>
    %cst_91 = arith.constant dense<0.000000e+00> : vector<32x64xf32>
    %253 = tpu.matmul %251, %252, %cst_91 {dimension_numbers = #tpu.dot_dimension_numbers<[1], [1], [0], [0], [0, 0, 1, 0], [], []>} : vector<32x16xbf16>, vector<64x16xbf16>, vector<32x64xf32> -> vector<32x64xf32>
    %254 = arith.addf %250, %253 : vector<32x64xf32>
    %255 = vector.extract_strided_slice %223 {offsets = [0, 160], sizes = [32, 16], strides = [1, 1]} : vector<32x256xbf16> to vector<32x16xbf16>
    %256 = vector.extract_strided_slice %225 {offsets = [0, 160], sizes = [64, 16], strides = [1, 1]} : vector<64x256xbf16> to vector<64x16xbf16>
    %cst_92 = arith.constant dense<0.000000e+00> : vector<32x64xf32>
    %257 = tpu.matmul %255, %256, %cst_92 {dimension_numbers = #tpu.dot_dimension_numbers<[1], [1], [0], [0], [0, 0, 1, 0], [], []>} : vector<32x16xbf16>, vector<64x16xbf16>, vector<32x64xf32> -> vector<32x64xf32>
    %258 = arith.addf %254, %257 : vector<32x64xf32>
    %259 = vector.extract_strided_slice %220 {offsets = [0, 96], sizes = [32, 32], strides = [1, 1]} : vector<32x256xbf16> to vector<32x32xbf16>
    %260 = vector.extract_strided_slice %224 {offsets = [0, 96], sizes = [64, 32], strides = [1, 1]} : vector<64x256xbf16> to vector<64x32xbf16>
    %cst_93 = arith.constant dense<0.000000e+00> : vector<32x64xf32>
    %261 = tpu.matmul %259, %260, %cst_93 {dimension_numbers = #tpu.dot_dimension_numbers<[1], [1], [0], [0], [0, 0, 1, 0], [], []>} : vector<32x32xbf16>, vector<64x32xbf16>, vector<32x64xf32> -> vector<32x64xf32>
    %262 = vector.extract_strided_slice %223 {offsets = [0, 48], sizes = [32, 16], strides = [1, 1]} : vector<32x256xbf16> to vector<32x16xbf16>
    %263 = vector.extract_strided_slice %225 {offsets = [0, 48], sizes = [64, 16], strides = [1, 1]} : vector<64x256xbf16> to vector<64x16xbf16>
    %cst_94 = arith.constant dense<0.000000e+00> : vector<32x64xf32>
    %264 = tpu.matmul %262, %263, %cst_94 {dimension_numbers = #tpu.dot_dimension_numbers<[1], [1], [0], [0], [0, 0, 1, 0], [], []>} : vector<32x16xbf16>, vector<64x16xbf16>, vector<32x64xf32> -> vector<32x64xf32>
    %265 = arith.addf %261, %264 : vector<32x64xf32>
    %266 = vector.extract_strided_slice %223 {offsets = [0, 176], sizes = [32, 16], strides = [1, 1]} : vector<32x256xbf16> to vector<32x16xbf16>
    %267 = vector.extract_strided_slice %225 {offsets = [0, 176], sizes = [64, 16], strides = [1, 1]} : vector<64x256xbf16> to vector<64x16xbf16>
    %cst_95 = arith.constant dense<0.000000e+00> : vector<32x64xf32>
    %268 = tpu.matmul %266, %267, %cst_95 {dimension_numbers = #tpu.dot_dimension_numbers<[1], [1], [0], [0], [0, 0, 1, 0], [], []>} : vector<32x16xbf16>, vector<64x16xbf16>, vector<32x64xf32> -> vector<32x64xf32>
    %269 = arith.addf %265, %268 : vector<32x64xf32>
    %270 = vector.extract_strided_slice %220 {offsets = [0, 128], sizes = [32, 32], strides = [1, 1]} : vector<32x256xbf16> to vector<32x32xbf16>
    %271 = vector.extract_strided_slice %224 {offsets = [0, 128], sizes = [64, 32], strides = [1, 1]} : vector<64x256xbf16> to vector<64x32xbf16>
    %cst_96 = arith.constant dense<0.000000e+00> : vector<32x64xf32>
    %272 = tpu.matmul %270, %271, %cst_96 {dimension_numbers = #tpu.dot_dimension_numbers<[1], [1], [0], [0], [0, 0, 1, 0], [], []>} : vector<32x32xbf16>, vector<64x32xbf16>, vector<32x64xf32> -> vector<32x64xf32>
    %273 = vector.extract_strided_slice %223 {offsets = [0, 64], sizes = [32, 16], strides = [1, 1]} : vector<32x256xbf16> to vector<32x16xbf16>
    %274 = vector.extract_strided_slice %225 {offsets = [0, 64], sizes = [64, 16], strides = [1, 1]} : vector<64x256xbf16> to vector<64x16xbf16>
    %cst_97 = arith.constant dense<0.000000e+00> : vector<32x64xf32>
    %275 = tpu.matmul %273, %274, %cst_97 {dimension_numbers = #tpu.dot_dimension_numbers<[1], [1], [0], [0], [0, 0, 1, 0], [], []>} : vector<32x16xbf16>, vector<64x16xbf16>, vector<32x64xf32> -> vector<32x64xf32>
    %276 = arith.addf %272, %275 : vector<32x64xf32>
    %277 = vector.extract_strided_slice %223 {offsets = [0, 192], sizes = [32, 16], strides = [1, 1]} : vector<32x256xbf16> to vector<32x16xbf16>
    %278 = vector.extract_strided_slice %225 {offsets = [0, 192], sizes = [64, 16], strides = [1, 1]} : vector<64x256xbf16> to vector<64x16xbf16>
    %cst_98 = arith.constant dense<0.000000e+00> : vector<32x64xf32>
    %279 = tpu.matmul %277, %278, %cst_98 {dimension_numbers = #tpu.dot_dimension_numbers<[1], [1], [0], [0], [0, 0, 1, 0], [], []>} : vector<32x16xbf16>, vector<64x16xbf16>, vector<32x64xf32> -> vector<32x64xf32>
    %280 = arith.addf %276, %279 : vector<32x64xf32>
    %281 = vector.extract_strided_slice %220 {offsets = [0, 160], sizes = [32, 32], strides = [1, 1]} : vector<32x256xbf16> to vector<32x32xbf16>
    %282 = vector.extract_strided_slice %224 {offsets = [0, 160], sizes = [64, 32], strides = [1, 1]} : vector<64x256xbf16> to vector<64x32xbf16>
    %cst_99 = arith.constant dense<0.000000e+00> : vector<32x64xf32>
    %283 = tpu.matmul %281, %282, %cst_99 {dimension_numbers = #tpu.dot_dimension_numbers<[1], [1], [0], [0], [0, 0, 1, 0], [], []>} : vector<32x32xbf16>, vector<64x32xbf16>, vector<32x64xf32> -> vector<32x64xf32>
    %284 = vector.extract_strided_slice %223 {offsets = [0, 80], sizes = [32, 16], strides = [1, 1]} : vector<32x256xbf16> to vector<32x16xbf16>
    %285 = vector.extract_strided_slice %225 {offsets = [0, 80], sizes = [64, 16], strides = [1, 1]} : vector<64x256xbf16> to vector<64x16xbf16>
    %cst_100 = arith.constant dense<0.000000e+00> : vector<32x64xf32>
    %286 = tpu.matmul %284, %285, %cst_100 {dimension_numbers = #tpu.dot_dimension_numbers<[1], [1], [0], [0], [0, 0, 1, 0], [], []>} : vector<32x16xbf16>, vector<64x16xbf16>, vector<32x64xf32> -> vector<32x64xf32>
    %287 = arith.addf %283, %286 : vector<32x64xf32>
    %288 = vector.extract_strided_slice %223 {offsets = [0, 208], sizes = [32, 16], strides = [1, 1]} : vector<32x256xbf16> to vector<32x16xbf16>
    %289 = vector.extract_strided_slice %225 {offsets = [0, 208], sizes = [64, 16], strides = [1, 1]} : vector<64x256xbf16> to vector<64x16xbf16>
    %cst_101 = arith.constant dense<0.000000e+00> : vector<32x64xf32>
    %290 = tpu.matmul %288, %289, %cst_101 {dimension_numbers = #tpu.dot_dimension_numbers<[1], [1], [0], [0], [0, 0, 1, 0], [], []>} : vector<32x16xbf16>, vector<64x16xbf16>, vector<32x64xf32> -> vector<32x64xf32>
    %291 = arith.addf %287, %290 : vector<32x64xf32>
    %292 = vector.extract_strided_slice %220 {offsets = [0, 192], sizes = [32, 32], strides = [1, 1]} : vector<32x256xbf16> to vector<32x32xbf16>
    %293 = vector.extract_strided_slice %224 {offsets = [0, 192], sizes = [64, 32], strides = [1, 1]} : vector<64x256xbf16> to vector<64x32xbf16>
    %cst_102 = arith.constant dense<0.000000e+00> : vector<32x64xf32>
    %294 = tpu.matmul %292, %293, %cst_102 {dimension_numbers = #tpu.dot_dimension_numbers<[1], [1], [0], [0], [0, 0, 1, 0], [], []>} : vector<32x32xbf16>, vector<64x32xbf16>, vector<32x64xf32> -> vector<32x64xf32>
    %295 = vector.extract_strided_slice %223 {offsets = [0, 96], sizes = [32, 16], strides = [1, 1]} : vector<32x256xbf16> to vector<32x16xbf16>
    %296 = vector.extract_strided_slice %225 {offsets = [0, 96], sizes = [64, 16], strides = [1, 1]} : vector<64x256xbf16> to vector<64x16xbf16>
    %cst_103 = arith.constant dense<0.000000e+00> : vector<32x64xf32>
    %297 = tpu.matmul %295, %296, %cst_103 {dimension_numbers = #tpu.dot_dimension_numbers<[1], [1], [0], [0], [0, 0, 1, 0], [], []>} : vector<32x16xbf16>, vector<64x16xbf16>, vector<32x64xf32> -> vector<32x64xf32>
    %298 = arith.addf %294, %297 : vector<32x64xf32>
    %299 = vector.extract_strided_slice %223 {offsets = [0, 224], sizes = [32, 16], strides = [1, 1]} : vector<32x256xbf16> to vector<32x16xbf16>
    %300 = vector.extract_strided_slice %225 {offsets = [0, 224], sizes = [64, 16], strides = [1, 1]} : vector<64x256xbf16> to vector<64x16xbf16>
    %cst_104 = arith.constant dense<0.000000e+00> : vector<32x64xf32>
    %301 = tpu.matmul %299, %300, %cst_104 {dimension_numbers = #tpu.dot_dimension_numbers<[1], [1], [0], [0], [0, 0, 1, 0], [], []>} : vector<32x16xbf16>, vector<64x16xbf16>, vector<32x64xf32> -> vector<32x64xf32>
    %302 = arith.addf %298, %301 : vector<32x64xf32>
    %303 = vector.extract_strided_slice %220 {offsets = [0, 224], sizes = [32, 32], strides = [1, 1]} : vector<32x256xbf16> to vector<32x32xbf16>
    %304 = vector.extract_strided_slice %224 {offsets = [0, 224], sizes = [64, 32], strides = [1, 1]} : vector<64x256xbf16> to vector<64x32xbf16>
    %cst_105 = arith.constant dense<0.000000e+00> : vector<32x64xf32>
    %305 = tpu.matmul %303, %304, %cst_105 {dimension_numbers = #tpu.dot_dimension_numbers<[1], [1], [0], [0], [0, 0, 1, 0], [], []>} : vector<32x32xbf16>, vector<64x32xbf16>, vector<32x64xf32> -> vector<32x64xf32>
    %306 = vector.extract_strided_slice %223 {offsets = [0, 112], sizes = [32, 16], strides = [1, 1]} : vector<32x256xbf16> to vector<32x16xbf16>
    %307 = vector.extract_strided_slice %225 {offsets = [0, 112], sizes = [64, 16], strides = [1, 1]} : vector<64x256xbf16> to vector<64x16xbf16>
    %cst_106 = arith.constant dense<0.000000e+00> : vector<32x64xf32>
    %308 = tpu.matmul %306, %307, %cst_106 {dimension_numbers = #tpu.dot_dimension_numbers<[1], [1], [0], [0], [0, 0, 1, 0], [], []>} : vector<32x16xbf16>, vector<64x16xbf16>, vector<32x64xf32> -> vector<32x64xf32>
    %309 = arith.addf %305, %308 : vector<32x64xf32>
    %310 = vector.extract_strided_slice %223 {offsets = [0, 240], sizes = [32, 16], strides = [1, 1]} : vector<32x256xbf16> to vector<32x16xbf16>
    %311 = vector.extract_strided_slice %225 {offsets = [0, 240], sizes = [64, 16], strides = [1, 1]} : vector<64x256xbf16> to vector<64x16xbf16>
    %cst_107 = arith.constant dense<0.000000e+00> : vector<32x64xf32>
    %312 = tpu.matmul %310, %311, %cst_107 {dimension_numbers = #tpu.dot_dimension_numbers<[1], [1], [0], [0], [0, 0, 1, 0], [], []>} : vector<32x16xbf16>, vector<64x16xbf16>, vector<32x64xf32> -> vector<32x64xf32>
    %313 = arith.addf %309, %312 : vector<32x64xf32>
    %314 = tpu.concatenate %236, %247, %258, %269, %280, %291, %302, %313 in 0 : vector<32x64xf32>, vector<32x64xf32>, vector<32x64xf32>, vector<32x64xf32>, vector<32x64xf32>, vector<32x64xf32>, vector<32x64xf32>, vector<32x64xf32> -> vector<256x64xf32>
    %cst_108 = arith.constant 1.250000e-01 : f32
    %315 = vector.broadcast %cst_108 : f32 to vector<256x64xf32>
    %316 = arith.mulf %314, %315 : vector<256x64xf32>
    %317 = arith.addf %316, %64 : vector<256x64xf32>
    %cst_109 = arith.constant dense<0xFF800000> : vector<256xf32>
    %318 = vector.multi_reduction <maximumf>, %317, %cst_109 [1] : vector<256x64xf32> to vector<256xf32>
    %319 = vector.shape_cast %318 : vector<256xf32> to vector<256x1xf32>
    %320 = vector.broadcast %319 : vector<256x1xf32> to vector<256x64xf32>
    %321 = arith.subf %317, %320 : vector<256x64xf32>
    %322 = math.exp %321 : vector<256x64xf32>
    %cst_110 = arith.constant dense<0.000000e+00> : vector<256xf32>
    %323 = vector.multi_reduction <add>, %322, %cst_110 [1] : vector<256x64xf32> to vector<256xf32>
    %324 = vector.shape_cast %323 : vector<256xf32> to vector<256x1xf32>
    %325 = vector.broadcast %324 : vector<256x1xf32> to vector<256x64xf32>
    %326 = arith.divf %322, %325 : vector<256x64xf32>
    %327 = arith.truncf %326 : vector<256x64xf32> to vector<256x64xbf16>
    %cst_111 = arith.constant 0.000000e+00 : f32
    %328 = vector.broadcast %cst_111 : f32 to vector<32x256xf32>
    %cst_112 = arith.constant 0.000000e+00 : bf16
    %329 = vector.shape_cast %9 : vector<1x256xi1> to vector<1x256xi1>
    %330 = vector.broadcast %329 : vector<1x256xi1> to vector<64x256xi1>
    %331 = vector.broadcast %cst_112 : bf16 to vector<64x256xbf16>
    %332 = arith.select %330, %224, %331 : vector<64x256xi1>, vector<64x256xbf16>
    %333 = vector.extract_strided_slice %327 {offsets = [0, 0], sizes = [32, 64], strides = [1, 1]} : vector<256x64xbf16> to vector<32x64xbf16>
    %cst_113 = arith.constant dense<0.000000e+00> : vector<32x256xf32>
    %334 = tpu.matmul %333, %332, %cst_113 {dimension_numbers = #tpu.dot_dimension_numbers<[1], [0], [0], [1], [0, 0, 1, 1], [], []>} : vector<32x64xbf16>, vector<64x256xbf16>, vector<32x256xf32> -> vector<32x256xf32>
    %335 = arith.addf %328, %334 : vector<32x256xf32>
    %cst_114 = arith.constant 0.000000e+00 : bf16
    %336 = vector.shape_cast %14 : vector<1x256xi1> to vector<1x256xi1>
    %337 = vector.broadcast %336 : vector<1x256xi1> to vector<64x256xi1>
    %338 = vector.broadcast %cst_114 : bf16 to vector<64x256xbf16>
    %339 = arith.select %337, %224, %338 : vector<64x256xi1>, vector<64x256xbf16>
    %340 = vector.extract_strided_slice %327 {offsets = [32, 0], sizes = [32, 64], strides = [1, 1]} : vector<256x64xbf16> to vector<32x64xbf16>
    %cst_115 = arith.constant dense<0.000000e+00> : vector<32x256xf32>
    %341 = tpu.matmul %340, %339, %cst_115 {dimension_numbers = #tpu.dot_dimension_numbers<[1], [0], [0], [1], [0, 0, 1, 1], [], []>} : vector<32x64xbf16>, vector<64x256xbf16>, vector<32x256xf32> -> vector<32x256xf32>
    %342 = arith.addf %335, %341 : vector<32x256xf32>
    %cst_116 = arith.constant 0.000000e+00 : bf16
    %343 = vector.shape_cast %19 : vector<1x256xi1> to vector<1x256xi1>
    %344 = vector.broadcast %343 : vector<1x256xi1> to vector<64x256xi1>
    %345 = vector.broadcast %cst_116 : bf16 to vector<64x256xbf16>
    %346 = arith.select %344, %224, %345 : vector<64x256xi1>, vector<64x256xbf16>
    %347 = vector.extract_strided_slice %327 {offsets = [64, 0], sizes = [32, 64], strides = [1, 1]} : vector<256x64xbf16> to vector<32x64xbf16>
    %cst_117 = arith.constant dense<0.000000e+00> : vector<32x256xf32>
    %348 = tpu.matmul %347, %346, %cst_117 {dimension_numbers = #tpu.dot_dimension_numbers<[1], [0], [0], [1], [0, 0, 1, 1], [], []>} : vector<32x64xbf16>, vector<64x256xbf16>, vector<32x256xf32> -> vector<32x256xf32>
    %349 = arith.addf %342, %348 : vector<32x256xf32>
    %cst_118 = arith.constant 0.000000e+00 : bf16
    %350 = vector.shape_cast %24 : vector<1x256xi1> to vector<1x256xi1>
    %351 = vector.broadcast %350 : vector<1x256xi1> to vector<64x256xi1>
    %352 = vector.broadcast %cst_118 : bf16 to vector<64x256xbf16>
    %353 = arith.select %351, %224, %352 : vector<64x256xi1>, vector<64x256xbf16>
    %354 = vector.extract_strided_slice %327 {offsets = [96, 0], sizes = [32, 64], strides = [1, 1]} : vector<256x64xbf16> to vector<32x64xbf16>
    %cst_119 = arith.constant dense<0.000000e+00> : vector<32x256xf32>
    %355 = tpu.matmul %354, %353, %cst_119 {dimension_numbers = #tpu.dot_dimension_numbers<[1], [0], [0], [1], [0, 0, 1, 1], [], []>} : vector<32x64xbf16>, vector<64x256xbf16>, vector<32x256xf32> -> vector<32x256xf32>
    %356 = arith.addf %349, %355 : vector<32x256xf32>
    %cst_120 = arith.constant 0.000000e+00 : bf16
    %357 = vector.shape_cast %29 : vector<1x256xi1> to vector<1x256xi1>
    %358 = vector.broadcast %357 : vector<1x256xi1> to vector<64x256xi1>
    %359 = vector.broadcast %cst_120 : bf16 to vector<64x256xbf16>
    %360 = arith.select %358, %224, %359 : vector<64x256xi1>, vector<64x256xbf16>
    %361 = vector.extract_strided_slice %327 {offsets = [128, 0], sizes = [32, 64], strides = [1, 1]} : vector<256x64xbf16> to vector<32x64xbf16>
    %cst_121 = arith.constant dense<0.000000e+00> : vector<32x256xf32>
    %362 = tpu.matmul %361, %360, %cst_121 {dimension_numbers = #tpu.dot_dimension_numbers<[1], [0], [0], [1], [0, 0, 1, 1], [], []>} : vector<32x64xbf16>, vector<64x256xbf16>, vector<32x256xf32> -> vector<32x256xf32>
    %363 = arith.addf %356, %362 : vector<32x256xf32>
    %cst_122 = arith.constant 0.000000e+00 : bf16
    %364 = vector.shape_cast %34 : vector<1x256xi1> to vector<1x256xi1>
    %365 = vector.broadcast %364 : vector<1x256xi1> to vector<64x256xi1>
    %366 = vector.broadcast %cst_122 : bf16 to vector<64x256xbf16>
    %367 = arith.select %365, %224, %366 : vector<64x256xi1>, vector<64x256xbf16>
    %368 = vector.extract_strided_slice %327 {offsets = [160, 0], sizes = [32, 64], strides = [1, 1]} : vector<256x64xbf16> to vector<32x64xbf16>
    %cst_123 = arith.constant dense<0.000000e+00> : vector<32x256xf32>
    %369 = tpu.matmul %368, %367, %cst_123 {dimension_numbers = #tpu.dot_dimension_numbers<[1], [0], [0], [1], [0, 0, 1, 1], [], []>} : vector<32x64xbf16>, vector<64x256xbf16>, vector<32x256xf32> -> vector<32x256xf32>
    %370 = arith.addf %363, %369 : vector<32x256xf32>
    %cst_124 = arith.constant 0.000000e+00 : bf16
    %371 = vector.shape_cast %39 : vector<1x256xi1> to vector<1x256xi1>
    %372 = vector.broadcast %371 : vector<1x256xi1> to vector<64x256xi1>
    %373 = vector.broadcast %cst_124 : bf16 to vector<64x256xbf16>
    %374 = arith.select %372, %224, %373 : vector<64x256xi1>, vector<64x256xbf16>
    %375 = vector.extract_strided_slice %327 {offsets = [192, 0], sizes = [32, 64], strides = [1, 1]} : vector<256x64xbf16> to vector<32x64xbf16>
    %cst_125 = arith.constant dense<0.000000e+00> : vector<32x256xf32>
    %376 = tpu.matmul %375, %374, %cst_125 {dimension_numbers = #tpu.dot_dimension_numbers<[1], [0], [0], [1], [0, 0, 1, 1], [], []>} : vector<32x64xbf16>, vector<64x256xbf16>, vector<32x256xf32> -> vector<32x256xf32>
    %377 = arith.addf %370, %376 : vector<32x256xf32>
    %cst_126 = arith.constant 0.000000e+00 : bf16
    %378 = vector.shape_cast %44 : vector<1x256xi1> to vector<1x256xi1>
    %379 = vector.broadcast %378 : vector<1x256xi1> to vector<64x256xi1>
    %380 = vector.broadcast %cst_126 : bf16 to vector<64x256xbf16>
    %381 = arith.select %379, %224, %380 : vector<64x256xi1>, vector<64x256xbf16>
    %382 = vector.extract_strided_slice %327 {offsets = [224, 0], sizes = [32, 64], strides = [1, 1]} : vector<256x64xbf16> to vector<32x64xbf16>
    %cst_127 = arith.constant dense<0.000000e+00> : vector<32x256xf32>
    %383 = tpu.matmul %382, %381, %cst_127 {dimension_numbers = #tpu.dot_dimension_numbers<[1], [0], [0], [1], [0, 0, 1, 1], [], []>} : vector<32x64xbf16>, vector<64x256xbf16>, vector<32x256xf32> -> vector<32x256xf32>
    %384 = arith.addf %377, %383 : vector<32x256xf32>
    %c0_128 = arith.constant 0 : index
    %c0_129 = arith.constant 0 : index
    %385 = vector.load %arg17[%c0_128, %c0_129] : memref<256x256xbf16, #tpu.memory_space<vmem>>, vector<256x256xbf16>
    %c0_130 = arith.constant 0 : index
    %c0_131 = arith.constant 0 : index
    %386 = vector.load %arg18[%c0_130, %c0_131] : memref<1x256xf32, #tpu.memory_space<vmem>>, vector<1x256xf32>
    %387 = arith.truncf %384 : vector<32x256xf32> to vector<32x256xbf16>
    %cst_132 = arith.constant dense<0.000000e+00> : vector<32x256xf32>
    %388 = tpu.matmul %387, %385, %cst_132 {dimension_numbers = #tpu.dot_dimension_numbers<[1], [0], [0], [1], [0, 0, 1, 1], [], []>} : vector<32x256xbf16>, vector<256x256xbf16>, vector<32x256xf32> -> vector<32x256xf32>
    %389 = vector.broadcast %386 : vector<1x256xf32> to vector<32x256xf32>
    %390 = arith.addf %388, %389 : vector<32x256xf32>
    %391 = arith.addf %205, %390 : vector<32x256xf32>
    %c0_133 = arith.constant 0 : index
    %c0_134 = arith.constant 0 : index
    %392 = vector.load %arg19[%c0_133, %c0_134] : memref<1x256xf32, #tpu.memory_space<vmem>>, vector<1x256xf32>
    %c0_135 = arith.constant 0 : index
    %c0_136 = arith.constant 0 : index
    %393 = vector.load %arg20[%c0_135, %c0_136] : memref<1x256xf32, #tpu.memory_space<vmem>>, vector<1x256xf32>
    %cst_137 = arith.constant dense<0.000000e+00> : vector<32xf32>
    %394 = vector.multi_reduction <add>, %391, %cst_137 [1] : vector<32x256xf32> to vector<32xf32>
    %395 = vector.shape_cast %394 : vector<32xf32> to vector<32x1xf32>
    %cst_138 = arith.constant 2.560000e+02 : f32
    %396 = vector.broadcast %cst_138 : f32 to vector<32x1xf32>
    %397 = arith.divf %395, %396 : vector<32x1xf32>
    %398 = vector.broadcast %397 : vector<32x1xf32> to vector<32x256xf32>
    %399 = arith.subf %391, %398 : vector<32x256xf32>
    %400 = arith.mulf %399, %399 : vector<32x256xf32>
    %cst_139 = arith.constant dense<0.000000e+00> : vector<32xf32>
    %401 = vector.multi_reduction <add>, %400, %cst_139 [1] : vector<32x256xf32> to vector<32xf32>
    %402 = vector.shape_cast %401 : vector<32xf32> to vector<32x1xf32>
    %cst_140 = arith.constant 2.560000e+02 : f32
    %403 = vector.broadcast %cst_140 : f32 to vector<32x1xf32>
    %404 = arith.divf %402, %403 : vector<32x1xf32>
    %cst_141 = arith.constant 9.99999974E-6 : f32
    %405 = vector.broadcast %cst_141 : f32 to vector<32x1xf32>
    %406 = arith.addf %404, %405 : vector<32x1xf32>
    %407 = math.rsqrt %406 : vector<32x1xf32>
    %408 = vector.broadcast %407 : vector<32x1xf32> to vector<32x256xf32>
    %409 = arith.mulf %399, %408 : vector<32x256xf32>
    %410 = vector.broadcast %392 : vector<1x256xf32> to vector<32x256xf32>
    %411 = arith.mulf %409, %410 : vector<32x256xf32>
    %412 = vector.broadcast %393 : vector<1x256xf32> to vector<32x256xf32>
    %413 = arith.addf %411, %412 : vector<32x256xf32>
    %c0_142 = arith.constant 0 : index
    %c0_143 = arith.constant 0 : index
    %414 = vector.load %arg21[%c0_142, %c0_143] : memref<256x512xbf16, #tpu.memory_space<vmem>>, vector<256x512xbf16>
    %c0_144 = arith.constant 0 : index
    %c0_145 = arith.constant 0 : index
    %415 = vector.load %arg22[%c0_144, %c0_145] : memref<1x512xf32, #tpu.memory_space<vmem>>, vector<1x512xf32>
    %416 = arith.truncf %413 : vector<32x256xf32> to vector<32x256xbf16>
    %cst_146 = arith.constant dense<0.000000e+00> : vector<32x512xf32>
    %417 = tpu.matmul %416, %414, %cst_146 {dimension_numbers = #tpu.dot_dimension_numbers<[1], [0], [0], [1], [0, 0, 1, 1], [], []>} : vector<32x256xbf16>, vector<256x512xbf16>, vector<32x512xf32> -> vector<32x512xf32>
    %418 = vector.broadcast %415 : vector<1x512xf32> to vector<32x512xf32>
    %419 = arith.addf %417, %418 : vector<32x512xf32>
    %cst_147 = arith.constant 0.000000e+00 : f32
    %420 = vector.broadcast %cst_147 : f32 to vector<32x512xf32>
    %421 = arith.maximumf %419, %420 : vector<32x512xf32>
    %c0_148 = arith.constant 0 : index
    %c0_149 = arith.constant 0 : index
    %422 = vector.load %arg23[%c0_148, %c0_149] : memref<512x256xbf16, #tpu.memory_space<vmem>>, vector<512x256xbf16>
    %c0_150 = arith.constant 0 : index
    %c0_151 = arith.constant 0 : index
    %423 = vector.load %arg24[%c0_150, %c0_151] : memref<1x256xf32, #tpu.memory_space<vmem>>, vector<1x256xf32>
    %424 = arith.truncf %421 : vector<32x512xf32> to vector<32x512xbf16>
    %cst_152 = arith.constant dense<0.000000e+00> : vector<32x256xf32>
    %425 = tpu.matmul %424, %422, %cst_152 {dimension_numbers = #tpu.dot_dimension_numbers<[1], [0], [0], [1], [0, 0, 1, 1], [], []>} : vector<32x512xbf16>, vector<512x256xbf16>, vector<32x256xf32> -> vector<32x256xf32>
    %426 = vector.broadcast %423 : vector<1x256xf32> to vector<32x256xf32>
    %427 = arith.addf %425, %426 : vector<32x256xf32>
    %428 = arith.addf %413, %427 : vector<32x256xf32>
    %c0_153 = arith.constant 0 : index
    %c0_154 = arith.constant 0 : index
    %429 = vector.load %arg25[%c0_153, %c0_154] : memref<1x256xf32, #tpu.memory_space<vmem>>, vector<1x256xf32>
    %c0_155 = arith.constant 0 : index
    %c0_156 = arith.constant 0 : index
    %430 = vector.load %arg26[%c0_155, %c0_156] : memref<1x256xf32, #tpu.memory_space<vmem>>, vector<1x256xf32>
    %cst_157 = arith.constant dense<0.000000e+00> : vector<32xf32>
    %431 = vector.multi_reduction <add>, %428, %cst_157 [1] : vector<32x256xf32> to vector<32xf32>
    %432 = vector.shape_cast %431 : vector<32xf32> to vector<32x1xf32>
    %cst_158 = arith.constant 2.560000e+02 : f32
    %433 = vector.broadcast %cst_158 : f32 to vector<32x1xf32>
    %434 = arith.divf %432, %433 : vector<32x1xf32>
    %435 = vector.broadcast %434 : vector<32x1xf32> to vector<32x256xf32>
    %436 = arith.subf %428, %435 : vector<32x256xf32>
    %437 = arith.mulf %436, %436 : vector<32x256xf32>
    %cst_159 = arith.constant dense<0.000000e+00> : vector<32xf32>
    %438 = vector.multi_reduction <add>, %437, %cst_159 [1] : vector<32x256xf32> to vector<32xf32>
    %439 = vector.shape_cast %438 : vector<32xf32> to vector<32x1xf32>
    %cst_160 = arith.constant 2.560000e+02 : f32
    %440 = vector.broadcast %cst_160 : f32 to vector<32x1xf32>
    %441 = arith.divf %439, %440 : vector<32x1xf32>
    %cst_161 = arith.constant 9.99999974E-6 : f32
    %442 = vector.broadcast %cst_161 : f32 to vector<32x1xf32>
    %443 = arith.addf %441, %442 : vector<32x1xf32>
    %444 = math.rsqrt %443 : vector<32x1xf32>
    %445 = vector.broadcast %444 : vector<32x1xf32> to vector<32x256xf32>
    %446 = arith.mulf %436, %445 : vector<32x256xf32>
    %447 = vector.broadcast %429 : vector<1x256xf32> to vector<32x256xf32>
    %448 = arith.mulf %446, %447 : vector<32x256xf32>
    %449 = vector.broadcast %430 : vector<1x256xf32> to vector<32x256xf32>
    %450 = arith.addf %448, %449 : vector<32x256xf32>
    %c0_162 = arith.constant 0 : index
    %c0_163 = arith.constant 0 : index
    %451 = vector.load %arg27[%c0_162, %c0_163] : memref<32x256xf32, #tpu.memory_space<vmem>>, vector<32x256xf32>
    tpu.vector_store %arg27[%c0_162, %c0_163], %450 {strides = array<i32>} : memref<32x256xf32, #tpu.memory_space<vmem>>, vector<32x256xf32>,
    return
  }
  func.func @transform_0(%arg0: i32) -> (i32, i32) {
    %c0_i32 = arith.constant 0 : i32
    %c0_i32_0 = arith.constant 0 : i32
    %c0_i32_1 = arith.constant 0 : i32
    return %c0_i32, %c0_i32_0 : i32, i32
  }
  func.func @transform_1(%arg0: i32) -> (i32, i32) {
    %c0_i32 = arith.constant 0 : i32
    %c0_i32_0 = arith.constant 0 : i32
    %c0_i32_1 = arith.constant 0 : i32
    return %c0_i32, %c0_i32_0 : i32, i32
  }
  func.func @transform_2(%arg0: i32) -> (i32, i32) {
    %c0_i32 = arith.constant 0 : i32
    %c0_i32_0 = arith.constant 0 : i32
    %c0_i32_1 = arith.constant 0 : i32
    return %c0_i32, %c0_i32_0 : i32, i32
  }
  func.func @transform_3(%arg0: i32) -> (i32, i32) {
    %c0_i32 = arith.constant 0 : i32
    %c0_i32_0 = arith.constant 0 : i32
    %c0_i32_1 = arith.constant 0 : i32
    return %c0_i32, %c0_i32_0 : i32, i32
  }
  func.func @transform_4(%arg0: i32) -> (i32, i32) {
    %c0_i32 = arith.constant 0 : i32
    %c0_i32_0 = arith.constant 0 : i32
    %c0_i32_1 = arith.constant 0 : i32
    return %c0_i32, %c0_i32_0 : i32, i32
  }
  func.func @transform_5(%arg0: i32) -> (i32, i32) {
    %c0_i32 = arith.constant 0 : i32
    %c0_i32_0 = arith.constant 0 : i32
    %c0_i32_1 = arith.constant 0 : i32
    return %c0_i32, %c0_i32_0 : i32, i32
  }
  func.func @transform_6(%arg0: i32) -> (i32, i32) {
    %c0_i32 = arith.constant 0 : i32
    %c0_i32_0 = arith.constant 0 : i32
    %c0_i32_1 = arith.constant 0 : i32
    return %c0_i32, %c0_i32_0 : i32, i32
  }
  func.func @transform_7(%arg0: i32) -> (i32, i32) {
    %c0_i32 = arith.constant 0 : i32
    %c0_i32_0 = arith.constant 0 : i32
    %c0_i32_1 = arith.constant 0 : i32
    return %c0_i32, %c0_i32_0 : i32, i32
  }
  func.func @transform_8(%arg0: i32) -> (i32, i32) {
    %c0_i32 = arith.constant 0 : i32
    %c0_i32_0 = arith.constant 0 : i32
    %c0_i32_1 = arith.constant 0 : i32
    return %c0_i32, %c0_i32_0 : i32, i32
  }
  func.func @transform_9(%arg0: i32) -> (i32, i32) {
    %c0_i32 = arith.constant 0 : i32
    %c0_i32_0 = arith.constant 0 : i32
    %c0_i32_1 = arith.constant 0 : i32
    return %c0_i32, %c0_i32_0 : i32, i32
  }
  func.func @transform_10(%arg0: i32) -> (i32, i32) {
    %c0_i32 = arith.constant 0 : i32
    %c0_i32_0 = arith.constant 0 : i32
    %c0_i32_1 = arith.constant 0 : i32
    return %c0_i32, %c0_i32_0 : i32, i32
  }
  func.func @transform_11(%arg0: i32) -> (i32, i32) {
    %c0_i32 = arith.constant 0 : i32
    %c0_i32_0 = arith.constant 0 : i32
    %c0_i32_1 = arith.constant 0 : i32
    return %c0_i32, %c0_i32_0 : i32, i32
  }
  func.func @transform_12(%arg0: i32) -> (i32, i32) {
    %c0_i32 = arith.constant 0 : i32
    %c0_i32_0 = arith.constant 0 : i32
    %c0_i32_1 = arith.constant 0 : i32
    return %c0_i32, %c0_i32_0 : i32, i32
  }
  func.func @transform_13(%arg0: i32) -> (i32, i32) {
    %c0_i32 = arith.constant 0 : i32
    %c0_i32_0 = arith.constant 0 : i32
    %c0_i32_1 = arith.constant 0 : i32
    return %c0_i32, %c0_i32_0 : i32, i32
  }
  func.func @transform_14(%arg0: i32) -> (i32, i32) {
    %c0_i32 = arith.constant 0 : i32
    %c0_i32_0 = arith.constant 0 : i32
    %c0_i32_1 = arith.constant 0 : i32
    return %c0_i32, %c0_i32_0 : i32, i32
  }
  func.func @transform_15(%arg0: i32) -> (i32, i32) {
    %c0_i32 = arith.constant 0 : i32
    %c0_i32_0 = arith.constant 0 : i32
    %c0_i32_1 = arith.constant 0 : i32
    return %c0_i32, %c0_i32_0 : i32, i32
  }
  func.func @transform_16(%arg0: i32) -> (i32, i32) {
    %c0_i32 = arith.constant 0 : i32
    %c0_i32_0 = arith.constant 0 : i32
    %c0_i32_1 = arith.constant 0 : i32
    return %c0_i32, %c0_i32_0 : i32, i32
  }
  func.func @transform_17(%arg0: i32) -> (i32, i32) {
    %c0_i32 = arith.constant 0 : i32
    %c0_i32_0 = arith.constant 0 : i32
    %c0_i32_1 = arith.constant 0 : i32
    return %c0_i32, %c0_i32_0 : i32, i32
  }
  func.func @transform_18(%arg0: i32) -> (i32, i32) {
    %c0_i32 = arith.constant 0 : i32
    %c0_i32_0 = arith.constant 0 : i32
    %c0_i32_1 = arith.constant 0 : i32
    return %c0_i32, %c0_i32_0 : i32, i32
  }
  func.func @transform_19(%arg0: i32) -> (i32, i32) {
    %c0_i32 = arith.constant 0 : i32
    %c0_i32_0 = arith.constant 0 : i32
    %c0_i32_1 = arith.constant 0 : i32
    return %c0_i32, %c0_i32_0 : i32, i32
  }
  func.func @transform_20(%arg0: i32) -> (i32, i32) {
    %c0_i32 = arith.constant 0 : i32
    %c0_i32_0 = arith.constant 0 : i32
    %c0_i32_1 = arith.constant 0 : i32
    return %c0_i32, %c0_i32_0 : i32, i32
  }
  func.func @transform_21(%arg0: i32) -> (i32, i32) {
    %c0_i32 = arith.constant 0 : i32
    %c0_i32_0 = arith.constant 0 : i32
    %c0_i32_1 = arith.constant 0 : i32
    return %c0_i32, %c0_i32_0 : i32, i32
  }
  func.func @transform_22(%arg0: i32) -> (i32, i32) {
    %c0_i32 = arith.constant 0 : i32
    %c0_i32_0 = arith.constant 0 : i32
    %c0_i32_1 = arith.constant 0 : i32
    return %c0_i32, %c0_i32_0 : i32, i32
  }
  func.func @transform_23(%arg0: i32) -> (i32, i32) {
    %c0_i32 = arith.constant 0 : i32
    %c0_i32_0 = arith.constant 0 : i32
    %c0_i32_1 = arith.constant 0 : i32
    return %c0_i32, %c0_i32_0 : i32, i32
  }
  func.func @transform_24(%arg0: i32) -> (i32, i32) {
    %c0_i32 = arith.constant 0 : i32
    %c0_i32_0 = arith.constant 0 : i32
    %c0_i32_1 = arith.constant 0 : i32
    return %c0_i32, %c0_i32_0 : i32, i32
  }
  func.func @transform_25(%arg0: i32) -> (i32, i32) {
    %c0_i32 = arith.constant 0 : i32
    %c0_i32_0 = arith.constant 0 : i32
    %c0_i32_1 = arith.constant 0 : i32
    return %c0_i32, %c0_i32_0 : i32, i32
  }
  func.func @transform_26(%arg0: i32) -> (i32, i32) {
    %c0_i32 = arith.constant 0 : i32
    %c0_i32_0 = arith.constant 0 : i32
    %c0_i32_1 = arith.constant 0 : i32
    return %c0_i32, %c0_i32_0 : i32, i32
  }
}

</mosaic_0001>

<bundles_post_ra>
// kernel: tpu_custom_call.1
= control target key start
LH: loop header
LB: loop body
LE: loop exit
PB: predicated region body
PF: predicated region fallthrough
CT: control target
= control target key end

     0   :  { %s16010_s0 = inlined_call_operand.hbm [shape: f32[32,256], index: 0, kind: input, shape index: {}]   ;;  %s16011_s1 = inlined_call_operand.hbm [shape: f32[64,256], index: 1, kind: input, shape index: {}]   ;;  %s16012_s2 = inlined_call_operand.hbm [shape: f32[32,640], index: 2, kind: input, shape index: {}]   ;;  %s16013_s3 = inlined_call_operand.hbm [shape: f32[64,256], index: 3, kind: input, shape index: {}]   ;;  %s16014_s4 = inlined_call_operand.hbm [shape: bf16[640,256], index: 4, kind: input, shape index: {}]   ;;  %s16015_s5 = inlined_call_operand.vmem [shape: f32[1,256], index: 5, kind: input, shape index: {}]   ;;  %s16016_s6 = inlined_call_operand.hbm [shape: bf16[256,256], index: 6, kind: input, shape index: {}]   ;;  %s16017_s7 = inlined_call_operand.hbm [shape: f32[1,256], index: 7, kind: input, shape index: {}]   ;;  %s16018_s8 = inlined_call_operand.hbm [shape: bf16[256,256], index: 8, kind: input, shape index: {}]   ;;  %s16019_s9 = inlined_call_operand.vmem [shape: f32[1,256], index: 9, kind: input, shape index: {}]   ;;  %s16020_s10 = inlined_call_operand.hbm [shape: f32[1,256], index: 10, kind: input, shape index: {}]   ;;  %s16021_s11 = inlined_call_operand.vmem [shape: f32[1,256], index: 11, kind: input, shape index: {}]   ;;  %s16022_s12 = inlined_call_operand.hbm [shape: bf16[256,256], index: 12, kind: input, shape index: {}]   ;;  %s16023_s13 = inlined_call_operand.vmem [shape: f32[1,256], index: 13, kind: input, shape index: {}]   ;;  %s16024_s14 = inlined_call_operand.hbm [shape: bf16[256,256], index: 14, kind: input, shape index: {}]   ;;  %s16025_s15 = inlined_call_operand.vmem [shape: f32[1,256], index: 15, kind: input, shape index: {}]   ;;  %s16026_s16 = inlined_call_operand.hbm [shape: bf16[256,256], index: 16, kind: input, shape index: {}]   ;;  %s16027_s17 = inlined_call_operand.vmem [shape: f32[1,256], index: 17, kind: input, shape index: {}]   ;;  %s16028_s18 = inlined_call_operand.hbm [shape: f32[1,256], index: 18, kind: input, shape index: {}]   ;;  %s16029_s19 = inlined_call_operand.vmem [shape: f32[1,256], index: 19, kind: input, shape index: {}]   ;;  %s16030_s20 = inlined_call_operand.hbm [shape: bf16[256,512], index: 20, kind: input, shape index: {}]   ;;  %s16031_s21 = inlined_call_operand.vmem [shape: f32[1,512], index: 21, kind: input, shape index: {}]   ;;  %s16032_s22 = inlined_call_operand.hbm [shape: bf16[512,256], index: 22, kind: input, shape index: {}]   ;;  %s16033_s23 = inlined_call_operand.vmem [shape: f32[1,256], index: 23, kind: input, shape index: {}]   ;;  %s16034_s24 = inlined_call_operand.vmem [shape: f32[1,256], index: 24, kind: input, shape index: {}]   ;;  %s16035_s25 = inlined_call_operand.vmem [shape: f32[1,256], index: 25, kind: input, shape index: {}]   ;;  %s16036_s26 = inlined_call_operand.hbm [shape: f32[32,256], index: 26, kind: output, shape index: {}]  }
   0x1   :  { %16117 = sst [smem:[#allocation85_spill]] %s16010_s0 }
   0x2   :  { %16118 = sst [smem:[#allocation86_spill]] %s16011_s1 }
   0x3   :  { %16119 = sst [smem:[#allocation87_spill]] %s16012_s2 }
   0x4   :  { %16120 = sst [smem:[#allocation88_spill]] %s16013_s3 }
   0x5   :  { %16121 = sst [smem:[#allocation89_spill]] %s16014_s4 }
   0x6   :  { %16122 = sst [smem:[#allocation90_spill]] %s16015_s5 }
   0x7   :  { %16123 = sst [smem:[#allocation91_spill]] %s16016_s6 }
   0x8   :  { %16124 = sst [smem:[#allocation92_spill]] %s16017_s7 }
   0x9   :  { %16125 = sst [smem:[#allocation93_spill]] %s16018_s8 }
   0xa   :  { %16126 = sst [smem:[#allocation94_spill]] %s16019_s9 }
   0xb   :  { %16127 = sst [smem:[#allocation95_spill]] %s16020_s10 }
   0xc   :  { %16128 = sst [smem:[#allocation96_spill]] %s16035_s25 }
   0xd   :  { %16129 = sst [smem:[#allocation97_spill]] %s16036_s26 }
   0xe   :  { %31 = vsyncpa [#allocation3], 0 }
   0xf   :  { %32 = vsyncpa [#allocation6], 0 }
  0x10   :  { %33 = vsyncpa [#allocation9], 0 }
  0x11   :  { %34 = vsyncpa [#allocation12], 0 }
  0x12   :  { %35 = vsyncpa [#allocation15], 0 }
  0x13   :  { %36 = vsyncpa [#allocation18], 0 }
  0x14   :  { %37 = vsyncpa [#allocation21], 0 }
  0x15   :  { %38 = vsyncpa [#allocation24], 0 }
  0x16   :  { %39 = vsyncpa [#allocation4], 0  ;;  %s16130_s7 = sld [smem:[#allocation86_spill]]  ;;  %s11776_s8 = smov [#allocation5]  }
  0x17   :  { %s59_s4 = sshll.u32 %s11776_s8, 4  ;;  %s16131_s9 = sld [smem:[#allocation88_spill]]  ;;  %s60_s4 = int_to_ptr.vmem [resolvable:$true] %s59_s4 }
  0x18   :  { %s16039_s2 = smov 256   ;;  %s11778_s5 = smov 16  }
  0x19   :  { %s11779_s10 = smov [#allocation8]   ;;  %s16132_s3 = sld [smem:[#allocation91_spill]] }
  0x1a   :  { %s85_s6 = sshll.u32 %s11779_s10, 4  ;;  %s11780_s8 = smov [#allocation11]   ;;  %s86_s6 = int_to_ptr.vmem [resolvable:$true] %s85_s6 }
  0x1b   :  { %s113_s29 = sshll.u32 %s11780_s8, 4  ;;  %s16133_s26 = sld [smem:[#allocation93_spill]]  ;;  %s114_s29 = int_to_ptr.vmem [resolvable:$true] %s113_s29 }
  0x1c   :  { %s57_s28 = sshll.u32 %s16130_s7, 4  ;;  %s11782_s25 = smov 8   ;;  %s58_s28 = int_to_ptr.hbm [resolvable:$true] %s57_s28 }
  0x1d   :  { %s83_s30 = sshll.u32 %s16131_s9, 4  ;;  %s163_s27 = sshll.u32 %s16022_s12, 4  ;;  %s84_s30 = int_to_ptr.hbm [resolvable:$true] %s83_s30  ;;  %s164_s27 = int_to_ptr.hbm [resolvable:$true] %s163_s27 }
  0x1e   :  { %65 = dma.hbm_to_vmem [thread:$0]  %s58_s28, 2048, %s60_s4, [#allocation6], %s16039_s2, %s16039_s2, %s11778_s5  }
  0x1f   :  { %91 = dma.hbm_to_vmem [thread:$0]  %s84_s30, 2048, %s86_s6, [#allocation9], %s16039_s2, %s16039_s2, %s11778_s5  }
  0x20   :  { %s111_s7 = sshll.u32 %s16132_s3, 4  ;;  %s16037_s4 = smov 128   ;;  %s112_s7 = int_to_ptr.hbm [resolvable:$true] %s111_s7 }
  0x21   :  { %s135_s28 = sshll.u32 %s16133_s26, 4  ;;  %s11783_s30 = smov [#allocation14]   ;;  %s136_s28 = int_to_ptr.hbm [resolvable:$true] %s135_s28 }
  0x22   :  { %119 = dma.hbm_to_vmem [thread:$0]  %s112_s7, 4096, %s114_s29, [#allocation12], %s16037_s4, %s16037_s4, %s11782_s25  }
  0x23   :  { %s137_s10 = sshll.u32 %s11783_s30, 4  ;;  %s193_s8 = sshll.u32 %s16026_s16, 4  ;;  %s138_s10 = int_to_ptr.vmem [resolvable:$true] %s137_s10  ;;  %s194_s8 = int_to_ptr.hbm [resolvable:$true] %s193_s8 }
  0x24   :  { %143 = dma.hbm_to_vmem [thread:$0]  %s136_s28, 4096, %s138_s10, [#allocation15], %s16037_s4, %s16037_s4, %s11782_s25  }
  0x25   :  { %s11784_s0 = smov [#allocation17]   ;;  %s11785_s7 = smov [#allocation20]  }
  0x26   :  { %s165_s9 = sshll.u32 %s11784_s0, 4  ;;  %s195_s12 = sshll.u32 %s11785_s7, 4  ;;  %s166_s9 = int_to_ptr.vmem [resolvable:$true] %s165_s9  ;;  %s196_s12 = int_to_ptr.vmem [resolvable:$true] %s195_s12 }
  0x27   :  { %171 = dma.hbm_to_vmem [thread:$0]  %s164_s27, 4096, %s166_s9, [#allocation18], %s16037_s4, %s16037_s4, %s11782_s25  }
  0x28   :  { %s221_s6 = sshll.u32 %s16030_s20, 4  ;;  %s16134_s10 = sld [smem:[#allocation85_spill]]  ;;  %s222_s6 = int_to_ptr.hbm [resolvable:$true] %s221_s6 }
  0x29   :  { %201 = dma.hbm_to_vmem [thread:$0]  %s194_s8, 4096, %s196_s12, [#allocation21], %s16037_s4, %s16037_s4, %s11782_s25  }
  0x2a   :  { %s11786_s26 = smov [#allocation23]   ;;  %s11787_s27 = smov [#allocation2]  }
  0x2b   :  { %s223_s3 = sshll.u32 %s11786_s26, 4  ;;  %s46_s20 = sshll.u32 %s11787_s27, 4  ;;  %s224_s3 = int_to_ptr.vmem [resolvable:$true] %s223_s3  ;;  %s47_s20 = int_to_ptr.vmem [resolvable:$true] %s46_s20 }
  0x2c   :  { %229 = dma.hbm_to_vmem [thread:$0]  %s222_s6, 8192, %s224_s3, [#allocation24], %s16039_s2, %s16039_s2, %s11778_s5  }
  0x2d   :  { %s16135_s7 = sld [smem:[#allocation87_spill]]  ;;  %s11788_s8 = smov [#allocation7]  }
  0x2e   :  { %s44_s1 = sshll.u32 %s16134_s10, 4  ;;  %s72_s12 = sshll.u32 %s11788_s8, 4  ;;  %s45_s1 = int_to_ptr.hbm [resolvable:$true] %s44_s1  ;;  %s73_s12 = int_to_ptr.vmem [resolvable:$true] %s72_s12 }
  0x2f   :  { %52 = dma.hbm_to_vmem [thread:$0]  %s45_s1, 1024, %s47_s20, [#allocation3], %s16039_s2, %s16039_s2, %s11778_s5  }
  0x30   :  { %s16136_s28 = sld [smem:[#allocation89_spill]]  ;;  %s11789_s6 = smov 640  }
  0x31   :  { %s11790_s26 = smov 40   ;;  %s11791_s3 = smov [#allocation10]  }
  0x32   :  { %s98_s27 = sshll.u32 %s11791_s3, 4  ;;  %s16138_s1 = smov 128   ;;  %s99_s27 = int_to_ptr.vmem [resolvable:$true] %s98_s27 }
  0x33   :  { %s70_s29 = sshll.u32 %s16135_s7, 4  ;;  %s16137_s7 = sld [smem:[#allocation92_spill]]  ;;  %s71_s29 = int_to_ptr.hbm [resolvable:$true] %s70_s29 }
  0x34   :  { %78 = dma.hbm_to_vmem [thread:$0]  %s71_s29, 2560, %s73_s12, [#allocation6], %s11789_s6, %s11789_s6, %s11790_s26  }
  0x35   :  { %s16139_s30 = sld [smem:[#allocation95_spill]]  ;;  %s11793_s29 = smov [#allocation16]  }
  0x36   :  { %s96_s10 = sshll.u32 %s16136_s28, 4  ;;  %s11792_s28 = smov [#allocation13]   ;;  %s97_s10 = int_to_ptr.hbm [resolvable:$true] %s96_s10 }
  0x37   :  { %104 = dma.hbm_to_vmem [thread:$0]  %s97_s10, 10240, %s99_s27, [#allocation9], %s16138_s1, %s16138_s1, %s11782_s25  }
  0x38   :  { %s127_s2 = sshll.u32 %s11792_s28, 4  ;;  %s153_s12 = sshll.u32 %s11793_s29, 4  ;;  %s128_s2 = int_to_ptr.vmem [resolvable:$true] %s127_s2  ;;  %s154_s12 = int_to_ptr.vmem [resolvable:$true] %s153_s12 }
  0x39   :  { %s125_s4 = sshll.u32 %s16137_s7, 4  ;;  %s178_s3 = sshll.u32 %s16024_s14, 4  ;;  %s126_s4 = int_to_ptr.hbm [resolvable:$true] %s125_s4  ;;  %s179_s3 = int_to_ptr.hbm [resolvable:$true] %s178_s3 }
  0x3a   :  { %130 = dma.hbm_to_vmem [thread:$0]  %s126_s4, 32, %s128_s2, [#allocation12]  }
  0x3b   :  { %s151_s16 = sshll.u32 %s16139_s30, 4  ;;  %s209_s27 = sshll.u32 %s16028_s18, 4  ;;  %s152_s16 = int_to_ptr.hbm [resolvable:$true] %s151_s16  ;;  %s210_s27 = int_to_ptr.hbm [resolvable:$true] %s209_s27 }
  0x3c   :  { %156 = dma.hbm_to_vmem [thread:$0]  %s152_s16, 32, %s154_s12, [#allocation15]  }
  0x3d   :  { %s11794_s9 = smov [#allocation19]   ;;  %s11795_s2 = smov [#allocation22]  }
  0x3e   :  { %s180_s7 = sshll.u32 %s11794_s9, 4  ;;  %s211_s4 = sshll.u32 %s11795_s2, 4  ;;  %s181_s7 = int_to_ptr.vmem [resolvable:$true] %s180_s7  ;;  %s212_s4 = int_to_ptr.vmem [resolvable:$true] %s211_s4 }
  0x3f   :  { %186 = dma.hbm_to_vmem [thread:$0]  %s179_s3, 4096, %s181_s7, [#allocation18], %s16138_s1, %s16138_s1, %s11782_s25  }
  0x40   :  { %s236_s14 = sshll.u32 %s16032_s22, 4  ;;  %s11796_s30 = smov [#allocation25]   ;;  %s237_s14 = int_to_ptr.hbm [resolvable:$true] %s236_s14 }
  0x41   :  { %214 = dma.hbm_to_vmem [thread:$0]  %s210_s27, 32, %s212_s4, [#allocation21]  }
  0x42   :  { %s238_s16 = sshll.u32 %s11796_s30, 4  ;;  %s239_s16 = int_to_ptr.vmem [resolvable:$true] %s238_s16 }
  0x43   :  { %244 = dma.hbm_to_vmem [thread:$0]  %s237_s14, 8192, %s239_s16, [#allocation24], %s16138_s1, %s16138_s1, %s11782_s25  }
  0x44   :  { %11758 = dma.done.wait [#allocation3], 1024  }
  0x45   :  { %11759 = vsyncadd [#allocation3], 4294966272 }
  0x46   :  { %11760 = dma.done.wait [#allocation6], 4608  }
  0x47   :  { %11761 = vsyncadd [#allocation6], 4294962688 }
  0x48   :  { %11762 = dma.done.wait [#allocation9], 12288  }
  0x49   :  { %11763 = vsyncadd [#allocation9], 4294955008 }
  0x4a   :  { %11764 = dma.done.wait [#allocation12], 4128  }
  0x4b   :  { %11765 = vsyncadd [#allocation12], 4294963168 }
  0x4c   :  { %11766 = dma.done.wait [#allocation15], 4128  }
  0x4d   :  { %11767 = vsyncadd [#allocation15], 4294963168 }
  0x4e   :  { %11768 = dma.done.wait [#allocation18], 8192  }
  0x4f   :  { %11769 = vsyncadd [#allocation18], 4294959104 }
  0x50   :  { %11770 = dma.done.wait [#allocation21], 4128  }
  0x51   :  { %11771 = vsyncadd [#allocation21], 4294963168 }
  0x52   :  { %11772 = dma.done.wait [#allocation24], 16384  }
  0x53   :  { %11773 = vsyncadd [#allocation24], 4294950912  ;;  %v9119_v0 = vld [vmem:[#allocation10 + $0x70] sm:$0xf]  ;;  %v10676_v1 = vld [vmem:[#allocation10 + $0x74] sm:$0xf0] }
  0x54   :  { %v9183_v2 = vld [vmem:[#allocation10 + $0xf0] sm:$0xf]  ;;  %v9120_v3 = vor.u32 %v10676_v1, %v9119_v0  ;;  %v10692_v4 = vld [vmem:[#allocation10 + $0xf4] sm:$0xf0]  ;;  %v9111_v11 = vld [vmem:[#allocation10 + $0x60] sm:$0xf] }
  0x55   :  { %v9247_v5 = vld [vmem:[#allocation10 + $0x170] sm:$0xf]  ;;  %v10708_v6 = vld [vmem:[#allocation10 + $0x174] sm:$0xf0]  ;;  %v9184_v7 = vor.u32 %v10692_v4, %v9183_v2  ;;  %v10674_v13 = vld [vmem:[#allocation10 + $0x64] sm:$0xf0] }
  0x56   :  { %v9248_v8 = vor.u32 %v10708_v6, %v9247_v5  ;;  %v9311_v9 = vld [vmem:[#allocation10 + $0x1f0] sm:$0xf]  ;;  %v10724_v10 = vld [vmem:[#allocation10 + $0x1f4] sm:$0xf0]  ;;  %1049 = vmatpush.bf16.msra.mxu0 %v9120_v3  ;;  %v9175_v14 = vld [vmem:[#allocation10 + $0xe0] sm:$0xf]  ;;  %v9112_v16 = vor.u32 %v10674_v13, %v9111_v11 }
  0x57   :  { %v9312_v12 = vor.u32 %v10724_v10, %v9311_v9  ;;  %v10690_v15 = vld [vmem:[#allocation10 + $0xe4] sm:$0xf0]  ;;  %1068 = vmatpush.bf16.msra.mxu1 %v9184_v7  ;;  %v9239_v18 = vld [vmem:[#allocation10 + $0x160] sm:$0xf]  ;;  %v9103_v23 = vld [vmem:[#allocation10 + $0x50] sm:$0xf] }
  0x58   :  { %1087 = vmatpush.bf16.msra.mxu2 %v9248_v8  ;;  %v9176_v17 = vor.u32 %v10690_v15, %v9175_v14  ;;  %v10706_v19 = vld [vmem:[#allocation10 + $0x164] sm:$0xf0]  ;;  %v9303_v20 = vld [vmem:[#allocation10 + $0x1e0] sm:$0xf]  ;;  %v10672_v24 = vld [vmem:[#allocation10 + $0x54] sm:$0xf0] }
  0x59   :  { %1106 = vmatpush.bf16.msra.mxu3 %v9312_v12  ;;  %v9240_v21 = vor.u32 %v10706_v19, %v9239_v18  ;;  %v10722_v22 = vld [vmem:[#allocation10 + $0x1e4] sm:$0xf0]  ;;  %v9167_v26 = vld [vmem:[#allocation10 + $0xd0] sm:$0xf]  ;;  %v10688_v27 = vld [vmem:[#allocation10 + $0xd4] sm:$0xf0]  ;;  %v9104_v29 = vor.u32 %v10672_v24, %v9103_v23 }
  0x5a   :  { %v9304_v25 = vor.u32 %v10722_v22, %v9303_v20  ;;  %v9231_v28 = vld [vmem:[#allocation10 + $0x150] sm:$0xf]  ;;  %1050 = vmatpush.bf16.msra.mxu0 %v9112_v16  ;;  %v10704_v30 = vld [vmem:[#allocation10 + $0x154] sm:$0xf0]  ;;  %v9168_v33 = vor.u32 %v10688_v27, %v9167_v26  ;;  %v9095_v35 = vld [vmem:[#allocation10 + $0x40] sm:$0xf] }
  0x5b   :  { %v9295_v31 = vld [vmem:[#allocation10 + $0x1d0] sm:$0xf]  ;;  %v10720_v32 = vld [vmem:[#allocation10 + $0x1d4] sm:$0xf0]  ;;  %1069 = vmatpush.bf16.msra.mxu1 %v9176_v17  ;;  %v9232_v34 = vor.u32 %v10704_v30, %v9231_v28  ;;  %v10670_v36 = vld [vmem:[#allocation10 + $0x44] sm:$0xf0] }
  0x5c   :  { %1088 = vmatpush.bf16.msra.mxu2 %v9240_v21  ;;  %v9159_v37 = vld [vmem:[#allocation10 + $0xc0] sm:$0xf]  ;;  %v9296_v38 = vor.u32 %v10720_v32, %v9295_v31  ;;  %v10686_v39 = vld [vmem:[#allocation10 + $0xc4] sm:$0xf0]  ;;  %v9096_v44 = vor.u32 %v10670_v36, %v9095_v35  ;;  %v9087_v47 = vld [vmem:[#allocation10 + $0x30] sm:$0xf] }
  0x5d   :  { %1107 = vmatpush.bf16.msra.mxu3 %v9304_v25  ;;  %v9223_v40 = vld [vmem:[#allocation10 + $0x140] sm:$0xf]  ;;  %v10702_v41 = vld [vmem:[#allocation10 + $0x144] sm:$0xf0]  ;;  %v9160_v45 = vor.u32 %v10686_v39, %v9159_v37  ;;  %v10668_v48 = vld [vmem:[#allocation10 + $0x34] sm:$0xf0] }
  0x5e   :  { %v9287_v42 = vld [vmem:[#allocation10 + $0x1c0] sm:$0xf]  ;;  %v10718_v43 = vld [vmem:[#allocation10 + $0x1c4] sm:$0xf0]  ;;  %1051 = vmatpush.bf16.msra.mxu0 %v9104_v29  ;;  %v9224_v46 = vor.u32 %v10702_v41, %v9223_v40  ;;  %v9151_v49 = vld [vmem:[#allocation10 + $0xb0] sm:$0xf]  ;;  %v9088_v56 = vor.u32 %v10668_v48, %v9087_v47 }
  0x5f   :  { %1070 = vmatpush.bf16.msra.mxu1 %v9168_v33  ;;  %v9288_v50 = vor.u32 %v10718_v43, %v9287_v42  ;;  %v10684_v51 = vld [vmem:[#allocation10 + $0xb4] sm:$0xf0]  ;;  %v9215_v52 = vld [vmem:[#allocation10 + $0x130] sm:$0xf]  ;;  %v9079_v59 = vld [vmem:[#allocation10 + $0x20] sm:$0xf] }
  0x60   :  { %1089 = vmatpush.bf16.msra.mxu2 %v9232_v34  ;;  %v10700_v53 = vld [vmem:[#allocation10 + $0x134] sm:$0xf0]  ;;  %v9279_v54 = vld [vmem:[#allocation10 + $0x1b0] sm:$0xf]  ;;  %v9152_v57 = vor.u32 %v10684_v51, %v9151_v49  ;;  %v10666_v60 = vld [vmem:[#allocation10 + $0x24] sm:$0xf0] }
  0x61   :  { %1108 = vmatpush.bf16.msra.mxu3 %v9296_v38  ;;  %v10716_v55 = vld [vmem:[#allocation10 + $0x1b4] sm:$0xf0]  ;;  %v9216_v58 = vor.u32 %v10700_v53, %v9215_v52  ;;  %v9143_v61 = vld [vmem:[#allocation10 + $0xa0] sm:$0xf]  ;;  %v10682_v63 = vld [vmem:[#allocation10 + $0xa4] sm:$0xf0]  ;;  %v9080_v4 = vor.u32 %v10666_v60, %v9079_v59 }
  0x62   :  { %1052 = vmatpush.bf16.msra.mxu0 %v9096_v44  ;;  %v9280_v62 = vor.u32 %v10716_v55, %v9279_v54  ;;  %v9207_v0 = vld [vmem:[#allocation10 + $0x120] sm:$0xf]  ;;  %v10698_v1 = vld [vmem:[#allocation10 + $0x124] sm:$0xf0]  ;;  %v9144_v5 = vor.u32 %v10682_v63, %v9143_v61  ;;  %v9071_v7 = vld [vmem:[#allocation10 + $0x10] sm:$0xf] }
  0x63   :  { %1071 = vmatpush.bf16.msra.mxu1 %v9160_v45  ;;  %v9271_v2 = vld [vmem:[#allocation10 + $0x1a0] sm:$0xf]  ;;  %v10714_v3 = vld [vmem:[#allocation10 + $0x1a4] sm:$0xf0]  ;;  %v9208_v6 = vor.u32 %v10698_v1, %v9207_v0  ;;  %v10664_v8 = vld [vmem:[#allocation10 + $0x14] sm:$0xf0] }
  0x64   :  { %1090 = vmatpush.bf16.msra.mxu2 %v9224_v46  ;;  %v9135_v9 = vld [vmem:[#allocation10 + $0x90] sm:$0xf]  ;;  %v9272_v10 = vor.u32 %v10714_v3, %v9271_v2  ;;  %v10680_v11 = vld [vmem:[#allocation10 + $0x94] sm:$0xf0]  ;;  %v9063_v16 = vld [vmem:[#allocation10] sm:$0xf]  ;;  %v9072_v17 = vor.u32 %v10664_v8, %v9071_v7 }
  0x65   :  { %1109 = vmatpush.bf16.msra.mxu3 %v9288_v50  ;;  %v9199_v12 = vld [vmem:[#allocation10 + $0x110] sm:$0xf]  ;;  %v10696_v13 = vld [vmem:[#allocation10 + $0x114] sm:$0xf0]  ;;  %v10662_v18 = vld [vmem:[#allocation10 + $0x4] sm:$0xf0]  ;;  %v9136_v21 = vor.u32 %v10680_v11, %v9135_v9 }
  0x66   :  { %1053 = vmatpush.bf16.msra.mxu0 %v9088_v56  ;;  %v9263_v14 = vld [vmem:[#allocation10 + $0x190] sm:$0xf]  ;;  %v10712_v15 = vld [vmem:[#allocation10 + $0x194] sm:$0xf0]  ;;  %v9127_v19 = vld [vmem:[#allocation10 + $0x80] sm:$0xf]  ;;  %v9200_v22 = vor.u32 %v10696_v13, %v9199_v12  ;;  %v9064_v34 = vor.u32 %v10662_v18, %v9063_v16 }
  0x67   :  { %1072 = vmatpush.bf16.msra.mxu1 %v9152_v57  ;;  %v10678_v20 = vld [vmem:[#allocation10 + $0x84] sm:$0xf0]  ;;  %v9191_v23 = vld [vmem:[#allocation10 + $0x100] sm:$0xf]  ;;  %v9264_v26 = vor.u32 %v10712_v15, %v9263_v14  ;;  %v342_v31 = vld [vmem:[#allocation7 + $0x30] sm:$0xff]  ;;  %s16140_s25 = sld [smem:[#allocation90_spill]] }
  0x68   :  { %1091 = vmatpush.bf16.msra.mxu2 %v9216_v58  ;;  %v10694_v24 = vld [vmem:[#allocation10 + $0x104] sm:$0xf0]  ;;  %v9255_v25 = vld [vmem:[#allocation10 + $0x180] sm:$0xf]  ;;  %v9375_v32 = vld [vmem:[#allocation10 + $0x270] sm:$0xf]  ;;  %v9128_v38 = vor.u32 %v10678_v20, %v9127_v19 }
  0x69   :  { %1110 = vmatpush.bf16.msra.mxu3 %v9280_v62  ;;  %v10710_v27 = vld [vmem:[#allocation10 + $0x184] sm:$0xf0]  ;;  %v336_v28 = vld [vmem:[#allocation7] sm:$0xff]  ;;  %v10740_v33 = vld [vmem:[#allocation10 + $0x274] sm:$0xf0]  ;;  %v9192_v39 = vor.u32 %v10694_v24, %v9191_v23  ;;  %vm16090_vm0 = vcmask 261120  }
  0x6a   :  { %1054 = vmatpush.bf16.msra.mxu0 %v9080_v4  ;;  %v341_v29 = vld [vmem:[#allocation7 + $0x28] sm:$0xff]  ;;  %v338_v35 = vld [vmem:[#allocation7 + $0x10] sm:$0xff]  ;;  %v9121_v37 = vld [vmem:[#allocation10 + $0x78] sm:$0xf0]  ;;  %v9256_v43 = vor.u32 %v10710_v27, %v9255_v25  ;;  %v9376_v44 = vor.u32 %v10740_v33, %v9375_v32  ;;  %s11797_s1 = smov 32   ;;  %s11798_s28 = smov 64  }
  0x6b   :  { %1073 = vmatpush.bf16.msra.mxu1 %v9144_v5  ;;  %v337_v30 = vld [vmem:[#allocation7 + $0x8] sm:$0xff]  ;;  %v10675_v36 = vld [vmem:[#allocation10 + $0x74] sm:$0xf]  ;;  %v343_v40 = vld [vmem:[#allocation7 + $0x38] sm:$0xff]  ;;  %v12020_v48 = vpack.c.bf16 %v341_v29, %v336_v28  ;;  %s11799_s29 = smov 96   ;;  %s16307_s26 = sld [smem:[#allocation94_spill]] }
  0x6c   :  { %1092 = vmatpush.bf16.msra.mxu2 %v9208_v6  ;;  %v10691_v41 = vld [vmem:[#allocation10 + $0xf4] sm:$0xf]  ;;  %v9185_v42 = vld [vmem:[#allocation10 + $0xf8] sm:$0xf0]  ;;  %v344_v46 = vld [vmem:[#allocation7 + $0x40] sm:$0xff]  ;;  %v9124_v49 = vor.u32 %v10675_v36, %v9121_v37  ;;  %v12022_v53 = vpack.c.bf16 %v342_v31, %v337_v30  ;;  %v12024_v54 = vpack.c.bf16 %v343_v40, %v338_v35  ;;  %s11803_s3 = smov 112  }
  0x6d   :  { %1111 = vmatpush.bf16.msra.mxu3 %v9272_v10  ;;  %v339_v45 = vld [vmem:[#allocation7 + $0x18] sm:$0xff]  ;;  %v10707_v47 = vld [vmem:[#allocation10 + $0x174] sm:$0xf]  ;;  %v9367_v51 = vld [vmem:[#allocation10 + $0x260] sm:$0xf]  ;;  %v9188_v57 = vor.u32 %v10691_v41, %v9185_v42  ;;  %s11804_s0 = smov 48  }
  0x6e   :  { %1055 = vmatpush.bf16.msra.mxu0 %v9072_v17  ;;  %v9249_v50 = vld [vmem:[#allocation10 + $0x178] sm:$0xf0]  ;;  %v10738_v52 = vld [vmem:[#allocation10 + $0x264] sm:$0xf0]  ;;  %v10673_v55 = vld [vmem:[#allocation10 + $0x64] sm:$0xf]  ;;  %v12026_v58 = vpack.c.bf16 %v344_v46, %v339_v45 }
  0x6f   :  { %1074 = vmatpush.bf16.msra.mxu1 %v9136_v21  ;;  %v9113_v56 = vld [vmem:[#allocation10 + $0x68] sm:$0xf0]  ;;  %v9252_v59 = vor.u32 %v10707_v47, %v9249_v50  ;;  %v9368_v60 = vor.u32 %v10738_v52, %v9367_v51  ;;  %v10689_v61 = vld [vmem:[#allocation10 + $0xe4] sm:$0xf]  ;;  %v9359_v2 = vld [vmem:[#allocation10 + $0x250] sm:$0xf] }
  0x70   :  { %1093 = vmatpush.bf16.msra.mxu2 %v9200_v22  ;;  %v9177_v62 = vld [vmem:[#allocation10 + $0xe8] sm:$0xf0]  ;;  %v10705_v63 = vld [vmem:[#allocation10 + $0x164] sm:$0xf]  ;;  %v9116_v0 = vor.u32 %v10673_v55, %v9113_v56  ;;  %v10736_v3 = vld [vmem:[#allocation10 + $0x254] sm:$0xf0] }
  0x71   :  { %1112 = vmatpush.bf16.msra.mxu3 %v9264_v26  ;;  %v9241_v1 = vld [vmem:[#allocation10 + $0x168] sm:$0xf0]  ;;  %v10671_v4 = vld [vmem:[#allocation10 + $0x54] sm:$0xf]  ;;  %v9105_v5 = vld [vmem:[#allocation10 + $0x58] sm:$0xf0]  ;;  %v9180_v6 = vor.u32 %v10689_v61, %v9177_v62  ;;  %v9360_v8 = vor.u32 %v10736_v3, %v9359_v2 }
  0x72   :  { %1056 = vmatpush.bf16.msra.mxu0 %v9064_v34  ;;  %v9244_v7 = vor.u32 %v10705_v63, %v9241_v1  ;;  %v10687_v9 = vld [vmem:[#allocation10 + $0xd4] sm:$0xf]  ;;  %v9169_v10 = vld [vmem:[#allocation10 + $0xd8] sm:$0xf0]  ;;  %v9108_v12 = vor.u32 %v10671_v4, %v9105_v5  ;;  %v9351_v14 = vld [vmem:[#allocation10 + $0x240] sm:$0xf] }
  0x73   :  { %1075 = vmatpush.bf16.msra.mxu1 %v9128_v38  ;;  %v10703_v11 = vld [vmem:[#allocation10 + $0x154] sm:$0xf]  ;;  %v9233_v13 = vld [vmem:[#allocation10 + $0x158] sm:$0xf0]  ;;  %v10734_v15 = vld [vmem:[#allocation10 + $0x244] sm:$0xf0]  ;;  %v9172_v18 = vor.u32 %v10687_v9, %v9169_v10 }
  0x74   :  { %1094 = vmatpush.bf16.msra.mxu2 %v9192_v39  ;;  %v10669_v16 = vld [vmem:[#allocation10 + $0x44] sm:$0xf]  ;;  %v9097_v17 = vld [vmem:[#allocation10 + $0x48] sm:$0xf0]  ;;  %v9236_v22 = vor.u32 %v10703_v11, %v9233_v13  ;;  %v9352_v23 = vor.u32 %v10734_v15, %v9351_v14  ;;  %v346_v25 = vld [vmem:[#allocation7 + $0x50] sm:$0xff]  ;;  %s11805_s10 = smov 80  }
  0x75   :  { %1113 = vmatpush.bf16.msra.mxu3 %v9256_v43  ;;  %1057 = vmatmul.bf16.vlgmr.msra.gmra.mxu0 %v12020_v48  ;;  %v10685_v19 = vld [vmem:[#allocation10 + $0xc4] sm:$0xf]  ;;  %v9161_v20 = vld [vmem:[#allocation10 + $0xc8] sm:$0xf0]  ;;  %v351_v26 = vld [vmem:[#allocation7 + $0x78] sm:$0xff]  ;;  %v9100_v27 = vor.u32 %v10669_v16, %v9097_v17  ;;  %s16460_s22 = sld [smem:[#allocation96_spill]] }
  0x76   :  { %1125 = vmatpush.bf16.msrb.mxu0 %v9376_v44  ;;  %1076 = vmatmul.bf16.vlgmr.msra.gmra.mxu1 %v12022_v53  ;;  %v10701_v21 = vld [vmem:[#allocation10 + $0x144] sm:$0xf]  ;;  %v9225_v24 = vld [vmem:[#allocation10 + $0x148] sm:$0xf0]  ;;  %v347_v28 = vld [vmem:[#allocation7 + $0x58] sm:$0xff]  ;;  %v9164_v35 = vor.u32 %v10685_v19, %v9161_v20  ;;  %v12032_v44 = vpack.c.bf16 %v351_v26, %v346_v25  ;;  %s16462_s6 = smov 256  }
  0x77   :  { %1144 = vmatpush.bf16.msrb.mxu1 %v9124_v49  ;;  %1095 = vmatmul.bf16.vlgmr.msra.gmra.mxu2 %v12024_v54  ;;  %v352_v29 = vld [vmem:[#allocation7 + $0x80] sm:$0xff]  ;;  %v9343_v30 = vld [vmem:[#allocation10 + $0x230] sm:$0xf]  ;;  %v10732_v31 = vld [vmem:[#allocation10 + $0x234] sm:$0xf0]  ;;  %v9228_v39 = vor.u32 %v10701_v21, %v9225_v24 }
  0x78   :  { %1163 = vmatpush.bf16.msrb.mxu2 %v9188_v57  ;;  %1114 = vmatmul.bf16.vlgmr.msra.gmra.mxu3 %v12026_v58  ;;  %v348_v32 = vld [vmem:[#allocation7 + $0x60] sm:$0xff]  ;;  %v10667_v33 = vld [vmem:[#allocation10 + $0x34] sm:$0xf]  ;;  %v9089_v34 = vld [vmem:[#allocation10 + $0x38] sm:$0xf0]  ;;  %v9344_v40 = vor.u32 %v10732_v31, %v9343_v30  ;;  %v12034_v50 = vpack.c.bf16 %v352_v29, %v347_v28 }
  0x79   :  { %1182 = vmatpush.bf16.msrb.mxu3 %v9252_v59  ;;  %v353_v36 = vld [vmem:[#allocation7 + $0x88] sm:$0xff]  ;;  %v10683_v37 = vld [vmem:[#allocation10 + $0xb4] sm:$0xf]  ;;  %v9153_v38 = vld [vmem:[#allocation10 + $0xb8] sm:$0xf0]  ;;  %v9092_v45 = vor.u32 %v10667_v33, %v9089_v34 }
  0x7a   :  { %1126 = vmatpush.bf16.msrb.mxu0 %v9368_v60  ;;  %v349_v41 = vld [vmem:[#allocation7 + $0x68] sm:$0xff]  ;;  %v354_v42 = vld [vmem:[#allocation7 + $0x90] sm:$0xff]  ;;  %v9217_v46 = vld [vmem:[#allocation10 + $0x138] sm:$0xf0]  ;;  %v12036_v51 = vpack.c.bf16 %v353_v36, %v348_v32  ;;  %v9156_v56 = vor.u32 %v10683_v37, %v9153_v38 }
  0x7b   :  { %1145 = vmatpush.bf16.msrb.mxu1 %v9116_v0  ;;  %v10699_v43 = vld [vmem:[#allocation10 + $0x134] sm:$0xf]  ;;  %v9335_v47 = vld [vmem:[#allocation10 + $0x220] sm:$0xf]  ;;  %v10730_v49 = vld [vmem:[#allocation10 + $0x224] sm:$0xf0]  ;;  %v12038_v57 = vpack.c.bf16 %v354_v42, %v349_v41 }
  0x7c   :  { %1164 = vmatpush.bf16.msrb.mxu2 %v9180_v6  ;;  %v10665_v52 = vld [vmem:[#allocation10 + $0x24] sm:$0xf]  ;;  %v9081_v55 = vld [vmem:[#allocation10 + $0x28] sm:$0xf0]  ;;  %v9220_v59 = vor.u32 %v10699_v43, %v9217_v46  ;;  %v9336_v60 = vor.u32 %v10730_v49, %v9335_v47  ;;  %v9327_v2 = vld [vmem:[#allocation10 + $0x210] sm:$0xf] }
  0x7d   :  { %1183 = vmatpush.bf16.msrb.mxu3 %v9244_v7  ;;  %v10681_v61 = vld [vmem:[#allocation10 + $0xa4] sm:$0xf]  ;;  %v9145_v62 = vld [vmem:[#allocation10 + $0xa8] sm:$0xf0]  ;;  %v9084_v0 = vor.u32 %v10665_v52, %v9081_v55  ;;  %v10728_v3 = vld [vmem:[#allocation10 + $0x214] sm:$0xf0] }
  0x7e   :  { %1127 = vmatpush.bf16.msrb.mxu0 %v9360_v8  ;;  %v10697_v63 = vld [vmem:[#allocation10 + $0x124] sm:$0xf]  ;;  %v9209_v1 = vld [vmem:[#allocation10 + $0x128] sm:$0xf0]  ;;  %v10663_v4 = vld [vmem:[#allocation10 + $0x14] sm:$0xf]  ;;  %v9148_v6 = vor.u32 %v10681_v61, %v9145_v62  ;;  %v9328_v9 = vor.u32 %v10728_v3, %v9327_v2 }
  0x7f   :  { %1146 = vmatpush.bf16.msrb.mxu1 %v9108_v12  ;;  %v9073_v5 = vld [vmem:[#allocation10 + $0x18] sm:$0xf0]  ;;  %v10679_v7 = vld [vmem:[#allocation10 + $0x94] sm:$0xf]  ;;  %v9212_v8 = vor.u32 %v10697_v63, %v9209_v1  ;;  %v9319_v14 = vld [vmem:[#allocation10 + $0x200] sm:$0xf] }
  0x80   :  { %1165 = vmatpush.bf16.msrb.mxu2 %v9172_v18  ;;  %v9137_v10 = vld [vmem:[#allocation10 + $0x98] sm:$0xf0]  ;;  %v10695_v11 = vld [vmem:[#allocation10 + $0x114] sm:$0xf]  ;;  %v9076_v13 = vor.u32 %v10663_v4, %v9073_v5  ;;  %v10726_v15 = vld [vmem:[#allocation10 + $0x204] sm:$0xf0] }
  0x81   :  { %1184 = vmatpush.bf16.msrb.mxu3 %v9236_v22  ;;  %v9201_v12 = vld [vmem:[#allocation10 + $0x118] sm:$0xf0]  ;;  %v10661_v16 = vld [vmem:[#allocation10 + $0x4] sm:$0xf]  ;;  %v9065_v17 = vld [vmem:[#allocation10 + $0x8] sm:$0xf0]  ;;  %v9140_v20 = vor.u32 %v10679_v7, %v9137_v10  ;;  %v9320_v24 = vor.u32 %v10726_v15, %v9319_v14 }
  0x82   :  { %1128 = vmatpush.bf16.msrb.mxu0 %v9352_v23  ;;  %v10723_v18 = vld [vmem:[#allocation10 + $0x1f4] sm:$0xf]  ;;  %v9313_v19 = vld [vmem:[#allocation10 + $0x1f8] sm:$0xf0]  ;;  %v9204_v23 = vor.u32 %v10695_v11, %v9201_v12  ;;  %v10677_v25 = vld [vmem:[#allocation10 + $0x84] sm:$0xf] }
  0x83   :  { %1147 = vmatpush.bf16.msrb.mxu1 %v9100_v27  ;;  %v10739_v21 = vld [vmem:[#allocation10 + $0x274] sm:$0xf]  ;;  %v9377_v22 = vld [vmem:[#allocation10 + $0x278] sm:$0xf0]  ;;  %v9129_v26 = vld [vmem:[#allocation10 + $0x88] sm:$0xf0]  ;;  %v9068_v27 = vor.u32 %v10661_v16, %v9065_v17  ;;  %v9316_v30 = vor.u32 %v10723_v18, %v9313_v19 }
  0x84   :  { %1166 = vmatpush.bf16.msrb.mxu2 %v9164_v35  ;;  %v10693_v28 = vld [vmem:[#allocation10 + $0x104] sm:$0xf]  ;;  %v9193_v29 = vld [vmem:[#allocation10 + $0x108] sm:$0xf0]  ;;  %v9380_v33 = vor.u32 %v10739_v21, %v9377_v22  ;;  %v9132_v34 = vor.u32 %v10677_v25, %v9129_v26  ;;  %v10719_v43 = vld [vmem:[#allocation10 + $0x1d4] sm:$0xf] }
  0x85   :  { %1185 = vmatpush.bf16.msrb.mxu3 %v9228_v39  ;;  %1062 = vmatmul.bf16.gmra.mxu0 %v12032_v44  ;;  %v340_v31 = vld [vmem:[#allocation7 + $0x20] sm:$0xff]  ;;  %v345_v32 = vld [vmem:[#allocation7 + $0x48] sm:$0xff]  ;;  %v9196_v35 = vor.u32 %v10693_v28, %v9193_v29  ;;  %v10735_v46 = vld [vmem:[#allocation10 + $0x254] sm:$0xf] }
  0x86   :  { %1129 = vmatpush.bf16.msrb.mxu0 %v9344_v40  ;;  %1081 = vmatmul.bf16.gmra.mxu1 %v12034_v50  ;;  %v10721_v36 = vld [vmem:[#allocation10 + $0x1e4] sm:$0xf]  ;;  %v9305_v37 = vld [vmem:[#allocation10 + $0x1e8] sm:$0xf0]  ;;  %v12044_v38 = vpack.c.bf16 %v345_v32, %v340_v31  ;;  %v9361_v47 = vld [vmem:[#allocation10 + $0x258] sm:$0xf0] }
  0x87   :  { %1148 = vmatpush.bf16.msrb.mxu1 %v9092_v45  ;;  %1100 = vmatmul.bf16.gmra.mxu2 %v12036_v51  ;;  %v10737_v39 = vld [vmem:[#allocation10 + $0x264] sm:$0xf]  ;;  %v9369_v40 = vld [vmem:[#allocation10 + $0x268] sm:$0xf0]  ;;  %v9308_v41 = vor.u32 %v10721_v36, %v9305_v37  ;;  %v9297_v45 = vld [vmem:[#allocation10 + $0x1d8] sm:$0xf0]  ;;  %v9364_v52 = vor.u32 %v10735_v46, %v9361_v47 }
  0x88   :  { %1167 = vmatpush.bf16.msrb.mxu2 %v9156_v56  ;;  %1119 = vmatmul.bf16.gmra.mxu3 %v12038_v57  ;;  %v9372_v42 = vor.u32 %v10737_v39, %v9369_v40  ;;  %v9300_v49 = vor.u32 %v10719_v43, %v9297_v45  ;;  %v10717_v55 = vld [vmem:[#allocation10 + $0x1c4] sm:$0xf]  ;;  %v9289_v56 = vld [vmem:[#allocation10 + $0x1c8] sm:$0xf0]  ;;  %v10715_v63 = vld [vmem:[#allocation10 + $0x1b4] sm:$0xf] }
  0x89   :  { %1186 = vmatpush.bf16.msrb.mxu3 %v9220_v59  ;;  %v10733_v59 = vld [vmem:[#allocation10 + $0x244] sm:$0xf]  ;;  %v9292_v61 = vor.u32 %v10717_v55, %v9289_v56  ;;  %v10731_v1 = vld [vmem:[#allocation10 + $0x234] sm:$0xf]  ;;  %v9273_v5 = vld [vmem:[#allocation10 + $0x1a8] sm:$0xf0] }
  0x8a   :  { %1130 = vmatpush.bf16.msrb.mxu0 %v9336_v60  ;;  %v9353_v60 = vld [vmem:[#allocation10 + $0x248] sm:$0xf0]  ;;  %v350_v2 = vld [vmem:[#allocation7 + $0x70] sm:$0xff]  ;;  %v10713_v4 = vld [vmem:[#allocation10 + $0x1a4] sm:$0xf] }
  0x8b   :  { %1149 = vmatpush.bf16.msrb.mxu1 %v9084_v0  ;;  %v9356_v62 = vor.u32 %v10733_v59, %v9353_v60  ;;  %v9281_v0 = vld [vmem:[#allocation10 + $0x1b8] sm:$0xf0]  ;;  %v10729_v7 = vld [vmem:[#allocation10 + $0x224] sm:$0xf]  ;;  %v10711_v11 = vld [vmem:[#allocation10 + $0x194] sm:$0xf] }
  0x8c   :  { %1168 = vmatpush.bf16.msrb.mxu2 %v9148_v6  ;;  %v9265_v12 = vld [vmem:[#allocation10 + $0x198] sm:$0xf0]  ;;  %v10709_v17 = vld [vmem:[#allocation10 + $0x184] sm:$0xf]  ;;  %v9257_v18 = vld [vmem:[#allocation10 + $0x188] sm:$0xf0] }
  0x8d   :  { %1187 = vmatpush.bf16.msrb.mxu3 %v9212_v8  ;;  %v9337_v8 = vld [vmem:[#allocation10 + $0x228] sm:$0xf0]  ;;  %v9329_v14 = vld [vmem:[#allocation10 + $0x218] sm:$0xf0]  ;;  %v9268_v15 = vor.u32 %v10711_v11, %v9265_v12  ;;  %v10725_v19 = vld [vmem:[#allocation10 + $0x204] sm:$0xf]  ;;  %v9260_v21 = vor.u32 %v10709_v17, %v9257_v18 }
  0x8e   :  { %1131 = vmatpush.bf16.msrb.mxu0 %v9328_v9  ;;  %v9276_v9 = vor.u32 %v10713_v4, %v9273_v5  ;;  %v9340_v10 = vor.u32 %v10729_v7, %v9337_v8  ;;  %v9431_v26 = vld [vmem:[#allocation11 + $0x60] sm:$0xf]  ;;  %v10753_v28 = vld [vmem:[#allocation11 + $0x64] sm:$0xf]  ;;  %v10752_v31 = vld [vmem:[#allocation11 + $0x54] sm:$0xf0] }
  0x8f   :  { %1150 = vmatpush.bf16.msrb.mxu1 %v9076_v13  ;;  %v10727_v13 = vld [vmem:[#allocation10 + $0x214] sm:$0xf]  ;;  %v9415_v36 = vld [vmem:[#allocation11 + $0x40] sm:$0xf]  ;;  %v10750_v37 = vld [vmem:[#allocation11 + $0x44] sm:$0xf0] }
  0x90   :  { %1169 = vmatpush.bf16.msrb.mxu2 %v9140_v20  ;;  %v9332_v16 = vor.u32 %v10727_v13, %v9329_v14  ;;  %v9321_v20 = vld [vmem:[#allocation10 + $0x208] sm:$0xf0]  ;;  %v10751_v32 = vld [vmem:[#allocation11 + $0x54] sm:$0xf]  ;;  %v9416_v39 = vor.u32 %v10750_v37, %v9415_v36  ;;  %v10748_v43 = vld [vmem:[#allocation11 + $0x34] sm:$0xf0] }
  0x91   :  { %1188 = vmatpush.bf16.msrb.mxu3 %v9204_v23  ;;  %v9324_v22 = vor.u32 %v10725_v19, %v9321_v20  ;;  %v9417_v40 = vld [vmem:[#allocation11 + $0x48] sm:$0xf0]  ;;  %v10747_v45 = vld [vmem:[#allocation11 + $0x34] sm:$0xf]  ;;  %v9409_v47 = vld [vmem:[#allocation11 + $0x38] sm:$0xf0] }
  0x92   :  { %1132 = vmatpush.bf16.msrb.mxu0 %v9320_v24  ;;  %v9441_v24 = vld [vmem:[#allocation11 + $0x78] sm:$0xf0]  ;;  %v9399_v56 = vld [vmem:[#allocation11 + $0x20] sm:$0xf]  ;;  %v10746_v59 = vld [vmem:[#allocation11 + $0x24] sm:$0xf0] }
  0x93   :  { %1151 = vmatpush.bf16.msrb.mxu1 %v9068_v27  ;;  %v10754_v27 = vld [vmem:[#allocation11 + $0x64] sm:$0xf0]  ;;  %v9400_v60 = vor.u32 %v10746_v59, %v9399_v56  ;;  %v10741_v8 = vld [vmem:[#allocation11 + $0x4] sm:$0xf]  ;;  %v9503_v14 = vld [vmem:[#allocation11 + $0xf0] sm:$0xf] }
  0x94   :  { %1170 = vmatpush.bf16.msrb.mxu2 %v9132_v34  ;;  %v9432_v29 = vor.u32 %v10754_v27, %v9431_v26  ;;  %v9425_v34 = vld [vmem:[#allocation11 + $0x58] sm:$0xf0]  ;;  %v10742_v7 = vld [vmem:[#allocation11 + $0x4] sm:$0xf0]  ;;  %v10765_v37 = vld [vmem:[#allocation11 + $0xc4] sm:$0xf] }
  0x95   :  { %1189 = vmatpush.bf16.msrb.mxu3 %v9196_v35  ;;  %1133 = vmatmul.bf16.vlgmr.msrb.gmra.mxu0 %v12044_v38  ;;  %v12062_v35 = vor.u32 %v10751_v32, %v9425_v34  ;;  %v9505_v19 = vld [vmem:[#allocation11 + $0xf8] sm:$0xf0]  ;;  %v10766_v36 = vld [vmem:[#allocation11 + $0xc4] sm:$0xf0] }
  0x96   :  { %1201 = vmatpush.bf16.msra.mxu0 %v9316_v30  ;;  %1152 = vmatmul.bf16.vlgmr.msrb.gmra.mxu1 %v12020_v48  ;;  %v9345_v48 = vld [vmem:[#allocation10 + $0x238] sm:$0xf0] }
  0x97   :  { %1220 = vmatpush.bf16.msra.mxu1 %v9380_v33  ;;  %1171 = vmatmul.bf16.vlgmr.msrb.gmra.mxu2 %v12022_v53  ;;  %v355_v53 = vld [vmem:[#allocation7 + $0x98] sm:$0xff]  ;;  %v9348_v3 = vor.u32 %v10731_v1, %v9345_v48  ;;  %v10743_v48 = vld [vmem:[#allocation11 + $0x14] sm:$0xf] }
  0x98   :  { %1190 = vmatmul.bf16.vlgmr.msrb.gmra.mxu3 %v12024_v54  ;;  %v9284_v54 = vor.u32 %v10715_v63, %v9281_v0  ;;  %v643_v6 = vpack.c.bf16 %v355_v53, %v350_v2  ;;  %v9391_v0 = vld [vmem:[#allocation11 + $0x10] sm:$0xf]  ;;  %v10744_v1 = vld [vmem:[#allocation11 + $0x14] sm:$0xf0]  ;;  %v9393_v53 = vld [vmem:[#allocation11 + $0x18] sm:$0xf0] }
  0x99   :  { %v9392_v2 = vor.u32 %v10744_v1, %v9391_v0  ;;  %v9489_v32 = vld [vmem:[#allocation11 + $0xd8] sm:$0xf0] }
  0x9a   :  { %1202 = vmatpush.bf16.msra.mxu0 %v9308_v41 }
  0x9b   :  { %1221 = vmatpush.bf16.msra.mxu1 %v9372_v42  ;;  %v9407_v42 = vld [vmem:[#allocation11 + $0x30] sm:$0xf] }
  0x9c   :  { %v9408_v46 = vor.u32 %v10748_v43, %v9407_v42 }
  0x9e   :  { %1203 = vmatpush.bf16.msra.mxu0 %v9300_v49 }
  0x9f   :  { %1222 = vmatpush.bf16.msra.mxu1 %v9364_v52  ;;  %v12070_v52 = vor.u32 %v10747_v45, %v9409_v47  ;;  %v10764_v47 = vld [vmem:[#allocation11 + $0xb4] sm:$0xf0] }
  0xa2   :  { %1204 = vmatpush.bf16.msra.mxu0 %v9292_v61  ;;  %v10745_v61 = vld [vmem:[#allocation11 + $0x24] sm:$0xf] }
  0xa3   :  { %1223 = vmatpush.bf16.msra.mxu1 %v9356_v62  ;;  %v9401_v62 = vld [vmem:[#allocation11 + $0x28] sm:$0xf0] }
  0xa4   :  { %v12075_v63 = vor.u32 %v10745_v61, %v9401_v62  ;;  %v9473_v62 = vld [vmem:[#allocation11 + $0xb8] sm:$0xf0] }
  0xa5   :  { %1138 = vmatmul.bf16.gmra.mxu0 %v643_v6 }
  0xa6   :  { %1205 = vmatpush.bf16.msra.mxu0 %v9284_v54  ;;  %1157 = vmatmul.bf16.gmra.mxu1 %v12032_v44  ;;  %v9439_v44 = vld [vmem:[#allocation11 + $0x70] sm:$0xf] }
  0xa7   :  { %1224 = vmatpush.bf16.msra.mxu1 %v9348_v3  ;;  %1176 = vmatmul.bf16.gmra.mxu2 %v12034_v50  ;;  %v10756_v50 = vld [vmem:[#allocation11 + $0x74] sm:$0xf0]  ;;  %v12078_v3 = vor.u32 %v10743_v48, %v9393_v53  ;;  %v10762_v48 = vld [vmem:[#allocation11 + $0xa4] sm:$0xf0] }
  0xa8   :  { %1195 = vmatmul.bf16.gmra.mxu3 %v12036_v51  ;;  %v10755_v51 = vld [vmem:[#allocation11 + $0x74] sm:$0xf]  ;;  %v9440_v23 = vor.u32 %v10756_v50, %v9439_v44  ;;  %v9495_v44 = vld [vmem:[#allocation11 + $0xe0] sm:$0xf]  ;;  %v10770_v50 = vld [vmem:[#allocation11 + $0xe4] sm:$0xf0] }
  0xa9   :  { %v12056_v25 = vor.u32 %v10755_v51, %v9441_v24  ;;  %v10769_v51 = vld [vmem:[#allocation11 + $0xe4] sm:$0xf]  ;;  %v9497_v24 = vld [vmem:[#allocation11 + $0xe8] sm:$0xf0] }
  0xaa   :  { %1206 = vmatpush.bf16.msra.mxu0 %v9276_v9  ;;  %1449 = vmatpush.bf16.msra.mxu2 %v9440_v23  ;;  %v9496_v23 = vor.u32 %v10770_v50, %v9495_v44 }
  0xab   :  { %1225 = vmatpush.bf16.msra.mxu1 %v9340_v10  ;;  %v9385_v10 = vld [vmem:[#allocation11 + $0x8] sm:$0xf0] }
  0xac   :  { %v12085_v11 = vor.u32 %v10741_v8, %v9385_v10  ;;  %v10760_v10 = vld [vmem:[#allocation11 + $0x94] sm:$0xf0] }
  0xae   :  { %1207 = vmatpush.bf16.msra.mxu0 %v9268_v15  ;;  %1450 = vmatpush.bf16.msra.mxu2 %v9432_v29  ;;  %v10772_v15 = vld [vmem:[#allocation11 + $0xf4] sm:$0xf0]  ;;  %v9487_v29 = vld [vmem:[#allocation11 + $0xd0] sm:$0xf] }
  0xaf   :  { %1226 = vmatpush.bf16.msra.mxu1 %v9332_v16  ;;  %v10771_v16 = vld [vmem:[#allocation11 + $0xf4] sm:$0xf]  ;;  %v9504_v18 = vor.u32 %v10772_v15, %v9503_v14 }
  0xb0   :  { %v12095_v20 = vor.u32 %v10771_v16, %v9505_v19  ;;  %v10759_v14 = vld [vmem:[#allocation11 + $0x94] sm:$0xf] }
  0xb1   :  { %1468 = vmatpush.bf16.msra.mxu3 %v9504_v18 }
  0xb2   :  { %1208 = vmatpush.bf16.msra.mxu0 %v9260_v21  ;;  %v12101_v21 = vld [vmem:[%s16140_s25] sm:$0x3] }
  0xb3   :  { %1227 = vmatpush.bf16.msra.mxu1 %v9324_v22  ;;  %v12108_v26 = vperm.slane %v12101_v21, 0 }
  0xb5   :  { %1209 = vmatmul.bf16.vlgmr.msra.gmra.mxu0 %v12026_v58  ;;  %v9433_v58 = vld [vmem:[#allocation11 + $0x68] sm:$0xf0]  ;;  %1469 = vmatpush.bf16.msra.mxu3 %v9496_v23  ;;  %v10758_v23 = vld [vmem:[#allocation11 + $0x84] sm:$0xf0] }
  0xb6   :  { %1228 = vmatmul.bf16.vlgmr.msra.gmra.mxu1 %v12044_v38  ;;  %1487 = vmatpush.bf16.msrb.mxu0 %v12056_v25  ;;  %v12059_v30 = vor.u32 %v10753_v28, %v9433_v58  ;;  %v10749_v38 = vld [vmem:[#allocation11 + $0x44] sm:$0xf]  ;;  %v10768_v58 = vld [vmem:[#allocation11 + $0xd4] sm:$0xf0] }
  0xb7   :  { %v12065_v41 = vor.u32 %v10749_v38, %v9417_v40  ;;  %1506 = vmatpush.bf16.msrb.mxu1 %v12095_v20  ;;  %v9481_v40 = vld [vmem:[#allocation11 + $0xc8] sm:$0xf0] }
  0xb8   :  { %v12124_v43 = vor.u32 %v10765_v37, %v9481_v40  ;;  %v646_v40 = vperm.slane %v12101_v21, 1 }
  0xba   :  { %1488 = vmatpush.bf16.msrb.mxu0 %v12059_v30 }
  0xbe   :  { %1489 = vmatpush.bf16.msrb.mxu0 %v12062_v35 }
  0xc2   :  { %1490 = vmatpush.bf16.msrb.mxu0 %v12065_v41 }
  0xc5   :  { %1214 = vmatmul.bf16.gmra.mxu0 %v12038_v57  ;;  %v9423_v57 = vld [vmem:[#allocation11 + $0x50] sm:$0xf] }
  0xc6   :  { %1233 = vmatmul.bf16.gmra.mxu1 %v643_v6  ;;  %v9424_v33 = vor.u32 %v10752_v31, %v9423_v57  ;;  %1491 = vmatpush.bf16.msrb.mxu0 %v12070_v52  ;;  %v9383_v6 = vld [vmem:[#allocation11] sm:$0xf]  ;;  %v9488_v31 = vor.u32 %v10768_v58, %v9487_v29 }
  0xc7   :  { %v9384_v9 = vor.u32 %v10742_v7, %v9383_v6 }
  0xc8   :  { %1451 = vmatpush.bf16.msra.mxu2 %v9424_v33  ;;  %1470 = vmatpush.bf16.msra.mxu3 %v9488_v31 }
  0xca   :  { %1492 = vmatpush.bf16.msrb.mxu0 %v12075_v63 }
  0xcc   :  { %1452 = vmatpush.bf16.msra.mxu2 %v9416_v39 }
  0xce   :  { %1493 = vmatpush.bf16.msrb.mxu0 %v12078_v3 }
  0xd0   :  { %1453 = vmatpush.bf16.msra.mxu2 %v9408_v46  ;;  %v9471_v46 = vld [vmem:[#allocation11 + $0xb0] sm:$0xf] }
  0xd1   :  { %v9472_v61 = vor.u32 %v10764_v47, %v9471_v46 }
  0xd2   :  { %1494 = vmatpush.bf16.msrb.mxu0 %v12085_v11 }
  0xd4   :  { %1454 = vmatpush.bf16.msra.mxu2 %v9400_v60 }
  0xd8   :  { %1455 = vmatpush.bf16.msra.mxu2 %v9392_v2  ;;  %v10761_v2 = vld [vmem:[#allocation11 + $0xa4] sm:$0xf] }
  0xdc   :  { %1456 = vmatpush.bf16.msra.mxu2 %v9384_v9  ;;  %v9455_v9 = vld [vmem:[#allocation11 + $0x90] sm:$0xf] }
  0xdd   :  { %v9456_v18 = vor.u32 %v10760_v10, %v9455_v9 }
  0xe0   :  { %11029 = vmatpush.bf16.msrb.mxu2 %v12056_v25  ;;  %v12104_v25 = vor.u32 %v10769_v51, %v9497_v24  ;;  %v9447_v51 = vld [vmem:[#allocation11 + $0x80] sm:$0xf]  ;;  %v10757_v24 = vld [vmem:[#allocation11 + $0x84] sm:$0xf] }
  0xe1   :  { %v9448_v58 = vor.u32 %v10758_v23, %v9447_v51 }
  0xe2   :  { %1507 = vmatpush.bf16.msrb.mxu1 %v12104_v25 }
  0xe4   :  { %11030 = vmatpush.bf16.msrb.mxu2 %v12059_v30  ;;  %v10767_v30 = vld [vmem:[#allocation11 + $0xd4] sm:$0xf] }
  0xe5   :  { %v12115_v33 = vor.u32 %v10767_v30, %v9489_v32  ;;  %v9449_v30 = vld [vmem:[#allocation11 + $0x88] sm:$0xf0] }
  0xe6   :  { %v9452_v31 = vor.u32 %v10757_v24, %v9449_v30 }
  0xe7   :  { %1508 = vmatpush.bf16.msrb.mxu1 %v12115_v33 }
  0xe8   :  { %11031 = vmatpush.bf16.msrb.mxu2 %v12062_v35  ;;  %v9479_v35 = vld [vmem:[#allocation11 + $0xc0] sm:$0xf] }
  0xe9   :  { %v9480_v39 = vor.u32 %v10766_v36, %v9479_v35 }
  0xeb   :  { %1471 = vmatpush.bf16.msra.mxu3 %v9480_v39  ;;  %1509 = vmatpush.bf16.msrb.mxu1 %v12124_v43 }
  0xec   :  { %11032 = vmatpush.bf16.msrb.mxu2 %v12065_v41 }
  0xef   :  { %1472 = vmatpush.bf16.msra.mxu3 %v9472_v61 }
  0xf0   :  { %11033 = vmatpush.bf16.msrb.mxu2 %v12070_v52 }
  0xf2   :  { %v12068_v49 = vpop.f32.mrf.mxu0 }
  0xf3   :  { %v12072_v55 = vpop.f32.mrf.mxu1  ;;  %v1059_v34 = vadd.f32 %v12068_v49, %v12108_v26  ;;  %v10763_v49 = vld [vmem:[#allocation11 + $0xb4] sm:$0xf] }
  0xf4   :  { %v12133_v1 = vor.u32 %v10763_v49, %v9473_v62  ;;  %11034 = vmatpush.bf16.msrb.mxu2 %v12075_v63 }
  0xf5   :  { %v1078_v41 = vadd.f32 %v12072_v55, %v1059_v34  ;;  %v9463_v55 = vld [vmem:[#allocation11 + $0xa0] sm:$0xf] }
  0xf6   :  { %1510 = vmatpush.bf16.msrb.mxu1 %v12133_v1 }
  0xf8   :  { %11035 = vmatpush.bf16.msrb.mxu2 %v12078_v3 }
  0xfa   :  { %v1060_v54 = vpop.f32.mrf.mxu0  ;;  %v12082_v5 = vpop.f32.mrf.mxu2 }
  0xfb   :  { %v12080_v4 = vpop.f32.mrf.mxu1  ;;  %v12087_v12 = vpop.f32.mrf.mxu3  ;;  %v1061_v38 = vadd.f32 %v1060_v54, %v12108_v26  ;;  %v1097_v56 = vadd.f32 %v12082_v5, %v1078_v41  ;;  %v9464_v54 = vor.u32 %v10762_v48, %v9463_v55 }
  0xfc   :  { %11036 = vmatpush.bf16.msrb.mxu2 %v12085_v11 }
  0xfd   :  { %v1080_v59 = vadd.f32 %v12080_v4, %v1061_v38  ;;  %v1116_v53 = vadd.f32 %v12087_v12, %v1097_v56  ;;  %v9465_v4 = vld [vmem:[#allocation11 + $0xa8] sm:$0xf0]  ;;  %1473 = vmatpush.bf16.msra.mxu3 %v9464_v54  ;;  %v9457_v12 = vld [vmem:[#allocation11 + $0x98] sm:$0xf0] }
  0xfe   :  { %v12138_v5 = vor.u32 %v10761_v2, %v9465_v4  ;;  %v9460_v19 = vor.u32 %v10759_v14, %v9457_v12 }
 0x100   :  { %1511 = vmatpush.bf16.msrb.mxu1 %v12138_v5 }
 0x101   :  { %1474 = vmatpush.bf16.msra.mxu3 %v9456_v18 }
 0x102   :  { %v12091_v13 = vpop.f32.mrf.mxu0  ;;  %v1098_v22 = vpop.f32.mrf.mxu2 }
 0x103   :  { %v12093_v17 = vpop.f32.mrf.mxu1  ;;  %v1117_v27 = vpop.f32.mrf.mxu3  ;;  %v1099_v52 = vadd.f32 %v1098_v22, %v1080_v59  ;;  %v1064_v3 = vadd.f32 %v12091_v13, %v12108_v26 }
 0x104   :  { %1512 = vmatpush.bf16.msrb.mxu1 %v9460_v19 }
 0x105   :  { %v1118_v6 = vadd.f32 %v1117_v27, %v1099_v52  ;;  %v1083_v11 = vadd.f32 %v12093_v17, %v1064_v3  ;;  %1475 = vmatpush.bf16.msra.mxu3 %v9448_v58 }
 0x108   :  { %1513 = vmatpush.bf16.msrb.mxu1 %v9452_v31 }
 0x109   :  { %11037 = vmatpush.bf16.msrb.mxu3 %v12095_v20 }
 0x10a   :  { %v12110_v28 = vpop.f32.mrf.mxu0  ;;  %v12122_v42 = vpop.f32.mrf.mxu2 }
 0x10b   :  { %v12113_v57 = vpop.f32.mrf.mxu1  ;;  %v1120_v0 = vpop.f32.mrf.mxu3  ;;  %v1066_v27 = vadd.f32 %v12110_v28, %v12108_v26  ;;  %v1102_v32 = vadd.f32 %v12122_v42, %v1083_v11 }
 0x10d   :  { %v1085_v34 = vadd.f32 %v12113_v57, %v1066_v27  ;;  %v1121_v28 = vadd.f32 %v1120_v0, %v1102_v32  ;;  %11038 = vmatpush.bf16.msrb.mxu3 %v12104_v25 }
 0x111   :  { %11039 = vmatpush.bf16.msrb.mxu3 %v12115_v33 }
 0x112   :  { %v1134_v45 = vpop.f32.mrf.mxu0  ;;  %v1103_v8 = vpop.f32.mrf.mxu2 }
 0x113   :  { %v12131_v60 = vpop.f32.mrf.mxu1  ;;  %v1135_v7 = vadd.f32 %v1134_v45, %v1116_v53  ;;  %v1122_v50 = vpop.f32.mrf.mxu3  ;;  %v1104_v26 = vadd.f32 %v1103_v8, %v1085_v34 }
 0x114   :  { %v1154_v20 = vadd.f32 %v12131_v60, %v646_v40 }
 0x115   :  { %v1239_v22 = vmax.f32 %v1135_v7, 0.0  ;;  %v1123_v38 = vadd.f32 %v1122_v50, %v1104_v26  ;;  %11040 = vmatpush.bf16.msrb.mxu3 %v12124_v43 }
 0x119   :  { %11041 = vmatpush.bf16.msrb.mxu3 %v12133_v1 }
 0x11a   :  { %v1136_v63 = vpop.f32.mrf.mxu0  ;;  %v1172_v36 = vpop.f32.mrf.mxu2 }
 0x11b   :  { %v1137_v15 = vadd.f32 %v1136_v63, %v1118_v6  ;;  %v1155_v16 = vpop.f32.mrf.mxu1  ;;  %v1191_v37 = vpop.f32.mrf.mxu3  ;;  %v1173_v49 = vadd.f32 %v1172_v36, %v1154_v20 }
 0x11c   :  { %v1156_v59 = vadd.f32 %v1155_v16, %v646_v40 }
 0x11d   :  { %v1241_v44 = vmax.f32 %v1137_v15, 0.0  ;;  %v1192_v21 = vadd.f32 %v1191_v37, %v1173_v49  ;;  %11042 = vmatpush.bf16.msrb.mxu3 %v12138_v5 }
 0x11f   :  { %v1280_v29 = vpack.c.bf16 %v1241_v44, %v1239_v22 }
 0x121   :  { %1457 = vmatmul.bf16.vlgmr.msra.gmra.mxu2 %v1280_v29  ;;  %1495 = vmatmul.bf16.vlgmr.msrb.gmra.mxu0 %v1280_v29 }
 0x122   :  { %v1139_v13 = vpop.f32.mrf.mxu0  ;;  %v1174_v46 = vpop.f32.mrf.mxu2  ;;  %11043 = vmatpush.bf16.msrb.mxu3 %v9460_v19 }
 0x123   :  { %v1158_v35 = vpop.f32.mrf.mxu1  ;;  %v1140_v17 = vadd.f32 %v1139_v13, %v1121_v28  ;;  %v1193_v25 = vpop.f32.mrf.mxu3  ;;  %v1175_v62 = vadd.f32 %v1174_v46, %v1156_v59 }
 0x124   :  { %v1159_v54 = vadd.f32 %v1158_v35, %v646_v40  ;;  %v1279_v35 = vld [vmem:[#allocation13] sm:$0x3] }
 0x125   :  { %v1243_v42 = vmax.f32 %v1140_v17, 0.0  ;;  %v1194_v52 = vadd.f32 %v1193_v25, %v1175_v62  ;;  %v1286_v26 = vperm.slane %v1279_v35, 1  ;;  %v1285_v37 = vperm.slane %v1279_v35, 0  ;;  %v12160_v25 = vld [vmem:[#allocation2 + $0x20] sm:$0xff] }
 0x126   :  { %11044 = vmatpush.bf16.msrb.mxu3 %v9452_v31 }
 0x12a   :  { %v1141_v39 = vpop.f32.mrf.mxu0  ;;  %v1177_v33 = vpop.f32.mrf.mxu2 }
 0x12b   :  { %v1142_v41 = vadd.f32 %v1141_v39, %v1123_v38  ;;  %v1160_v45 = vpop.f32.mrf.mxu1  ;;  %v1196_v43 = vpop.f32.mrf.mxu3  ;;  %v1178_v7 = vadd.f32 %v1177_v33, %v1159_v54  ;;  %v12165_v33 = vld [vmem:[#allocation2 + $0x30] sm:$0xff]  ;;  %v12170_v54 = vld [vmem:[#allocation2] sm:$0xff] }
 0x12c   :  { %v1161_v9 = vadd.f32 %v1160_v45, %v646_v40  ;;  %v12158_v45 = vld [vmem:[#allocation2 + $0x28] sm:$0xff] }
 0x12d   :  { %v1245_v57 = vmax.f32 %v1142_v41, 0.0  ;;  %v1197_v10 = vadd.f32 %v1196_v43, %v1178_v7 }
 0x12f   :  { %v1282_v47 = vpack.c.bf16 %v1245_v57, %v1243_v42 }
 0x131   :  { %1462 = vmatmul.bf16.gmra.mxu2 %v1282_v47 }
 0x132   :  { %v1210_v56 = vpop.f32.mrf.mxu0  ;;  %v1179_v8 = vpop.f32.mrf.mxu2 }
 0x133   :  { %v1229_v61 = vpop.f32.mrf.mxu1  ;;  %v1211_v0 = vadd.f32 %v1210_v56, %v1192_v21  ;;  %v1180_v14 = vadd.f32 %v1179_v8, %v1161_v9  ;;  %v1198_v15 = vpop.f32.mrf.mxu3 }
 0x135   :  { %v1230_v60 = vadd.f32 %v1229_v61, %v1211_v0  ;;  %v1199_v18 = vadd.f32 %v1198_v15, %v1180_v14  ;;  %v12163_v0 = vld [vmem:[#allocation2 + $0x10] sm:$0xff] }
 0x137   :  { %v1240_v4 = vmax.f32 %v1230_v60, 0.0 }
 0x13a   :  { %v1212_v55 = vpop.f32.mrf.mxu0 }
 0x13b   :  { %v1213_v48 = vadd.f32 %v1212_v55, %v1194_v52  ;;  %v1231_v2 = vpop.f32.mrf.mxu1  ;;  %v12167_v52 = vld [vmem:[#allocation2 + $0x38] sm:$0xff] }
 0x13d   :  { %v1232_v53 = vadd.f32 %v1231_v2, %v1213_v48 }
 0x13f   :  { %v1242_v6 = vmax.f32 %v1232_v53, 0.0 }
 0x141   :  { %v1281_v1 = vpack.c.bf16 %v1242_v6, %v1240_v4  ;;  %1500 = vmatmul.bf16.vlgmr.msrb.gmra.mxu2 %v1282_v47  ;;  %v12172_v4 = vld [vmem:[#allocation2 + $0x18] sm:$0xff] }
 0x142   :  { %v1215_v63 = vpop.f32.mrf.mxu0 }
 0x143   :  { %v1234_v5 = vpop.f32.mrf.mxu1  ;;  %1476 = vmatmul.bf16.vlgmr.msra.gmra.mxu3 %v1281_v1  ;;  %1514 = vmatmul.bf16.vlgmr.msrb.gmra.mxu1 %v1281_v1  ;;  %v1216_v16 = vadd.f32 %v1215_v63, %v1197_v10  ;;  %v12177_v63 = vld [vmem:[#allocation2 + $0x8] sm:$0xff] }
 0x145   :  { %v1235_v19 = vadd.f32 %v1234_v5, %v1216_v16 }
 0x147   :  { %v1244_v50 = vmax.f32 %v1235_v19, 0.0 }
 0x14a   :  { %v1217_v12 = vpop.f32.mrf.mxu0 }
 0x14b   :  { %v1218_v3 = vadd.f32 %v1217_v12, %v1199_v18  ;;  %v1236_v22 = vpop.f32.mrf.mxu1 }
 0x14d   :  { %v1237_v44 = vadd.f32 %v1236_v22, %v1218_v3 }
 0x14f   :  { %v1246_v51 = vmax.f32 %v1237_v44, 0.0 }
 0x151   :  { %v1283_v23 = vpack.c.bf16 %v1246_v51, %v1244_v50 }
 0x153   :  { %1481 = vmatmul.bf16.gmra.mxu3 %v1283_v23 }
 0x163   :  { %1519 = vmatmul.bf16.vlgmr.msrb.gmra.mxu3 %v1283_v23 }
 0x19e   :  { %v1496_v32 = vpop.f32.mrf.mxu0 }
 0x19f   :  { %v1497_v62 = vadd.f32 %v1496_v32, %v1286_v26 }
 0x1a4   :  { %v1458_v24 = vpop.f32.mrf.mxu2 }
 0x1a5   :  { %v1459_v20 = vadd.f32 %v1458_v24, %v1285_v37 }
 0x1a6   :  { %v1498_v17 = vpop.f32.mrf.mxu0 }
 0x1a7   :  { %v1499_v47 = vadd.f32 %v1498_v17, %v1286_v26 }
 0x1ac   :  { %v1460_v27 = vpop.f32.mrf.mxu2 }
 0x1ad   :  { %v1461_v42 = vadd.f32 %v1460_v27, %v1285_v37 }
 0x1b4   :  { %v1463_v58 = vpop.f32.mrf.mxu2 }
 0x1b5   :  { %v1464_v39 = vadd.f32 %v1463_v58, %v1285_v37 }
 0x1bc   :  { %v1465_v31 = vpop.f32.mrf.mxu2 }
 0x1bd   :  { %v1466_v57 = vadd.f32 %v1465_v31, %v1285_v37 }
 0x1c0   :  { %v1515_v36 = vpop.f32.mrf.mxu1 }
 0x1c1   :  { %v1516_v53 = vadd.f32 %v1515_v36, %v1497_v62 }
 0x1c3   :  { %v1526_v14 = vadd.f32 %v1516_v53, %v12177_v63 }
 0x1c4   :  { %v1501_v34 = vpop.f32.mrf.mxu2 }
 0x1c5   :  { %v1502_v38 = vadd.f32 %v1501_v34, %v1286_v26 }
 0x1c6   :  { %v1477_v29 = vpop.f32.mrf.mxu3 }
 0x1c7   :  { %v1478_v60 = vadd.f32 %v1477_v29, %v1459_v20 }
 0x1c8   :  { %v1517_v49 = vpop.f32.mrf.mxu1 }
 0x1c9   :  { %v1518_v48 = vadd.f32 %v1517_v49, %v1499_v47  ;;  %v1525_v9 = vadd.f32 %v1478_v60, %v12170_v54  ;;  %v372_v47 = vlaneseq }
 0x1cb   :  { %v1528_v5 = vadd.f32 %v1518_v48, %v12172_v4  ;;  %v1533_v12 = vpack.c.bf16 %v1526_v14, %v1525_v9  ;;  %v12220_v49 = vand.u32 127, %v372_v47 }
 0x1cc   :  { %v1503_v41 = vpop.f32.mrf.mxu2 }
 0x1cd   :  { %v1504_v56 = vadd.f32 %v1503_v41, %v1286_v26  ;;  %v1545_v50 = vunpack.c.l.b16 %v1533_v12  ;;  %v12229_v48 = vand.u32 1, %v12220_v49 }
 0x1ce   :  { %v1479_v30 = vpop.f32.mrf.mxu3 }
 0x1cf   :  { %v1480_v59 = vadd.f32 %v1479_v30, %v1461_v42  ;;  %v1664_v30 = vunpack.c.h.b16 %v1533_v12 }
 0x1d1   :  { %v1527_v6 = vadd.f32 %v1480_v59, %v12163_v0 }
 0x1d3   :  { %v1534_v15 = vpack.c.bf16 %v1528_v5, %v1527_v6 }
 0x1d5   :  { %v1546_v3 = vunpack.c.l.b16 %v1534_v15  ;;  %v1665_v29 = vunpack.c.h.b16 %v1534_v15 }
 0x1d6   :  { %v1482_v11 = vpop.f32.mrf.mxu3 }
 0x1d7   :  { %v1483_v46 = vadd.f32 %v1482_v11, %v1464_v39  ;;  %v1549_v23 = vpack.c.b16 %v1546_v3, %v1545_v50  ;;  %v1668_v31 = vpack.c.b16 %v1665_v29, %v1664_v30 }
 0x1d9   :  { %v1529_v2 = vadd.f32 %v1483_v46, %v12160_v25  ;;  %v1553_v27 = vsel %vm16090_vm0, %v1549_v23, 0  ;;  %v1671_v11 = vsel %vm16090_vm0, %v1668_v31, 0 }
 0x1de   :  { %v1484_v13 = vpop.f32.mrf.mxu3 }
 0x1df   :  { %v1485_v61 = vadd.f32 %v1484_v13, %v1466_v57 }
 0x1e1   :  { %v1531_v7 = vadd.f32 %v1485_v61, %v12165_v33 }
 0x1e6   :  { %v1520_v28 = vpop.f32.mrf.mxu3 }
 0x1e7   :  { %v1521_v40 = vadd.f32 %v1520_v28, %v1502_v38 }
 0x1e9   :  { %v1530_v21 = vadd.f32 %v1521_v40, %v12158_v45 }
 0x1eb   :  { %v1535_v1 = vpack.c.bf16 %v1530_v21, %v1529_v2 }
 0x1ed   :  { %v1547_v16 = vunpack.c.l.b16 %v1535_v1  ;;  %v1666_v51 = vunpack.c.h.b16 %v1535_v1 }
 0x1ee   :  { %v1522_v55 = vpop.f32.mrf.mxu3 }
 0x1ef   :  { %v1523_v43 = vadd.f32 %v1522_v55, %v1504_v56  ;;  %v12222_v56 = vshrl.u32 %v372_v47, 7 }
 0x1f1   :  { %v1532_v8 = vadd.f32 %v1523_v43, %v12167_v52  ;;  %v456_v60 = vand.u32 1, %v12222_v56  ;;  %v425_v43 = vadd.s32 8, %v12222_v56  ;;  %v426_v14 = vadd.s32 16, %v12222_v56 }
 0x1f3   :  { %v1536_v10 = vpack.c.bf16 %v1532_v8, %v1531_v7  ;;  %vm489_vm1 = vcmp.eq.s32.totalorder %v456_v60, %v12229_v48  ;;  %v16040_v7 = vmov -1e+09   ;;  %v457_v9 = vand.u32 1, %v425_v43 }
 0x1f4   :  { %v12237_v1 = vsel %vm489_vm1, 0.0, %v16040_v7  ;;  %v458_v12 = vand.u32 1, %v426_v14 }
 0x1f5   :  { %v1548_v18 = vunpack.c.l.b16 %v1536_v10  ;;  %v1667_v44 = vunpack.c.h.b16 %v1536_v10  ;;  %16141 = vst [vmem:[#allocation36_spill] sm:$0xff] %v12237_v1  ;;  %vm490_vm2 = vcmp.eq.s32.totalorder %v457_v9, %v12229_v48 }
 0x1f6   :  { %vm491_vm3 = vcmp.eq.s32.totalorder %v458_v12, %v12229_v48 }
 0x1f7   :  { %v1550_v19 = vpack.c.b16 %v1548_v18, %v1547_v16  ;;  %v1669_v24 = vpack.c.b16 %v1667_v44, %v1666_v51  ;;  %v12248_v16 = vsel %vm490_vm2, 0.0, %v16040_v7  ;;  %v12260_v50 = vsel %vm491_vm3, 0.0, %v16040_v7 }
 0x1f8   :  { %16142 = vst [vmem:[#allocation37_spill] sm:$0xff] %v12248_v16 }
 0x1f9   :  { %1637 = vrot.lane.b32.xlu2 %v1550_v19, %s11797_s1  ;;  %1608 = vrot.lane.b32.xlu1 %v1550_v19, %s11798_s28  ;;  %v1556_v22 = vsel %vm16090_vm0, %v1550_v19, 0  ;;  %v1674_v58 = vsel %vm16090_vm0, %v1669_v24, 0  ;;  %16143 = vst [vmem:[#allocation38_spill] sm:$0xff] %v12260_v50 }
 0x1fa   :  { %1579 = vrot.lane.b32.xlu0 %v1550_v19, %s11799_s29  ;;  %1564 = vmatpush.bf16.xpose.msra.mxu2 %v1556_v22  ;;  %v427_v22 = vadd.s32 24, %v12222_v56 }
 0x201   :  { %1635 = vrot.lane.b32.xlu2 %v1549_v23, %s11797_s1  ;;  %1606 = vrot.lane.b32.xlu1 %v1549_v23, %s11798_s28 }
 0x202   :  { %1577 = vrot.lane.b32.xlu0 %v1549_v23, %s11799_s29  ;;  %1565 = vmatpush.bf16.xpose.msra.mxu2 %v1553_v27 }
 0x209   :  { %1726 = vrot.lane.b32.xlu2 %v1669_v24, %s11798_s28  ;;  %1695 = vrot.lane.b32.xlu1 %v1668_v31, %s11799_s29 }
 0x20a   :  { %1682 = vmatpush.bf16.xpose.msrb.mxu2 %v1674_v58  ;;  %1697 = vrot.lane.b32.xlu0 %v1669_v24, %s11799_s29 }
 0x20b   :  { %9509 = vmatmul.msk.bf16.vlgmr.msra.gmra.mxu2 %vm16090_vm0, %v1549_v23  ;;  %v459_v23 = vand.u32 1, %v427_v22 }
 0x20d   :  { %vm492_vm4 = vcmp.eq.s32.totalorder %v459_v23, %v12229_v48  ;;  %v435_v23 = vadd.s32 88, %v12222_v56 }
 0x20e   :  { %v12270_v58 = vsel %vm492_vm4, 0.0, %v16040_v7 }
 0x20f   :  { %16144 = vst [vmem:[#allocation39_spill] sm:$0xff] %v12270_v58 }
 0x211   :  { %1753 = vrot.lane.b32.xlu2 %v1668_v31, %s11797_s1  ;;  %1755 = vrot.lane.b32.xlu1 %v1669_v24, %s11797_s1 }
 0x212   :  { %1683 = vmatpush.bf16.xpose.msrb.mxu2 %v1671_v11  ;;  %1724 = vrot.lane.b32.xlu0 %v1668_v31, %s11798_s28 }
 0x21b   :  { %9510 = vmatmul.msk.bf16.gmra.mxu2 %vm16090_vm0, %v1550_v19 }
 0x22b   :  { %9517 = vmatmul.msk.bf16.vlgmr.msrb.gmra.mxu2 %vm16090_vm0, %v1668_v31 }
 0x23b   :  { %9518 = vmatmul.msk.bf16.gmra.mxu2 %vm16090_vm0, %v1669_v24 }
 0x253   :  { %v1638_v13 = vpop.permute.xlu2 %1637 }
 0x254   :  { %v1643_v32 = vsel %vm16090_vm0, %v1638_v13, 0 }
 0x255   :  { %1651 = vmatpush.bf16.xpose.msra.mxu1 %v1643_v32  ;;  %v433_v32 = vadd.s32 72, %v12222_v56 }
 0x25b   :  { %v1636_v34 = vpop.permute.xlu2 %1635 }
 0x25c   :  { %v1640_v35 = vsel %vm16090_vm0, %v1636_v34, 0 }
 0x25d   :  { %1652 = vmatpush.bf16.xpose.msra.mxu1 %v1640_v35 }
 0x263   :  { %v12207_v38 = vpop.permute.xlu2 %1726 }
 0x264   :  { %9515 = vmatmul.msk.bf16.vlgmr.msra.gmra.mxu1 %vm16090_vm0, %v1636_v34  ;;  %v1732_v42 = vsel %vm16090_vm0, %v12207_v38, 0 }
 0x26b   :  { %v1609_v36 = vpop.permute.xlu1 %1608  ;;  %v1754_v2 = vpop.permute.xlu2 %1753 }
 0x26c   :  { %v1580_v26 = vpop.permute.xlu0 %1579  ;;  %v1614_v28 = vsel %vm16090_vm0, %v1609_v36, 0  ;;  %v1758_v53 = vsel %vm16090_vm0, %v1754_v2, 0 }
 0x26d   :  { %v1585_v37 = vsel %vm16090_vm0, %v1580_v26, 0  ;;  %1622 = vmatpush.bf16.xpose.msra.mxu0 %v1614_v28  ;;  %v429_v28 = vadd.s32 40, %v12222_v56 }
 0x26e   :  { %1593 = vmatpush.bf16.xpose.msra.mxu3 %v1585_v37 }
 0x273   :  { %v1607_v17 = vpop.permute.xlu1 %1606 }
 0x274   :  { %v1578_v39 = vpop.permute.xlu0 %1577  ;;  %9516 = vmatmul.msk.bf16.gmra.mxu1 %vm16090_vm0, %v1638_v13  ;;  %v1611_v40 = vsel %vm16090_vm0, %v1607_v17, 0  ;;  %v428_v13 = vadd.s32 32, %v12222_v56 }
 0x275   :  { %v1582_v41 = vsel %vm16090_vm0, %v1578_v39, 0  ;;  %1623 = vmatpush.bf16.xpose.msra.mxu0 %v1611_v40 }
 0x276   :  { %1594 = vmatpush.bf16.xpose.msra.mxu3 %v1582_v41  ;;  %v460_v35 = vand.u32 1, %v428_v13 }
 0x278   :  { %vm493_vm5 = vcmp.eq.s32.totalorder %v460_v35, %v12229_v48 }
 0x27b   :  { %v1696_v57 = vpop.permute.xlu1 %1695 }
 0x27c   :  { %v12214_v46 = vpop.permute.xlu0 %1697  ;;  %9513 = vmatmul.msk.bf16.vlgmr.msra.gmra.mxu0 %vm16090_vm0, %v1607_v17  ;;  %v1700_v62 = vsel %vm16090_vm0, %v1696_v57, 0 }
 0x27d   :  { %1740 = vmatpush.bf16.xpose.msrb.mxu0 %v1732_v42  ;;  %9511 = vmatmul.msk.bf16.vlgmr.msra.gmra.mxu3 %vm16090_vm0, %v1578_v39  ;;  %v1703_v20 = vsel %vm16090_vm0, %v12214_v46, 0  ;;  %v12289_v39 = vsel %vm493_vm5, 0.0, %v16040_v7 }
 0x27e   :  { %1711 = vmatpush.bf16.xpose.msrb.mxu3 %v1703_v20  ;;  %16145 = vst [vmem:[#allocation40_spill] sm:$0xff] %v12289_v39 }
 0x283   :  { %v1756_v59 = vpop.permute.xlu1 %1755 }
 0x284   :  { %v1725_v61 = vpop.permute.xlu0 %1724  ;;  %v1761_v21 = vsel %vm16090_vm0, %v1756_v59, 0 }
 0x285   :  { %v1729_v55 = vsel %vm16090_vm0, %v1725_v61, 0  ;;  %1769 = vmatpush.bf16.xpose.msrb.mxu1 %v1761_v21 }
 0x286   :  { %1712 = vmatpush.bf16.xpose.msrb.mxu3 %v1700_v62  ;;  %1741 = vmatpush.bf16.xpose.msrb.mxu0 %v1729_v55 }
 0x28c   :  { %9514 = vmatmul.msk.bf16.gmra.mxu0 %vm16090_vm0, %v1609_v36  ;;  %v465_v36 = vand.u32 1, %v433_v32 }
 0x28d   :  { %9512 = vmatmul.msk.bf16.gmra.mxu3 %vm16090_vm0, %v1580_v26  ;;  %1770 = vmatpush.bf16.xpose.msrb.mxu1 %v1758_v53  ;;  %v436_v26 = vadd.s32 96, %v12222_v56 }
 0x28e   :  { %v1567_v6 = vpop.f32.mrf.mxu2  ;;  %vm498_vm6 = vcmp.eq.s32.totalorder %v465_v36, %v12229_v48 }
 0x28f   :  { %v1782_v8 = vmul.f32 0.17677669, %v1567_v6  ;;  %v468_v37 = vand.u32 1, %v436_v26 }
 0x291   :  { %v12240_v5 = vadd.f32 %v1782_v8, %v12237_v1  ;;  %vm501_vm7 = vcmp.eq.s32.totalorder %v468_v37, %v12229_v48 }
 0x292   :  { %v12306_v60 = vsel %vm501_vm7, 0.0, %v16040_v7 }
 0x293   :  { %v1846_v10 = vsel %vm16090_vm0, %v12240_v5, -inf  ;;  %16147 = vst [vmem:[#allocation42_spill] sm:$0xff] %v12306_v60 }
 0x294   :  { %1847 = vmax.xlane.f32.xlu2 %v1846_v10  ;;  %9523 = vmatmul.msk.bf16.vlgmr.msrb.gmra.mxu1 %vm16090_vm0, %v1754_v2  ;;  %v430_v2 = vadd.s32 48, %v12222_v56 }
 0x296   :  { %v1569_v15 = vpop.f32.mrf.mxu2 }
 0x297   :  { %v1783_v18 = vmul.f32 0.17677669, %v1569_v15 }
 0x299   :  { %v12251_v19 = vadd.f32 %v1783_v18, %v12248_v16 }
 0x29b   :  { %v1849_v3 = vsel %vm16090_vm0, %v12251_v19, -inf }
 0x29c   :  { %1850 = vmax.xlane.f32.xlu2 %v1849_v3  ;;  %9521 = vmatmul.msk.bf16.vlgmr.msrb.gmra.mxu0 %vm16090_vm0, %v1725_v61  ;;  %v432_v61 = vadd.s32 64, %v12222_v56 }
 0x29d   :  { %9519 = vmatmul.msk.bf16.vlgmr.msrb.gmra.mxu3 %vm16090_vm0, %v1696_v57  ;;  %v12292_v57 = vsel %vm498_vm6, 0.0, %v16040_v7 }
 0x29e   :  { %v1572_v44 = vpop.f32.mrf.mxu2  ;;  %16146 = vst [vmem:[#allocation41_spill] sm:$0xff] %v12292_v57  ;;  %v464_v8 = vand.u32 1, %v432_v61  ;;  %v437_v61 = vadd.s32 104, %v12222_v56 }
 0x29f   :  { %v1784_v51 = vmul.f32 0.17677669, %v1572_v44  ;;  %v462_v44 = vand.u32 1, %v430_v2 }
 0x2a0   :  { %vm497_vm10 = vcmp.eq.s32.totalorder %v464_v8, %v12229_v48 }
 0x2a1   :  { %v12263_v24 = vadd.f32 %v1784_v51, %v12260_v50  ;;  %vm495_vm11 = vcmp.eq.s32.totalorder %v462_v44, %v12229_v48  ;;  %v12342_v26 = vsel %vm497_vm10, 0.0, %v16040_v7 }
 0x2a2   :  { %16150 = vst [vmem:[#allocation45_spill] sm:$0xff] %v12342_v26 }
 0x2a3   :  { %v1852_v27 = vsel %vm16090_vm0, %v12263_v24, -inf }
 0x2a4   :  { %1853 = vmax.xlane.f32.xlu2 %v1852_v27  ;;  %9524 = vmatmul.msk.bf16.gmra.mxu1 %vm16090_vm0, %v1756_v59 }
 0x2a6   :  { %v1574_v29 = vpop.f32.mrf.mxu2 }
 0x2a7   :  { %v1785_v30 = vmul.f32 0.17677669, %v1574_v29 }
 0x2a9   :  { %v12273_v31 = vadd.f32 %v1785_v30, %v12270_v58  ;;  %v431_v30 = vadd.s32 56, %v12222_v56 }
 0x2ab   :  { %v1855_v11 = vsel %vm16090_vm0, %v12273_v31, -inf }
 0x2ac   :  { %1856 = vmax.xlane.f32.xlu0 %v1855_v11  ;;  %9522 = vmatmul.msk.bf16.gmra.mxu0 %vm16090_vm0, %v12207_v38  ;;  %v434_v38 = vadd.s32 80, %v12222_v56  ;;  %v441_v11 = vadd.s32 136, %v12222_v56 }
 0x2ad   :  { %9520 = vmatmul.msk.bf16.gmra.mxu3 %vm16090_vm0, %v12214_v46  ;;  %v461_v46 = vand.u32 1, %v429_v28  ;;  %v467_v28 = vand.u32 1, %v435_v23 }
 0x2ae   :  { %v466_v47 = vand.u32 1, %v434_v38  ;;  %v12319_v15 = vpop.f32.mrf.mxu2  ;;  %v463_v38 = vand.u32 1, %v431_v30 }
 0x2af   :  { %vm494_vm8 = vcmp.eq.s32.totalorder %v461_v46, %v12229_v48  ;;  %vm500_vm12 = vcmp.eq.s32.totalorder %v467_v28, %v12229_v48 }
 0x2b0   :  { %vm499_vm9 = vcmp.eq.s32.totalorder %v466_v47, %v12229_v48  ;;  %v12314_v10 = vsel %vm494_vm8, 0.0, %v16040_v7  ;;  %vm12359_vm13 = vcmp.eq.s32.totalorder %v463_v38, %v12229_v48  ;;  %vm377_vm8 = vcmp.lt.s32.totalorder %v12220_v49, 32 }
 0x2b1   :  { %16148 = vst [vmem:[#allocation43_spill] sm:$0xff] %v12314_v10  ;;  %v12322_v22 = vsel %vm499_vm9, 0.0, %v16040_v7  ;;  %vm16082_vm9 = vmmov 0  }
 0x2b2   :  { %16149 = vst [vmem:[#allocation44_spill] sm:$0xff] %v12322_v22  ;;  %vm12525_vm10 = vmpackc.low %vm16082_vm9, %vm377_vm8 }
 0x2e1   :  { %v1654_v40 = vpop.f32.mrf.mxu1 }
 0x2e2   :  { %v1794_v21 = vmul.f32 0.17677669, %v1654_v40 }
 0x2e4   :  { %v12317_v14 = vadd.f32 %v1794_v21, %v12306_v60  ;;  %v438_v21 = vadd.s32 112, %v12222_v56 }
 0x2e6   :  { %v1882_v27 = vsel %vm16090_vm0, %v12317_v14, -inf  ;;  %v470_v44 = vand.u32 1, %v438_v21 }
 0x2e8   :  { %vm503_vm1 = vcmp.eq.s32.totalorder %v470_v44, %v12229_v48  ;;  %v445_v44 = vadd.s32 168, %v12222_v56 }
 0x2e9   :  { %v1656_v35 = vpop.f32.mrf.mxu1 }
 0x2ea   :  { %v1795_v38 = vmul.f32 0.17677669, %v1656_v35  ;;  %v12406_v35 = vsel %vm503_vm1, 0.0, %v16040_v7 }
 0x2eb   :  { %16158 = vst [vmem:[#allocation51_spill] sm:$0xff] %v12406_v35 }
 0x2f9   :  { %v1625_v34 = vpop.f32.mrf.mxu0 }
 0x2fa   :  { %v1790_v13 = vmul.f32 0.17677669, %v1625_v34  ;;  %v12345_v34 = vsel %vm495_vm11, 0.0, %v16040_v7 }
 0x2fb   :  { %16151 = vst [vmem:[#allocation46_spill] sm:$0xff] %v12345_v34 }
 0x300   :  { %v1596_v17 = vpop.f32.mrf.mxu3 }
 0x301   :  { %v1786_v41 = vmul.f32 0.17677669, %v1596_v17  ;;  %v1627_v42 = vpop.f32.mrf.mxu0  ;;  %v473_v17 = vand.u32 1, %v441_v11 }
 0x302   :  { %v1791_v20 = vmul.f32 0.17677669, %v1627_v42 }
 0x303   :  { %v12296_v59 = vadd.f32 %v1786_v41, %v12289_v39  ;;  %v12348_v41 = vadd.f32 %v1790_v13, %v12342_v26  ;;  %vm506_vm14 = vcmp.eq.s32.totalorder %v473_v17, %v12229_v48 }
 0x304   :  { %v12300_v62 = vadd.f32 %v1791_v20, %v12292_v57  ;;  %v1687_v20 = vpop.f32.mrf.mxu2 }
 0x305   :  { %v1858_v55 = vsel %vm16090_vm0, %v12296_v59, -inf  ;;  %v1799_v8 = vmul.f32 0.17677669, %v1687_v20 }
 0x306   :  { %1859 = vmax.xlane.f32.xlu0 %v1858_v55  ;;  %v1873_v53 = vsel %vm16090_vm0, %v12300_v62, -inf }
 0x307   :  { %v1848_v43 = vpop.xlane.xlu2 %1847  ;;  %1874 = vmax.xlane.f32.xlu2 %v1873_v53 }
 0x308   :  { %v1942_v6 = vsub.f32 %v12240_v5, %v1848_v43  ;;  %v1598_v9 = vpop.f32.mrf.mxu3  ;;  %v1870_v43 = vsel %vm16090_vm0, %v12348_v41, -inf }
 0x309   :  { %v1787_v12 = vmul.f32 0.17677669, %v1598_v9  ;;  %v1630_v3 = vpop.f32.mrf.mxu0 }
 0x30a   :  { %v1974_v18 = vmul.f32 1.442695, %v1942_v6  ;;  %v1792_v51 = vmul.f32 0.17677669, %v1630_v3  ;;  %v444_v6 = vadd.s32 160, %v12222_v56  ;;  %v469_v3 = vand.u32 1, %v437_v61 }
 0x30b   :  { %v12325_v5 = vadd.f32 %v1787_v12, %v12314_v10  ;;  %v12375_v12 = vsel %vm506_vm14, 0.0, %v16040_v7 }
 0x30c   :  { %v12332_v29 = vadd.f32 %v1792_v51, %v12322_v22  ;;  %11076 = vpow2.f32 %v1974_v18  ;;  %v12372_v18 = vsel %vm500_vm12, 0.0, %v16040_v7  ;;  %16155 = vst [vmem:[#allocation48_spill] sm:$0xff] %v12375_v12  ;;  %v1659_v51 = vpop.f32.mrf.mxu1  ;;  %vm502_vm15 = vcmp.eq.s32.totalorder %v469_v3, %v12229_v48 }
 0x30d   :  { %v1861_v32 = vsel %vm16090_vm0, %v12325_v5, -inf  ;;  %16154 = vst [vmem:[#allocation47_spill] sm:$0xff] %v12372_v18  ;;  %v12403_v21 = vsel %vm502_vm15, 0.0, %v16040_v7 }
 0x30e   :  { %1862 = vmax.xlane.f32.xlu1 %v1861_v32  ;;  %1883 = vmax.xlane.f32.xlu0 %v1882_v27  ;;  %v1876_v36 = vsel %vm16090_vm0, %v12332_v29, -inf  ;;  %v12380_v27 = vsel %vm12359_vm13, 0.0, %v16040_v7  ;;  %v476_v32 = vand.u32 1, %v444_v6  ;;  %16157 = vst [vmem:[#allocation50_spill] sm:$0xff] %v12403_v21  ;;  %v12412_v6 = vadd.f32 %v1795_v38, %v12403_v21 }
 0x30f   :  { %1877 = vmax.xlane.f32.xlu2 %v1876_v36  ;;  %16156 = vst [vmem:[#allocation49_spill] sm:$0xff] %v12380_v27  ;;  %v1851_v30 = vpop.xlane.xlu2 %1850  ;;  %v12386_v36 = vadd.f32 %v1799_v8, %v12375_v12  ;;  %v477_v38 = vand.u32 1, %v445_v44 }
 0x310   :  { %v1601_v37 = vpop.f32.mrf.mxu3  ;;  %v1943_v17 = vsub.f32 %v12251_v19, %v1851_v30  ;;  %vm509_vm2 = vcmp.eq.s32.totalorder %v476_v32, %v12229_v48  ;;  %v1885_v30 = vsel %vm16090_vm0, %v12412_v6, -inf }
 0x311   :  { %v1788_v40 = vmul.f32 0.17677669, %v1601_v37  ;;  %v1632_v42 = vpop.f32.mrf.mxu0  ;;  %v439_v37 = vadd.s32 120, %v12222_v56  ;;  %v1897_v61 = vsel %vm16090_vm0, %v12386_v36, -inf  ;;  %vm510_vm4 = vcmp.eq.s32.totalorder %v477_v38, %v12229_v48 }
 0x312   :  { %v12350_v46 = vpop.eup %11076  ;;  %v1793_v2 = vmul.f32 0.17677669, %v1632_v42  ;;  %v1976_v55 = vmul.f32 1.442695, %v1943_v17 }
 0x313   :  { %v12353_v47 = vadd.f32 %v1788_v40, %v12345_v34  ;;  %v2038_v9 = vsel %vm16090_vm0, %v12350_v46, 0.0  ;;  %v1796_v40 = vmul.f32 0.17677669, %v1659_v51  ;;  %v471_v19 = vand.u32 1, %v439_v37 }
 0x314   :  { %v12383_v13 = vadd.f32 %v1793_v2, %v12372_v18  ;;  %v440_v51 = vadd.s32 128, %v12222_v56  ;;  %11078 = vpow2.f32 %v1976_v55 }
 0x315   :  { %v1864_v53 = vsel %vm16090_vm0, %v12353_v47, -inf  ;;  %v12415_v8 = vadd.f32 %v1796_v40, %v12406_v35  ;;  %vm504_vm3 = vcmp.eq.s32.totalorder %v471_v19, %v12229_v48  ;;  %v442_v19 = vadd.s32 144, %v12222_v56 }
 0x316   :  { %1871 = vmax.xlane.f32.xlu1 %v1870_v43  ;;  %1865 = vmax.xlane.f32.xlu0 %v1864_v53  ;;  %v1879_v20 = vsel %vm16090_vm0, %v12383_v13, -inf  ;;  %v12409_v43 = vsel %vm509_vm2, 0.0, %v16040_v7  ;;  %v12430_v37 = vsel %vm504_vm3, 0.0, %v16040_v7  ;;  %v472_v17 = vand.u32 1, %v440_v51 }
 0x317   :  { %2039 = vadd.xlane.f32.xlu2 %v2038_v9  ;;  %16159 = vst [vmem:[#allocation52_spill] sm:$0xff] %v12409_v43  ;;  %v1661_v9 = vpop.f32.mrf.mxu1  ;;  %v1854_v40 = vpop.xlane.xlu2 %1853  ;;  %v12447_v51 = vsel %vm510_vm4, 0.0, %v16040_v7 }
 0x318   :  { %v1603_v23 = vpop.f32.mrf.mxu3  ;;  %16160 = vst [vmem:[#allocation53_spill] sm:$0xff] %v12430_v37  ;;  %vm505_vm5 = vcmp.eq.s32.totalorder %v472_v17, %v12229_v48  ;;  %v1944_v55 = vsub.f32 %v12263_v24, %v1854_v40 }
 0x319   :  { %v1789_v11 = vmul.f32 0.17677669, %v1603_v23  ;;  %v1797_v23 = vmul.f32 0.17677669, %v1661_v9  ;;  %16161 = vst [vmem:[#allocation54_spill] sm:$0xff] %v12447_v51 }
 0x31b   :  { %v12389_v28 = vadd.f32 %v1789_v11, %v12380_v27  ;;  %v1888_v11 = vsel %vm16090_vm0, %v12415_v8, -inf }
 0x31d   :  { %v1867_v42 = vsel %vm16090_vm0, %v12389_v28, -inf }
 0x31e   :  { %1868 = vmax.xlane.f32.xlu1 %v1867_v42  ;;  %1880 = vmax.xlane.f32.xlu0 %v1879_v20  ;;  %v12433_v42 = vadd.f32 %v1797_v23, %v12430_v37  ;;  %v12435_v20 = vpop.eup %11078  ;;  %v12450_v23 = vsel %vm505_vm5, 0.0, %v16040_v7 }
 0x31f   :  { %1898 = vmax.xlane.f32.xlu2 %v1897_v61  ;;  %v2041_v44 = vsel %vm16090_vm0, %v12435_v20, 0.0  ;;  %16162 = vst [vmem:[#allocation55_spill] sm:$0xff] %v12450_v23 }
 0x320   :  { %v1714_v2 = vpop.f32.mrf.mxu3  ;;  %v1891_v9 = vsel %vm16090_vm0, %v12433_v42, -inf }
 0x321   :  { %v1802_v53 = vmul.f32 0.17677669, %v1714_v2  ;;  %v1798_v2 = vmul.f32 0.17677669, %v12319_v15 }
 0x323   :  { %v12418_v3 = vadd.f32 %v1802_v53, %v12409_v43  ;;  %v12456_v15 = vadd.f32 %v1798_v2, %v12450_v23 }
 0x325   :  { %v1906_v32 = vsel %vm16090_vm0, %v12418_v3, -inf  ;;  %v1894_v40 = vsel %vm16090_vm0, %v12456_v15, -inf }
 0x326   :  { %1886 = vmax.xlane.f32.xlu1 %v1885_v30  ;;  %1889 = vmax.xlane.f32.xlu0 %v1888_v11  ;;  %v474_v30 = vand.u32 1, %v442_v19  ;;  %v1978_v11 = vmul.f32 1.442695, %v1944_v55 }
 0x327   :  { %1907 = vmax.xlane.f32.xlu2 %v1906_v32  ;;  %v1690_v32 = vpop.f32.mrf.mxu2 }
 0x328   :  { %v1716_v61 = vpop.f32.mrf.mxu3  ;;  %vm507_vm6 = vcmp.eq.s32.totalorder %v474_v30, %v12229_v48  ;;  %11080 = vpow2.f32 %v1978_v11  ;;  %v1800_v38 = vmul.f32 0.17677669, %v1690_v32  ;;  %v443_v32 = vadd.s32 152, %v12222_v56 }
 0x329   :  { %v1803_v53 = vmul.f32 0.17677669, %v1716_v61  ;;  %v12464_v61 = vsel %vm507_vm6, 0.0, %v16040_v7 }
 0x32a   :  { %16163 = vst [vmem:[#allocation56_spill] sm:$0xff] %v12464_v61  ;;  %v12467_v19 = vadd.f32 %v1800_v38, %v12464_v61  ;;  %v475_v38 = vand.u32 1, %v443_v32  ;;  %v16164_v32 = vmov -1e+09  }
 0x32b   :  { %v12453_v24 = vadd.f32 %v1803_v53, %v12447_v51 }
 0x32c   :  { %v1900_v53 = vsel %vm16090_vm0, %v12467_v19, -inf  ;;  %vm508_vm7 = vcmp.eq.s32.totalorder %v475_v38, %v12229_v48  ;;  %v12500_v38 = vpack.c.bf16 %v12158_v45, %v12160_v25  ;;  %v12518_v45 = vpack.c.bf16 %v12177_v63, %v12170_v54 }
 0x32d   :  { %v1909_v17 = vsel %vm16090_vm0, %v12453_v24, -inf  ;;  %v12522_v25 = vpack.c.bf16 %v12172_v4, %v12163_v0 }
 0x32e   :  { %1892 = vmax.xlane.f32.xlu1 %v1891_v9  ;;  %2042 = vadd.xlane.f32.xlu0 %v2041_v44  ;;  %v12469_v55 = vpop.eup %11080  ;;  %v1857_v9 = vpop.xlane.xlu0 %1856  ;;  %v2653_v54 = vsel %vm12525_vm10, %v12500_v38, 0  ;;  %v2651_v12 = vsel %vm12525_vm10, %v12518_v45, 0 }
 0x32f   :  { %v2044_v2 = vsel %vm16090_vm0, %v12469_v55, 0.0  ;;  %v1692_v37 = vpop.f32.mrf.mxu2  ;;  %v1945_v61 = vsub.f32 %v12273_v31, %v1857_v9 }
 0x331   :  { %v1980_v21 = vmul.f32 1.442695, %v1945_v61 }
 0x336   :  { %1910 = vmax.xlane.f32.xlu0 %v1909_v17  ;;  %1895 = vmax.xlane.f32.xlu1 %v1894_v40 }
 0x33e   :  { %2045 = vadd.xlane.f32.xlu1 %v2044_v2  ;;  %1901 = vmax.xlane.f32.xlu0 %v1900_v53 }
 0x379   :  { %v1860_v44 = vpop.xlane.xlu0 %1859 }
 0x37a   :  { %v1946_v30 = vsub.f32 %v12296_v59, %v1860_v44  ;;  %v1875_v11 = vpop.xlane.xlu2 %1874  ;;  %v1801_v44 = vmul.f32 0.17677669, %v1692_v37 }
 0x37c   :  { %v1982_v17 = vmul.f32 1.442695, %v1946_v30 }
 0x37e   :  { %11082 = vpow2.f32 %v1982_v17  ;;  %v12489_v17 = vsel %vm508_vm7, 0.0, %v16164_v32 }
 0x37f   :  { %16165 = vst [vmem:[#allocation57_spill] sm:$0xff] %v12489_v17  ;;  %v12492_v31 = vadd.f32 %v1801_v44, %v12489_v17 }
 0x381   :  { %v1863_v40 = vpop.xlane.xlu1 %1862  ;;  %v12477_v7 = vpop.xlane.xlu0 %1883 }
 0x382   :  { %v1947_v23 = vsub.f32 %v12325_v5, %v1863_v40  ;;  %v12481_v2 = vpop.xlane.xlu2 %1877 }
 0x384   :  { %v12484_v53 = vpop.eup %11082  ;;  %v1984_v59 = vmul.f32 1.442695, %v1947_v23  ;;  %v1951_v23 = vsub.f32 %v12300_v62, %v1875_v11  ;;  %v1903_v62 = vsel %vm16090_vm0, %v12492_v31, -inf }
 0x385   :  { %v2050_v30 = vsel %vm16090_vm0, %v12484_v53, 0.0 }
 0x386   :  { %11084 = vpow2.f32 %v1984_v59  ;;  %2051 = vadd.xlane.f32.xlu1 %v2050_v30  ;;  %v12504_v59 = vpack.c.bf16 %v12167_v52, %v12165_v33  ;;  %v1992_v33 = vmul.f32 1.442695, %v1951_v23  ;;  %v16166_v52 = vmov 0 }
 0x387   :  { %11086 = vpow2.f32 %v1980_v21  ;;  %v12513_v21 = vpop.f32.mrf.mxu3  ;;  %v16167_v52 = vsel %vm12525_vm10, 4294967295, %v16166_v52 }
 0x388   :  { %16168 = vst [vmem:[#allocation58_spill] sm:$0xff] %v16167_v52  ;;  %v2654_v0 = vsel %vm12525_vm10, %v12504_v59, 0 }
 0x389   :  { %v1872_v5 = vpop.xlane.xlu1 %1871  ;;  %v1866_v40 = vpop.xlane.xlu0 %1865  ;;  %v2759_v23 = vunpack.c.h.b16 %v2654_v0 }
 0x38a   :  { %v1948_v9 = vsub.f32 %v12353_v47, %v1866_v40  ;;  %v1950_v61 = vsub.f32 %v12348_v41, %v1872_v5  ;;  %v12507_v44 = vpop.xlane.xlu2 %2039  ;;  %v2756_v5 = vunpack.c.l.b16 %v2653_v54  ;;  %v2758_v40 = vunpack.c.l.b16 %v2654_v0 }
 0x38b   :  { %vm2139_vm1 = vweird.f32 %v12507_v44 }
 0x38c   :  { %v12496_v37 = vpop.eup %11084  ;;  %v1986_v30 = vmul.f32 1.442695, %v1948_v9  ;;  %v1990_v41 = vmul.f32 1.442695, %v1950_v61  ;;  %v2757_v9 = vunpack.c.h.b16 %v2653_v54  ;;  %v2752_v54 = vunpack.c.l.b16 %v2651_v12 }
 0x38d   :  { %v2053_v47 = vsel %vm16090_vm0, %v12496_v37, 0.0  ;;  %v12536_v4 = vpop.eup %11086 }
 0x38e   :  { %2054 = vadd.xlane.f32.xlu2 %v2053_v47  ;;  %1904 = vmax.xlane.f32.xlu1 %v1903_v62  ;;  %11088 = vpow2.f32 %v1986_v30  ;;  %v447_v30 = vadd.s32 184, %v12222_v56  ;;  %v446_v47 = vadd.s32 176, %v12222_v56  ;;  %v2762_v62 = vpack.c.b16 %v2758_v40, %v2756_v5 }
 0x38f   :  { %11090 = vrcp.f32 %v12507_v44  ;;  %v2763_v17 = vpack.c.b16 %v2759_v23, %v2757_v9  ;;  %v2047_v43 = vsel %vm16090_vm0, %v12536_v4, 0.0  ;;  %v448_v5 = vadd.s32 192, %v12222_v56  ;;  %v1743_v9 = vpop.f32.mrf.mxu0  ;;  %v1721_v23 = vpop.f32.mrf.mxu3 }
 0x390   :  { %11092 = vpow2.f32 %v1990_v41  ;;  %2780 = vmatpush.bf16.msra.mxu0 %v2762_v62  ;;  %v2652_v41 = vsel %vm12525_vm10, %v12522_v25, 0  ;;  %v479_v40 = vand.u32 1, %v447_v30 }
 0x391   :  { %v1869_v63 = vpop.xlane.xlu1 %1868  ;;  %v12538_v11 = vpop.xlane.xlu0 %1880  ;;  %11094 = vpow2.f32 %v1992_v33  ;;  %2799 = vmatpush.bf16.msra.mxu1 %v2763_v17  ;;  %v2754_v33 = vunpack.c.l.b16 %v2652_v41  ;;  %v2755_v17 = vunpack.c.h.b16 %v2652_v41 }
 0x392   :  { %v1949_v61 = vsub.f32 %v12389_v28, %v1869_v63  ;;  %v1954_v28 = vsub.f32 %v12317_v14, %v12477_v7  ;;  %v478_v7 = vand.u32 1, %v446_v47  ;;  %v2753_v14 = vunpack.c.h.b16 %v2651_v12 }
 0x393   :  { %v2760_v62 = vpack.c.b16 %v2754_v33, %v2752_v54  ;;  %vm12570_vm11 = vcmp.eq.s32.totalorder %v479_v40, %v12229_v48  ;;  %v1804_v54 = vmul.f32 0.17677669, %v12513_v21  ;;  %v1806_v47 = vmul.f32 0.17677669, %v1743_v9 }
 0x394   :  { %v1988_v51 = vmul.f32 1.442695, %v1949_v61  ;;  %v12548_v22 = vpop.eup %11088  ;;  %v449_v61 = vadd.s32 200, %v12222_v56  ;;  %v1998_v52 = vmul.f32 1.442695, %v1954_v28  ;;  %v2761_v35 = vpack.c.b16 %v2755_v17, %v2753_v14 }
 0x395   :  { %v12555_v0 = vpop.eup %11090  ;;  %v2056_v63 = vsel %vm16090_vm0, %v12548_v22, 0.0  ;;  %2781 = vmatpush.bf16.msra.mxu0 %v2760_v62  ;;  %vm12575_vm12 = vcmp.eq.s32.totalorder %v478_v7, %v12229_v48  ;;  %v480_v28 = vand.u32 1, %v448_v5  ;;  %v12592_v21 = vsel %vm12570_vm11, 0.0, %v16164_v32 }
 0x396   :  { %11096 = vpow2.f32 %v1988_v51  ;;  %2048 = vadd.xlane.f32.xlu2 %v2047_v43  ;;  %2057 = vadd.xlane.f32.xlu0 %v2056_v63  ;;  %v2135_v43 = vmul.f32 %v12555_v0, %v12507_v44  ;;  %v12565_v60 = vpop.eup %11092  ;;  %v1805_v63 = vmul.f32 0.17677669, %v1721_v23  ;;  %v481_v14 = vand.u32 1, %v449_v61  ;;  %16173 = vst [vmem:[#allocation59_spill] sm:$0xff] %v12592_v21 }
 0x397   :  { %v12567_v30 = vpop.eup %11094  ;;  %2800 = vmatpush.bf16.msra.mxu1 %v2761_v35  ;;  %11098 = vpow2.f32 %v1998_v52  ;;  %v2062_v17 = vsel %vm16090_vm0, %v12565_v60, 0.0  ;;  %v452_v52 = vadd.s32 224, %v12222_v56  ;;  %vm513_vm13 = vcmp.eq.s32.totalorder %v480_v28, %v12229_v48  ;;  %v1745_v28 = vpop.f32.mrf.mxu0 }
 0x398   :  { %v2136_v40 = vsub.f32 1.0, %v2135_v43  ;;  %v2065_v35 = vsel %vm16090_vm0, %v12567_v30, 0.0  ;;  %v12605_v62 = vadd.f32 %v1805_v63, %v12592_v21  ;;  %vm514_vm14 = vcmp.eq.s32.totalorder %v481_v14, %v12229_v48 }
 0x399   :  { %v1887_v51 = vpop.xlane.xlu1 %1886  ;;  %v12563_v57 = vpop.xlane.xlu0 %1889  ;;  %v12619_v63 = vsel %vm513_vm13, 0.0, %v16164_v32  ;;  %v453_v14 = vadd.s32 232, %v12222_v56  ;;  %vm2140_vm15 = vweird.f32 %v12555_v0 }
 0x39a   :  { %v1955_v33 = vsub.f32 %v12412_v6, %v1887_v51  ;;  %v12597_v6 = vsel %vm12575_vm12, 0.0, %v16164_v32  ;;  %v2137_v23 = vmul.f32 %v12555_v0, %v2136_v40  ;;  %v1952_v51 = vsub.f32 %v12332_v29, %v12481_v2  ;;  %16175 = vst [vmem:[#allocation61_spill] sm:$0xff] %v12619_v63  ;;  %v1772_v29 = vpop.f32.mrf.mxu1  ;;  %vm2141_vm2 = vmor %vm2139_vm1, %vm2140_vm15 }
 0x39b   :  { %16174 = vst [vmem:[#allocation60_spill] sm:$0xff] %v12597_v6  ;;  %v12608_v43 = vadd.f32 %v1804_v54, %v12597_v6  ;;  %v484_v40 = vand.u32 1, %v452_v52  ;;  %v12622_v54 = vsel %vm514_vm14, 0.0, %v16164_v32  ;;  %v1915_v9 = vsel %vm16090_vm0, %v12605_v62, -inf }
 0x39c   :  { %v12579_v41 = vpop.eup %11096  ;;  %v2000_v5 = vmul.f32 1.442695, %v1955_v33  ;;  %v1953_v33 = vsub.f32 %v12383_v13, %v12538_v11  ;;  %16176 = vst [vmem:[#allocation62_spill] sm:$0xff] %v12622_v54  ;;  %v2138_v2 = vadd.f32 %v12555_v0, %v2137_v23  ;;  %v1807_v11 = vmul.f32 0.17677669, %v1745_v28 }
 0x39d   :  { %v2059_v7 = vsel %vm16090_vm0, %v12579_v41, 0.0  ;;  %v12614_v12 = vpop.eup %11098  ;;  %v1912_v13 = vsel %vm16090_vm0, %v12608_v43, -inf  ;;  %v2143_v52 = vand.u32 2147483647, %v12507_v44  ;;  %v12637_v23 = vadd.f32 %v1806_v47, %v12619_v63 }
 0x39e   :  { %2063 = vadd.xlane.f32.xlu2 %v2062_v17  ;;  %2060 = vadd.xlane.f32.xlu1 %v2059_v7  ;;  %v1994_v17 = vmul.f32 1.442695, %v1952_v51  ;;  %v2145_v7 = vand.u32 2147483648, %v12507_v44  ;;  %v2142_v28 = vsel %vm2141_vm2, %v12555_v0, %v2138_v2  ;;  %vm12644_vm3 = vcmp.eq.s32.totalorder %v484_v40, %v12229_v48 }
 0x39f   :  { %2066 = vadd.xlane.f32.xlu0 %v2065_v35  ;;  %v2074_v35 = vsel %vm16090_vm0, %v12614_v12, 0.0  ;;  %v12651_v47 = vadd.f32 %v1807_v11, %v12622_v54  ;;  %vm2144_vm4 = vcmp.eq.f32.partialorder %v2143_v52, 8.507059e+37  ;;  %v1918_v0 = vsel %vm16090_vm0, %v12637_v23, -inf }
 0x3a0   :  { %v1956_v40 = vsub.f32 %v12415_v8, %v12563_v57  ;;  %v12668_v57 = vsel %vm12644_vm3, 0.0, %v16164_v32  ;;  %vm381_vm1 = vcmp.ge.s32.totalorder %v12220_v49, 32  ;;  %vm383_vm2 = vcmp.lt.s32.totalorder %v12220_v49, 64 }
 0x3a1   :  { %v12602_v61 = vpop.xlane.xlu0 %2042  ;;  %v1893_v51 = vpop.xlane.xlu1 %1892  ;;  %v1921_v52 = vsel %vm16090_vm0, %v12651_v47, -inf  ;;  %16179 = vst [vmem:[#allocation63_spill] sm:$0xff] %v12668_v57  ;;  %vm385_vm3 = vmand %vm381_vm1, %vm383_vm2 }
 0x3a2   :  { %11100 = vrcp.f32 %v12602_v61  ;;  %v1957_v21 = vsub.f32 %v12433_v42, %v1893_v51  ;;  %v2160_v18 = vand.u32 2147483648, %v12602_v61  ;;  %v2158_v11 = vand.u32 2147483647, %v12602_v61 }
 0x3a3   :  { %11102 = vpow2.f32 %v2000_v5  ;;  %v1996_v5 = vmul.f32 1.442695, %v1953_v33  ;;  %v2146_v33 = vor.u32 1.1754944e-38, %v2145_v7  ;;  %v1810_v7 = vmul.f32 0.17677669, %v1772_v29 }
 0x3a4   :  { %11104 = vpow2.f32 %v1994_v17  ;;  %vm2154_vm6 = vweird.f32 %v12602_v61  ;;  %v2002_v29 = vmul.f32 1.442695, %v1956_v40  ;;  %v2161_v51 = vor.u32 1.1754944e-38, %v2160_v18 }
 0x3a5   :  { %11106 = vpow2.f32 %v1996_v5  ;;  %v2147_v2 = vsel %vm2144_vm4, %v2146_v33, %v2142_v28  ;;  %v1774_v5 = vpop.f32.mrf.mxu1  ;;  %v2004_v33 = vmul.f32 1.442695, %v1957_v21  ;;  %vm2159_vm8 = vcmp.eq.f32.partialorder %v2158_v11, 8.507059e+37  ;;  %vm12773_vm4 = vmpackc.low %vm16082_vm9, %vm385_vm3 }
 0x3a6   :  { %1916 = vmax.xlane.f32.xlu2 %v1915_v9  ;;  %1913 = vmax.xlane.f32.xlu1 %v1912_v13  ;;  %v2148_v8 = vmul.f32 %v12350_v46, %v2147_v2  ;;  %v451_v40 = vadd.s32 216, %v12222_v56  ;;  %v1811_v18 = vmul.f32 0.17677669, %v1774_v5  ;;  %11108 = vpow2.f32 %v2002_v29 }
 0x3a7   :  { %2075 = vadd.xlane.f32.xlu0 %v2074_v35  ;;  %v485_v35 = vand.u32 1, %v453_v14  ;;  %11110 = vpow2.f32 %v2004_v33 }
 0x3a8   :  { %v11101_v6 = vpop.eup %11100  ;;  %v2614_v2 = vpack.c.bf16 %v2148_v8, %v2148_v8  ;;  %v483_v8 = vand.u32 1, %v451_v40 }
 0x3a9   :  { %v2150_v9 = vmul.f32 %v11101_v6, %v12602_v61  ;;  %v12648_v44 = vpop.eup %11102  ;;  %vm2155_vm5 = vweird.f32 %v11101_v6  ;;  %vm518_vm11 = vcmp.eq.s32.totalorder %v485_v35, %v12229_v48  ;;  %v1896_v13 = vpop.xlane.xlu1 %1895 }
 0x3aa   :  { %v2077_v14 = vsel %vm16090_vm0, %v12648_v44, 0.0  ;;  %v12671_v42 = vpop.eup %11104  ;;  %vm2156_vm7 = vmor %vm2154_vm6, %vm2155_vm5  ;;  %v1958_v35 = vsub.f32 %v12456_v15, %v1896_v13  ;;  %v2742_v5 = vunpack.c.l.b16 %v2614_v2  ;;  %vm516_vm12 = vcmp.eq.s32.totalorder %v483_v8, %v12229_v48 }
 0x3ab   :  { %v2151_v63 = vsub.f32 1.0, %v2150_v9  ;;  %v12674_v9 = vpop.eup %11106  ;;  %v2068_v21 = vsel %vm16090_vm0, %v12671_v42, 0.0  ;;  %v454_v2 = vadd.s32 240, %v12222_v56 }
 0x3ac   :  { %v2071_v11 = vsel %vm16090_vm0, %v12674_v9, 0.0  ;;  %v12696_v13 = vpop.eup %11108 }
 0x3ad   :  { %v2152_v17 = vmul.f32 %v11101_v6, %v2151_v63  ;;  %v1748_v63 = vpop.f32.mrf.mxu0  ;;  %v1777_v15 = vpop.f32.mrf.mxu1 }
 0x3ae   :  { %1919 = vmax.xlane.f32.xlu2 %v1918_v0  ;;  %2078 = vadd.xlane.f32.xlu1 %v2077_v14  ;;  %v450_v14 = vadd.s32 208, %v12222_v56 }
 0x3af   :  { %v2153_v28 = vadd.f32 %v11101_v6, %v2152_v17  ;;  %1922 = vmax.xlane.f32.xlu0 %v1921_v52  ;;  %v12678_v17 = vadd.f32 %v1810_v7, %v12668_v57  ;;  %v1899_v7 = vpop.xlane.xlu2 %1898 }
 0x3b0   :  { %v482_v29 = vand.u32 1, %v450_v14  ;;  %v1959_v40 = vsub.f32 %v12386_v36, %v1899_v7  ;;  %v486_v7 = vand.u32 1, %v454_v2 }
 0x3b1   :  { %v2157_v0 = vsel %vm2156_vm7, %v11101_v6, %v2153_v28  ;;  %v12686_v6 = vsel %vm518_vm11, 0.0, %v16164_v32  ;;  %v1930_v52 = vsel %vm16090_vm0, %v12678_v17, -inf }
 0x3b2   :  { %v2162_v61 = vsel %vm2159_vm8, %v2161_v51, %v2157_v0  ;;  %16180 = vst [vmem:[#allocation64_spill] sm:$0xff] %v12686_v6  ;;  %v1911_v51 = vpop.xlane.xlu0 %1910  ;;  %v12694_v33 = vadd.f32 %v1811_v18, %v12686_v6  ;;  %v2006_v0 = vmul.f32 1.442695, %v1958_v35  ;;  %vm515_vm13 = vcmp.eq.s32.totalorder %v482_v29, %v12229_v48 }
 0x3b3   :  { %v2163_v46 = vmul.f32 %v12435_v20, %v2162_v61  ;;  %v455_v18 = vadd.s32 248, %v12222_v56  ;;  %v12717_v36 = vsel %vm515_vm13, 0.0, %v16164_v32  ;;  %v2008_v56 = vmul.f32 1.442695, %v1959_v40 }
 0x3b4   :  { %v1933_v14 = vsel %vm16090_vm0, %v12694_v33, -inf  ;;  %11112 = vpow2.f32 %v2006_v0  ;;  %16183 = vst [vmem:[#allocation67_spill] sm:$0xff] %v12717_v36  ;;  %vm519_vm14 = vcmp.eq.s32.totalorder %v486_v7, %v12229_v48  ;;  %v1963_v2 = vsub.f32 %v12453_v24, %v1911_v51 }
 0x3b5   :  { %v2615_v20 = vpack.c.bf16 %v2163_v46, %v2163_v46  ;;  %v1750_v46 = vpop.f32.mrf.mxu0  ;;  %11114 = vpow2.f32 %v2008_v56  ;;  %v1812_v40 = vmul.f32 0.17677669, %v1777_v15 }
 0x3b6   :  { %2072 = vadd.xlane.f32.xlu2 %v2071_v11  ;;  %2069 = vadd.xlane.f32.xlu1 %v2068_v21  ;;  %v12698_v11 = vpop.eup %11110  ;;  %v1808_v21 = vmul.f32 0.17677669, %v1748_v63  ;;  %v1809_v35 = vmul.f32 0.17677669, %v1750_v46  ;;  %v1779_v46 = vpop.f32.mrf.mxu1 }
 0x3b7   :  { %1931 = vmax.xlane.f32.xlu0 %v1930_v52  ;;  %v2743_v28 = vunpack.c.l.b16 %v2615_v20  ;;  %16181 = vst [vmem:[#allocation65_spill] sm:$0xff] %v12698_v11  ;;  %v2080_v20 = vsel %vm16090_vm0, %v12696_v13, 0.0  ;;  %v2083_v52 = vsel %vm16090_vm0, %v12698_v11, 0.0  ;;  %v1908_v63 = vpop.xlane.xlu2 %1907 }
 0x3b8   :  { %v12723_v29 = vadd.f32 %v1808_v21, %v12717_v36 }
 0x3b9   :  { %v2746_v61 = vpack.c.b16 %v2743_v28, %v2742_v5  ;;  %v12714_v5 = vsel %vm516_vm12, 0.0, %v16164_v32  ;;  %v487_v28 = vand.u32 1, %v455_v18 }
 0x3ba   :  { %16182 = vst [vmem:[#allocation66_spill] sm:$0xff] %v12714_v5  ;;  %v12720_v8 = vadd.f32 %v1809_v35, %v12714_v5  ;;  %v1902_v0 = vpop.xlane.xlu0 %1901  ;;  %v1924_v35 = vsel %vm16090_vm0, %v12723_v29, -inf }
 0x3bb   :  { %9529 = vmatmul.msk.bf16.vlgmr.msra.gmra.mxu0 %vm16090_vm0, %v2746_v61  ;;  %9531 = vmatmul.msk.bf16.vlgmr.msra.gmra.mxu1 %vm16090_vm0, %v2746_v61  ;;  %v12725_v61 = vpop.eup %11112  ;;  %vm520_vm15 = vcmp.eq.s32.totalorder %v487_v28, %v12229_v48  ;;  %v1960_v18 = vsub.f32 %v12467_v19, %v1902_v0  ;;  %v2016_v19 = vmul.f32 1.442695, %v1963_v2 }
 0x3bc   :  { %v1927_v21 = vsel %vm16090_vm0, %v12720_v8, -inf  ;;  %v12742_v48 = vsel %vm520_vm15, 0.0, %v16164_v32  ;;  %v12747_v7 = vpop.eup %11114 }
 0x3bd   :  { %16185 = vst [vmem:[#allocation69_spill] sm:$0xff] %v12742_v48  ;;  %v2010_v51 = vmul.f32 1.442695, %v1960_v18 }
 0x3be   :  { %2081 = vadd.xlane.f32.xlu2 %v2080_v20  ;;  %1934 = vmax.xlane.f32.xlu1 %v1933_v14  ;;  %v1962_v14 = vsub.f32 %v12418_v3, %v1908_v63  ;;  %v1813_v20 = vmul.f32 0.17677669, %v1779_v46  ;;  %v2086_v3 = vsel %vm16090_vm0, %v12725_v61, 0.0 }
 0x3bf   :  { %2084 = vadd.xlane.f32.xlu0 %v2083_v52  ;;  %v12739_v52 = vsel %vm519_vm14, 0.0, %v16164_v32  ;;  %v2089_v32 = vsel %vm16090_vm0, %v12747_v7, 0.0 }
 0x3c0   :  { %16184 = vst [vmem:[#allocation68_spill] sm:$0xff] %v12739_v52  ;;  %v2014_v24 = vmul.f32 1.442695, %v1962_v14  ;;  %v12745_v15 = vadd.f32 %v1812_v40, %v12739_v52  ;;  %v12750_v56 = vadd.f32 %v1813_v20, %v12742_v48  ;;  %v2662_v20 = vsel %vm12773_vm4, %v12500_v38, 0 }
 0x3c2   :  { %11116 = vpow2.f32 %v2014_v24  ;;  %v1936_v63 = vsel %vm16090_vm0, %v12745_v15, -inf  ;;  %v1939_v28 = vsel %vm16090_vm0, %v12750_v56, -inf  ;;  %v2682_v24 = vunpack.c.l.b16 %v2662_v20 }
 0x3c3   :  { %11118 = vpow2.f32 %v2016_v19 }
 0x3c4   :  { %11120 = vpow2.f32 %v2010_v51  ;;  %v2683_v51 = vunpack.c.h.b16 %v2662_v20 }
 0x3c6   :  { %1928 = vmax.xlane.f32.xlu2 %v1927_v21  ;;  %1925 = vmax.xlane.f32.xlu1 %v1924_v35  ;;  %v2046_v21 = vpop.xlane.xlu1 %2045  ;;  %v16188_v35 = vmov 0 }
 0x3c7   :  { %2087 = vadd.xlane.f32.xlu0 %v2086_v3  ;;  %11122 = vrcp.f32 %v2046_v21  ;;  %v16189_v35 = vsel %vm12773_vm4, 4294967295, %v16188_v35  ;;  %v2663_v3 = vsel %vm12773_vm4, %v12504_v59, 0  ;;  %vm2169_vm6 = vweird.f32 %v2046_v21 }
 0x3c8   :  { %v12758_v0 = vpop.eup %11116  ;;  %16190 = vst [vmem:[#allocation72_spill] sm:$0xff] %v16189_v35  ;;  %v2684_v19 = vunpack.c.l.b16 %v2663_v3 }
 0x3c9   :  { %16186 = vst [vmem:[#allocation70_spill] sm:$0xff] %v12758_v0  ;;  %v12760_v46 = vpop.eup %11118  ;;  %v2098_v40 = vsel %vm16090_vm0, %v12758_v0, 0.0 }
 0x3ca   :  { %v12762_v14 = vpop.eup %11120  ;;  %v2101_v2 = vsel %vm16090_vm0, %v12760_v46, 0.0 }
 0x3cb   :  { %16187 = vst [vmem:[#allocation71_spill] sm:$0xff] %v12762_v14  ;;  %v2092_v18 = vsel %vm16090_vm0, %v12762_v14, 0.0 }
 0x3ce   :  { %1937 = vmax.xlane.f32.xlu2 %v1936_v63  ;;  %2090 = vadd.xlane.f32.xlu1 %v2089_v32  ;;  %v2685_v63 = vunpack.c.h.b16 %v2663_v3  ;;  %v11123_v32 = vpop.eup %11122 }
 0x3cf   :  { %1940 = vmax.xlane.f32.xlu0 %v1939_v28  ;;  %v2688_v28 = vpack.c.b16 %v2684_v19, %v2682_v24  ;;  %v2165_v20 = vmul.f32 %v11123_v32, %v2046_v21  ;;  %vm2170_vm5 = vweird.f32 %v11123_v32 }
 0x3d0   :  { %vm12790_vm7 = vmor %vm2169_vm6, %vm2170_vm5 }
 0x3d1   :  { %2706 = vmatpush.bf16.msra.mxu2 %v2688_v28  ;;  %v2166_v19 = vsub.f32 1.0, %v2165_v20 }
 0x3d3   :  { %v2167_v35 = vmul.f32 %v11123_v32, %v2166_v19 }
 0x3d5   :  { %v2168_v27 = vadd.f32 %v11123_v32, %v2167_v35 }
 0x3d6   :  { %2102 = vadd.xlane.f32.xlu2 %v2101_v2  ;;  %2099 = vadd.xlane.f32.xlu1 %v2098_v40  ;;  %v2689_v2 = vpack.c.b16 %v2685_v63, %v2683_v51  ;;  %v2660_v40 = vsel %vm12773_vm4, %v12518_v45, 0 }
 0x3d7   :  { %2093 = vadd.xlane.f32.xlu0 %v2092_v18  ;;  %v2661_v18 = vsel %vm12773_vm4, %v12522_v25, 0  ;;  %v2678_v6 = vunpack.c.l.b16 %v2660_v40  ;;  %v2679_v57 = vunpack.c.h.b16 %v2660_v40 }
 0x3d8   :  { %2725 = vmatpush.bf16.msra.mxu3 %v2689_v2  ;;  %v2680_v36 = vunpack.c.l.b16 %v2661_v18  ;;  %v2681_v52 = vunpack.c.h.b16 %v2661_v18  ;;  %v2175_v18 = vand.u32 2147483648, %v2046_v21 }
 0x3da   :  { %v2686_v3 = vpack.c.b16 %v2680_v36, %v2678_v6  ;;  %v2687_v24 = vpack.c.b16 %v2681_v52, %v2679_v57  ;;  %v2173_v57 = vand.u32 2147483647, %v2046_v21 }
 0x3dc   :  { %2707 = vmatpush.bf16.msra.mxu2 %v2686_v3  ;;  %2726 = vmatpush.bf16.msra.mxu3 %v2687_v24  ;;  %vm2174_vm11 = vcmp.eq.f32.partialorder %v2173_v57, 8.507059e+37 }
 0x3f9   :  { %v2052_v48 = vpop.xlane.xlu1 %2051 }
 0x3fa   :  { %11124 = vrcp.f32 %v2052_v48  ;;  %v2205_v35 = vand.u32 2147483648, %v2052_v48  ;;  %vm2199_vm12 = vweird.f32 %v2052_v48  ;;  %v2203_v21 = vand.u32 2147483647, %v2052_v48 }
 0x3fc   :  { %vm2204_vm15 = vcmp.eq.f32.partialorder %v2203_v21, 8.507059e+37 }
 0x400   :  { %v11125_v51 = vpop.eup %11124 }
 0x401   :  { %v2195_v63 = vmul.f32 %v11125_v51, %v2052_v48  ;;  %v2055_v5 = vpop.xlane.xlu2 %2054  ;;  %v1905_v54 = vpop.xlane.xlu1 %1904  ;;  %vm2200_vm8 = vweird.f32 %v11125_v51 }
 0x402   :  { %11126 = vrcp.f32 %v2055_v5  ;;  %v1961_v28 = vsub.f32 %v12492_v31, %v1905_v54  ;;  %v2176_v54 = vor.u32 1.1754944e-38, %v2175_v18  ;;  %vm12803_vm13 = vmor %vm2199_vm12, %vm2200_vm8  ;;  %v2220_v48 = vand.u32 2147483648, %v2055_v5 }
 0x403   :  { %v2196_v26 = vsub.f32 1.0, %v2195_v63  ;;  %vm2214_vm1 = vweird.f32 %v2055_v5  ;;  %v2218_v36 = vand.u32 2147483647, %v2055_v5 }
 0x404   :  { %v2012_v2 = vmul.f32 1.442695, %v1961_v28  ;;  %v2221_v21 = vor.u32 1.1754944e-38, %v2220_v48 }
 0x405   :  { %v2197_v40 = vmul.f32 %v11125_v51, %v2196_v26  ;;  %v2172_v26 = vsel %vm12790_vm7, %v11123_v32, %v2168_v27  ;;  %v2206_v32 = vor.u32 1.1754944e-38, %v2205_v35  ;;  %vm2219_vm3 = vcmp.eq.f32.partialorder %v2218_v36, 8.507059e+37 }
 0x406   :  { %11128 = vpow2.f32 %v2012_v2  ;;  %v2177_v2 = vsel %vm2174_vm11, %v2176_v54, %v2172_v26 }
 0x407   :  { %v2198_v3 = vadd.f32 %v11125_v51, %v2197_v40 }
 0x408   :  { %v11127_v6 = vpop.eup %11126 }
 0x409   :  { %v2210_v52 = vmul.f32 %v11127_v6, %v2055_v5  ;;  %v12794_v20 = vpop.xlane.xlu2 %2048  ;;  %v12797_v31 = vpop.xlane.xlu0 %2057  ;;  %v2202_v40 = vsel %vm12803_vm13, %v11125_v51, %v2198_v3  ;;  %vm2215_vm14 = vweird.f32 %v11127_v6 }
 0x40a   :  { %11130 = vrcp.f32 %v12794_v20  ;;  %vm2216_vm2 = vmor %vm2214_vm1, %vm2215_vm14  ;;  %vm2184_vm5 = vweird.f32 %v12794_v20  ;;  %vm2229_vm8 = vweird.f32 %v12797_v31 }
 0x40b   :  { %v2211_v24 = vsub.f32 1.0, %v2210_v52  ;;  %11132 = vrcp.f32 %v12797_v31  ;;  %v2178_v52 = vmul.f32 %v12469_v55, %v2177_v2 }
 0x40c   :  { %v12801_v19 = vpop.eup %11128 }
 0x40d   :  { %16193 = vst [vmem:[#allocation73_spill] sm:$0xff] %v12801_v19  ;;  %v2212_v28 = vmul.f32 %v11127_v6, %v2211_v24  ;;  %v2095_v27 = vsel %vm16090_vm0, %v12801_v19, 0.0  ;;  %v2207_v24 = vsel %vm2204_vm15, %v2206_v32, %v2202_v40  ;;  %v2616_v5 = vpack.c.bf16 %v2178_v52, %v2178_v52 }
 0x40e   :  { %2096 = vadd.xlane.f32.xlu1 %v2095_v27  ;;  %v2208_v55 = vmul.f32 %v12484_v53, %v2207_v24  ;;  %v2190_v40 = vand.u32 2147483648, %v12794_v20  ;;  %v2188_v27 = vand.u32 2147483647, %v12794_v20  ;;  %v2233_v24 = vand.u32 2147483647, %v12797_v31 }
 0x40f   :  { %v2213_v18 = vadd.f32 %v11127_v6, %v2212_v28  ;;  %v12837_v53 = vunpack.c.l.b16 %v2616_v5 }
 0x410   :  { %v12812_v57 = vpop.eup %11130  ;;  %v2618_v36 = vpack.c.bf16 %v2208_v55, %v2208_v55  ;;  %v2191_v10 = vor.u32 1.1754944e-38, %v2190_v40  ;;  %vm12850_vm6 = vcmp.eq.f32.partialorder %v2188_v27, 8.507059e+37  ;;  %vm12903_vm1 = vcmp.eq.f32.partialorder %v2233_v24, 8.507059e+37 }
 0x411   :  { %v2180_v51 = vmul.f32 %v12812_v57, %v12794_v20  ;;  %v12817_v3 = vpop.xlane.xlu2 %2063  ;;  %v12819_v26 = vpop.xlane.xlu1 %2060  ;;  %v2217_v54 = vsel %vm2216_vm2, %v11127_v6, %v2213_v18  ;;  %v2235_v18 = vand.u32 2147483648, %v12797_v31  ;;  %vm2185_vm7 = vweird.f32 %v12812_v57 }
 0x412   :  { %11134 = vrcp.f32 %v12817_v3  ;;  %v12822_v35 = vpop.xlane.xlu0 %2066  ;;  %v12824_v63 = vpop.eup %11132  ;;  %v2222_v28 = vsel %vm2219_vm3, %v2221_v21, %v2217_v54  ;;  %vm2259_vm12 = vweird.f32 %v12817_v3  ;;  %vm12875_vm13 = vmor %vm2184_vm5, %vm2185_vm7  ;;  %vm2244_vm7 = vweird.f32 %v12819_v26 }
 0x413   :  { %11136 = vrcp.f32 %v12822_v35  ;;  %v2181_v2 = vsub.f32 1.0, %v2180_v51  ;;  %v2225_v6 = vmul.f32 %v12824_v63, %v12797_v31  ;;  %v2223_v48 = vmul.f32 %v12496_v37, %v2222_v28 }
 0x414   :  { %11138 = vrcp.f32 %v12819_v26  ;;  %v12859_v40 = vor.u32 1.1754944e-38, %v2235_v18  ;;  %vm2230_vm11 = vweird.f32 %v12824_v63  ;;  %v2263_v18 = vand.u32 2147483647, %v12817_v3 }
 0x415   :  { %v2182_v52 = vmul.f32 %v12812_v57, %v2181_v2  ;;  %v2226_v50 = vsub.f32 1.0, %v2225_v6  ;;  %v2619_v1 = vpack.c.bf16 %v2223_v48, %v2223_v48  ;;  %v2278_v48 = vand.u32 2147483647, %v12822_v35 }
 0x416   :  { %vm2274_vm14 = vweird.f32 %v12822_v35  ;;  %v2280_v58 = vand.u32 2147483648, %v12822_v35  ;;  %vm12895_vm15 = vcmp.eq.f32.partialorder %v2263_v18, 8.507059e+37 }
 0x417   :  { %vm12909_vm3 = vcmp.eq.f32.partialorder %v2278_v48, 8.507059e+37 }
 0x418   :  { %v12833_v32 = vpop.eup %11134 }
 0x419   :  { %v2255_v51 = vmul.f32 %v12833_v32, %v12817_v3  ;;  %v1917_v54 = vpop.xlane.xlu2 %1916  ;;  %v1914_v21 = vpop.xlane.xlu1 %1913  ;;  %vm2260_vm2 = vweird.f32 %v12833_v32 }
 0x41a   :  { %v12844_v34 = vpop.eup %11136  ;;  %v1965_v37 = vsub.f32 %v12605_v62, %v1917_v54  ;;  %v12847_v55 = vpop.xlane.xlu0 %2075  ;;  %v1964_v5 = vsub.f32 %v12608_v43, %v1914_v21  ;;  %v2265_v62 = vand.u32 2147483648, %v12817_v3  ;;  %v2668_v54 = vunpack.c.l.b16 %v2618_v36  ;;  %vm12943_vm9 = vmor %vm2259_vm12, %vm2260_vm2 }
 0x41b   :  { %v2256_v2 = vsub.f32 1.0, %v2255_v51  ;;  %v2270_v39 = vmul.f32 %v12844_v34, %v12822_v35  ;;  %11140 = vrcp.f32 %v12847_v55  ;;  %v12857_v16 = vpop.eup %11138  ;;  %v2183_v43 = vadd.f32 %v12812_v57, %v2182_v52 }
 0x41c   :  { %v2020_v6 = vmul.f32 1.442695, %v1965_v37  ;;  %v2227_v51 = vmul.f32 %v12824_v63, %v2226_v50  ;;  %v2018_v21 = vmul.f32 1.442695, %v1964_v5  ;;  %v2240_v52 = vmul.f32 %v12857_v16, %v12819_v26 }
 0x41d   :  { %v2271_v27 = vsub.f32 1.0, %v2270_v39  ;;  %v2257_v36 = vmul.f32 %v12833_v32, %v2256_v2  ;;  %v2669_v37 = vunpack.c.l.b16 %v2619_v1  ;;  %v12879_v50 = vor.u32 1.1754944e-38, %v2265_v62 }
 0x41e   :  { %11142 = vpow2.f32 %v2020_v6  ;;  %v2250_v6 = vand.u32 2147483648, %v12819_v26  ;;  %v2187_v62 = vsel %vm12875_vm13, %v12812_v57, %v2183_v43  ;;  %v12893_v14 = vadd.f32 %v12824_v63, %v2227_v51  ;;  %vm12932_vm13 = vmor %vm2229_vm8, %vm2230_vm11 }
 0x41f   :  { %11144 = vpow2.f32 %v2018_v21  ;;  %v2272_v2 = vmul.f32 %v12844_v34, %v2271_v27  ;;  %v2672_v1 = vpack.c.b16 %v2669_v37, %v2668_v54  ;;  %v2248_v21 = vand.u32 2147483647, %v12819_v26 }
 0x420   :  { %v2258_v57 = vadd.f32 %v12833_v32, %v2257_v36  ;;  %v2241_v51 = vsub.f32 1.0, %v2240_v52  ;;  %v2192_v18 = vsel %vm12850_vm6, %v2191_v10, %v2187_v62  ;;  %vm2275_vm5 = vweird.f32 %v12844_v34 }
 0x421   :  { %v12883_v5 = vpop.eup %11140  ;;  %v1920_v19 = vpop.xlane.xlu2 %1919  ;;  %9525 = vmatmul.msk.bf16.vlgmr.msra.gmra.mxu2 %vm16090_vm0, %v2672_v1  ;;  %9527 = vmatmul.msk.bf16.vlgmr.msra.gmra.mxu3 %vm16090_vm0, %v2672_v1  ;;  %v2273_v48 = vadd.f32 %v12844_v34, %v2272_v2  ;;  %v2281_v52 = vor.u32 1.1754944e-38, %v2280_v58  ;;  %v12924_v39 = vor.u32 1.1754944e-38, %v2250_v6  ;;  %vm2319_vm6 = vweird.f32 %v12847_v55  ;;  %vm12962_vm12 = vmor %vm2274_vm14, %vm2275_vm5 }
 0x422   :  { %v12887_v20 = vpop.xlane.xlu1 %2078  ;;  %v2315_v27 = vmul.f32 %v12883_v5, %v12847_v55  ;;  %v1966_v54 = vsub.f32 %v12637_v23, %v1920_v19  ;;  %v1923_v37 = vpop.xlane.xlu0 %1922  ;;  %v2323_v58 = vand.u32 2147483647, %v12847_v55  ;;  %v2242_v31 = vmul.f32 %v12857_v16, %v2241_v51 }
 0x423   :  { %11146 = vrcp.f32 %v12887_v20  ;;  %v1967_v24 = vsub.f32 %v12651_v47, %v1923_v37  ;;  %vm2245_vm8 = vweird.f32 %v12857_v16  ;;  %vm12949_vm11 = vcmp.eq.f32.partialorder %v2248_v21, 8.507059e+37 }
 0x424   :  { %v2316_v23 = vsub.f32 1.0, %v2315_v27  ;;  %v2022_v19 = vmul.f32 1.442695, %v1966_v54  ;;  %v12919_v36 = vpop.eup %11142  ;;  %v2325_v62 = vand.u32 2147483648, %v12847_v55  ;;  %v2193_v27 = vmul.f32 %v12536_v4, %v2192_v18 }
 0x425   :  { %v12926_v1 = vpop.eup %11144  ;;  %v2024_v28 = vmul.f32 1.442695, %v1967_v24  ;;  %v2262_v3 = vsel %vm12943_vm9, %v12833_v32, %v2258_v57  ;;  %v2107_v21 = vsel %vm16090_vm0, %v12919_v36, 0.0  ;;  %v2232_v4 = vsel %vm12932_vm13, %v12824_v63, %v12893_v14 }
 0x426   :  { %v2317_v10 = vmul.f32 %v12883_v5, %v2316_v23  ;;  %11148 = vpow2.f32 %v2022_v19  ;;  %v2277_v32 = vsel %vm12962_vm12, %v12844_v34, %v2273_v48  ;;  %v2617_v35 = vpack.c.bf16 %v2193_v27, %v2193_v27  ;;  %2108 = vadd.xlane.f32.xlu0 %v2107_v21 }
 0x427   :  { %11150 = vpow2.f32 %v2024_v28  ;;  %v2104_v57 = vsel %vm16090_vm0, %v12926_v1, 0.0  ;;  %vm2320_vm9 = vweird.f32 %v12883_v5  ;;  %v2267_v63 = vsel %vm12895_vm15, %v12879_v50, %v2262_v3 }
 0x428   :  { %v2318_v19 = vadd.f32 %v12883_v5, %v2317_v10  ;;  %2105 = vadd.xlane.f32.xlu2 %v2104_v57  ;;  %v2243_v24 = vadd.f32 %v12857_v16, %v2242_v31  ;;  %vm12989_vm14 = vcmp.eq.f32.partialorder %v2323_v58, 8.507059e+37  ;;  %v2745_v48 = vunpack.c.l.b16 %v2617_v35  ;;  %vm13001_vm15 = vmor %vm2319_vm6, %vm2320_vm9 }
 0x429   :  { %v11147_v37 = vpop.eup %11146  ;;  %v12977_v51 = vpop.xlane.xlu2 %2072  ;;  %v2282_v47 = vsel %vm12909_vm3, %v2281_v52, %v2277_v32  ;;  %v2237_v2 = vsel %vm12903_vm1, %v12859_v40, %v2232_v4  ;;  %v2326_v50 = vor.u32 1.1754944e-38, %v2325_v62  ;;  %v2338_v58 = vand.u32 2147483647, %v12887_v20  ;;  %vm13015_vm1 = vmor %vm2244_vm7, %vm2245_vm8 }
 0x42a   :  { %v12979_v23 = vpop.xlane.xlu1 %2069  ;;  %v2330_v14 = vmul.f32 %v11147_v37, %v12887_v20  ;;  %11152 = vrcp.f32 %v12977_v51  ;;  %v1932_v34 = vpop.xlane.xlu0 %1931  ;;  %v2340_v31 = vand.u32 2147483648, %v12887_v20  ;;  %v2747_v43 = vpack.c.b16 %v2745_v48, %v12837_v53 }
 0x42b   :  { %v1970_v28 = vsub.f32 %v12678_v17, %v1932_v34  ;;  %v2268_v17 = vmul.f32 %v12565_v60, %v2267_v63  ;;  %v2322_v55 = vsel %vm13001_vm15, %v12883_v5, %v2318_v19  ;;  %vm2335_vm2 = vweird.f32 %v11147_v37 }
 0x42c   :  { %v2331_v10 = vsub.f32 1.0, %v2330_v14  ;;  %v13008_v52 = vpop.eup %11148  ;;  %v2283_v53 = vmul.f32 %v12567_v30, %v2282_v47  ;;  %9530 = vmatmul.msk.bf16.gmra.mxu0 %vm16090_vm0, %v2747_v43  ;;  %9532 = vmatmul.msk.bf16.gmra.mxu1 %vm16090_vm0, %v2747_v43  ;;  %v2238_v26 = vmul.f32 %v12548_v22, %v2237_v2  ;;  %v2247_v27 = vsel %vm13015_vm1, %v12857_v16, %v2243_v24 }
 0x42d   :  { %v13022_v62 = vpop.eup %11150  ;;  %v2030_v60 = vmul.f32 1.442695, %v1970_v28  ;;  %vm2334_vm3 = vweird.f32 %v12887_v20  ;;  %11154 = vrcp.f32 %v12979_v23  ;;  %v2252_v30 = vsel %vm12949_vm11, %v12924_v39, %v2247_v27 }
 0x42e   :  { %v2332_v40 = vmul.f32 %v11147_v37, %v2331_v10  ;;  %v2327_v54 = vsel %vm12989_vm14, %v2326_v50, %v2322_v55  ;;  %vm2336_vm5 = vmor %vm2334_vm3, %vm2335_vm2  ;;  %vm2339_vm7 = vcmp.eq.f32.partialorder %v2338_v58, 8.507059e+37  ;;  %v2341_v22 = vor.u32 1.1754944e-38, %v2340_v31 }
 0x42f   :  { %v2253_v20 = vmul.f32 %v12579_v41, %v2252_v30  ;;  %v2620_v35 = vpack.c.bf16 %v2238_v26, %v2238_v26  ;;  %v2110_v6 = vsel %vm16090_vm0, %v13008_v52, 0.0  ;;  %11156 = vpow2.f32 %v2030_v60 }
 0x430   :  { %v13031_v3 = vpop.eup %11152  ;;  %v2333_v5 = vadd.f32 %v11147_v37, %v2332_v40  ;;  %2111 = vadd.xlane.f32.xlu1 %v2110_v6  ;;  %v2113_v19 = vsel %vm16090_vm0, %v13022_v62, 0.0  ;;  %v2622_v14 = vpack.c.bf16 %v2268_v17, %v2268_v17  ;;  %v2328_v34 = vmul.f32 %v12614_v12, %v2327_v54 }
 0x431   :  { %v2300_v16 = vmul.f32 %v13031_v3, %v12977_v51  ;;  %v13042_v21 = vpop.xlane.xlu2 %2081  ;;  %v2621_v63 = vpack.c.bf16 %v2253_v20, %v2253_v20  ;;  %2114 = vadd.xlane.f32.xlu2 %v2113_v19  ;;  %v2670_v48 = vunpack.c.l.b16 %v2620_v35  ;;  %v2310_v10 = vand.u32 2147483648, %v12977_v51 }
 0x432   :  { %v1935_v4 = vpop.xlane.xlu1 %1934  ;;  %v2337_v32 = vsel %vm2336_vm5, %v11147_v37, %v2333_v5  ;;  %v13047_v39 = vpop.xlane.xlu0 %2084  ;;  %v2623_v37 = vpack.c.bf16 %v2283_v53, %v2283_v53  ;;  %v13056_v28 = vunpack.c.l.b16 %v2622_v14  ;;  %v2626_v2 = vpack.c.bf16 %v2328_v34, %v2328_v34 }
 0x433   :  { %v2342_v57 = vsel %vm2339_vm7, %v2341_v22, %v2337_v32  ;;  %v13052_v24 = vpop.eup %11154  ;;  %v2301_v18 = vsub.f32 1.0, %v2300_v16  ;;  %v2671_v47 = vunpack.c.l.b16 %v2621_v63  ;;  %v2295_v0 = vand.u32 2147483648, %v12979_v23 }
 0x434   :  { %v2343_v41 = vmul.f32 %v12648_v44, %v2342_v57  ;;  %v13063_v12 = vmul.f32 %v13052_v24, %v12979_v23  ;;  %11158 = vrcp.f32 %v13042_v21  ;;  %v1971_v44 = vsub.f32 %v12694_v33, %v1935_v4 }
 0x435   :  { %v2673_v50 = vpack.c.b16 %v2671_v47, %v2670_v48  ;;  %v13059_v58 = vpop.eup %11156  ;;  %vm387_vm13 = vcmp.ge.s32.totalorder %v12220_v49, 64  ;;  %v13068_v43 = vunpack.c.l.b16 %v2623_v37  ;;  %v2302_v11 = vmul.f32 %v13031_v3, %v2301_v18 }
 0x436   :  { %v2627_v17 = vpack.c.bf16 %v2343_v41, %v2343_v41  ;;  %vm389_vm6 = vcmp.lt.s32.totalorder %v12220_v49, 96  ;;  %v13075_v40 = vor.u32 1.1754944e-38, %v2310_v10  ;;  %11160 = vrcp.f32 %v13047_v39 }
 0x437   :  { %9526 = vmatmul.msk.bf16.gmra.mxu2 %vm16090_vm0, %v2673_v50  ;;  %9528 = vmatmul.msk.bf16.gmra.mxu3 %vm16090_vm0, %v2673_v50  ;;  %vm393_vm8 = vcmp.ge.s32.totalorder %v12220_v49, 96  ;;  %v13083_v60 = vunpack.c.l.b16 %v2626_v2  ;;  %v2032_v27 = vmul.f32 1.442695, %v1971_v44  ;;  %vm391_vm11 = vmand %vm387_vm13, %vm389_vm6  ;;  %v2122_v5 = vsel %vm16090_vm0, %v13059_v58, 0.0 }
 0x438   :  { %v2286_v30 = vsub.f32 1.0, %v13063_v12  ;;  %v13091_v54 = vor.u32 1.1754944e-38, %v2295_v0  ;;  %vm16220_vm12 = vmmov 0   ;;  %v16221_v4 = vmov 0  ;;  %2123 = vadd.xlane.f32.xlu0 %v2122_v5 }
 0x439   :  { %v1929_v31 = vpop.xlane.xlu2 %1928  ;;  %vm13096_vm9 = vmpackc.low %vm16220_vm12, %vm391_vm11  ;;  %v13100_v32 = vunpack.c.l.b16 %v2627_v17  ;;  %v13103_v20 = vadd.f32 %v13031_v3, %v2302_v11  ;;  %v16224_v6 = vmov 0  ;;  %vm2290_vm15 = vweird.f32 %v13052_v24 }
 0x43a   :  { %v13079_v33 = vpop.xlane.xlu0 %2087  ;;  %v13081_v53 = vpop.xlane.xlu1 %1925  ;;  %v16222_v4 = vsel %vm13096_vm9, 4294967295, %v16221_v4  ;;  %v2819_v35 = vsel %vm13096_vm9, %v12500_v38, 0  ;;  %vm13111_vm14 = vmpackc.low %vm16220_vm12, %vm393_vm8  ;;  %v2820_v19 = vsel %vm13096_vm9, %v12504_v59, 0  ;;  %v1969_v18 = vsub.f32 %v12720_v8, %v1929_v31 }
 0x43b   :  { %16223 = vst [vmem:[#allocation74_spill] sm:$0xff] %v16222_v4  ;;  %v16225_v6 = vsel %vm13111_vm14, 4294967295, %v16224_v6  ;;  %11162 = vrcp.f32 %v13079_v33  ;;  %v13116_v57 = vpop.eup %11158  ;;  %v2839_v14 = vunpack.c.l.b16 %v2819_v35  ;;  %v2840_v34 = vunpack.c.h.b16 %v2819_v35 }
 0x43c   :  { %16226 = vst [vmem:[#allocation75_spill] sm:$0xff] %v16225_v6  ;;  %v2910_v63 = vsel %vm13111_vm14, %v12500_v38, 0  ;;  %11164 = vpow2.f32 %v2032_v27  ;;  %v2841_v37 = vunpack.c.l.b16 %v2820_v19  ;;  %v2842_v41 = vunpack.c.h.b16 %v2820_v19  ;;  %v13125_v48 = vpop.eup %11160 }
 0x43d   :  { %v2911_v47 = vsel %vm13111_vm14, %v12504_v59, 0  ;;  %v2930_v10 = vunpack.c.l.b16 %v2910_v63  ;;  %v2931_v2 = vunpack.c.h.b16 %v2910_v63  ;;  %v2817_v0 = vsel %vm13096_vm9, %v12518_v45, 0 }
 0x43e   :  { %v2345_v12 = vmul.f32 %v13116_v57, %v13042_v21  ;;  %v2845_v44 = vpack.c.b16 %v2841_v37, %v2839_v14  ;;  %v2846_v17 = vpack.c.b16 %v2842_v41, %v2840_v34  ;;  %v2932_v8 = vunpack.c.l.b16 %v2911_v47 }
 0x43f   :  { %v2933_v31 = vunpack.c.h.b16 %v2911_v47  ;;  %v2818_v11 = vsel %vm13096_vm9, %v12522_v25, 0  ;;  %v2835_v27 = vunpack.c.l.b16 %v2817_v0  ;;  %v2836_v5 = vunpack.c.h.b16 %v2817_v0 }
 0x440   :  { %v2360_v19 = vmul.f32 %v13125_v48, %v13047_v39  ;;  %2863 = vmatpush.bf16.msrb.mxu2 %v2845_v44  ;;  %2882 = vmatpush.bf16.msrb.mxu3 %v2846_v17  ;;  %v2936_v63 = vpack.c.b16 %v2932_v8, %v2930_v10  ;;  %v2837_v22 = vunpack.c.l.b16 %v2818_v11  ;;  %v2838_v55 = vunpack.c.h.b16 %v2818_v11 }
 0x441   :  { %v13133_v50 = vpop.xlane.xlu2 %1937  ;;  %v13140_v35 = vpop.eup %11162  ;;  %v2937_v14 = vpack.c.b16 %v2933_v31, %v2931_v2  ;;  %v2908_v34 = vsel %vm13111_vm14, %v12518_v45, 0  ;;  %v2909_v37 = vsel %vm13111_vm14, %v12522_v25, 0  ;;  %v2028_v41 = vmul.f32 1.442695, %v1969_v18 }
 0x442   :  { %v13150_v47 = vpop.xlane.xlu1 %2090  ;;  %v13152_v0 = vpop.eup %11164  ;;  %2954 = vmatpush.bf16.msrb.mxu0 %v2936_v63  ;;  %v2843_v44 = vpack.c.b16 %v2837_v22, %v2835_v27  ;;  %v2844_v17 = vpack.c.b16 %v2838_v55, %v2836_v5  ;;  %v2926_v10 = vunpack.c.l.b16 %v2908_v34  ;;  %v2928_v8 = vunpack.c.l.b16 %v2909_v37 }
 0x443   :  { %2973 = vmatpush.bf16.msrb.mxu1 %v2937_v14  ;;  %v2927_v2 = vunpack.c.h.b16 %v2908_v34  ;;  %v2929_v31 = vunpack.c.h.b16 %v2909_v37  ;;  %11166 = vpow2.f32 %v2028_v41  ;;  %v2375_v11 = vmul.f32 %v13140_v35, %v13079_v33  ;;  %v1941_v63 = vpop.xlane.xlu0 %1940 }
 0x444   :  { %v2287_v16 = vmul.f32 %v13052_v24, %v2286_v30  ;;  %v2346_v26 = vsub.f32 1.0, %v2345_v12  ;;  %v2361_v18 = vsub.f32 1.0, %v2360_v19  ;;  %2864 = vmatpush.bf16.msrb.mxu2 %v2843_v44  ;;  %2883 = vmatpush.bf16.msrb.mxu3 %v2844_v17  ;;  %v2934_v6 = vpack.c.b16 %v2928_v8, %v2926_v10 }
 0x445   :  { %v2935_v22 = vpack.c.b16 %v2929_v31, %v2927_v2  ;;  %v2376_v55 = vsub.f32 1.0, %v2375_v11  ;;  %v1968_v27 = vsub.f32 %v12723_v29, %v13081_v53  ;;  %v2829_v5 = vpack.c.b16 %v13068_v43, %v13056_v28 }
 0x446   :  { %v2370_v30 = vand.u32 2147483648, %v13047_v39  ;;  %2955 = vmatpush.bf16.msrb.mxu0 %v2934_v6  ;;  %v2383_v12 = vand.u32 2147483647, %v13079_v33  ;;  %v2920_v19 = vpack.c.b16 %v13100_v32, %v13083_v60  ;;  %v2125_v34 = vsel %vm16090_vm0, %v13152_v0, 0.0 }
 0x447   :  { %vm2289_vm2 = vweird.f32 %v12979_v23  ;;  %2974 = vmatpush.bf16.msrb.mxu1 %v2935_v22  ;;  %v2377_v29 = vmul.f32 %v13140_v35, %v2376_v55  ;;  %v2026_v28 = vmul.f32 1.442695, %v1968_v27  ;;  %9533 = vmatmul.msk.bf16.vlgmr.msrb.gmra.mxu2 %vm16090_vm0, %v2829_v5  ;;  %v1972_v43 = vsub.f32 %v12745_v15, %v13133_v50 }
 0x448   :  { %11168 = vrcp.f32 %v13150_v47  ;;  %v2347_v53 = vmul.f32 %v13116_v57, %v2346_v26  ;;  %v2362_v60 = vmul.f32 %v13125_v48, %v2361_v18  ;;  %9535 = vmatmul.msk.bf16.vlgmr.msrb.gmra.mxu3 %vm16090_vm0, %v2829_v5  ;;  %2126 = vadd.xlane.f32.xlu1 %v2125_v34  ;;  %v1973_v32 = vsub.f32 %v12750_v56, %v1941_v63 }
 0x449   :  { %v13162_v14 = vpop.xlane.xlu2 %2102  ;;  %v13183_v6 = vpop.eup %11166  ;;  %v16227_v37 = vand.u32 2147483647, %v12979_v23  ;;  %v2378_v50 = vadd.f32 %v13140_v35, %v2377_v29  ;;  %vm2380_vm7 = vweird.f32 %v13140_v35  ;;  %v2385_v26 = vand.u32 2147483648, %v13079_v33  ;;  %9537 = vmatmul.msk.bf16.vlgmr.msrb.gmra.mxu0 %vm16090_vm0, %v2920_v19 }
 0x44a   :  { %11170 = vrcp.f32 %v13162_v14  ;;  %v2288_v56 = vadd.f32 %v13052_v24, %v2287_v16  ;;  %v16230_v41 = vand.u32 2147483648, %v13042_v21  ;;  %v2368_v17 = vand.u32 2147483647, %v13047_v39  ;;  %9539 = vmatmul.msk.bf16.vlgmr.msrb.gmra.mxu1 %vm16090_vm0, %v2920_v19  ;;  %v13214_v11 = vpop.xlane.xlu1 %2099 }
 0x44b   :  { %vm13187_vm5 = vcmp.eq.f32.partialorder %v16227_v37, 8.507059e+37  ;;  %11172 = vpow2.f32 %v2026_v28  ;;  %v2119_v10 = vsel %vm16090_vm0, %v13183_v6, 0.0  ;;  %v16231_v8 = vand.u32 2147483647, %v12977_v51 }
 0x44c   :  { %v13199_v44 = vor.u32 1.1754944e-38, %v16230_v41  ;;  %vm2379_vm11 = vweird.f32 %v13079_v33  ;;  %v2034_v16 = vmul.f32 1.442695, %v1972_v43  ;;  %v2398_v31 = vand.u32 2147483647, %v13150_v47  ;;  %2120 = vadd.xlane.f32.xlu0 %v2119_v10 }
 0x44d   :  { %vm13207_vm6 = vcmp.eq.f32.partialorder %v16231_v8, 8.507059e+37  ;;  %v2348_v18 = vadd.f32 %v13116_v57, %v2347_v53  ;;  %v13218_v22 = vadd.f32 %v13125_v48, %v2362_v60  ;;  %v13220_v55 = vor.u32 1.1754944e-38, %v2370_v30  ;;  %vm13224_vm13 = vmor %vm2379_vm11, %vm2380_vm7 }
 0x44e   :  { %v2036_v33 = vmul.f32 1.442695, %v1973_v32  ;;  %v11169_v5 = vpop.eup %11168  ;;  %v16236_v63 = vand.u32 2147483647, %v13042_v21  ;;  %v2382_v34 = vsel %vm13224_vm13, %v13140_v35, %v2378_v50  ;;  %vm13237_vm3 = vcmp.eq.f32.partialorder %v2383_v12, 8.507059e+37  ;;  %vm13259_vm7 = vmor %vm2289_vm2, %vm2290_vm15 }
 0x44f   :  { %v2386_v29 = vor.u32 1.1754944e-38, %v2385_v26  ;;  %v2400_v28 = vand.u32 2147483648, %v13150_v47  ;;  %v2390_v53 = vmul.f32 %v11169_v5, %v13150_v47  ;;  %11174 = vrcp.f32 %v13214_v11 }
 0x450   :  { %vm13230_vm8 = vcmp.eq.f32.partialorder %v16236_v63, 8.507059e+37  ;;  %v11171_v43 = vpop.eup %11170  ;;  %11176 = vpow2.f32 %v2034_v16  ;;  %vm13249_vm13 = vcmp.eq.f32.partialorder %v2398_v31, 8.507059e+37  ;;  %v2458_v32 = vand.u32 2147483647, %v13162_v14 }
 0x451   :  { %v13247_v60 = vpop.eup %11172  ;;  %v2450_v12 = vmul.f32 %v11171_v43, %v13162_v14  ;;  %vm2364_vm1 = vweird.f32 %v13047_v39  ;;  %v2387_v50 = vsel %vm13237_vm3, %v2386_v29, %v2382_v34  ;;  %11178 = vpow2.f32 %v2036_v33 }
 0x452   :  { %v2391_v26 = vsub.f32 1.0, %v2390_v53  ;;  %v2116_v41 = vsel %vm16090_vm0, %v13247_v60, 0.0  ;;  %vm16245_vm11 = vweird.f32 %v13031_v3  ;;  %vm16246_vm14 = vweird.f32 %v12977_v51 }
 0x453   :  { %vm13272_vm9 = vmor %vm16246_vm14, %vm16245_vm11  ;;  %v2401_v10 = vor.u32 1.1754944e-38, %v2400_v28  ;;  %2117 = vadd.xlane.f32.xlu2 %v2116_v41  ;;  %v2451_v8 = vsub.f32 1.0, %v2450_v12  ;;  %v2460_v16 = vand.u32 2147483648, %v13162_v14  ;;  %v2292_v31 = vsel %vm13259_vm7, %v13052_v24, %v2288_v56 }
 0x454   :  { %vm13280_vm15 = vcmp.eq.f32.partialorder %v2368_v17, 8.507059e+37  ;;  %v2392_v33 = vmul.f32 %v11169_v5, %v2391_v26  ;;  %vm2395_vm2 = vweird.f32 %v11169_v5  ;;  %v2297_v51 = vsel %vm13187_vm5, %v13091_v54, %v2292_v31 }
 0x455   :  { %v2307_v63 = vsel %vm13272_vm9, %v13031_v3, %v13103_v20  ;;  %vm16251_vm14 = vweird.f32 %v13116_v57  ;;  %vm16252_vm3 = vweird.f32 %v13042_v21  ;;  %v2388_v56 = vmul.f32 %v12725_v61, %v2387_v50  ;;  %v11175_v54 = vpop.eup %11174 }
 0x456   :  { %vm13295_vm7 = vmor %vm16252_vm3, %vm16251_vm14  ;;  %v2452_v17 = vmul.f32 %v11171_v43, %v2451_v8  ;;  %vm2455_vm11 = vweird.f32 %v11171_v43  ;;  %vm13300_vm0 = vcmp.eq.f32.partialorder %v2458_v32, 8.507059e+37  ;;  %v2393_v34 = vadd.f32 %v11169_v5, %v2392_v33  ;;  %v13311_v30 = vpop.eup %11176 }
 0x457   :  { %v2298_v3 = vmul.f32 %v12671_v42, %v2297_v51  ;;  %v2312_v21 = vsel %vm13207_vm6, %v13075_v40, %v2307_v63  ;;  %v2352_v20 = vsel %vm13295_vm7, %v13116_v57, %v2348_v18  ;;  %vm16257_vm9 = vweird.f32 %v13150_v47  ;;  %v13317_v42 = vpop.eup %11178  ;;  %v16265_v51 = vld [vmem:[#allocation70_spill] sm:$0xff] }
 0x458   :  { %vm2396_vm5 = vmor %vm16257_vm9, %vm2395_vm2  ;;  %v2453_v61 = vadd.f32 %v11171_v43, %v2452_v17  ;;  %v2461_v29 = vor.u32 1.1754944e-38, %v2460_v16  ;;  %v2435_v28 = vmul.f32 %v11175_v54, %v13214_v11  ;;  %vm2439_vm14 = vweird.f32 %v13214_v11 }
 0x459   :  { %v2397_v53 = vsel %vm2396_vm5, %v11169_v5, %v2393_v34  ;;  %vm16258_vm6 = vweird.f32 %v13162_v14  ;;  %v2313_v40 = vmul.f32 %v12674_v9, %v2312_v21  ;;  %v2624_v57 = vpack.c.bf16 %v2298_v3, %v2298_v3 }
 0x45a   :  { %vm2456_vm3 = vmor %vm16258_vm6, %vm2455_vm11  ;;  %v2357_v47 = vsel %vm13230_vm8, %v13199_v44, %v2352_v20  ;;  %v2402_v2 = vsel %vm13249_vm13, %v2401_v10, %v2397_v53  ;;  %v2436_v12 = vsub.f32 1.0, %v2435_v28  ;;  %v2445_v32 = vand.u32 2147483648, %v13214_v11 }
 0x45b   :  { %v2457_v18 = vsel %vm2456_vm3, %v11171_v43, %v2453_v61  ;;  %vm2440_vm2 = vweird.f32 %v11175_v54  ;;  %v2443_v5 = vand.u32 2147483647, %v13214_v11  ;;  %v2625_v37 = vpack.c.bf16 %v2313_v40, %v2313_v40 }
 0x45c   :  { %v2827_v14 = vunpack.c.l.b16 %v2624_v57  ;;  %vm16259_vm7 = vweird.f32 %v13125_v48  ;;  %v2403_v9 = vmul.f32 %v12747_v7, %v2402_v2  ;;  %v2462_v44 = vsel %vm13300_vm0, %v2461_v29, %v2457_v18  ;;  %vm2441_vm0 = vmor %vm2439_vm14, %vm2440_vm2 }
 0x45d   :  { %vm2366_vm11 = vmor %vm2364_vm1, %vm16259_vm7  ;;  %v2437_v19 = vmul.f32 %v11175_v54, %v2436_v12  ;;  %v2358_v43 = vmul.f32 %v12696_v13, %v2357_v47  ;;  %v2630_v35 = vpack.c.bf16 %v2388_v56, %v2388_v56  ;;  %v2828_v50 = vunpack.c.l.b16 %v2625_v37 }
 0x45e   :  { %v2367_v26 = vsel %vm2366_vm11, %v13125_v48, %v13218_v22  ;;  %vm16260_vm8 = vcmask 261120   ;;  %v2446_v10 = vor.u32 1.1754944e-38, %v2445_v32  ;;  %v13346_v8 = vmul.f32 %v12760_v46, %v2462_v44  ;;  %v16261_v48 = vld [vmem:[#allocation65_spill] sm:$0xff] }
 0x45f   :  { %v2128_v41 = vsel %vm16260_vm8, %v13311_v30, 0.0  ;;  %v2438_v23 = vadd.f32 %v11175_v54, %v2437_v19  ;;  %v2372_v7 = vsel %vm13280_vm15, %v13220_v55, %v2367_v26  ;;  %v2628_v39 = vpack.c.bf16 %v2358_v43, %v2358_v43  ;;  %vm16262_vm1 = vmmov %vm16260_vm8 }
 0x460   :  { %2129 = vadd.xlane.f32.xlu1 %v2128_v41  ;;  %v2830_v13 = vpack.c.b16 %v2828_v50, %v2827_v14  ;;  %v2373_v22 = vmul.f32 %v16261_v48, %v2372_v7  ;;  %v2131_v16 = vsel %vm16262_vm1, %v13317_v42, 0.0  ;;  %v2631_v31 = vpack.c.bf16 %v2403_v9, %v2403_v9  ;;  %vm16263_vm15 = vmmov %vm16262_vm1  ;;  %v2094_v48 = vpop.xlane.xlu0 %2093 }
 0x461   :  { %v2442_v33 = vsel %vm2441_vm0, %v11175_v54, %v2438_v23  ;;  %vm2444_vm13 = vcmp.eq.f32.partialorder %v2443_v5, 8.507059e+37  ;;  %2132 = vadd.xlane.f32.xlu2 %v2131_v16  ;;  %v13355_v55 = vadd.s32 128, %v12220_v49  ;;  %vm16264_vm9 = vmmov %vm16262_vm1  ;;  %v2918_v11 = vunpack.c.l.b16 %v2628_v39 }
 0x462   :  { %v2447_v27 = vsel %vm2444_vm13, %v2446_v10, %v2442_v33  ;;  %9534 = vmatmul.msk.bf16.gmra.mxu2 %vm16263_vm15, %v2830_v13  ;;  %9536 = vmatmul.msk.bf16.gmra.mxu3 %vm16264_vm9, %v2830_v13  ;;  %v2629_v46 = vpack.c.bf16 %v2373_v22, %v2373_v22  ;;  %v3007_v24 = vunpack.c.l.b16 %v2630_v35  ;;  %v2635_v49 = vpack.c.bf16 %v13346_v8, %v13346_v8  ;;  %vm16272_vm11 = vmmov %vm16262_vm1 }
 0x463   :  { %v2448_v63 = vmul.f32 %v16265_v51, %v2447_v27  ;;  %vm402_vm5 = vcmp.lt.s32.totalorder %v13355_v55, 160  ;;  %vm406_vm14 = vcmp.ge.s32.totalorder %v13355_v55, 160  ;;  %vm408_vm6 = vcmp.lt.s32.totalorder %v13355_v55, 192  ;;  %vm16273_vm8 = vmmov %vm16262_vm1 }
 0x464   :  { %v2919_v56 = vunpack.c.l.b16 %v2629_v46  ;;  %vm13366_vm3 = vmpackc.low %vm402_vm5, %vm16220_vm12  ;;  %v16266_v17 = vmov 0  ;;  %v3008_v15 = vunpack.c.l.b16 %v2631_v31  ;;  %v16269_v28 = vmov 0 }
 0x465   :  { %v16267_v17 = vsel %vm13366_vm3, 4294967295, %v16266_v17  ;;  %v3001_v54 = vsel %vm13366_vm3, %v12500_v38, 0  ;;  %v3002_v34 = vsel %vm13366_vm3, %v12504_v59, 0  ;;  %v2999_v3 = vsel %vm13366_vm3, %v12518_v45, 0  ;;  %vm410_vm2 = vmand %vm406_vm14, %vm408_vm6 }
 0x466   :  { %16268 = vst [vmem:[#allocation65_spill] sm:$0xff] %v16267_v17  ;;  %v2921_v21 = vpack.c.b16 %v2919_v56, %v2918_v11  ;;  %v3021_v20 = vunpack.c.l.b16 %v3001_v54  ;;  %v3023_v61 = vunpack.c.l.b16 %v3002_v34  ;;  %v3022_v29 = vunpack.c.h.b16 %v3001_v54  ;;  %vm13380_vm7 = vmpackc.low %vm410_vm2, %vm16220_vm12 }
 0x467   :  { %v16270_v28 = vsel %vm13380_vm7, 4294967295, %v16269_v28  ;;  %v2634_v53 = vpack.c.bf16 %v2448_v63, %v2448_v63  ;;  %v3024_v40 = vunpack.c.h.b16 %v3002_v34  ;;  %v3000_v57 = vsel %vm13366_vm3, %v12522_v25, 0  ;;  %vm16274_vm0 = vmmov %vm16262_vm1 }
 0x468   :  { %16271 = vst [vmem:[#allocation70_spill] sm:$0xff] %v16270_v28  ;;  %v3017_v47 = vunpack.c.l.b16 %v2999_v3  ;;  %9538 = vmatmul.msk.bf16.gmra.mxu0 %vm16272_vm11, %v2921_v21  ;;  %9540 = vmatmul.msk.bf16.gmra.mxu1 %vm16273_vm8, %v2921_v21  ;;  %v3027_v2 = vpack.c.b16 %v3023_v61, %v3021_v20  ;;  %v3019_v18 = vunpack.c.l.b16 %v3000_v57  ;;  %v3018_v12 = vunpack.c.h.b16 %v2999_v3  ;;  %vm16275_vm1 = vmmov %vm16274_vm0 }
 0x469   :  { %v3020_v32 = vunpack.c.h.b16 %v3000_v57  ;;  %v3028_v5 = vpack.c.b16 %v3024_v40, %v3022_v29  ;;  %v3092_v37 = vsel %vm13380_vm7, %v12500_v38, 0  ;;  %v3093_v14 = vsel %vm13380_vm7, %v12504_v59, 0  ;;  %vm16276_vm13 = vmmov %vm16274_vm0 }
 0x46a   :  { %v3090_v9 = vsel %vm13380_vm7, %v12518_v45, 0  ;;  %3045 = vmatpush.bf16.msra.mxu2 %v3027_v2  ;;  %v3025_v44 = vpack.c.b16 %v3019_v18, %v3017_v47  ;;  %v3112_v43 = vunpack.c.l.b16 %v3092_v37  ;;  %v3114_v35 = vunpack.c.l.b16 %v3093_v14  ;;  %vm16277_vm15 = vmmov %vm16274_vm0  ;;  %v16278_v2 = vld [vmem:[#allocation71_spill] sm:$0xff] }
 0x46b   :  { %v3026_v19 = vpack.c.b16 %v3020_v32, %v3018_v12  ;;  %3064 = vmatpush.bf16.msra.mxu3 %v3028_v5  ;;  %v3113_v50 = vunpack.c.h.b16 %v3092_v37  ;;  %v3115_v26 = vunpack.c.h.b16 %v3093_v14  ;;  %v3091_v41 = vsel %vm13380_vm7, %v12522_v25, 0  ;;  %v16279_v37 = vld [vmem:[#allocation73_spill] sm:$0xff] }
 0x46c   :  { %v3108_v23 = vunpack.c.l.b16 %v3090_v9  ;;  %v3118_v10 = vpack.c.b16 %v3114_v35, %v3112_v43  ;;  %v3110_v7 = vunpack.c.l.b16 %v3091_v41  ;;  %v3109_v39 = vunpack.c.h.b16 %v3090_v9 }
 0x46d   :  { %v3111_v8 = vunpack.c.h.b16 %v3091_v41  ;;  %v3119_v13 = vpack.c.b16 %v3115_v26, %v3113_v50  ;;  %v3011_v22 = vpack.c.b16 %v3008_v15, %v3007_v24  ;;  %v3099_v33 = vunpack.c.l.b16 %v2635_v49 }
 0x46e   :  { %3046 = vmatpush.bf16.msra.mxu2 %v3025_v44  ;;  %3136 = vmatpush.bf16.msra.mxu0 %v3118_v10  ;;  %v3116_v16 = vpack.c.b16 %v3110_v7, %v3108_v23  ;;  %v3098_v27 = vunpack.c.l.b16 %v2634_v53  ;;  %11180 = vrcp.f32 %v2094_v48  ;;  %v2415_v15 = vand.u32 2147483648, %v2094_v48 }
 0x46f   :  { %3065 = vmatpush.bf16.msra.mxu3 %v3026_v19  ;;  %3155 = vmatpush.bf16.msra.mxu1 %v3119_v13  ;;  %v3117_v31 = vpack.c.b16 %v3111_v8, %v3109_v39  ;;  %vm2409_vm5 = vweird.f32 %v2094_v48  ;;  %v2413_v54 = vand.u32 2147483647, %v2094_v48  ;;  %v16281_v41 = vmov 0 }
 0x470   :  { %v3102_v46 = vpack.c.b16 %v3099_v33, %v3098_v27  ;;  %v2416_v20 = vor.u32 1.1754944e-38, %v2415_v15 }
 0x471   :  { %vm2414_vm6 = vcmp.eq.f32.partialorder %v2413_v54, 8.507059e+37  ;;  %v16284_v54 = vmov 0 }
 0x472   :  { %9541 = vmatmul.msk.bf16.vlgmr.msra.gmra.mxu2 %vm16274_vm0, %v3011_v22  ;;  %9543 = vmatmul.msk.bf16.vlgmr.msra.gmra.mxu3 %vm16275_vm1, %v3011_v22 }
 0x473   :  { %3137 = vmatpush.bf16.msra.mxu0 %v3116_v16  ;;  %3156 = vmatpush.bf16.msra.mxu1 %v3117_v31 }
 0x474   :  { %v11181_v11 = vpop.eup %11180 }
 0x475   :  { %v2405_v51 = vmul.f32 %v11181_v11, %v2094_v48  ;;  %vm2410_vm9 = vweird.f32 %v11181_v11 }
 0x476   :  { %vm2411_vm14 = vmor %vm2409_vm5, %vm2410_vm9  ;;  %vm414_vm9 = vcmp.lt.s32.totalorder %v13355_v55, 224 }
 0x477   :  { %v2406_v63 = vsub.f32 1.0, %v2405_v51 }
 0x478   :  { %9545 = vmatmul.msk.bf16.vlgmr.msra.gmra.mxu0 %vm16276_vm13, %v3102_v46  ;;  %9547 = vmatmul.msk.bf16.vlgmr.msra.gmra.mxu1 %vm16277_vm15, %v3102_v46  ;;  %vm16280_vm13 = vmmov %vm16275_vm1  ;;  %vm412_vm15 = vcmp.ge.s32.totalorder %v13355_v55, 192 }
 0x479   :  { %v2407_v24 = vmul.f32 %v11181_v11, %v2406_v63  ;;  %vm416_vm5 = vmand %vm412_vm15, %vm414_vm9 }
 0x47b   :  { %v2408_v49 = vadd.f32 %v11181_v11, %v2407_v24 }
 0x47d   :  { %v2412_v21 = vsel %vm2411_vm14, %v11181_v11, %v2408_v49  ;;  %vm13415_vm14 = vmpackc.low %vm416_vm5, %vm16220_vm12 }
 0x47e   :  { %v2417_v53 = vsel %vm2414_vm6, %v2416_v20, %v2412_v21  ;;  %v16282_v41 = vsel %vm13415_vm14, 4294967295, %v16281_v41  ;;  %v3183_v23 = vsel %vm13415_vm14, %v12500_v38, 0  ;;  %v3184_v10 = vsel %vm13415_vm14, %v12504_v59, 0  ;;  %v13445_v20 = vpop.f32.mrf.mxu0 }
 0x47f   :  { %v2418_v18 = vmul.f32 %v16278_v2, %v2417_v53  ;;  %16283 = vst [vmem:[#allocation71_spill] sm:$0xff] %v16282_v41  ;;  %v3203_v39 = vunpack.c.l.b16 %v3183_v23  ;;  %v3205_v8 = vunpack.c.l.b16 %v3184_v10  ;;  %v3204_v13 = vunpack.c.h.b16 %v3183_v23  ;;  %v11368_v41 = vld [vmem:[#allocation7 + $0x30] sm:$0xff] }
 0x480   :  { %v3206_v48 = vunpack.c.h.b16 %v3184_v10  ;;  %vm418_vm6 = vcmp.ge.s32.totalorder %v13355_v55, 224 }
 0x481   :  { %v2097_v56 = vpop.xlane.xlu1 %2096  ;;  %v2632_v9 = vpack.c.bf16 %v2418_v18, %v2418_v18  ;;  %v3209_v33 = vpack.c.b16 %v3205_v8, %v3203_v39 }
 0x482   :  { %11182 = vrcp.f32 %v2097_v56  ;;  %v2430_v29 = vand.u32 2147483648, %v2097_v56  ;;  %v2428_v57 = vand.u32 2147483647, %v2097_v56  ;;  %vm2424_vm11 = vweird.f32 %v2097_v56 }
 0x483   :  { %v3009_v19 = vunpack.c.l.b16 %v2632_v9  ;;  %v3210_v27 = vpack.c.b16 %v3206_v48, %v3204_v13  ;;  %3227 = vmatpush.bf16.msrb.mxu2 %v3209_v33 }
 0x484   :  { %v2431_v12 = vor.u32 1.1754944e-38, %v2430_v29  ;;  %vm2429_vm0 = vcmp.eq.f32.partialorder %v2428_v57, 8.507059e+37 }
 0x485   :  { %3246 = vmatpush.bf16.msrb.mxu3 %v3210_v27 }
 0x488   :  { %v11183_v34 = vpop.eup %11182 }
 0x489   :  { %v2420_v3 = vmul.f32 %v11183_v34, %v2097_v56  ;;  %vm2425_vm2 = vweird.f32 %v11183_v34 }
 0x48a   :  { %vm2426_vm8 = vmor %vm2424_vm11, %vm2425_vm2 }
 0x48b   :  { %v2421_v61 = vsub.f32 1.0, %v2420_v3 }
 0x48d   :  { %v2422_v40 = vmul.f32 %v11183_v34, %v2421_v61  ;;  %v13447_v61 = vpop.f32.mrf.mxu1 }
 0x48f   :  { %v2423_v47 = vadd.f32 %v11183_v34, %v2422_v40 }
 0x491   :  { %v2427_v32 = vsel %vm2426_vm8, %v11183_v34, %v2423_v47  ;;  %vm13435_vm8 = vmpackc.low %vm418_vm6, %vm16220_vm12 }
 0x492   :  { %v2432_v5 = vsel %vm2429_vm0, %v2431_v12, %v2427_v32  ;;  %v16285_v54 = vsel %vm13435_vm8, 4294967295, %v16284_v54  ;;  %v3274_v18 = vsel %vm13435_vm8, %v12500_v38, 0  ;;  %v3275_v12 = vsel %vm13435_vm8, %v12504_v59, 0 }
 0x493   :  { %v2433_v14 = vmul.f32 %v16279_v37, %v2432_v5  ;;  %16286 = vst [vmem:[#allocation73_spill] sm:$0xff] %v16285_v54  ;;  %v3294_v37 = vunpack.c.l.b16 %v3274_v18  ;;  %v3295_v9 = vunpack.c.h.b16 %v3274_v18 }
 0x495   :  { %v2633_v44 = vpack.c.bf16 %v2433_v14, %v2433_v14  ;;  %v3296_v14 = vunpack.c.l.b16 %v3275_v12 }
 0x497   :  { %v3010_v43 = vunpack.c.l.b16 %v2633_v44  ;;  %v3297_v44 = vunpack.c.h.b16 %v3275_v12 }
 0x499   :  { %v3012_v35 = vpack.c.b16 %v3010_v43, %v3009_v19  ;;  %v13407_v50 = vpop.xlane.xlu0 %2108  ;;  %v3301_v13 = vpack.c.b16 %v3297_v44, %v3295_v9 }
 0x49a   :  { %11184 = vrcp.f32 %v13407_v50  ;;  %v2490_v11 = vand.u32 2147483648, %v13407_v50  ;;  %vm2484_vm2 = vweird.f32 %v13407_v50  ;;  %v2488_v55 = vand.u32 2147483647, %v13407_v50 }
 0x49b   :  { %9542 = vmatmul.msk.bf16.gmra.mxu2 %vm16275_vm1, %v3012_v35  ;;  %9544 = vmatmul.msk.bf16.gmra.mxu3 %vm16280_vm13, %v3012_v35  ;;  %v2106_v26 = vpop.xlane.xlu2 %2105 }
 0x49c   :  { %11186 = vrcp.f32 %v2106_v26  ;;  %v2473_v51 = vand.u32 2147483647, %v2106_v26  ;;  %v2475_v24 = vand.u32 2147483648, %v2106_v26  ;;  %v2491_v53 = vor.u32 1.1754944e-38, %v2490_v11  ;;  %3337 = vmatpush.bf16.msrb.mxu1 %v3301_v13 }
 0x49d   :  { %vm2469_vm12 = vweird.f32 %v2106_v26  ;;  %vm2489_vm9 = vcmp.eq.f32.partialorder %v2488_v55, 8.507059e+37  ;;  %v13502_v55 = vpop.f32.mrf.mxu0 }
 0x49e   :  { %vm13449_vm1 = vcmp.eq.f32.partialorder %v2473_v51, 8.507059e+37  ;;  %v2476_v2 = vor.u32 1.1754944e-38, %v2475_v24  ;;  %v3181_v24 = vsel %vm13415_vm14, %v12518_v45, 0 }
 0x49f   :  { %v3199_v57 = vunpack.c.l.b16 %v3181_v24 }
 0x4a0   :  { %v11185_v7 = vpop.eup %11184 }
 0x4a1   :  { %v2480_v16 = vmul.f32 %v11185_v7, %v13407_v50  ;;  %vm2485_vm11 = vweird.f32 %v11185_v7  ;;  %v3300_v50 = vpack.c.b16 %v3296_v14, %v3294_v37 }
 0x4a2   :  { %v11187_v22 = vpop.eup %11186  ;;  %vm13456_vm13 = vmor %vm2484_vm2, %vm2485_vm11 }
 0x4a3   :  { %v2465_v31 = vmul.f32 %v11187_v22, %v2106_v26  ;;  %v2481_v46 = vsub.f32 1.0, %v2480_v16  ;;  %v13430_v49 = vpop.xlane.xlu1 %2111  ;;  %vm2470_vm0 = vweird.f32 %v11187_v22  ;;  %3318 = vmatpush.bf16.msrb.mxu0 %v3300_v50 }
 0x4a4   :  { %v13428_v56 = vpop.xlane.xlu2 %2114  ;;  %v13440_v3 = vpop.f32.mrf.mxu2  ;;  %vm2471_vm15 = vmor %vm2469_vm12, %vm2470_vm0  ;;  %v2503_v38 = vand.u32 2147483647, %v13430_v49  ;;  %vm2499_vm6 = vweird.f32 %v13430_v49 }
 0x4a5   :  { %v2466_v63 = vsub.f32 1.0, %v2465_v31  ;;  %v2482_v15 = vmul.f32 %v11185_v7, %v2481_v46  ;;  %11188 = vrcp.f32 %v13428_v56  ;;  %v13442_v21 = vpop.f32.mrf.mxu3  ;;  %v2518_v32 = vand.u32 2147483647, %v13428_v56 }
 0x4a6   :  { %11190 = vrcp.f32 %v13430_v49  ;;  %v2520_v5 = vand.u32 2147483648, %v13428_v56  ;;  %vm2514_vm5 = vweird.f32 %v13428_v56  ;;  %v2505_v31 = vand.u32 2147483648, %v13430_v49 }
 0x4a7   :  { %v2467_v34 = vmul.f32 %v11187_v22, %v2466_v63  ;;  %v2483_v29 = vadd.f32 %v11185_v7, %v2482_v15  ;;  %vm13477_vm2 = vcmp.eq.f32.partialorder %v2518_v32, 8.507059e+37  ;;  %vm13487_vm11 = vcmp.eq.f32.partialorder %v2503_v38, 8.507059e+37 }
 0x4a8   :  { %v2521_v16 = vor.u32 1.1754944e-38, %v2520_v5  ;;  %v3182_v15 = vsel %vm13415_vm14, %v12522_v25, 0  ;;  %v3272_v5 = vsel %vm13435_vm8, %v12518_v45, 0  ;;  %v2506_v9 = vor.u32 1.1754944e-38, %v2505_v31 }
 0x4a9   :  { %v2468_v47 = vadd.f32 %v11187_v22, %v2467_v34  ;;  %v2487_v43 = vsel %vm13456_vm13, %v11185_v7, %v2483_v29  ;;  %v13504_v34 = vpop.f32.mrf.mxu1  ;;  %v3202_v32 = vunpack.c.h.b16 %v3182_v15  ;;  %v3290_v45 = vunpack.c.l.b16 %v3272_v5  ;;  %v2788_v13 = vpop.f32.mrf.mxu0 }
 0x4aa   :  { %v2492_v10 = vsel %vm2489_vm9, %v2491_v53, %v2487_v43 }
 0x4ab   :  { %v2472_v19 = vsel %vm2471_vm15, %v11187_v22, %v2468_v47  ;;  %v11189_v35 = vpop.eup %11188  ;;  %v13482_v8 = vpop.xlane.xlu0 %2123  ;;  %v2493_v46 = vmul.f32 %v12919_v36, %v2492_v10  ;;  %v3201_v47 = vunpack.c.l.b16 %v3182_v15  ;;  %vm16295_vm15 = vcmask 261120  }
 0x4ac   :  { %v2477_v59 = vsel %vm13449_vm1, %v2476_v2, %v2472_v19  ;;  %v11191_v26 = vpop.eup %11190  ;;  %v2510_v23 = vmul.f32 %v11189_v35, %v13428_v56  ;;  %11192 = vrcp.f32 %v13482_v8  ;;  %vm2515_vm0 = vweird.f32 %v11189_v35  ;;  %v13492_v63 = vpop.f32.mrf.mxu2  ;;  %vm16296_vm9 = vmmov %vm16295_vm15 }
 0x4ad   :  { %v2495_v7 = vmul.f32 %v11191_v26, %v13430_v49  ;;  %v2478_v48 = vmul.f32 %v12926_v1, %v2477_v59  ;;  %v13494_v1 = vpop.f32.mrf.mxu3  ;;  %vm2500_vm12 = vweird.f32 %v11191_v26  ;;  %v2637_v29 = vpack.c.bf16 %v2493_v46, %v2493_v46  ;;  %vm2516_vm1 = vmor %vm2514_vm5, %vm2515_vm0 }
 0x4ae   :  { %v2511_v22 = vsub.f32 1.0, %v2510_v23  ;;  %v3200_v2 = vunpack.c.h.b16 %v3181_v24  ;;  %vm2501_vm13 = vmor %vm2499_vm6, %vm2500_vm12  ;;  %v3207_v44 = vpack.c.b16 %v3201_v47, %v3199_v57  ;;  %v3273_v56 = vsel %vm13435_vm8, %v12522_v25, 0 }
 0x4af   :  { %v2496_v33 = vsub.f32 1.0, %v2495_v7  ;;  %v2636_v11 = vpack.c.bf16 %v2478_v48, %v2478_v48  ;;  %v3101_v12 = vunpack.c.l.b16 %v2637_v29  ;;  %v3292_v10 = vunpack.c.l.b16 %v3273_v56  ;;  %vm16297_vm6 = vmmov %vm16296_vm9 }
 0x4b0   :  { %v2512_v51 = vmul.f32 %v11189_v35, %v2511_v22  ;;  %3228 = vmatpush.bf16.msrb.mxu2 %v3207_v44  ;;  %v3208_v59 = vpack.c.b16 %v3202_v32, %v3200_v2  ;;  %v3291_v25 = vunpack.c.h.b16 %v3272_v5 }
 0x4b1   :  { %v2497_v36 = vmul.f32 %v11191_v26, %v2496_v33  ;;  %v3100_v53 = vunpack.c.l.b16 %v2636_v11  ;;  %v2807_v48 = vpop.f32.mrf.mxu1  ;;  %v3298_v22 = vpack.c.b16 %v3292_v10, %v3290_v45  ;;  %v13546_v32 = vpop.f32.mrf.mxu0 }
 0x4b2   :  { %v2513_v40 = vadd.f32 %v11189_v35, %v2512_v51  ;;  %v13512_v37 = vpop.eup %11192  ;;  %3247 = vmatpush.bf16.msrb.mxu3 %v3208_v59 }
 0x4b3   :  { %v2498_v18 = vadd.f32 %v11191_v26, %v2497_v36  ;;  %v2555_v38 = vmul.f32 %v13512_v37, %v13482_v8  ;;  %3319 = vmatpush.bf16.msrb.mxu0 %v3298_v22  ;;  %vm2560_vm5 = vweird.f32 %v13512_v37 }
 0x4b4   :  { %v2517_v14 = vsel %vm2516_vm1, %v11189_v35, %v2513_v40  ;;  %v3103_v35 = vpack.c.b16 %v3101_v12, %v3100_v53  ;;  %v2565_v53 = vand.u32 2147483648, %v13482_v8  ;;  %v2563_v40 = vand.u32 2147483647, %v13482_v8 }
 0x4b5   :  { %v2522_v19 = vsel %vm13477_vm2, %v2521_v16, %v2517_v14  ;;  %v2502_v43 = vsel %vm2501_vm13, %v11191_v26, %v2498_v18  ;;  %v2556_v39 = vsub.f32 1.0, %v2555_v38  ;;  %v3293_v26 = vunpack.c.h.b16 %v3273_v56  ;;  %vm16298_vm2 = vmmov %vm16297_vm6 }
 0x4b6   :  { %v2523_v50 = vmul.f32 %v13022_v62, %v2522_v19  ;;  %v2507_v49 = vsel %vm13487_vm11, %v2506_v9, %v2502_v43  ;;  %9546 = vmatmul.msk.bf16.gmra.mxu0 %vm16295_vm15, %v3103_v35  ;;  %9548 = vmatmul.msk.bf16.gmra.mxu1 %vm16296_vm9, %v3103_v35  ;;  %vm2559_vm11 = vweird.f32 %v13482_v8  ;;  %v2566_v5 = vor.u32 1.1754944e-38, %v2565_v53 }
 0x4b7   :  { %v2508_v23 = vmul.f32 %v13008_v52, %v2507_v49  ;;  %v3299_v27 = vpack.c.b16 %v3293_v26, %v3291_v25  ;;  %v2557_v51 = vmul.f32 %v13512_v37, %v2556_v39  ;;  %vm2561_vm0 = vmor %vm2559_vm11, %vm2560_vm5  ;;  %vm2564_vm12 = vcmp.eq.f32.partialorder %v2563_v40, 8.507059e+37 }
 0x4b8   :  { %v2639_v7 = vpack.c.bf16 %v2523_v50, %v2523_v50  ;;  %v2803_v26 = vadd.f32 %v13447_v61, %v13442_v21 }
 0x4b9   :  { %v2638_v62 = vpack.c.bf16 %v2508_v23, %v2508_v23  ;;  %3338 = vmatpush.bf16.msrb.mxu1 %v3299_v27  ;;  %v2558_v29 = vadd.f32 %v13512_v37, %v2557_v51  ;;  %v13551_v43 = vpop.f32.mrf.mxu1 }
 0x4ba   :  { %v3190_v16 = vunpack.c.l.b16 %v2639_v7  ;;  %v2714_v31 = vpop.f32.mrf.mxu2  ;;  %v2733_v33 = vpop.f32.mrf.mxu3 }
 0x4bb   :  { %v3189_v46 = vunpack.c.l.b16 %v2638_v62  ;;  %v13529_v52 = vadd.f32 %v2788_v13, %v2714_v31  ;;  %v13531_v11 = vadd.f32 %v2807_v48, %v2733_v33  ;;  %v2127_v24 = vpop.xlane.xlu1 %2126  ;;  %v2562_v18 = vsel %vm2561_vm0, %v13512_v37, %v2558_v29 }
 0x4bc   :  { %11194 = vrcp.f32 %v2127_v24  ;;  %v2580_v56 = vand.u32 2147483648, %v2127_v24  ;;  %v2567_v8 = vsel %vm2564_vm12, %v2566_v5, %v2562_v18  ;;  %v2578_v45 = vand.u32 2147483647, %v2127_v24 }
 0x4bd   :  { %v3193_v15 = vpack.c.b16 %v3190_v16, %v3189_v46  ;;  %v2784_v37 = vadd.f32 %v13445_v20, %v13440_v3  ;;  %v2568_v49 = vmul.f32 %v13059_v58, %v2567_v8  ;;  %vm2574_vm13 = vweird.f32 %v2127_v24 }
 0x4be   :  { %v2581_v59 = vor.u32 1.1754944e-38, %v2580_v56  ;;  %vm2579_vm5 = vcmp.eq.f32.partialorder %v2578_v45, 8.507059e+37 }
 0x4bf   :  { %v2121_v36 = vpop.xlane.xlu0 %2120  ;;  %9549 = vmatmul.msk.bf16.vlgmr.msrb.gmra.mxu2 %vm16297_vm6, %v3193_v15  ;;  %9551 = vmatmul.msk.bf16.vlgmr.msrb.gmra.mxu3 %vm16298_vm2, %v3193_v15  ;;  %v2642_v16 = vpack.c.bf16 %v2568_v49, %v2568_v49 }
 0x4c0   :  { %11196 = vrcp.f32 %v2121_v36  ;;  %v2548_v10 = vand.u32 2147483647, %v2121_v36  ;;  %v2550_v25 = vand.u32 2147483648, %v2121_v36  ;;  %vm2544_vm6 = vweird.f32 %v2121_v36 }
 0x4c2   :  { %v13541_v57 = vpop.f32.mrf.mxu2  ;;  %v13543_v47 = vpop.f32.mrf.mxu3  ;;  %vm2549_vm11 = vcmp.eq.f32.partialorder %v2548_v10, 8.507059e+37  ;;  %v2551_v61 = vor.u32 1.1754944e-38, %v2550_v25 }
 0x4c3   :  { %v11195_v2 = vpop.eup %11194 }
 0x4c4   :  { %v2570_v12 = vmul.f32 %v11195_v2, %v2127_v24  ;;  %vm2575_vm1 = vweird.f32 %v11195_v2 }
 0x4c5   :  { %vm2576_vm15 = vmor %vm2574_vm13, %vm2575_vm1 }
 0x4c6   :  { %v13548_v14 = vpop.xlane.xlu2 %2117  ;;  %v11197_v9 = vpop.eup %11196  ;;  %v2571_v44 = vsub.f32 1.0, %v2570_v12  ;;  %v3280_v12 = vunpack.c.l.b16 %v2642_v16 }
 0x4c7   :  { %11198 = vrcp.f32 %v13548_v14  ;;  %v2540_v19 = vmul.f32 %v11197_v9, %v2121_v36  ;;  %vm2545_vm9 = vweird.f32 %v11197_v9  ;;  %v2957_v62 = vpop.f32.mrf.mxu0  ;;  %v2976_v36 = vpop.f32.mrf.mxu1  ;;  %v2533_v29 = vand.u32 2147483647, %v13548_v14 }
 0x4c8   :  { %v2572_v38 = vmul.f32 %v11195_v2, %v2571_v44  ;;  %vm13561_vm2 = vmor %vm2544_vm6, %vm2545_vm9  ;;  %vm2529_vm12 = vweird.f32 %v13548_v14 }
 0x4c9   :  { %v2541_v50 = vsub.f32 1.0, %v2540_v19  ;;  %vm2534_vm13 = vcmp.eq.f32.partialorder %v2533_v29, 8.507059e+37 }
 0x4ca   :  { %v2573_v35 = vadd.f32 %v11195_v2, %v2572_v38  ;;  %v2866_v7 = vpop.f32.mrf.mxu2 }
 0x4cb   :  { %v2542_v23 = vmul.f32 %v11197_v9, %v2541_v50  ;;  %v2895_v48 = vadd.f32 %v2866_v7, %v2784_v37  ;;  %v2885_v3 = vpop.f32.mrf.mxu3 }
 0x4cc   :  { %v2577_v13 = vsel %vm2576_vm15, %v11195_v2, %v2573_v35  ;;  %v2896_v27 = vadd.f32 %v2885_v3, %v2803_v26  ;;  %vm16301_vm15 = vcmask 261120  }
 0x4cd   :  { %v11199_v39 = vpop.eup %11198  ;;  %v2582_v20 = vsel %vm2579_vm5, %v2581_v59, %v2577_v13  ;;  %v2543_v58 = vadd.f32 %v11197_v9, %v2542_v23  ;;  %v13565_v21 = vadd.f32 %v2957_v62, %v2895_v48  ;;  %vm16302_vm9 = vmmov %vm16301_vm15 }
 0x4ce   :  { %v2525_v22 = vmul.f32 %v11199_v39, %v13548_v14  ;;  %v2583_v31 = vmul.f32 %v13152_v0, %v2582_v20  ;;  %v2535_v0 = vand.u32 2147483648, %v13548_v14  ;;  %vm2530_vm0 = vweird.f32 %v11199_v39 }
 0x4cf   :  { %v2547_v24 = vsel %vm13561_vm2, %v11197_v9, %v2543_v58  ;;  %v13571_v18 = vadd.f32 %v2976_v36, %v2896_v27  ;;  %vm2531_vm1 = vmor %vm2529_vm12, %vm2530_vm0  ;;  %v13582_v26 = vpop.f32.mrf.mxu0  ;;  %v13584_v13 = vpop.f32.mrf.mxu1 }
 0x4d0   :  { %v2526_v46 = vsub.f32 1.0, %v2525_v22  ;;  %v2643_v15 = vpack.c.bf16 %v2583_v31, %v2583_v31  ;;  %v2552_v2 = vsel %vm2549_vm11, %v2551_v61, %v2547_v24  ;;  %v2536_v9 = vor.u32 1.1754944e-38, %v2535_v0 }
 0x4d1   :  { %v2553_v8 = vmul.f32 %v13183_v6, %v2552_v2 }
 0x4d2   :  { %v2527_v53 = vmul.f32 %v11199_v39, %v2526_v46  ;;  %v3281_v5 = vunpack.c.l.b16 %v2643_v15  ;;  %v13578_v23 = vpop.f32.mrf.mxu2 }
 0x4d3   :  { %v2130_v51 = vpop.xlane.xlu1 %2129  ;;  %v2641_v37 = vpack.c.bf16 %v2553_v8, %v2553_v8  ;;  %v13580_v10 = vpop.f32.mrf.mxu3 }
 0x4d4   :  { %11200 = vrcp.f32 %v2130_v51  ;;  %v2133_v40 = vpop.xlane.xlu2 %2132  ;;  %v2528_v44 = vadd.f32 %v11199_v39, %v2527_v53  ;;  %v3284_v56 = vpack.c.b16 %v3281_v5, %v3280_v12  ;;  %v2593_v7 = vand.u32 2147483647, %v2130_v51 }
 0x4d5   :  { %11202 = vrcp.f32 %v2133_v40  ;;  %v3192_v25 = vunpack.c.l.b16 %v2641_v37  ;;  %v2610_v62 = vand.u32 2147483648, %v2133_v40  ;;  %vm2589_vm6 = vweird.f32 %v2130_v51  ;;  %v10804_v37 = vld [vmem:[#allocation14 + $0xf4] sm:$0xf0] }
 0x4d6   :  { %v2532_v19 = vsel %vm2531_vm1, %v11199_v39, %v2528_v44  ;;  %9553 = vmatmul.msk.bf16.vlgmr.msrb.gmra.mxu0 %vm16301_vm15, %v3284_v56  ;;  %9555 = vmatmul.msk.bf16.vlgmr.msrb.gmra.mxu1 %vm16302_vm9, %v3284_v56  ;;  %v2595_v39 = vand.u32 2147483648, %v2130_v51  ;;  %vm2604_vm0 = vweird.f32 %v2133_v40  ;;  %vm2594_vm12 = vcmp.eq.f32.partialorder %v2593_v7, 8.507059e+37  ;;  %vm16303_vm1 = vmmov %vm16302_vm9  ;;  %v10786_v7 = vld [vmem:[#allocation14 + $0x64] sm:$0xf0] }
 0x4d7   :  { %v2537_v45 = vsel %vm2534_vm13, %v2536_v9, %v2532_v19  ;;  %vm16304_vm13 = vmmov %vm16303_vm1  ;;  %v2611_v61 = vor.u32 1.1754944e-38, %v2610_v62  ;;  %v10785_v62 = vld [vmem:[#allocation14 + $0x64] sm:$0xf] }
 0x4d8   :  { %v2538_v49 = vmul.f32 %v13247_v60, %v2537_v45  ;;  %v2608_v60 = vand.u32 2147483647, %v2133_v40  ;;  %v2596_v31 = vor.u32 1.1754944e-38, %v2595_v39  ;;  %v9679_v45 = vld [vmem:[#allocation14 + $0xf0] sm:$0xf] }
 0x4d9   :  { %v9671_v39 = vld [vmem:[#allocation14 + $0xe0] sm:$0xf] }
 0x4da   :  { %v11201_v38 = vpop.eup %11200  ;;  %v2640_v6 = vpack.c.bf16 %v2538_v49, %v2538_v49  ;;  %vm2609_vm9 = vcmp.eq.f32.partialorder %v2608_v60, 8.507059e+37  ;;  %v9680_v49 = vor.u32 %v10804_v37, %v9679_v45  ;;  %v10802_v60 = vld [vmem:[#allocation14 + $0xe4] sm:$0xf0]  ;;  %v9593_v37 = vld [vmem:[#allocation14 + $0x48] sm:$0xf0] }
 0x4db   :  { %v2585_v50 = vmul.f32 %v11201_v38, %v2130_v51  ;;  %v11203_v35 = vpop.eup %11202  ;;  %vm2590_vm5 = vweird.f32 %v11201_v38 }
 0x4dc   :  { %v2600_v59 = vmul.f32 %v11203_v35, %v2133_v40  ;;  %v3191_v20 = vunpack.c.l.b16 %v2640_v6  ;;  %vm2605_vm2 = vweird.f32 %v11203_v35  ;;  %vm2591_vm11 = vmor %vm2589_vm6, %vm2590_vm5  ;;  %3579 = vmatpush.bf16.msra.mxu3 %v9680_v49 }
 0x4dd   :  { %v2586_v14 = vsub.f32 1.0, %v2585_v50  ;;  %vm2606_vm15 = vmor %vm2604_vm0, %vm2605_vm2  ;;  %v9617_v50 = vld [vmem:[#allocation14 + $0x78] sm:$0xf0] }
 0x4de   :  { %v2601_v48 = vsub.f32 1.0, %v2600_v59  ;;  %v3194_v16 = vpack.c.b16 %v3192_v25, %v3191_v20  ;;  %vm16305_vm5 = vmmov %vm16303_vm1  ;;  %v10803_v59 = vld [vmem:[#allocation14 + $0xf4] sm:$0xf]  ;;  %v9607_v25 = vld [vmem:[#allocation14 + $0x60] sm:$0xf] }
 0x4df   :  { %v2587_v3 = vmul.f32 %v11201_v38, %v2586_v14  ;;  %vm16306_vm6 = vmmov %vm16303_vm1  ;;  %v9681_v14 = vld [vmem:[#allocation14 + $0xf8] sm:$0xf0]  ;;  %v9608_v20 = vor.u32 %v10786_v7, %v9607_v25  ;;  %v10780_v25 = vld [vmem:[#allocation14 + $0x34] sm:$0xf0] }
 0x4e0   :  { %v2602_v58 = vmul.f32 %v11203_v35, %v2601_v48  ;;  %9550 = vmatmul.msk.bf16.gmra.mxu2 %vm16303_vm1, %v3194_v16  ;;  %9552 = vmatmul.msk.bf16.gmra.mxu3 %vm16304_vm13, %v3194_v16  ;;  %v9684_v6 = vor.u32 %v10803_v59, %v9681_v14  ;;  %v9657_v59 = vld [vmem:[#allocation14 + $0xc8] sm:$0xf0]  ;;  %v9647_v7 = vld [vmem:[#allocation14 + $0xb0] sm:$0xf] }
 0x4e1   :  { %v2588_v22 = vadd.f32 %v11201_v38, %v2587_v3 }
 0x4e2   :  { %v2603_v33 = vadd.f32 %v11203_v35, %v2602_v58  ;;  %3617 = vmatpush.bf16.msra.mxu1 %v9684_v6  ;;  %v9609_v58 = vld [vmem:[#allocation14 + $0x68] sm:$0xf0]  ;;  %v9583_v6 = vld [vmem:[#allocation14 + $0x30] sm:$0xf] }
 0x4e3   :  { %v2592_v27 = vsel %vm2591_vm11, %v11201_v38, %v2588_v22  ;;  %v10788_v38 = vld [vmem:[#allocation14 + $0x74] sm:$0xf0]  ;;  %v9672_v22 = vor.u32 %v10802_v60, %v9671_v39  ;;  %v9612_v16 = vor.u32 %v10785_v62, %v9609_v58  ;;  %v9584_v39 = vor.u32 %v10780_v25, %v9583_v6  ;;  %v10779_v60 = vld [vmem:[#allocation14 + $0x34] sm:$0xf]  ;;  %v9585_v62 = vld [vmem:[#allocation14 + $0x38] sm:$0xf0] }
 0x4e4   :  { %v2597_v46 = vsel %vm2594_vm12, %v2596_v31, %v2592_v27  ;;  %v2607_v24 = vsel %vm2606_vm15, %v11203_v35, %v2603_v33  ;;  %v10801_v31 = vld [vmem:[#allocation14 + $0xe4] sm:$0xf]  ;;  %v9673_v33 = vld [vmem:[#allocation14 + $0xe8] sm:$0xf0] }
 0x4e5   :  { %v2598_v51 = vmul.f32 %v13311_v30, %v2597_v46  ;;  %v2612_v15 = vsel %vm2609_vm9, %v2611_v61, %v2607_v24  ;;  %v2871_v36 = vpop.f32.mrf.mxu2  ;;  %v2890_v29 = vpop.f32.mrf.mxu3  ;;  %v9676_v27 = vor.u32 %v10801_v31, %v9673_v33  ;;  %3580 = vmatpush.bf16.msra.mxu3 %v9672_v22  ;;  %v9599_v61 = vld [vmem:[#allocation14 + $0x50] sm:$0xf]  ;;  %v10784_v46 = vld [vmem:[#allocation14 + $0x54] sm:$0xf0]  ;;  %v9588_v22 = vor.u32 %v10779_v60, %v9585_v62  ;;  %v9649_v31 = vld [vmem:[#allocation14 + $0xb8] sm:$0xf0] }
 0x4e6   :  { %v2613_v0 = vmul.f32 %v13317_v42, %v2612_v15  ;;  %v2899_v40 = vadd.f32 %v2871_v36, %v13529_v52  ;;  %v2900_v2 = vadd.f32 %v2890_v29, %v13531_v11  ;;  %v2962_v12 = vpop.f32.mrf.mxu0  ;;  %v2981_v5 = vpop.f32.mrf.mxu1  ;;  %v9615_v42 = vld [vmem:[#allocation14 + $0x70] sm:$0xf]  ;;  %v10787_v11 = vld [vmem:[#allocation14 + $0x74] sm:$0xf]  ;;  %v9600_v24 = vor.u32 %v10784_v46, %v9599_v61  ;;  %v10800_v15 = vld [vmem:[#allocation14 + $0xd4] sm:$0xf0] }
 0x4e7   :  { %v2644_v53 = vpack.c.bf16 %v2598_v51, %v2598_v51  ;;  %v9616_v52 = vor.u32 %v10788_v38, %v9615_v42  ;;  %v9620_v35 = vor.u32 %v10787_v11, %v9617_v50  ;;  %3618 = vmatpush.bf16.msra.mxu1 %v9676_v27  ;;  %v9663_v51 = vld [vmem:[#allocation14 + $0xd0] sm:$0xf]  ;;  %v10783_v36 = vld [vmem:[#allocation14 + $0x54] sm:$0xf]  ;;  %v9601_v29 = vld [vmem:[#allocation14 + $0x58] sm:$0xf0] }
 0x4e8   :  { %v2645_v44 = vpack.c.bf16 %v2613_v0, %v2613_v0  ;;  %v13592_v56 = vadd.f32 %v2962_v12, %v2899_v40  ;;  %v13594_v8 = vadd.f32 %v2981_v5, %v2900_v2  ;;  %v9664_v0 = vor.u32 %v10800_v15, %v9663_v51  ;;  %v10799_v40 = vld [vmem:[#allocation14 + $0xd4] sm:$0xf]  ;;  %v9665_v2 = vld [vmem:[#allocation14 + $0xd8] sm:$0xf0]  ;;  %v9591_v12 = vld [vmem:[#allocation14 + $0x40] sm:$0xf] }
 0x4e9   :  { %v3282_v9 = vunpack.c.l.b16 %v2644_v53  ;;  %3560 = vmatpush.bf16.msra.mxu2 %v9616_v52  ;;  %3598 = vmatpush.bf16.msra.mxu0 %v9620_v35  ;;  %v9604_v53 = vor.u32 %v10783_v36, %v9601_v29  ;;  %v10798_v42 = vld [vmem:[#allocation14 + $0xc4] sm:$0xf0]  ;;  %v10781_v52 = vld [vmem:[#allocation14 + $0x44] sm:$0xf]  ;;  %v9639_v36 = vld [vmem:[#allocation14 + $0xa0] sm:$0xf] }
 0x4ea   :  { %v3283_v30 = vunpack.c.l.b16 %v2645_v44  ;;  %3581 = vmatpush.bf16.msra.mxu3 %v9664_v0  ;;  %v10797_v11 = vld [vmem:[#allocation14 + $0xc4] sm:$0xf]  ;;  %v9596_v35 = vor.u32 %v10781_v52, %v9593_v37  ;;  %v10778_v15 = vld [vmem:[#allocation14 + $0x24] sm:$0xf0]  ;;  %v10792_v52 = vld [vmem:[#allocation14 + $0x94] sm:$0xf0] }
 0x4eb   :  { %v9660_v14 = vor.u32 %v10797_v11, %v9657_v59  ;;  %v10794_v0 = vld [vmem:[#allocation14 + $0xa4] sm:$0xf0]  ;;  %v9569_v59 = vld [vmem:[#allocation14 + $0x18] sm:$0xf0] }
 0x4ec   :  { %v3285_v19 = vpack.c.b16 %v3283_v30, %v3282_v9  ;;  %v9668_v9 = vor.u32 %v10799_v40, %v9665_v2  ;;  %v10782_v30 = vld [vmem:[#allocation14 + $0x44] sm:$0xf0]  ;;  %v9577_v40 = vld [vmem:[#allocation14 + $0x28] sm:$0xf0]  ;;  %v9640_v2 = vor.u32 %v10794_v0, %v9639_v36  ;;  %v10789_v0 = vld [vmem:[#allocation14 + $0x84] sm:$0xf] }
 0x4ed   :  { %v13598_v48 = vpop.f32.mrf.mxu2  ;;  %v13600_v3 = vpop.f32.mrf.mxu3  ;;  %3561 = vmatpush.bf16.msra.mxu2 %v9608_v20  ;;  %3599 = vmatpush.bf16.msra.mxu0 %v9612_v16  ;;  %v9592_v38 = vor.u32 %v10782_v30, %v9591_v12  ;;  %v10796_v20 = vld [vmem:[#allocation14 + $0xb4] sm:$0xf0]  ;;  %v10795_v16 = vld [vmem:[#allocation14 + $0xb4] sm:$0xf]  ;;  %v9641_v30 = vld [vmem:[#allocation14 + $0xa8] sm:$0xf0] }
 0x4ee   :  { %9554 = vmatmul.msk.bf16.gmra.mxu0 %vm16305_vm5, %v3285_v19  ;;  %9556 = vmatmul.msk.bf16.gmra.mxu1 %vm16306_vm6, %v3285_v19  ;;  %v13602_v5 = vpop.f32.mrf.mxu0  ;;  %v13604_v44 = vpop.f32.mrf.mxu1  ;;  %v9655_v19 = vld [vmem:[#allocation14 + $0xc0] sm:$0xf]  ;;  %v9648_v58 = vor.u32 %v10796_v20, %v9647_v7  ;;  %v9652_v61 = vor.u32 %v10795_v16, %v9649_v31 }
 0x4ef   :  { %v9656_v45 = vor.u32 %v10798_v42, %v9655_v19  ;;  %3619 = vmatpush.bf16.msra.mxu1 %v9668_v9  ;;  %v10793_v9 = vld [vmem:[#allocation14 + $0xa4] sm:$0xf]  ;;  %v9567_v19 = vld [vmem:[#allocation14 + $0x10] sm:$0xf]  ;;  %v9623_v16 = vld [vmem:[#allocation14 + $0x80] sm:$0xf] }
 0x4f0   :  { %v9644_v42 = vor.u32 %v10793_v9, %v9641_v30 }
 0x4f1   :  { %3562 = vmatpush.bf16.msra.mxu2 %v9600_v24  ;;  %3600 = vmatpush.bf16.msra.mxu0 %v9604_v53  ;;  %v9575_v24 = vld [vmem:[#allocation14 + $0x20] sm:$0xf]  ;;  %v10777_v53 = vld [vmem:[#allocation14 + $0x24] sm:$0xf] }
 0x4f2   :  { %3582 = vmatpush.bf16.msra.mxu3 %v9656_v45  ;;  %v9576_v29 = vor.u32 %v10778_v15, %v9575_v24  ;;  %v9580_v12 = vor.u32 %v10777_v53, %v9577_v40  ;;  %v9631_v45 = vld [vmem:[#allocation14 + $0x90] sm:$0xf]  ;;  %v10773_v24 = vld [vmem:[#allocation14 + $0x4] sm:$0xf]  ;;  %v9561_v15 = vld [vmem:[#allocation14 + $0x8] sm:$0xf0] }
 0x4f3   :  { %3620 = vmatpush.bf16.msra.mxu1 %v9660_v14  ;;  %v9632_v11 = vor.u32 %v10792_v52, %v9631_v45  ;;  %v10791_v14 = vld [vmem:[#allocation14 + $0x94] sm:$0xf]  ;;  %v9625_v53 = vld [vmem:[#allocation14 + $0x88] sm:$0xf0]  ;;  %v2805_v45 = vadd.f32 %v13504_v34, %v13494_v1 }
 0x4f5   :  { %v13606_v50 = vpop.f32.mrf.mxu2  ;;  %v13608_v49 = vpop.f32.mrf.mxu3  ;;  %3563 = vmatpush.bf16.msra.mxu2 %v9592_v38  ;;  %3601 = vmatpush.bf16.msra.mxu0 %v9596_v35  ;;  %v10776_v38 = vld [vmem:[#allocation14 + $0x14] sm:$0xf0]  ;;  %v10775_v35 = vld [vmem:[#allocation14 + $0x14] sm:$0xf] }
 0x4f6   :  { %v13610_v33 = vpop.f32.mrf.mxu0  ;;  %v13612_v27 = vpop.f32.mrf.mxu1  ;;  %3583 = vmatpush.bf16.msra.mxu3 %v9648_v58  ;;  %v9568_v37 = vor.u32 %v10776_v38, %v9567_v19  ;;  %v9572_v7 = vor.u32 %v10775_v35, %v9569_v59  ;;  %v9559_v58 = vld [vmem:[#allocation14] sm:$0xf]  ;;  %v2786_v38 = vadd.f32 %v13502_v55, %v13492_v63  ;;  %v2898_v35 = vadd.f32 %v13580_v10, %v2805_v45 }
 0x4f7   :  { %3621 = vmatpush.bf16.msra.mxu1 %v9652_v61  ;;  %v10790_v61 = vld [vmem:[#allocation14 + $0x84] sm:$0xf0]  ;;  %v3078_v63 = vadd.f32 %v13608_v49, %v13571_v18 }
 0x4f8   :  { %v9624_v36 = vor.u32 %v10790_v61, %v9623_v16 }
 0x4f9   :  { %3564 = vmatpush.bf16.msra.mxu2 %v9584_v39  ;;  %3602 = vmatpush.bf16.msra.mxu0 %v9588_v22  ;;  %v9633_v39 = vld [vmem:[#allocation14 + $0x98] sm:$0xf0]  ;;  %v10774_v22 = vld [vmem:[#allocation14 + $0x4] sm:$0xf0] }
 0x4fa   :  { %3584 = vmatpush.bf16.msra.mxu3 %v9640_v2  ;;  %v9636_v20 = vor.u32 %v10791_v14, %v9633_v39  ;;  %v9560_v31 = vor.u32 %v10774_v22, %v9559_v58  ;;  %v2989_v14 = vadd.f32 %v13584_v13, %v2898_v35 }
 0x4fb   :  { %3622 = vmatpush.bf16.msra.mxu1 %v9644_v42 }
 0x4fd   :  { %v13614_v46 = vpop.f32.mrf.mxu2  ;;  %v13616_v51 = vpop.f32.mrf.mxu3  ;;  %3565 = vmatpush.bf16.msra.mxu2 %v9576_v29  ;;  %3603 = vmatpush.bf16.msra.mxu0 %v9580_v12  ;;  %v9564_v29 = vor.u32 %v10773_v24, %v9561_v15  ;;  %v9628_v12 = vor.u32 %v10789_v0, %v9625_v53 }
 0x4fe   :  { %v3141_v6 = vpop.f32.mrf.mxu0  ;;  %v3160_v25 = vpop.f32.mrf.mxu1  ;;  %3585 = vmatpush.bf16.msra.mxu3 %v9632_v11  ;;  %v2897_v11 = vadd.f32 %v13578_v23, %v2786_v38  ;;  %v3080_v55 = vadd.f32 %v13616_v51, %v2989_v14 }
 0x4ff   :  { %3623 = vmatpush.bf16.msra.mxu1 %v9636_v20  ;;  %v3077_v20 = vadd.f32 %v13606_v50, %v13565_v21 }
 0x500   :  { %v2988_v59 = vadd.f32 %v13582_v26, %v2897_v11  ;;  %v3169_v26 = vadd.f32 %v13612_v27, %v3078_v63  ;;  %v3171_v13 = vadd.f32 %v3160_v25, %v3080_v55  ;;  %v2810_v27 = vadd.f32 %v13551_v43, %v13543_v47 }
 0x501   :  { %3566 = vmatpush.bf16.msra.mxu2 %v9568_v37  ;;  %3604 = vmatpush.bf16.msra.mxu0 %v9572_v7  ;;  %v3168_v10 = vadd.f32 %v13610_v33, %v3077_v20  ;;  %v2791_v33 = vadd.f32 %v13546_v32, %v13541_v57 }
 0x502   :  { %3586 = vmatpush.bf16.msra.mxu3 %v9624_v36  ;;  %v3079_v1 = vadd.f32 %v13614_v46, %v2988_v59 }
 0x503   :  { %3624 = vmatpush.bf16.msra.mxu1 %v9628_v12  ;;  %v2901_v36 = vadd.f32 %v13598_v48, %v2791_v33 }
 0x504   :  { %v3170_v58 = vadd.f32 %v3141_v6, %v3079_v1 }
 0x505   :  { %3567 = vmatpush.bf16.msra.mxu2 %v9560_v31  ;;  %3605 = vmatpush.bf16.msra.mxu0 %v9564_v29  ;;  %v2902_v29 = vadd.f32 %v13600_v3, %v2810_v27  ;;  %v2992_v0 = vadd.f32 %v13602_v5, %v2901_v36 }
 0x507   :  { %v2993_v53 = vadd.f32 %v13604_v44, %v2902_v29 }
 0x51e   :  { %v13618_v60 = vpop.f32.mrf.mxu2  ;;  %v13620_v62 = vpop.f32.mrf.mxu3 }
 0x51f   :  { %v3081_v57 = vadd.f32 %v13618_v60, %v13592_v56  ;;  %v3082_v47 = vadd.f32 %v13620_v62, %v13594_v8 }
 0x526   :  { %v3055_v9 = vpop.f32.mrf.mxu2  ;;  %v3074_v30 = vpop.f32.mrf.mxu3 }
 0x527   :  { %v3083_v32 = vadd.f32 %v3055_v9, %v2992_v0  ;;  %v3084_v43 = vadd.f32 %v3074_v30, %v2993_v53 }
 0x533   :  { %v13622_v40 = vpop.f32.mrf.mxu0  ;;  %v13624_v2 = vpop.f32.mrf.mxu1 }
 0x534   :  { %v3172_v48 = vadd.f32 %v13622_v40, %v3081_v57  ;;  %v3173_v3 = vadd.f32 %v13624_v2, %v3082_v47  ;;  %v3390_v40 = vld [vmem:[%s16307_s26] sm:$0x3]  ;;  %v11362_v47 = vld [vmem:[#allocation2 + $0x28] sm:$0xff] }
 0x535   :  { %v3397_v2 = vperm.slane %v3390_v40, 1 }
 0x53b   :  { %v3146_v19 = vpop.f32.mrf.mxu0  ;;  %v3165_v42 = vpop.f32.mrf.mxu1 }
 0x53c   :  { %v3175_v5 = vadd.f32 %v3165_v42, %v3084_v43  ;;  %v3396_v42 = vperm.slane %v3390_v40, 0  ;;  %v11363_v43 = vld [vmem:[#allocation2 + $0x20] sm:$0xff] }
 0x542   :  { %v3230_v52 = vpop.f32.mrf.mxu2  ;;  %v3249_v37 = vpop.f32.mrf.mxu3 }
 0x543   :  { %v3259_v22 = vadd.f32 %v3230_v52, %v3168_v10  ;;  %v3260_v16 = vadd.f32 %v3249_v37, %v3169_v26  ;;  %v3174_v37 = vadd.f32 %v3146_v19, %v3083_v32  ;;  %v11358_v26 = vld [vmem:[#allocation2 + $0x8] sm:$0xff] }
 0x54a   :  { %v3232_v34 = vpop.f32.mrf.mxu2  ;;  %v3251_v23 = vpop.f32.mrf.mxu3 }
 0x54b   :  { %v3261_v31 = vadd.f32 %v3232_v34, %v3170_v58  ;;  %v3262_v61 = vadd.f32 %v3251_v23, %v3171_v13  ;;  %v11359_v13 = vld [vmem:[#allocation2] sm:$0xff] }
 0x553   :  { %v3321_v7 = vpop.f32.mrf.mxu0  ;;  %v3340_v39 = vpop.f32.mrf.mxu1 }
 0x554   :  { %v3350_v24 = vadd.f32 %v3321_v7, %v3259_v22  ;;  %v3351_v18 = vadd.f32 %v3340_v39, %v3260_v16 }
 0x55b   :  { %v3323_v21 = vpop.f32.mrf.mxu0  ;;  %v3342_v50 = vpop.f32.mrf.mxu1 }
 0x55c   :  { %v3352_v49 = vadd.f32 %v3323_v21, %v3261_v31  ;;  %v3353_v46 = vadd.f32 %v3342_v50, %v3262_v61 }
 0x55e   :  { %v3391_v15 = vpack.c.bf16 %v3352_v49, %v3350_v24  ;;  %v3392_v51 = vpack.c.bf16 %v3353_v46, %v3351_v18  ;;  %v11360_v46 = vld [vmem:[#allocation2 + $0x10] sm:$0xff] }
 0x560   :  { %3568 = vmatmul.bf16.vlgmr.msra.gmra.mxu2 %v3391_v15  ;;  %3587 = vmatmul.bf16.vlgmr.msra.gmra.mxu3 %v3392_v51 }
 0x561   :  { %3606 = vmatmul.bf16.vlgmr.msra.gmra.mxu0 %v3391_v15  ;;  %3625 = vmatmul.bf16.vlgmr.msra.gmra.mxu1 %v3392_v51  ;;  %v11361_v51 = vld [vmem:[#allocation2 + $0x18] sm:$0xff] }
 0x563   :  { %v3235_v6 = vpop.f32.mrf.mxu2  ;;  %v3254_v25 = vpop.f32.mrf.mxu3 }
 0x564   :  { %v3263_v11 = vadd.f32 %v3235_v6, %v3172_v48  ;;  %v3264_v44 = vadd.f32 %v3254_v25, %v3173_v3 }
 0x56b   :  { %v3326_v12 = vpop.f32.mrf.mxu0  ;;  %v3345_v38 = vpop.f32.mrf.mxu1 }
 0x56c   :  { %v3237_v45 = vpop.f32.mrf.mxu2  ;;  %v3256_v52 = vpop.f32.mrf.mxu3  ;;  %v3354_v56 = vadd.f32 %v3326_v12, %v3263_v11  ;;  %v3355_v60 = vadd.f32 %v3345_v38, %v3264_v44 }
 0x56d   :  { %v3265_v35 = vadd.f32 %v3237_v45, %v3174_v37  ;;  %v3266_v59 = vadd.f32 %v3256_v52, %v3175_v5 }
 0x573   :  { %v3328_v14 = vpop.f32.mrf.mxu0  ;;  %v3347_v7 = vpop.f32.mrf.mxu1 }
 0x574   :  { %v3356_v39 = vadd.f32 %v3328_v14, %v3265_v35  ;;  %v3357_v8 = vadd.f32 %v3347_v7, %v3266_v59  ;;  %v11364_v59 = vld [vmem:[#allocation2 + $0x30] sm:$0xff]  ;;  %v11365_v7 = vld [vmem:[#allocation2 + $0x38] sm:$0xff] }
 0x576   :  { %v3393_v62 = vpack.c.bf16 %v3356_v39, %v3354_v56  ;;  %v3394_v9 = vpack.c.bf16 %v3357_v8, %v3355_v60  ;;  %v11802_v39 = vmov 256.0  }
 0x577   :  { %11204 = vrcp.f32 %v11802_v39  ;;  %v363_v39 = vld [vmem:[#allocation8 + $0x38] sm:$0xff] }
 0x578   :  { %3573 = vmatmul.bf16.gmra.mxu2 %v3393_v62  ;;  %3592 = vmatmul.bf16.gmra.mxu3 %v3394_v9 }
 0x579   :  { %3611 = vmatmul.bf16.gmra.mxu0 %v3393_v62  ;;  %3630 = vmatmul.bf16.gmra.mxu1 %v3394_v9 }
 0x57d   :  { %v11205_v8 = vpop.eup %11204 }
 0x57e   :  { %v3659_v62 = vmul.f32 256.0, %v11205_v8  ;;  %vm3663_vm2 = vweird.f32 %v11205_v8 }
 0x580   :  { %v3660_v9 = vsub.f32 1.0, %v3659_v62 }
 0x582   :  { %v3661_v40 = vmul.f32 %v11205_v8, %v3660_v9 }
 0x5de   :  { %v3607_v30 = vpop.f32.mrf.mxu0  ;;  %v3626_v20 = vpop.f32.mrf.mxu1 }
 0x5df   :  { %v3608_v19 = vadd.f32 %v3607_v30, %v3397_v2 }
 0x5e1   :  { %v3627_v55 = vadd.f32 %v3626_v20, %v3608_v19 }
 0x5e3   :  { %v3569_v63 = vpop.f32.mrf.mxu2  ;;  %v3588_v1 = vpop.f32.mrf.mxu3  ;;  %v3637_v58 = vadd.f32 %v11358_v26, %v3627_v55 }
 0x5e4   :  { %v3570_v34 = vadd.f32 %v3569_v63, %v3396_v42 }
 0x5e6   :  { %v3589_v23 = vadd.f32 %v3588_v1, %v3570_v34  ;;  %v3609_v10 = vpop.f32.mrf.mxu0  ;;  %v3628_v61 = vpop.f32.mrf.mxu1 }
 0x5e7   :  { %v3610_v16 = vadd.f32 %v3609_v10, %v3397_v2 }
 0x5e8   :  { %v3636_v22 = vadd.f32 %v11359_v13, %v3589_v23 }
 0x5e9   :  { %v3629_v50 = vadd.f32 %v3628_v61, %v3610_v16 }
 0x5ea   :  { %v3646_v31 = vadd.f32 %v3637_v58, %v3636_v22 }
 0x5eb   :  { %v3571_v21 = vpop.f32.mrf.mxu2  ;;  %v3590_v18 = vpop.f32.mrf.mxu3  ;;  %v3639_v33 = vadd.f32 %v11361_v51, %v3629_v50 }
 0x5ec   :  { %v3572_v24 = vadd.f32 %v3571_v21, %v3396_v42  ;;  %3647 = vadd.xlane.f32.xlu0 %v3646_v31 }
 0x5ee   :  { %v3591_v49 = vadd.f32 %v3590_v18, %v3572_v24 }
 0x5f0   :  { %v3638_v15 = vadd.f32 %v11360_v46, %v3591_v49 }
 0x5f2   :  { %v3649_v27 = vadd.f32 %v3639_v33, %v3638_v15 }
 0x5f4   :  { %3650 = vadd.xlane.f32.xlu1 %v3649_v27 }
 0x5f6   :  { %v3612_v6 = vpop.f32.mrf.mxu0  ;;  %v3631_v36 = vpop.f32.mrf.mxu1 }
 0x5f7   :  { %v3613_v25 = vadd.f32 %v3612_v6, %v3397_v2 }
 0x5f9   :  { %v3632_v53 = vadd.f32 %v3631_v36, %v3613_v25  ;;  %v364_v25 = vld [vmem:[#allocation8 + $0x40] sm:$0xff]  ;;  %v365_v36 = vld [vmem:[#allocation8 + $0x48] sm:$0xff] }
 0x5fb   :  { %v3574_v29 = vpop.f32.mrf.mxu2  ;;  %v3593_v0 = vpop.f32.mrf.mxu3  ;;  %v3641_v32 = vadd.f32 %v11362_v47, %v3632_v53 }
 0x5fc   :  { %v3575_v12 = vadd.f32 %v3574_v29, %v3396_v42  ;;  %v366_v29 = vld [vmem:[#allocation8 + $0x50] sm:$0xff] }
 0x5fe   :  { %v3594_v38 = vadd.f32 %v3593_v0, %v3575_v12  ;;  %v3614_v57 = vpop.f32.mrf.mxu0  ;;  %v3633_v3 = vpop.f32.mrf.mxu1  ;;  %v367_v0 = vld [vmem:[#allocation8 + $0x58] sm:$0xff]  ;;  %v4387_v12 = vpack.c.bf16 %v365_v36, %v364_v25 }
 0x5ff   :  { %v3615_v52 = vadd.f32 %v3614_v57, %v3397_v2  ;;  %v3662_v2 = vadd.f32 %v11205_v8, %v3661_v40  ;;  %v327_v36 = vld [vmem:[#allocation5 + $0x38] sm:$0xff] }
 0x600   :  { %v3640_v45 = vadd.f32 %v11363_v43, %v3594_v38  ;;  %v4388_v38 = vpack.c.bf16 %v367_v0, %v366_v29  ;;  %v4413_v57 = vunpack.c.l.b16 %v4387_v12  ;;  %v333_v43 = vld [vmem:[#allocation5 + $0x68] sm:$0xff] }
 0x601   :  { %v3634_v5 = vadd.f32 %v3633_v3, %v3615_v52  ;;  %v13659_v30 = vsel %vm3663_vm2, %v11205_v8, %v3662_v2  ;;  %v335_v52 = vld [vmem:[#allocation5 + $0x78] sm:$0xff] }
 0x602   :  { %v3652_v48 = vadd.f32 %v3641_v32, %v3640_v45  ;;  %16308 = vst [vmem:[#allocation76_spill] sm:$0xff] %v13659_v30  ;;  %v4414_v47 = vunpack.c.l.b16 %v4388_v38 }
 0x603   :  { %v3576_v37 = vpop.f32.mrf.mxu2  ;;  %v3595_v44 = vpop.f32.mrf.mxu3  ;;  %v3643_v56 = vadd.f32 %v11365_v7, %v3634_v5  ;;  %v328_v5 = vld [vmem:[#allocation5 + $0x40] sm:$0xff]  ;;  %v362_v7 = vld [vmem:[#allocation8 + $0x30] sm:$0xff] }
 0x604   :  { %v3577_v11 = vadd.f32 %v3576_v37, %v3396_v42  ;;  %3653 = vadd.xlane.f32.xlu2 %v3652_v48  ;;  %v13697_v48 = vpack.c.b16 %v4414_v47, %v4413_v57  ;;  %v13709_v62 = vpack.c.bf16 %v363_v39, %v362_v7  ;;  %v321_v47 = vld [vmem:[#allocation5 + $0x8] sm:$0xff]  ;;  %v359_v7 = vld [vmem:[#allocation8 + $0x18] sm:$0xff] }
 0x606   :  { %v3596_v35 = vadd.f32 %v3595_v44, %v3577_v11  ;;  %v329_v11 = vld [vmem:[#allocation5 + $0x48] sm:$0xff] }
 0x607   :  { %v13713_v40 = vpack.c.bf16 %v329_v11, %v328_v5 }
 0x608   :  { %v3642_v14 = vadd.f32 %v11364_v59, %v3596_v35  ;;  %v360_v59 = vld [vmem:[#allocation8 + $0x20] sm:$0xff] }
 0x60a   :  { %v3655_v60 = vadd.f32 %v3643_v56, %v3642_v14 }
 0x60c   :  { %3656 = vadd.xlane.f32.xlu0 %v3655_v60  ;;  %v331_v60 = vld [vmem:[#allocation5 + $0x58] sm:$0xff] }
 0x65f   :  { %v3648_v19 = vpop.xlane.xlu0 %3647 }
 0x660   :  { %v3665_v42 = vmul.f32 %v13659_v30, %v3648_v19 }
 0x662   :  { %v13662_v20 = vsub.f32 %v3636_v22, %v3665_v42  ;;  %v13664_v63 = vsub.f32 %v3637_v58, %v3665_v42  ;;  %v4412_v42 = vunpack.c.l.b16 %v13709_v62 }
 0x664   :  { %v3677_v1 = vmul.f32 %v13662_v20, %v13662_v20  ;;  %v3678_v55 = vmul.f32 %v13664_v63, %v13664_v63 }
 0x666   :  { %v3685_v34 = vadd.f32 %v3678_v55, %v3677_v1  ;;  %v4471_v1 = vunpack.c.l.b16 %v13713_v40 }
 0x667   :  { %v3651_v23 = vpop.xlane.xlu1 %3650 }
 0x668   :  { %v3666_v10 = vmul.f32 %v13659_v30, %v3651_v23  ;;  %3686 = vadd.xlane.f32.xlu1 %v3685_v34  ;;  %v368_v34 = vld [vmem:[#allocation8 + $0x60] sm:$0xff]  ;;  %v369_v23 = vld [vmem:[#allocation8 + $0x68] sm:$0xff] }
 0x66a   :  { %v13671_v26 = vsub.f32 %v3638_v15, %v3666_v10  ;;  %v13673_v13 = vsub.f32 %v3639_v33, %v3666_v10  ;;  %v370_v10 = vld [vmem:[#allocation8 + $0x70] sm:$0xff] }
 0x66c   :  { %v3679_v22 = vmul.f32 %v13671_v26, %v13671_v26  ;;  %v3680_v58 = vmul.f32 %v13673_v13, %v13673_v13 }
 0x66e   :  { %v3688_v16 = vadd.f32 %v3680_v58, %v3679_v22  ;;  %v371_v58 = vld [vmem:[#allocation8 + $0x78] sm:$0xff] }
 0x670   :  { %3689 = vadd.xlane.f32.xlu2 %v3688_v16  ;;  %v4389_v16 = vpack.c.bf16 %v369_v23, %v368_v34  ;;  %v4525_v34 = vunpack.c.h.b16 %v13709_v62 }
 0x677   :  { %v3654_v31 = vpop.xlane.xlu2 %3653 }
 0x678   :  { %v3667_v61 = vmul.f32 %v13659_v30, %v3654_v31  ;;  %v4390_v31 = vpack.c.bf16 %v371_v58, %v370_v10  ;;  %v4415_v10 = vunpack.c.l.b16 %v4389_v16 }
 0x67a   :  { %v13680_v21 = vsub.f32 %v3640_v45, %v3667_v61  ;;  %v13682_v50 = vsub.f32 %v3641_v32, %v3667_v61  ;;  %v332_v32 = vld [vmem:[#allocation5 + $0x60] sm:$0xff]  ;;  %v334_v45 = vld [vmem:[#allocation5 + $0x70] sm:$0xff]  ;;  %v4416_v58 = vunpack.c.l.b16 %v4390_v31 }
 0x67b   :  { %v13699_v3 = vpack.c.bf16 %v333_v43, %v332_v32  ;;  %v13701_v37 = vpack.c.bf16 %v335_v52, %v334_v45  ;;  %v322_v32 = vld [vmem:[#allocation5 + $0x10] sm:$0xff]  ;;  %v323_v43 = vld [vmem:[#allocation5 + $0x18] sm:$0xff] }
 0x67c   :  { %v3681_v24 = vmul.f32 %v13680_v21, %v13680_v21  ;;  %v3682_v18 = vmul.f32 %v13682_v50, %v13682_v50  ;;  %v13749_v5 = vpack.c.bf16 %v323_v43, %v322_v32 }
 0x67d   :  { %v4473_v44 = vunpack.c.l.b16 %v13699_v3  ;;  %v4474_v35 = vunpack.c.l.b16 %v13701_v37 }
 0x67e   :  { %v3691_v49 = vadd.f32 %v3682_v18, %v3681_v24  ;;  %v4528_v24 = vunpack.c.h.b16 %v4389_v16  ;;  %v4529_v18 = vunpack.c.h.b16 %v4390_v31  ;;  %v9745_v16 = vld [vmem:[#allocation17 + $0x78] sm:$0xf0] }
 0x67f   :  { %v3657_v46 = vpop.xlane.xlu0 %3656  ;;  %v13711_v9 = vpack.c.b16 %v4474_v35, %v4473_v44  ;;  %v4468_v44 = vunpack.c.l.b16 %v13749_v5  ;;  %v356_v35 = vld [vmem:[#allocation8] sm:$0xff] }
 0x680   :  { %v3668_v15 = vmul.f32 %v13659_v30, %v3657_v46  ;;  %3692 = vadd.xlane.f32.xlu0 %v3691_v49  ;;  %v4526_v49 = vunpack.c.h.b16 %v4387_v12  ;;  %v4527_v46 = vunpack.c.h.b16 %v4388_v38  ;;  %v13731_v25 = vpack.c.b16 %v4529_v18, %v4528_v24  ;;  %v320_v38 = vld [vmem:[#allocation5] sm:$0xff]  ;;  %v9743_v18 = vld [vmem:[#allocation17 + $0x70] sm:$0xf] }
 0x681   :  { %v13747_v52 = vpack.c.bf16 %v321_v47, %v320_v38  ;;  %v13777_v24 = vpack.c.b16 %v4416_v58, %v4415_v10  ;;  %v10818_v38 = vld [vmem:[#allocation17 + $0x64] sm:$0xf0]  ;;  %v9799_v47 = vld [vmem:[#allocation17 + $0xe0] sm:$0xf] }
 0x682   :  { %v13689_v51 = vsub.f32 %v3642_v14, %v3668_v15  ;;  %v13691_v33 = vsub.f32 %v3643_v56, %v3668_v15  ;;  %v361_v14 = vld [vmem:[#allocation8 + $0x28] sm:$0xff]  ;;  %v330_v56 = vld [vmem:[#allocation5 + $0x50] sm:$0xff]  ;;  %v324_v15 = vld [vmem:[#allocation5 + $0x20] sm:$0xff] }
 0x683   :  { %v13707_v8 = vpack.c.bf16 %v361_v14, %v360_v59  ;;  %v13715_v2 = vpack.c.bf16 %v331_v60, %v330_v56  ;;  %v4467_v11 = vunpack.c.l.b16 %v13747_v52  ;;  %v357_v59 = vld [vmem:[#allocation8 + $0x8] sm:$0xff]  ;;  %v358_v14 = vld [vmem:[#allocation8 + $0x10] sm:$0xff] }
 0x684   :  { %v3683_v27 = vmul.f32 %v13689_v51, %v13689_v51  ;;  %v3684_v6 = vmul.f32 %v13691_v33, %v13691_v33  ;;  %v4383_v60 = vpack.c.bf16 %v357_v59, %v356_v35  ;;  %v4384_v39 = vpack.c.bf16 %v359_v7, %v358_v14  ;;  %v10834_v35 = vld [vmem:[#allocation17 + $0xe4] sm:$0xf0]  ;;  %v10817_v59 = vld [vmem:[#allocation17 + $0x64] sm:$0xf]  ;;  %v9737_v14 = vld [vmem:[#allocation17 + $0x68] sm:$0xf0] }
 0x685   :  { %v4411_v19 = vunpack.c.l.b16 %v13707_v8  ;;  %v4472_v55 = vunpack.c.l.b16 %v13715_v2  ;;  %v13757_v56 = vpack.c.b16 %v4468_v44, %v4467_v11 }
 0x686   :  { %v3694_v53 = vadd.f32 %v3684_v6, %v3683_v27  ;;  %v325_v27 = vld [vmem:[#allocation5 + $0x28] sm:$0xff]  ;;  %v326_v6 = vld [vmem:[#allocation5 + $0x30] sm:$0xff]  ;;  %v4409_v32 = vunpack.c.l.b16 %v4383_v60  ;;  %v4410_v43 = vunpack.c.l.b16 %v4384_v39 }
 0x687   :  { %v13723_v22 = vpack.c.b16 %v4412_v42, %v4411_v19  ;;  %v13725_v61 = vpack.c.b16 %v4472_v55, %v4471_v1  ;;  %v13733_v29 = vpack.c.bf16 %v325_v27, %v324_v15  ;;  %v13735_v0 = vpack.c.bf16 %v327_v36, %v326_v6  ;;  %v10819_v15 = vld [vmem:[#allocation17 + $0x74] sm:$0xf]  ;;  %v9809_v36 = vld [vmem:[#allocation17 + $0xf8] sm:$0xf0] }
 0x688   :  { %3695 = vadd.xlane.f32.xlu1 %v3694_v53  ;;  %v13737_v53 = vpack.c.b16 %v4527_v46, %v4526_v49  ;;  %v4522_v19 = vunpack.c.h.b16 %v4383_v60  ;;  %v4523_v42 = vunpack.c.h.b16 %v4384_v39  ;;  %v4524_v55 = vunpack.c.h.b16 %v13707_v8  ;;  %4585 = vrot.lane.b32.xlu2 %v13777_v24, %s11803_s3  ;;  %v10820_v8 = vld [vmem:[#allocation17 + $0x74] sm:$0xf0]  ;;  %v9807_v49 = vld [vmem:[#allocation17 + $0xf0] sm:$0xf]  ;;  %v10835_v6 = vld [vmem:[#allocation17 + $0xf4] sm:$0xf] }
 0x689   :  { %v4469_v57 = vunpack.c.l.b16 %v13733_v29  ;;  %v4470_v12 = vunpack.c.l.b16 %v13735_v0  ;;  %v9744_v62 = vor.u32 %v10820_v8, %v9743_v18  ;;  %v10836_v46 = vld [vmem:[#allocation17 + $0xf4] sm:$0xf0]  ;;  %v9748_v27 = vor.u32 %v10819_v15, %v9745_v16  ;;  %v9727_v60 = vld [vmem:[#allocation17 + $0x50] sm:$0xf]  ;;  %v9729_v16 = vld [vmem:[#allocation17 + $0x58] sm:$0xf0] }
 0x68a   :  { %v13763_v1 = vpack.c.b16 %v4523_v42, %v4522_v19  ;;  %v13775_v23 = vpack.c.b16 %v4525_v34, %v4524_v55  ;;  %v9808_v31 = vor.u32 %v10836_v46, %v9807_v49  ;;  %v9800_v19 = vor.u32 %v10834_v35, %v9799_v47  ;;  %v10833_v55 = vld [vmem:[#allocation17 + $0xe4] sm:$0xf]  ;;  %v9801_v34 = vld [vmem:[#allocation17 + $0xe8] sm:$0xf0]  ;;  %v10816_v39 = vld [vmem:[#allocation17 + $0x54] sm:$0xf0] }
 0x68b   :  { %v13745_v45 = vpack.c.b16 %v4470_v12, %v4469_v57  ;;  %4001 = vmatpush.bf16.msrb.mxu2 %v9744_v62  ;;  %v9812_v57 = vor.u32 %v10835_v6, %v9809_v36  ;;  %4039 = vmatpush.bf16.msrb.mxu0 %v9748_v27  ;;  %v9735_v12 = vld [vmem:[#allocation17 + $0x60] sm:$0xf]  ;;  %v9740_v42 = vor.u32 %v10817_v59, %v9737_v14  ;;  %v9791_v49 = vld [vmem:[#allocation17 + $0xd0] sm:$0xf]  ;;  %v10832_v62 = vld [vmem:[#allocation17 + $0xd4] sm:$0xf0] }
 0x68c   :  { %4020 = vmatpush.bf16.msrb.mxu3 %v9808_v31  ;;  %v9736_v44 = vor.u32 %v10818_v38, %v9735_v12  ;;  %v9804_v10 = vor.u32 %v10833_v55, %v9801_v34  ;;  %v13790_v58 = vpack.c.b16 %v4410_v43, %v4409_v32  ;;  %v9728_v8 = vor.u32 %v10816_v39, %v9727_v60  ;;  %v10815_v46 = vld [vmem:[#allocation17 + $0x54] sm:$0xf]  ;;  %v9793_v27 = vld [vmem:[#allocation17 + $0xd8] sm:$0xf0]  ;;  %v10814_v12 = vld [vmem:[#allocation17 + $0x44] sm:$0xf0] }
 0x68d   :  { %4058 = vmatpush.bf16.msrb.mxu1 %v9812_v57  ;;  %v9792_v15 = vor.u32 %v10832_v62, %v9791_v49  ;;  %v10831_v31 = vld [vmem:[#allocation17 + $0xd4] sm:$0xf]  ;;  %v9732_v6 = vor.u32 %v10815_v46, %v9729_v16  ;;  %v9719_v57 = vld [vmem:[#allocation17 + $0x40] sm:$0xf]  ;;  %v10830_v43 = vld [vmem:[#allocation17 + $0xc4] sm:$0xf0]  ;;  %v5084_v34 = vunpack.c.h.b16 %v13701_v37 }
 0x68e   :  { %v9796_v36 = vor.u32 %v10831_v31, %v9793_v27  ;;  %v9783_v38 = vld [vmem:[#allocation17 + $0xc0] sm:$0xf]  ;;  %v9720_v32 = vor.u32 %v10814_v12, %v9719_v57  ;;  %v9711_v39 = vld [vmem:[#allocation17 + $0x30] sm:$0xf]  ;;  %v10828_v16 = vld [vmem:[#allocation17 + $0xb4] sm:$0xf0] }
 0x68f   :  { %4002 = vmatpush.bf16.msrb.mxu2 %v9736_v44  ;;  %4040 = vmatpush.bf16.msrb.mxu0 %v9740_v42  ;;  %v9721_v44 = vld [vmem:[#allocation17 + $0x48] sm:$0xf0]  ;;  %v9784_v59 = vor.u32 %v10830_v43, %v9783_v38  ;;  %v5083_v42 = vunpack.c.h.b16 %v13699_v3  ;;  %v10811_v31 = vld [vmem:[#allocation17 + $0x34] sm:$0xf]  ;;  %v9777_v38 = vld [vmem:[#allocation17 + $0xb8] sm:$0xf0] }
 0x690   :  { %4021 = vmatpush.bf16.msrb.mxu3 %v9800_v19  ;;  %4579 = vrot.lane.b32.xlu2 %v13790_v58, %s11803_s3  ;;  %v9785_v19 = vld [vmem:[#allocation17 + $0xc8] sm:$0xf0]  ;;  %v10810_v43 = vld [vmem:[#allocation17 + $0x24] sm:$0xf0] }
 0x691   :  { %4059 = vmatpush.bf16.msrb.mxu1 %v9804_v10  ;;  %v13810_v62 = vpack.c.b16 %v5084_v34, %v5083_v42  ;;  %v10825_v42 = vld [vmem:[#allocation17 + $0xa4] sm:$0xf]  ;;  %v3644_v34 = vld [vmem:[#allocation16] sm:$0x3] }
 0x693   :  { %4003 = vmatpush.bf16.msrb.mxu2 %v9728_v8  ;;  %4041 = vmatpush.bf16.msrb.mxu0 %v9732_v6  ;;  %v10812_v8 = vld [vmem:[#allocation17 + $0x34] sm:$0xf0]  ;;  %v9713_v6 = vld [vmem:[#allocation17 + $0x38] sm:$0xf0] }
 0x694   :  { %4583 = vrot.lane.b32.xlu0 %v13697_v48, %s11803_s3  ;;  %4022 = vmatpush.bf16.msrb.mxu3 %v9792_v15  ;;  %v9712_v46 = vor.u32 %v10812_v8, %v9711_v39  ;;  %v9775_v15 = vld [vmem:[#allocation17 + $0xb0] sm:$0xf]  ;;  %v9716_v12 = vor.u32 %v10811_v31, %v9713_v6  ;;  %v3645_v39 = vld [vmem:[%s16021_s11] sm:$0x3]  ;;  %v10808_v31 = vld [vmem:[#allocation17 + $0x14] sm:$0xf0] }
 0x695   :  { %4060 = vmatpush.bf16.msrb.mxu1 %v9796_v36  ;;  %v9776_v27 = vor.u32 %v10828_v16, %v9775_v15  ;;  %v10827_v36 = vld [vmem:[#allocation17 + $0xb4] sm:$0xf]  ;;  %v9695_v16 = vld [vmem:[#allocation17 + $0x10] sm:$0xf] }
 0x697   :  { %4004 = vmatpush.bf16.msrb.mxu2 %v9720_v32  ;;  %v9703_v32 = vld [vmem:[#allocation17 + $0x20] sm:$0xf] }
 0x698   :  { %4023 = vmatpush.bf16.msrb.mxu3 %v9784_v59  ;;  %4736 = vrot.lane.b32.xlu2 %v13777_v24, %s11799_s29  ;;  %v10826_v59 = vld [vmem:[#allocation17 + $0xa4] sm:$0xf0] }
 0x69b   :  { %4005 = vmatpush.bf16.msrb.mxu2 %v9712_v46 }
 0x69c   :  { %4634 = vrot.lane.b32.xlu0 %v13711_v9, %s11799_s29  ;;  %4024 = vmatpush.bf16.msrb.mxu3 %v9776_v27  ;;  %v9759_v27 = vld [vmem:[#allocation17 + $0x90] sm:$0xf] }
 0x6a0   :  { %4785 = vrot.lane.b32.xlu2 %v13711_v9, %s11798_s28 }
 0x6a1   :  { %4581 = vrot.lane.b32.xlu1 %v13723_v22, %s11803_s3 }
 0x6a4   :  { %4632 = vrot.lane.b32.xlu0 %v13725_v61, %s11799_s29 }
 0x6a8   :  { %4679 = vrot.lane.b32.xlu2 %v13775_v23, %s11803_s3 }
 0x6a9   :  { %4683 = vrot.lane.b32.xlu1 %v13731_v25, %s11803_s3 }
 0x6ac   :  { %4681 = vrot.lane.b32.xlu0 %v13737_v53, %s11803_s3 }
 0x6b0   :  { %4732 = vrot.lane.b32.xlu2 %v13723_v22, %s11799_s29 }
 0x6b1   :  { %4630 = vrot.lane.b32.xlu1 %v13745_v45, %s11799_s29 }
 0x6b4   :  { %4734 = vrot.lane.b32.xlu0 %v13697_v48, %s11799_s29 }
 0x6b8   :  { %4781 = vrot.lane.b32.xlu2 %v13745_v45, %s11798_s28 }
 0x6b9   :  { %4783 = vrot.lane.b32.xlu1 %v13725_v61, %s11798_s28 }
 0x6bc   :  { %4628 = vrot.lane.b32.xlu0 %v13757_v56, %s11799_s29 }
 0x6c0   :  { %4730 = vrot.lane.b32.xlu2 %v13790_v58, %s11799_s29 }
 0x6c1   :  { %4832 = vrot.lane.b32.xlu1 %v13737_v53, %s11799_s29 }
 0x6c4   :  { %4677 = vrot.lane.b32.xlu0 %v13763_v1, %s11803_s3 }
 0x6c8   :  { %4887 = vrot.lane.b32.xlu2 %v13777_v24, %s11805_s10 }
 0x6c9   :  { %4828 = vrot.lane.b32.xlu1 %v13763_v1, %s11799_s29 }
 0x6cc   :  { %4834 = vrot.lane.b32.xlu0 %v13731_v25, %s11799_s29 }
 0x6d0   :  { %4936 = vrot.lane.b32.xlu2 %v13711_v9, %s11797_s1 }
 0x6d1   :  { %5189 = vrot.lane.b32.xlu1 %v13777_v24, %s11804_s0 }
 0x6d4   :  { %4779 = vrot.lane.b32.xlu0 %v13757_v56, %s11798_s28 }
 0x6d8   :  { %4985 = vrot.lane.b32.xlu2 %v13731_v25, %s11805_s10 }
 0x6d9   :  { %5134 = vrot.lane.b32.xlu1 %v13737_v53, %s11798_s28 }
 0x6db   :  { %v3687_v11 = vpop.xlane.xlu1 %3686 }
 0x6dc   :  { %4885 = vrot.lane.b32.xlu0 %v13697_v48, %s11805_s10  ;;  %v3697_v7 = vmul.f32 %v3687_v11, %v13659_v30  ;;  %v10813_v11 = vld [vmem:[#allocation17 + $0x44] sm:$0xf] }
 0x6dd   :  { %v9724_v14 = vor.u32 %v10813_v11, %v9721_v44  ;;  %v9767_v11 = vld [vmem:[#allocation17 + $0xa0] sm:$0xf] }
 0x6de   :  { %v13792_v18 = vadd.f32 1e-05, %v3697_v7  ;;  %v10829_v7 = vld [vmem:[#allocation17 + $0xc4] sm:$0xf] }
 0x6df   :  { %v9788_v55 = vor.u32 %v10829_v7, %v9785_v19  ;;  %4042 = vmatpush.bf16.msrb.mxu0 %v9724_v14  ;;  %v10809_v14 = vld [vmem:[#allocation17 + $0x24] sm:$0xf]  ;;  %v9768_v7 = vor.u32 %v10826_v59, %v9767_v11  ;;  %v9705_v19 = vld [vmem:[#allocation17 + $0x28] sm:$0xf0]  ;;  %v9761_v59 = vld [vmem:[#allocation17 + $0x98] sm:$0xf0] }
 0x6e0   :  { %11206 = vrsqrt.f32 %v13792_v18  ;;  %vm3711_vm0 = vweird.f32 %v13792_v18  ;;  %4934 = vrot.lane.b32.xlu2 %v13725_v61, %s11797_s1 }
 0x6e1   :  { %5032 = vrot.lane.b32.xlu1 %v13790_v58, %s11798_s28  ;;  %4061 = vmatpush.bf16.msrb.mxu1 %v9788_v55  ;;  %v9769_v55 = vld [vmem:[#allocation17 + $0xa8] sm:$0xf0] }
 0x6e2   :  { %v9772_v46 = vor.u32 %v10825_v42, %v9769_v55  ;;  %4025 = vmatpush.bf16.msrb.mxu3 %v9768_v7 }
 0x6e3   :  { %v3690_v47 = vpop.xlane.xlu2 %3689  ;;  %4043 = vmatpush.bf16.msrb.mxu0 %v9716_v12  ;;  %v10824_v12 = vld [vmem:[#allocation17 + $0x94] sm:$0xf0] }
 0x6e4   :  { %4830 = vrot.lane.b32.xlu0 %v13775_v23, %s11799_s29  ;;  %v3698_v35 = vmul.f32 %v3690_v47, %v13659_v30  ;;  %v9780_v47 = vor.u32 %v10827_v36, %v9777_v38  ;;  %v10807_v38 = vld [vmem:[#allocation17 + $0x14] sm:$0xf] }
 0x6e6   :  { %v13804_v10 = vpop.eup %11206  ;;  %v13806_v60 = vadd.f32 1e-05, %v3698_v35  ;;  %v9704_v35 = vor.u32 %v10810_v43, %v9703_v32  ;;  %4062 = vmatpush.bf16.msrb.mxu1 %v9780_v47  ;;  %v9697_v47 = vld [vmem:[#allocation17 + $0x18] sm:$0xf0]  ;;  %v13830_v32 = vperm.slane %v3644_v34, 0  ;;  %v13832_v43 = vperm.slane %v3644_v34, 1 }
 0x6e7   :  { %v3706_v49 = vmul.f32 %v13804_v10, %v13792_v18  ;;  %vm3712_vm11 = vweird.f32 %v13804_v10  ;;  %v10823_v18 = vld [vmem:[#allocation17 + $0x94] sm:$0xf] }
 0x6e8   :  { %11208 = vrsqrt.f32 %v13806_v60  ;;  %4006 = vmatpush.bf16.msrb.mxu2 %v9704_v35  ;;  %vm3713_vm12 = vmor %vm3711_vm0, %vm3712_vm11  ;;  %v9700_v35 = vor.u32 %v10807_v38, %v9697_v47  ;;  %v10821_v38 = vld [vmem:[#allocation17 + $0x84] sm:$0xf]  ;;  %vm3721_vm13 = vweird.f32 %v13806_v60  ;;  %4983 = vrot.lane.b32.xlu2 %v13737_v53, %s11805_s10 }
 0x6e9   :  { %v3707_v57 = vmul.f32 %v13804_v10, %v3706_v49  ;;  %5238 = vrot.lane.b32.xlu1 %v13810_v62, %s11799_s29  ;;  %v9708_v49 = vor.u32 %v10809_v14, %v9705_v19  ;;  %v13838_v14 = vperm.slane %v3645_v39, 0 }
 0x6ea   :  { %4063 = vmatpush.bf16.msrb.mxu1 %v9772_v46  ;;  %v10806_v46 = vld [vmem:[#allocation17 + $0x4] sm:$0xf0] }
 0x6eb   :  { %v3708_v44 = vmul.f32 0.5, %v3707_v57  ;;  %4044 = vmatpush.bf16.msrb.mxu0 %v9708_v49  ;;  %v9696_v57 = vor.u32 %v10808_v31, %v9695_v16  ;;  %v9687_v49 = vld [vmem:[#allocation17] sm:$0xf]  ;;  %v13849_v16 = vperm.slane %v3645_v39, 1 }
 0x6ec   :  { %4883 = vrot.lane.b32.xlu0 %v13723_v22, %s11805_s10 }
 0x6ed   :  { %v3709_v8 = vsub.f32 1.5, %v3708_v44  ;;  %v9760_v44 = vor.u32 %v10824_v12, %v9759_v27  ;;  %4007 = vmatpush.bf16.msrb.mxu2 %v9696_v57  ;;  %v9689_v57 = vld [vmem:[#allocation17 + $0x8] sm:$0xf0] }
 0x6ee   :  { %v13824_v15 = vpop.eup %11208 }
 0x6ef   :  { %v3710_v6 = vmul.f32 %v13804_v10, %v3709_v8  ;;  %v3716_v36 = vmul.f32 %v13824_v15, %v13806_v60  ;;  %4026 = vmatpush.bf16.msrb.mxu3 %v9760_v44  ;;  %v9764_v8 = vor.u32 %v10823_v18, %v9761_v59  ;;  %4045 = vmatpush.bf16.msrb.mxu0 %v9700_v35  ;;  %vm3722_vm1 = vweird.f32 %v13824_v15  ;;  %v9753_v44 = vld [vmem:[#allocation17 + $0x88] sm:$0xf0] }
 0x6f0   :  { %v9756_v35 = vor.u32 %v10821_v38, %v9753_v44  ;;  %vm3723_vm15 = vmor %vm3721_vm13, %vm3722_vm1  ;;  %4932 = vrot.lane.b32.xlu2 %v13745_v45, %s11797_s1 }
 0x6f1   :  { %v3714_v7 = vsel %vm3713_vm12, %v13804_v10, %v3710_v6  ;;  %v3717_v19 = vmul.f32 %v13824_v15, %v3716_v36  ;;  %5287 = vrot.lane.b32.xlu1 %v13731_v25, %s11804_s0  ;;  %v9751_v10 = vld [vmem:[#allocation17 + $0x80] sm:$0xf]  ;;  %v9688_v6 = vor.u32 %v10806_v46, %v9687_v49  ;;  %v10822_v36 = vld [vmem:[#allocation17 + $0x84] sm:$0xf0]  ;;  %4064 = vmatpush.bf16.msrb.mxu1 %v9764_v8  ;;  %vm16317_vm12 = vcmask 261120  }
 0x6f2   :  { %v3745_v55 = vmul.f32 %v3714_v7, %v13662_v20  ;;  %v3746_v34 = vmul.f32 %v3714_v7, %v13664_v63  ;;  %v9752_v20 = vor.u32 %v10822_v36, %v9751_v10  ;;  %v10805_v63 = vld [vmem:[#allocation17 + $0x4] sm:$0xf]  ;;  %vm16318_vm1 = vmmov %vm16317_vm12 }
 0x6f3   :  { %v3693_v11 = vpop.xlane.xlu0 %3692  ;;  %v3718_v31 = vmul.f32 0.5, %v3717_v19  ;;  %v9692_v39 = vor.u32 %v10805_v63, %v9689_v57  ;;  %4008 = vmatpush.bf16.msrb.mxu2 %v9688_v6  ;;  %vm16319_vm13 = vmmov %vm16318_vm1 }
 0x6f4   :  { %v3699_v42 = vmul.f32 %v3693_v11, %v13659_v30  ;;  %4881 = vrot.lane.b32.xlu0 %v13790_v58, %s11805_s10  ;;  %v3758_v12 = vmul.f32 %v13830_v32, %v3745_v55  ;;  %v3759_v47 = vmul.f32 %v13832_v43, %v3746_v34  ;;  %4027 = vmatpush.bf16.msrb.mxu3 %v9752_v20 }
 0x6f5   :  { %v3719_v11 = vsub.f32 1.5, %v3718_v31  ;;  %4046 = vmatpush.bf16.msrb.mxu0 %v9692_v39  ;;  %4065 = vmatpush.bf16.msrb.mxu1 %v9756_v35 }
 0x6f6   :  { %v3703_v27 = vadd.f32 1e-05, %v3699_v42  ;;  %v13861_v7 = vadd.f32 %v13838_v14, %v3758_v12  ;;  %v13864_v19 = vadd.f32 %v13849_v16, %v3759_v47 }
 0x6f7   :  { %v3720_v18 = vmul.f32 %v13824_v15, %v3719_v11 }
 0x6f8   :  { %11210 = vrsqrt.f32 %v3703_v27  ;;  %16309 = vst [vmem:[#allocation77_spill] sm:$0xff] %v13861_v7  ;;  %v3812_v6 = vpack.c.bf16 %v13864_v19, %v13861_v7  ;;  %vm3731_vm5 = vweird.f32 %v3703_v27  ;;  %4981 = vrot.lane.b32.xlu2 %v13775_v23, %s11805_s10  ;;  %v11366_v7 = vld [vmem:[#allocation7] sm:$0xff] }
 0x6f9   :  { %16310 = vst [vmem:[#allocation78_spill] sm:$0xff] %v13864_v19  ;;  %v3724_v42 = vsel %vm3723_vm15, %v13824_v15, %v3720_v18  ;;  %vm4421_vm15 = vcmask 130048  }
 0x6fa   :  { %v3747_v60 = vmul.f32 %v3724_v42, %v13671_v26  ;;  %v3748_v34 = vmul.f32 %v3724_v42, %v13673_v13  ;;  %v3826_v20 = vunpack.c.h.b16 %v3812_v6  ;;  %v3825_v11 = vunpack.c.l.b16 %v3812_v6 }
 0x6fb   :  { %v3696_v59 = vpop.xlane.xlu1 %3695 }
 0x6fc   :  { %v3700_v55 = vmul.f32 %v3696_v59, %v13659_v30  ;;  %5038 = vrot.lane.b32.xlu0 %v13777_v24, %s11798_s28  ;;  %v3760_v46 = vmul.f32 %v13830_v32, %v3747_v60  ;;  %v3761_v10 = vmul.f32 %v13832_v43, %v3748_v34 }
 0x6fe   :  { %v11211_v8 = vpop.eup %11210  ;;  %v3704_v49 = vadd.f32 1e-05, %v3700_v55  ;;  %v13877_v15 = vadd.f32 %v13838_v14, %v3760_v46  ;;  %v13880_v36 = vadd.f32 %v13849_v16, %v3761_v10 }
 0x6ff   :  { %v3726_v31 = vmul.f32 %v11211_v8, %v3703_v27  ;;  %vm3732_vm9 = vweird.f32 %v11211_v8 }
 0x700   :  { %11212 = vrsqrt.f32 %v3704_v49  ;;  %16311 = vst [vmem:[#allocation79_spill] sm:$0xff] %v13877_v15  ;;  %v3813_v13 = vpack.c.bf16 %v13880_v36, %v13877_v15  ;;  %vm3733_vm6 = vmor %vm3731_vm5, %vm3732_vm9  ;;  %vm3741_vm11 = vweird.f32 %v3704_v49  ;;  %4930 = vrot.lane.b32.xlu2 %v13757_v56, %s11797_s1 }
 0x701   :  { %16312 = vst [vmem:[#allocation80_spill] sm:$0xff] %v13880_v36  ;;  %v3727_v26 = vmul.f32 %v11211_v8, %v3726_v31  ;;  %vm16320_vm9 = vmmov %vm16318_vm1 }
 0x702   :  { %v3827_v63 = vunpack.c.l.b16 %v3813_v13  ;;  %v3828_v57 = vunpack.c.h.b16 %v3813_v13  ;;  %vm16321_vm5 = vmmov %vm16318_vm1 }
 0x703   :  { %v3728_v12 = vmul.f32 0.5, %v3727_v26 }
 0x704   :  { %4979 = vrot.lane.b32.xlu0 %v13763_v1, %s11805_s10  ;;  %v13888_v35 = vpack.c.b16 %v3828_v57, %v3826_v20  ;;  %v13890_v18 = vpack.c.b16 %v3827_v63, %v3825_v11 }
 0x705   :  { %v3729_v38 = vsub.f32 1.5, %v3728_v12 }
 0x706   :  { %v11213_v47 = vpop.eup %11212  ;;  %4028 = vmatmul.bf16.vlgmr.msrb.gmra.mxu3 %v13888_v35  ;;  %4066 = vmatmul.bf16.vlgmr.msrb.gmra.mxu1 %v13888_v35 }
 0x707   :  { %v3730_v39 = vmul.f32 %v11211_v8, %v3729_v38  ;;  %v3736_v44 = vmul.f32 %v11213_v47, %v3704_v49  ;;  %4624 = vrot.lane.b32.xlu1 %v13890_v18, %s11799_s29  ;;  %4009 = vmatmul.bf16.vlgmr.msrb.gmra.mxu2 %v13890_v18  ;;  %vm3742_vm2 = vweird.f32 %v11213_v47 }
 0x708   :  { %4047 = vmatmul.bf16.vlgmr.msrb.gmra.mxu0 %v13890_v18  ;;  %vm3743_vm0 = vmor %vm3741_vm11, %vm3742_vm2  ;;  %5036 = vrot.lane.b32.xlu2 %v13697_v48, %s11798_s28 }
 0x709   :  { %v3734_v59 = vsel %vm3733_vm6, %v11211_v8, %v3730_v39  ;;  %v3737_v42 = vmul.f32 %v11213_v47, %v3736_v44  ;;  %v9935_v39 = vld [vmem:[#allocation19 + $0xf0] sm:$0xf]  ;;  %v10868_v44 = vld [vmem:[#allocation19 + $0xf4] sm:$0xf0]  ;;  %vm16322_vm6 = vmmov %vm16318_vm1 }
 0x70a   :  { %v3749_v55 = vmul.f32 %v3734_v59, %v13680_v21  ;;  %v3750_v60 = vmul.f32 %v3734_v59, %v13682_v50  ;;  %v10867_v59 = vld [vmem:[#allocation19 + $0xf4] sm:$0xf]  ;;  %vm16323_vm2 = vmmov %vm16318_vm1 }
 0x70b   :  { %v3738_v27 = vmul.f32 0.5, %v3737_v42  ;;  %v9936_v42 = vor.u32 %v10868_v44, %v9935_v39  ;;  %v9863_v39 = vld [vmem:[#allocation19 + $0x60] sm:$0xf]  ;;  %v10850_v44 = vld [vmem:[#allocation19 + $0x64] sm:$0xf0]  ;;  %vm16324_vm11 = vmmov %vm16318_vm1 }
 0x70c   :  { %5136 = vrot.lane.b32.xlu0 %v13731_v25, %s11798_s28  ;;  %v3762_v21 = vmul.f32 %v13830_v32, %v3749_v55  ;;  %v3763_v50 = vmul.f32 %v13832_v43, %v3750_v60  ;;  %v9937_v55 = vld [vmem:[#allocation19 + $0xf8] sm:$0xf0] }
 0x70d   :  { %v3739_v34 = vsub.f32 1.5, %v3738_v27  ;;  %v9940_v60 = vor.u32 %v10867_v59, %v9937_v55  ;;  %4306 = vmatpush.bf16.msra.mxu3 %v9936_v42  ;;  %v9927_v27 = vld [vmem:[#allocation19 + $0xe0] sm:$0xf]  ;;  %v10849_v59 = vld [vmem:[#allocation19 + $0x64] sm:$0xf]  ;;  %v9864_v42 = vor.u32 %v10850_v44, %v9863_v39 }
 0x70e   :  { %v13907_v10 = vadd.f32 %v13838_v14, %v3762_v21  ;;  %v13910_v31 = vadd.f32 %v13849_v16, %v3763_v50  ;;  %v10865_v50 = vld [vmem:[#allocation19 + $0xe4] sm:$0xf]  ;;  %v9865_v55 = vld [vmem:[#allocation19 + $0x68] sm:$0xf0]  ;;  %v9847_v39 = vld [vmem:[#allocation19 + $0x40] sm:$0xf] }
 0x70f   :  { %v3740_v8 = vmul.f32 %v11213_v47, %v3739_v34  ;;  %4775 = vrot.lane.b32.xlu1 %v13890_v18, %s11798_s28  ;;  %4344 = vmatpush.bf16.msra.mxu1 %v9940_v60  ;;  %v10866_v34 = vld [vmem:[#allocation19 + $0xe4] sm:$0xf0]  ;;  %v9911_v60 = vld [vmem:[#allocation19 + $0xc0] sm:$0xf] }
 0x710   :  { %16313 = vst [vmem:[#allocation81_spill] sm:$0xff] %v13907_v10  ;;  %v3814_v12 = vpack.c.bf16 %v13910_v31, %v13907_v10  ;;  %v9928_v21 = vor.u32 %v10866_v34, %v9927_v27  ;;  %5034 = vrot.lane.b32.xlu2 %v13723_v22, %s11798_s28  ;;  %v9868_v27 = vor.u32 %v10849_v59, %v9865_v55  ;;  %v10862_v34 = vld [vmem:[#allocation19 + $0xc4] sm:$0xf0]  ;;  %v10845_v59 = vld [vmem:[#allocation19 + $0x44] sm:$0xf] }
 0x711   :  { %v3744_v46 = vsel %vm3743_vm0, %v11213_v47, %v3740_v8  ;;  %16314 = vst [vmem:[#allocation82_spill] sm:$0xff] %v13910_v31  ;;  %v5082_v47 = vunpack.c.h.b16 %v13715_v2  ;;  %v9929_v8 = vld [vmem:[#allocation19 + $0xe8] sm:$0xf0]  ;;  %v10846_v44 = vld [vmem:[#allocation19 + $0x44] sm:$0xf0]  ;;  %vm16325_vm0 = vmmov %vm16318_vm1 }
 0x712   :  { %v3751_v6 = vmul.f32 %v3744_v46, %v13689_v51  ;;  %v3752_v26 = vmul.f32 %v3744_v46, %v13691_v33  ;;  %v3829_v63 = vunpack.c.l.b16 %v3814_v12  ;;  %v3830_v57 = vunpack.c.h.b16 %v3814_v12  ;;  %v9871_v46 = vld [vmem:[#allocation19 + $0x70] sm:$0xf]  ;;  %4307 = vmatpush.bf16.msra.mxu3 %v9928_v21  ;;  %v10861_v21 = vld [vmem:[#allocation19 + $0xc4] sm:$0xf]  ;;  %v9849_v55 = vld [vmem:[#allocation19 + $0x48] sm:$0xf0] }
 0x714   :  { %v3764_v49 = vmul.f32 %v13830_v32, %v3751_v6  ;;  %v3765_v13 = vmul.f32 %v13832_v43, %v3752_v26  ;;  %5185 = vrot.lane.b32.xlu0 %v13723_v22, %s11804_s0  ;;  %v9932_v6 = vor.u32 %v10865_v50, %v9929_v8  ;;  %v10852_v26 = vld [vmem:[#allocation19 + $0x74] sm:$0xf0]  ;;  %v9913_v50 = vld [vmem:[#allocation19 + $0xc8] sm:$0xf0]  ;;  %v9912_v8 = vor.u32 %v10862_v34, %v9911_v60  ;;  %v10858_v34 = vld [vmem:[#allocation19 + $0xa4] sm:$0xf0] }
 0x715   :  { %v9872_v12 = vor.u32 %v10852_v26, %v9871_v46  ;;  %v9916_v46 = vor.u32 %v10861_v21, %v9913_v50  ;;  %v10848_v26 = vld [vmem:[#allocation19 + $0x54] sm:$0xf0]  ;;  %v9852_v60 = vor.u32 %v10845_v59, %v9849_v55  ;;  %v10857_v21 = vld [vmem:[#allocation19 + $0xa4] sm:$0xf] }
 0x716   :  { %v13925_v51 = vadd.f32 %v13838_v14, %v3764_v49  ;;  %v13928_v33 = vadd.f32 %v13849_v16, %v3765_v13  ;;  %v5081_v16 = vunpack.c.h.b16 %v13713_v40  ;;  %v10851_v49 = vld [vmem:[#allocation19 + $0x74] sm:$0xf]  ;;  %v9873_v13 = vld [vmem:[#allocation19 + $0x78] sm:$0xf0]  ;;  %4345 = vmatpush.bf16.msra.mxu1 %v9932_v6  ;;  %v9855_v6 = vld [vmem:[#allocation19 + $0x50] sm:$0xf] }
 0x717   :  { %4926 = vrot.lane.b32.xlu1 %v13890_v18, %s11797_s1  ;;  %4287 = vmatpush.bf16.msra.mxu2 %v9872_v12  ;;  %v9857_v12 = vld [vmem:[#allocation19 + $0x58] sm:$0xf0]  ;;  %v10841_v59 = vld [vmem:[#allocation19 + $0x24] sm:$0xf] }
 0x718   :  { %16315 = vst [vmem:[#allocation83_spill] sm:$0xff] %v13925_v51  ;;  %v3815_v20 = vpack.c.bf16 %v13928_v33, %v13925_v51  ;;  %v13948_v11 = vpack.c.b16 %v5082_v47, %v5081_v16  ;;  %v9921_v16 = vld [vmem:[#allocation19 + $0xd8] sm:$0xf0]  ;;  %5187 = vrot.lane.b32.xlu2 %v13697_v48, %s11804_s0 }
 0x719   :  { %16316 = vst [vmem:[#allocation84_spill] sm:$0xff] %v13928_v33 }
 0x71a   :  { %v3831_v32 = vunpack.c.l.b16 %v3815_v20  ;;  %v3832_v38 = vunpack.c.h.b16 %v3815_v20  ;;  %v9876_v20 = vor.u32 %v10851_v49, %v9873_v13  ;;  %v10847_v49 = vld [vmem:[#allocation19 + $0x54] sm:$0xf]  ;;  %v9856_v13 = vor.u32 %v10848_v26, %v9855_v6  ;;  %v9839_v6 = vld [vmem:[#allocation19 + $0x30] sm:$0xf]  ;;  %v10844_v26 = vld [vmem:[#allocation19 + $0x34] sm:$0xf0] }
 0x71b   :  { %4288 = vmatpush.bf16.msra.mxu2 %v9864_v42  ;;  %v9848_v42 = vor.u32 %v10846_v44, %v9847_v39  ;;  %v10842_v44 = vld [vmem:[#allocation19 + $0x24] sm:$0xf0] }
 0x71c   :  { %5130 = vrot.lane.b32.xlu0 %v13763_v1, %s11798_s28  ;;  %v13938_v43 = vpack.c.b16 %v3832_v38, %v3830_v57  ;;  %v13940_v14 = vpack.c.b16 %v3831_v32, %v3829_v63  ;;  %v9919_v63 = vld [vmem:[#allocation19 + $0xd0] sm:$0xf]  ;;  %v10864_v57 = vld [vmem:[#allocation19 + $0xd4] sm:$0xf0]  ;;  %v10863_v32 = vld [vmem:[#allocation19 + $0xd4] sm:$0xf]  ;;  %4325 = vmatpush.bf16.msra.mxu0 %v9876_v20 }
 0x71d   :  { %v9920_v38 = vor.u32 %v10864_v57, %v9919_v63  ;;  %v9924_v47 = vor.u32 %v10863_v32, %v9921_v16  ;;  %v9903_v20 = vld [vmem:[#allocation19 + $0xb0] sm:$0xf]  ;;  %v10860_v63 = vld [vmem:[#allocation19 + $0xb4] sm:$0xf0]  ;;  %v9860_v57 = vor.u32 %v10847_v49, %v9857_v12  ;;  %v9905_v16 = vld [vmem:[#allocation19 + $0xb8] sm:$0xf0] }
 0x71e   :  { %4033 = vmatmul.bf16.gmra.mxu3 %v13938_v43  ;;  %4071 = vmatmul.bf16.gmra.mxu1 %v13938_v43  ;;  %v9904_v32 = vor.u32 %v10860_v63, %v9903_v20  ;;  %v10843_v49 = vld [vmem:[#allocation19 + $0x34] sm:$0xf]  ;;  %v9841_v12 = vld [vmem:[#allocation19 + $0x38] sm:$0xf0]  ;;  %v9887_v20 = vld [vmem:[#allocation19 + $0x90] sm:$0xf] }
 0x71f   :  { %4014 = vmatmul.bf16.gmra.mxu2 %v13940_v14  ;;  %4052 = vmatmul.bf16.gmra.mxu0 %v13940_v14  ;;  %v10856_v63 = vld [vmem:[#allocation19 + $0x94] sm:$0xf0] }
 0x720   :  { %4626 = vrot.lane.b32.xlu1 %v13940_v14, %s11799_s29  ;;  %4308 = vmatpush.bf16.msra.mxu3 %v9920_v38  ;;  %v10859_v38 = vld [vmem:[#allocation19 + $0xb4] sm:$0xf] }
 0x721   :  { %4346 = vmatpush.bf16.msra.mxu1 %v9924_v47  ;;  %4326 = vmatpush.bf16.msra.mxu0 %v9868_v27  ;;  %v9908_v47 = vor.u32 %v10859_v38, %v9905_v16  ;;  %v9895_v27 = vld [vmem:[#allocation19 + $0xa0] sm:$0xf]  ;;  %v10855_v38 = vld [vmem:[#allocation19 + $0x94] sm:$0xf]  ;;  %v9889_v16 = vld [vmem:[#allocation19 + $0x98] sm:$0xf0] }
 0x722   :  { %4289 = vmatpush.bf16.msra.mxu2 %v9856_v13  ;;  %v9896_v50 = vor.u32 %v10858_v34, %v9895_v27  ;;  %5132 = vrot.lane.b32.xlu2 %v13775_v23, %s11798_s28  ;;  %v9840_v13 = vor.u32 %v10844_v26, %v9839_v6  ;;  %v9892_v39 = vor.u32 %v10855_v38, %v9889_v16  ;;  %v9879_v27 = vld [vmem:[#allocation19 + $0x80] sm:$0xf]  ;;  %v10854_v34 = vld [vmem:[#allocation19 + $0x84] sm:$0xf0]  ;;  %v9823_v6 = vld [vmem:[#allocation19 + $0x10] sm:$0xf] }
 0x723   :  { %v10840_v26 = vld [vmem:[#allocation19 + $0x14] sm:$0xf0]  ;;  %v10837_v38 = vld [vmem:[#allocation19 + $0x4] sm:$0xf]  ;;  %v9817_v16 = vld [vmem:[#allocation19 + $0x8] sm:$0xf0] }
 0x724   :  { %5236 = vrot.lane.b32.xlu0 %v13948_v11, %s11799_s29  ;;  %4309 = vmatpush.bf16.msra.mxu3 %v9912_v8  ;;  %v9897_v8 = vld [vmem:[#allocation19 + $0xa8] sm:$0xf0] }
 0x725   :  { %4347 = vmatpush.bf16.msra.mxu1 %v9916_v46  ;;  %4327 = vmatpush.bf16.msra.mxu0 %v9860_v57  ;;  %v9900_v46 = vor.u32 %v10857_v21, %v9897_v8  ;;  %v9844_v57 = vor.u32 %v10843_v49, %v9841_v12  ;;  %v10853_v21 = vld [vmem:[#allocation19 + $0x84] sm:$0xf]  ;;  %v9881_v8 = vld [vmem:[#allocation19 + $0x88] sm:$0xf0]  ;;  %v10839_v49 = vld [vmem:[#allocation19 + $0x14] sm:$0xf] }
 0x726   :  { %4290 = vmatpush.bf16.msra.mxu2 %v9848_v42  ;;  %v9833_v42 = vld [vmem:[#allocation19 + $0x28] sm:$0xf0]  ;;  %v9825_v12 = vld [vmem:[#allocation19 + $0x18] sm:$0xf0] }
 0x728   :  { %4777 = vrot.lane.b32.xlu1 %v13940_v14, %s11798_s28  ;;  %4310 = vmatpush.bf16.msra.mxu3 %v9904_v32  ;;  %v9888_v32 = vor.u32 %v10856_v63, %v9887_v20  ;;  %v4495_v20 = vsel %vm16317_vm12, %v13711_v9, 0  ;;  %v9815_v63 = vld [vmem:[#allocation19] sm:$0xf]  ;;  %v4492_v9 = vsel %vm16318_vm1, %v13725_v61, 0  ;;  %vm16326_vm12 = vmmov %vm16325_vm0 }
 0x729   :  { %4348 = vmatpush.bf16.msra.mxu1 %v9908_v47  ;;  %4328 = vmatpush.bf16.msra.mxu0 %v9852_v60  ;;  %v9831_v47 = vld [vmem:[#allocation19 + $0x20] sm:$0xf]  ;;  %v9836_v60 = vor.u32 %v10841_v59, %v9833_v42  ;;  %vm16327_vm1 = vmmov %vm16325_vm0 }
 0x72a   :  { %4291 = vmatpush.bf16.msra.mxu2 %v9840_v13  ;;  %v9832_v55 = vor.u32 %v10842_v44, %v9831_v47  ;;  %5183 = vrot.lane.b32.xlu2 %v13790_v58, %s11804_s0  ;;  %v9824_v13 = vor.u32 %v10840_v26, %v9823_v6  ;;  %v3811_v44 = vld [vmem:[%s16023_s13] sm:$0x3] }
 0x72c   :  { %4928 = vrot.lane.b32.xlu0 %v13940_v14, %s11797_s1  ;;  %4311 = vmatpush.bf16.msra.mxu3 %v9896_v50  ;;  %v9880_v50 = vor.u32 %v10854_v34, %v9879_v27 }
 0x72d   :  { %4349 = vmatpush.bf16.msra.mxu1 %v9900_v46  ;;  %4329 = vmatpush.bf16.msra.mxu0 %v9844_v57  ;;  %v9884_v46 = vor.u32 %v10853_v21, %v9881_v8  ;;  %v9828_v57 = vor.u32 %v10839_v49, %v9825_v12  ;;  %v13989_v21 = vpop.permute.xlu1 %4581 }
 0x72e   :  { %4292 = vmatpush.bf16.msra.mxu2 %v9832_v55  ;;  %v3818_v55 = vperm.slane %v3811_v44, 1 }
 0x730   :  { %4312 = vmatpush.bf16.msra.mxu3 %v9888_v32  ;;  %v10838_v32 = vld [vmem:[#allocation19 + $0x4] sm:$0xf0] }
 0x731   :  { %4350 = vmatpush.bf16.msra.mxu1 %v9892_v39  ;;  %4330 = vmatpush.bf16.msra.mxu0 %v9836_v60  ;;  %v9816_v47 = vor.u32 %v10838_v32, %v9815_v63  ;;  %v9820_v39 = vor.u32 %v10837_v38, %v9817_v16 }
 0x732   :  { %4293 = vmatpush.bf16.msra.mxu2 %v9824_v13 }
 0x734   :  { %4313 = vmatpush.bf16.msra.mxu3 %v9880_v50  ;;  %v3817_v50 = vperm.slane %v3811_v44, 0  ;;  %v4486_v44 = vsel %vm16320_vm9, %v13757_v56, 0  ;;  %vm16329_vm9 = vmmov %vm16325_vm0 }
 0x735   :  { %4351 = vmatpush.bf16.msra.mxu1 %v9884_v46  ;;  %4331 = vmatpush.bf16.msra.mxu0 %v9828_v57  ;;  %v4489_v46 = vsel %vm16319_vm13, %v13745_v45, 0  ;;  %vm16328_vm13 = vmmov %vm16325_vm0 }
 0x736   :  { %4294 = vmatpush.bf16.msra.mxu2 %v9816_v47  ;;  %v4684_v47 = vpop.permute.xlu1 %4683 }
 0x737   :  { %v4701_v45 = vsel %vm4421_vm15, %v4684_v47, 0 }
 0x738   :  { %4501 = vmatpush.bf16.xpose.msrb.mxu3 %v4495_v20 }
 0x739   :  { %4332 = vmatpush.bf16.msra.mxu0 %v9820_v39 }
 0x740   :  { %4502 = vmatpush.bf16.xpose.msrb.mxu3 %v4492_v9 }
 0x748   :  { %4503 = vmatpush.bf16.xpose.msrb.mxu3 %v4489_v46 }
 0x750   :  { %4504 = vmatpush.bf16.xpose.msrb.mxu3 %v4486_v44 }
 0x783   :  { %v4067_v42 = vpop.f32.mrf.mxu1 }
 0x785   :  { %v4048_v59 = vpop.f32.mrf.mxu0 }
 0x786   :  { %v4049_v60 = vadd.f32 %v4048_v59, %v3818_v55 }
 0x788   :  { %v4068_v6 = vadd.f32 %v4067_v42, %v4049_v60 }
 0x789   :  { %v4029_v34 = vpop.f32.mrf.mxu3 }
 0x78a   :  { %v4010_v27 = vpop.f32.mrf.mxu2  ;;  %v4078_v20 = vmax.f32 %v4068_v6, 0.0 }
 0x78b   :  { %v4011_v49 = vadd.f32 %v4010_v27, %v3817_v50  ;;  %v4069_v13 = vpop.f32.mrf.mxu1 }
 0x78d   :  { %v4050_v8 = vpop.f32.mrf.mxu0  ;;  %v4030_v57 = vadd.f32 %v4029_v34, %v4011_v49 }
 0x78e   :  { %v4051_v26 = vadd.f32 %v4050_v8, %v3818_v55 }
 0x78f   :  { %v4077_v59 = vmax.f32 %v4030_v57, 0.0 }
 0x790   :  { %v4070_v12 = vadd.f32 %v4069_v13, %v4051_v26 }
 0x791   :  { %v4031_v16 = vpop.f32.mrf.mxu3 }
 0x792   :  { %v4080_v63 = vmax.f32 %v4070_v12, 0.0  ;;  %v4012_v61 = vpop.f32.mrf.mxu2 }
 0x793   :  { %v4013_v32 = vadd.f32 %v4012_v61, %v3817_v50 }
 0x794   :  { %v4119_v38 = vpack.c.bf16 %v4080_v63, %v4078_v20 }
 0x795   :  { %v4032_v39 = vadd.f32 %v4031_v16, %v4013_v32 }
 0x796   :  { %4314 = vmatmul.bf16.vlgmr.msra.gmra.mxu3 %v4119_v38  ;;  %4352 = vmatmul.bf16.vlgmr.msra.gmra.mxu1 %v4119_v38 }
 0x797   :  { %v4079_v42 = vmax.f32 %v4032_v39, 0.0  ;;  %4707 = vmatpush.bf16.xpose.msra.mxu3 %v4701_v45  ;;  %v4586_v39 = vpop.permute.xlu2 %4585 }
 0x798   :  { %v4603_v44 = vsel %vm4421_vm15, %v4586_v39, 0  ;;  %v4544_v39 = vsel %vm4421_vm15, %v13775_v23, 0 }
 0x799   :  { %v4118_v9 = vpack.c.bf16 %v4079_v42, %v4077_v59  ;;  %4609 = vmatpush.bf16.xpose.msrb.mxu1 %v4603_v44  ;;  %v4438_v42 = vsel %vm4421_vm15, %v13777_v24, 0 }
 0x79a   :  { %4444 = vmatpush.bf16.xpose.msrb.mxu2 %v4438_v42 }
 0x79b   :  { %v4072_v27 = vpop.f32.mrf.mxu1  ;;  %4295 = vmatmul.bf16.vlgmr.msra.gmra.mxu2 %v4118_v9  ;;  %4333 = vmatmul.bf16.vlgmr.msra.gmra.mxu0 %v4118_v9 }
 0x79c   :  { %v4053_v60 = vpop.f32.mrf.mxu0 }
 0x79d   :  { %v4054_v34 = vadd.f32 %v4053_v60, %v3818_v55 }
 0x79f   :  { %v4073_v26 = vadd.f32 %v4072_v27, %v4054_v34  ;;  %v14003_v9 = vpop.permute.xlu2 %4579  ;;  %v4584_v27 = vpop.permute.xlu0 %4583 }
 0x7a1   :  { %v4034_v46 = vpop.f32.mrf.mxu3  ;;  %v4082_v20 = vmax.f32 %v4073_v26, 0.0 }
 0x7a2   :  { %v4015_v8 = vpop.f32.mrf.mxu2 }
 0x7a3   :  { %v4074_v56 = vpop.f32.mrf.mxu1  ;;  %v4016_v13 = vadd.f32 %v4015_v8, %v3817_v50 }
 0x7a4   :  { %v4055_v6 = vpop.f32.mrf.mxu0 }
 0x7a5   :  { %v4056_v49 = vadd.f32 %v4055_v6, %v3818_v55  ;;  %v4035_v57 = vadd.f32 %v4034_v46, %v4016_v13  ;;  %v4432_v13 = vsel %vm4421_vm15, %v13723_v22, 0 }
 0x7a7   :  { %v4075_v12 = vadd.f32 %v4074_v56, %v4056_v49  ;;  %v4081_v45 = vmax.f32 %v4035_v57, 0.0  ;;  %v4737_v60 = vpop.permute.xlu2 %4736  ;;  %v4635_v8 = vpop.permute.xlu0 %4634  ;;  %v4550_v56 = vsel %vm4421_vm15, %v13731_v25, 0 }
 0x7a8   :  { %v4631_v49 = vpop.permute.xlu1 %4630  ;;  %4556 = vmatpush.bf16.xpose.msrb.mxu0 %v4550_v56 }
 0x7a9   :  { %v4084_v63 = vmax.f32 %v4075_v12, 0.0  ;;  %v4036_v16 = vpop.f32.mrf.mxu3 }
 0x7aa   :  { %v4017_v61 = vpop.f32.mrf.mxu2 }
 0x7ab   :  { %v4018_v32 = vadd.f32 %v4017_v61, %v3817_v50  ;;  %v4121_v38 = vpack.c.bf16 %v4084_v63, %v4082_v20  ;;  %v4435_v50 = vsel %vm4421_vm15, %v13697_v48, 0  ;;  %v4547_v63 = vsel %vm4421_vm15, %v13737_v53, 0 }
 0x7ac   :  { %4445 = vmatpush.bf16.xpose.msrb.mxu2 %v4435_v50 }
 0x7ad   :  { %v4037_v47 = vadd.f32 %v4036_v16, %v4018_v32  ;;  %4319 = vmatmul.bf16.gmra.mxu3 %v4121_v38  ;;  %4357 = vmatmul.bf16.gmra.mxu1 %v4121_v38  ;;  %v4652_v38 = vsel %vm16323_vm2, %v4635_v8, 0  ;;  %v4429_v16 = vsel %vm4421_vm15, %v13790_v58, 0  ;;  %v4541_v8 = vsel %vm4421_vm15, %v13763_v1, 0  ;;  %vm16332_vm2 = vmmov %vm16325_vm0 }
 0x7af   :  { %v4083_v59 = vmax.f32 %v4037_v47, 0.0  ;;  %v4786_v34 = vpop.permute.xlu2 %4785  ;;  %v4633_v6 = vpop.permute.xlu0 %4632  ;;  %v4600_v47 = vsel %vm4421_vm15, %v4584_v27, 0  ;;  %v4597_v27 = vsel %vm4421_vm15, %v13989_v21, 0  ;;  %v4646_v21 = vsel %vm16325_vm0, %v4631_v49, 0 }
 0x7b0   :  { %4557 = vmatpush.bf16.xpose.msrb.mxu0 %v4547_v63  ;;  %4610 = vmatpush.bf16.xpose.msrb.mxu1 %v4600_v47  ;;  %v4649_v42 = vsel %vm16324_vm11, %v4633_v6, 0  ;;  %v4803_v31 = vsel %vm16326_vm12, %v4786_v34, 0  ;;  %v11367_v34 = vld [vmem:[#allocation7 + $0x8] sm:$0xff]  ;;  %vm16333_vm11 = vmmov %vm16325_vm0 }
 0x7b1   :  { %v4120_v55 = vpack.c.bf16 %v4083_v59, %v4081_v45  ;;  %vm16334_vm12 = vmmov %vm16325_vm0 }
 0x7b3   :  { %4300 = vmatmul.bf16.gmra.mxu2 %v4120_v55  ;;  %4338 = vmatmul.bf16.gmra.mxu0 %v4120_v55  ;;  %v4754_v55 = vsel %vm4421_vm15, %v4737_v60, 0  ;;  %v4117_v60 = vld [vmem:[%s16025_s15] sm:$0x3] }
 0x7b4   :  { %4446 = vmatpush.bf16.xpose.msrb.mxu2 %v4432_v13  ;;  %v14059_v47 = vperm.slane %v4117_v60, 1 }
 0x7b7   :  { %v14007_v46 = vpop.permute.xlu2 %4679 }
 0x7b8   :  { %4558 = vmatpush.bf16.xpose.msrb.mxu0 %v4544_v39  ;;  %4611 = vmatpush.bf16.xpose.msrb.mxu1 %v4597_v27 }
 0x7bc   :  { %4447 = vmatpush.bf16.xpose.msrb.mxu2 %v4429_v16 }
 0x7bd   :  { %9943 = vmatmul.msk.bf16.vlgmr.msrb.gmra.mxu3 %vm16321_vm5, %v13890_v18  ;;  %v14011_v18 = vpop.permute.xlu0 %4681  ;;  %vm16330_vm5 = vmmov %vm16325_vm0 }
 0x7bf   :  { %v14009_v26 = vpop.permute.xlu2 %4732 }
 0x7c0   :  { %4559 = vmatpush.bf16.xpose.msrb.mxu0 %v4541_v8 }
 0x7c4   :  { %4658 = vmatpush.bf16.xpose.msra.mxu2 %v4652_v38  ;;  %v14054_v38 = vperm.slane %v4117_v60, 0 }
 0x7c5   :  { %v14021_v20 = vpop.permute.xlu0 %4734 }
 0x7c7   :  { %v14017_v12 = vpop.permute.xlu2 %4781 }
 0x7c8   :  { %4760 = vmatpush.bf16.xpose.msra.mxu0 %v4754_v55 }
 0x7cc   :  { %4659 = vmatpush.bf16.xpose.msra.mxu2 %v4649_v42 }
 0x7cd   :  { %9944 = vmatmul.msk.bf16.gmra.mxu3 %vm16322_vm6, %v13940_v14  ;;  %v14019_v14 = vpop.permute.xlu1 %4783  ;;  %v4629_v32 = vpop.permute.xlu0 %4628  ;;  %vm16331_vm6 = vmmov %vm16325_vm0 }
 0x7ce   :  { %v4643_v36 = vsel %vm16327_vm1, %v4629_v32, 0  ;;  %vm16335_vm1 = vmmov %vm16325_vm0 }
 0x7cf   :  { %v14025_v61 = vpop.permute.xlu2 %4730 }
 0x7d4   :  { %4660 = vmatpush.bf16.xpose.msra.mxu2 %v4646_v21 }
 0x7d5   :  { %v14027_v57 = vpop.permute.xlu1 %4832  ;;  %v14039_v59 = vpop.permute.xlu0 %4677 }
 0x7d7   :  { %v14035_v44 = vpop.permute.xlu2 %4887 }
 0x7dc   :  { %4661 = vmatpush.bf16.xpose.msra.mxu2 %v4643_v36 }
 0x7dd   :  { %v14037_v45 = vpop.permute.xlu1 %4828  ;;  %v4835_v63 = vpop.permute.xlu0 %4834 }
 0x7df   :  { %v14043_v50 = vpop.permute.xlu2 %4936 }
 0x7e5   :  { %v14049_v56 = vpop.permute.xlu1 %5189  ;;  %v14065_v51 = vpop.permute.xlu0 %4779 }
 0x7e7   :  { %v14056_v16 = vpop.permute.xlu2 %4985 }
 0x7ed   :  { %v14062_v8 = vpop.permute.xlu1 %5134  ;;  %v14077_v32 = vpop.permute.xlu0 %4885 }
 0x7ef   :  { %v14069_v21 = vpop.permute.xlu2 %4934 }
 0x813   :  { %v4353_v6 = vpop.f32.mrf.mxu1 }
 0x818   :  { %v4334_v13 = vpop.f32.mrf.mxu0 }
 0x819   :  { %v4315_v39 = vpop.f32.mrf.mxu3  ;;  %v4335_v30 = vadd.f32 %v4334_v13, %v14059_v47 }
 0x81b   :  { %v4354_v49 = vadd.f32 %v4353_v6, %v4335_v30  ;;  %v4355_v60 = vpop.f32.mrf.mxu1 }
 0x81d   :  { %v4364_v30 = vmul.f32 %v11367_v34, %v4354_v49  ;;  %v14081_v49 = vpop.permute.xlu2 %4983  ;;  %v4831_v34 = vpop.permute.xlu0 %4830 }
 0x81e   :  { %v4296_v55 = vpop.f32.mrf.mxu2 }
 0x81f   :  { %v4297_v42 = vadd.f32 %v4296_v55, %v14054_v38  ;;  %v4594_v55 = vsel %vm4421_vm15, %v14003_v9, 0  ;;  %v11369_v9 = vld [vmem:[#allocation7 + $0x28] sm:$0xff] }
 0x820   :  { %v4336_v27 = vpop.f32.mrf.mxu0  ;;  %4612 = vmatpush.bf16.xpose.msrb.mxu1 %v4594_v55  ;;  %v4852_v55 = vsel %vm4421_vm15, %v4835_v63, 0 }
 0x821   :  { %v4316_v33 = vadd.f32 %v4315_v39, %v4297_v42  ;;  %v4337_v10 = vadd.f32 %v4336_v27, %v14059_v47  ;;  %v4317_v39 = vpop.f32.mrf.mxu3  ;;  %v14075_v42 = vpop.permute.xlu1 %5032 }
 0x823   :  { %v4363_v19 = vmul.f32 %v11366_v7, %v4316_v33  ;;  %v4356_v13 = vadd.f32 %v4355_v60, %v4337_v10 }
 0x825   :  { %v4371_v27 = vpack.c.bf16 %v4364_v30, %v4363_v19  ;;  %v4366_v28 = vmul.f32 %v11368_v41, %v4356_v13 }
 0x826   :  { %v4298_v15 = vpop.f32.mrf.mxu2 }
 0x827   :  { %v4299_v54 = vadd.f32 %v4298_v15, %v14054_v38  ;;  %v4800_v15 = vsel %vm16328_vm13, %v14019_v14, 0  ;;  %v4395_v36 = vunpack.c.l.b16 %v4371_v27  ;;  %v4516_v33 = vunpack.c.h.b16 %v4371_v27  ;;  %vm16336_vm13 = vmmov %vm16325_vm0 }
 0x828   :  { %4809 = vmatpush.bf16.xpose.msra.mxu1 %v4803_v31 }
 0x829   :  { %v4318_v6 = vadd.f32 %v4317_v39, %v4299_v54  ;;  %v14097_v14 = vpop.permute.xlu1 %5238 }
 0x82a   :  { %v4358_v54 = vpop.f32.mrf.mxu1 }
 0x82b   :  { %v4365_v17 = vmul.f32 %v11369_v9, %v4318_v6  ;;  %v14103_v9 = vpop.permute.xlu2 %4932 }
 0x82d   :  { %v4372_v7 = vpack.c.bf16 %v4366_v28, %v4365_v17 }
 0x82f   :  { %v4396_v31 = vunpack.c.l.b16 %v4372_v7  ;;  %v4517_v60 = vunpack.c.h.b16 %v4372_v7 }
 0x830   :  { %v4339_v10 = vpop.f32.mrf.mxu0  ;;  %4810 = vmatpush.bf16.xpose.msra.mxu1 %v4800_v15  ;;  %v4320_v13 = vpop.f32.mrf.mxu3 }
 0x831   :  { %v14083_v19 = vpack.c.b16 %v4396_v31, %v4395_v36  ;;  %v14085_v41 = vpack.c.b16 %v4517_v60, %v4516_v33  ;;  %v4340_v63 = vadd.f32 %v4339_v10, %v14059_v47  ;;  %v4849_v36 = vsel %vm4421_vm15, %v14027_v57, 0  ;;  %v11370_v33 = vld [vmem:[#allocation7 + $0x50] sm:$0xff]  ;;  %v11372_v57 = vld [vmem:[#allocation7 + $0x80] sm:$0xff] }
 0x832   :  { %v4360_v7 = vpop.f32.mrf.mxu1 }
 0x833   :  { %4975 = vrot.lane.b32.xlu2 %v14085_v41, %s11805_s10  ;;  %9945 = vmatmul.msk.bf16.vlgmr.msrb.gmra.mxu0 %vm4421_vm15, %v14085_v41  ;;  %v4359_v27 = vadd.f32 %v4358_v54, %v4340_v63  ;;  %v11371_v54 = vld [vmem:[#allocation7 + $0x58] sm:$0xff] }
 0x834   :  { %4726 = vrot.lane.b32.xlu0 %v14083_v19, %s11799_s29  ;;  %4575 = vrot.lane.b32.xlu1 %v14083_v19, %s11803_s3  ;;  %v11373_v63 = vld [vmem:[#allocation7 + $0x78] sm:$0xff] }
 0x835   :  { %9941 = vmatmul.msk.bf16.vlgmr.msrb.gmra.mxu2 %vm4421_vm15, %v14083_v19 }
 0x836   :  { %v4301_v17 = vpop.f32.mrf.mxu2  ;;  %4858 = vmatpush.bf16.xpose.msrb.mxu2 %v4852_v55  ;;  %v4368_v55 = vmul.f32 %v11371_v54, %v4359_v27  ;;  %v4846_v27 = vsel %vm4421_vm15, %v4831_v34, 0 }
 0x837   :  { %v4302_v28 = vadd.f32 %v4301_v17, %v14054_v38  ;;  %v14114_v17 = vpop.permute.xlu1 %5287 }
 0x838   :  { %v4341_v39 = vpop.f32.mrf.mxu0 }
 0x839   :  { %v4321_v30 = vadd.f32 %v4320_v13, %v4302_v28  ;;  %v4342_v6 = vadd.f32 %v4341_v39, %v14059_v47  ;;  %v4322_v47 = vpop.f32.mrf.mxu3 }
 0x83b   :  { %5028 = vrot.lane.b32.xlu2 %v14083_v19, %s11798_s28  ;;  %v4367_v31 = vmul.f32 %v11370_v33, %v4321_v30  ;;  %v4361_v60 = vadd.f32 %v4360_v7, %v4342_v6  ;;  %v14116_v6 = vpop.permute.xlu0 %4883 }
 0x83c   :  { %5179 = vrot.lane.b32.xlu0 %v14083_v19, %s11804_s0  ;;  %4673 = vrot.lane.b32.xlu1 %v14085_v41, %s11803_s3 }
 0x83d   :  { %v4373_v28 = vpack.c.bf16 %v4368_v55, %v4367_v31  ;;  %v4370_v39 = vmul.f32 %v11372_v57, %v4361_v60  ;;  %v14127_v60 = vpop.permute.xlu2 %4981  ;;  %v4843_v55 = vsel %vm4421_vm15, %v14037_v45, 0 }
 0x83e   :  { %v4303_v15 = vpop.f32.mrf.mxu2  ;;  %4859 = vmatpush.bf16.xpose.msrb.mxu2 %v4849_v36 }
 0x83f   :  { %v4304_v10 = vadd.f32 %v4303_v15, %v14054_v38  ;;  %v4698_v38 = vsel %vm4421_vm15, %v14011_v18, 0  ;;  %v4397_v15 = vunpack.c.l.b16 %v4373_v28  ;;  %v4518_v36 = vunpack.c.h.b16 %v4373_v28  ;;  %v4625_v34 = vpop.permute.xlu1 %4624 }
 0x840   :  { %4708 = vmatpush.bf16.xpose.msra.mxu3 %v4698_v38  ;;  %v5080_v28 = vunpack.c.h.b16 %v13735_v0  ;;  %v4692_v38 = vsel %vm4421_vm15, %v14039_v59, 0  ;;  %v4797_v59 = vsel %vm16330_vm5, %v14017_v12, 0  ;;  %v4794_v12 = vsel %vm16331_vm6, %v14065_v51, 0  ;;  %vm16338_vm5 = vmmov %vm16325_vm0 }
 0x841   :  { %v4323_v13 = vadd.f32 %v4322_v47, %v4304_v10  ;;  %v4751_v47 = vsel %vm4421_vm15, %v14021_v20, 0  ;;  %4811 = vmatpush.bf16.xpose.msra.mxu1 %v4797_v59  ;;  %v5077_v51 = vunpack.c.h.b16 %v13747_v52  ;;  %vm16339_vm6 = vmmov %vm16325_vm0 }
 0x842   :  { %4761 = vmatpush.bf16.xpose.msra.mxu0 %v4751_v47 }
 0x843   :  { %v4369_v30 = vmul.f32 %v11373_v63, %v4323_v13  ;;  %5126 = vrot.lane.b32.xlu2 %v14085_v41, %s11798_s28  ;;  %v14139_v54 = vpop.permute.xlu0 %4881  ;;  %v5079_v13 = vunpack.c.h.b16 %v13733_v29 }
 0x844   :  { %5283 = vrot.lane.b32.xlu0 %v13775_v23, %s11804_s0  ;;  %4824 = vrot.lane.b32.xlu1 %v14085_v41, %s11799_s29 }
 0x845   :  { %v4374_v7 = vpack.c.bf16 %v4370_v39, %v4369_v30  ;;  %v14151_v20 = vpop.permute.xlu2 %4930  ;;  %v14153_v57 = vpack.c.b16 %v5080_v28, %v5079_v13  ;;  %v4695_v39 = vsel %vm4421_vm15, %v14007_v46, 0  ;;  %v4905_v46 = vsel %vm4421_vm15, %v14035_v44, 0 }
 0x846   :  { %4860 = vmatpush.bf16.xpose.msrb.mxu2 %v4846_v27  ;;  %v5047_v28 = vsel %vm4421_vm15, %v14075_v42, 0  ;;  %v4899_v42 = vsel %vm4421_vm15, %v14116_v6, 0  ;;  %v4896_v6 = vsel %vm4421_vm15, %v14139_v54, 0 }
 0x847   :  { %v4398_v33 = vunpack.c.l.b16 %v4374_v7  ;;  %v4519_v31 = vunpack.c.h.b16 %v4374_v7  ;;  %v14157_v45 = vpop.permute.xlu1 %4775 }
 0x848   :  { %4709 = vmatpush.bf16.xpose.msra.mxu3 %v4695_v39 }
 0x849   :  { %v14129_v18 = vpack.c.b16 %v4398_v33, %v4397_v15  ;;  %v14131_v10 = vpack.c.b16 %v4519_v31, %v4518_v36  ;;  %v4748_v36 = vsel %vm4421_vm15, %v14009_v26, 0  ;;  %4812 = vmatpush.bf16.xpose.msra.mxu1 %v4794_v12  ;;  %v5078_v26 = vunpack.c.h.b16 %v13749_v5 }
 0x84a   :  { %4762 = vmatpush.bf16.xpose.msra.mxu0 %v4748_v36 }
 0x84b   :  { %9946 = vmatmul.msk.bf16.gmra.mxu0 %vm4421_vm15, %v14131_v10  ;;  %9942 = vmatmul.msk.bf16.gmra.mxu2 %vm4421_vm15, %v14129_v18  ;;  %v5039_v63 = vpop.permute.xlu0 %5038  ;;  %v14214_v39 = vpack.c.b16 %v5078_v26, %v5077_v51  ;;  %v5256_v51 = vsel %vm16336_vm13, %v14097_v14, 0  ;;  %vm16344_vm13 = vmmov %vm16325_vm0 }
 0x84c   :  { %5285 = vrot.lane.b32.xlu2 %v13737_v53, %s11804_s0  ;;  %5281 = vrot.lane.b32.xlu0 %v13763_v1, %s11804_s0  ;;  %v5056_v30 = vsel %vm4421_vm15, %v5039_v63, 0 }
 0x84d   :  { %4877 = vrot.lane.b32.xlu1 %v14083_v19, %s11805_s10  ;;  %v5037_v7 = vpop.permute.xlu2 %5036 }
 0x84e   :  { %4861 = vmatpush.bf16.xpose.msrb.mxu2 %v4843_v55  ;;  %v5053_v44 = vsel %vm4421_vm15, %v5037_v7, 0  ;;  %v4745_v55 = vsel %vm4421_vm15, %v14025_v61, 0  ;;  %v4951_v61 = vsel %vm16325_vm0, %v14069_v21, 0 }
 0x84f   :  { %v14179_v27 = vpop.permute.xlu1 %4926 }
 0x850   :  { %4710 = vmatpush.bf16.xpose.msra.mxu3 %v4692_v38 }
 0x852   :  { %4763 = vmatpush.bf16.xpose.msra.mxu0 %v4745_v55 }
 0x853   :  { %v14198_v47 = vpop.permute.xlu0 %4979 }
 0x854   :  { %5234 = vrot.lane.b32.xlu2 %v14153_v57, %s11799_s29  ;;  %4728 = vrot.lane.b32.xlu0 %v14129_v18, %s11799_s29 }
 0x855   :  { %4577 = vrot.lane.b32.xlu1 %v14129_v18, %s11803_s3  ;;  %v5035_v15 = vpop.permute.xlu2 %5034 }
 0x856   :  { %v5050_v33 = vsel %vm4421_vm15, %v5035_v15, 0 }
 0x857   :  { %v4627_v31 = vpop.permute.xlu1 %4626 }
 0x858   :  { %4911 = vmatpush.bf16.xpose.msrb.mxu3 %v4905_v46 }
 0x85b   :  { %9949 = vmatmul.msk.bf16.vlgmr.msra.gmra.mxu2 %vm16329_vm9, %v4625_v34  ;;  %v4954_v34 = vsel %vm16333_vm11, %v14043_v50, 0  ;;  %v4902_v50 = vsel %vm4421_vm15, %v14077_v32, 0  ;;  %v5137_v32 = vpop.permute.xlu0 %5136  ;;  %vm16337_vm9 = vmmov %vm16325_vm0 }
 0x85c   :  { %5062 = vmatpush.bf16.xpose.msra.mxu2 %v5056_v30  ;;  %5387 = vrot.lane.b32.xlu2 %v13948_v11, %s11798_s28  ;;  %v4948_v30 = vsel %vm16334_vm12, %v14103_v9, 0  ;;  %v4945_v9 = vsel %vm16335_vm1, %v14151_v20, 0  ;;  %v5154_v59 = vsel %vm4421_vm15, %v5137_v32, 0  ;;  %v5105_v55 = vsel %vm16337_vm9, %v13810_v62, 0  ;;  %vm16341_vm11 = vmmov %vm16325_vm0 }
 0x85d   :  { %5438 = vrot.lane.b32.xlu0 %v13731_v25, %s11797_s1  ;;  %5340 = vrot.lane.b32.xlu1 %v13777_v24, %s11797_s1  ;;  %v14210_v13 = vpop.permute.xlu2 %5187  ;;  %vm16342_vm12 = vmmov %vm16325_vm0 }
 0x85e   :  { %4960 = vmatpush.bf16.xpose.msrb.mxu0 %v4954_v34  ;;  %vm16343_vm1 = vmmov %vm16325_vm0 }
 0x85f   :  { %v14276_v7 = vpop.permute.xlu1 %4777  ;;  %vm16346_vm9 = vmmov %vm16325_vm0 }
 0x860   :  { %4912 = vmatpush.bf16.xpose.msrb.mxu3 %v4902_v50 }
 0x863   :  { %v14234_v21 = vpop.permute.xlu0 %5185 }
 0x864   :  { %5063 = vmatpush.bf16.xpose.msra.mxu2 %v5053_v44  ;;  %5336 = vrot.lane.b32.xlu2 %v13723_v22, %s11797_s1 }
 0x865   :  { %4826 = vrot.lane.b32.xlu0 %v14131_v10, %s11799_s29  ;;  %5389 = vrot.lane.b32.xlu1 %v13810_v62, %s11798_s28  ;;  %v5133_v63 = vpop.permute.xlu2 %5132 }
 0x866   :  { %4961 = vmatpush.bf16.xpose.msrb.mxu0 %v4951_v61 }
 0x868   :  { %4913 = vmatpush.bf16.xpose.msrb.mxu3 %v4899_v42  ;;  %v5102_v42 = vsel %vm16339_vm6, %v13948_v11, 0  ;;  %vm16347_vm6 = vmmov %vm16325_vm0 }
 0x86b   :  { %9950 = vmatmul.msk.bf16.gmra.mxu2 %vm16332_vm2, %v4627_v31  ;;  %v14248_v38 = vpop.permute.xlu0 %5130  ;;  %v5151_v31 = vsel %vm4421_vm15, %v14062_v8, 0  ;;  %vm16340_vm2 = vmmov %vm16325_vm0 }
 0x86c   :  { %5064 = vmatpush.bf16.xpose.msra.mxu2 %v5050_v33  ;;  %5385 = vrot.lane.b32.xlu2 %v14153_v57, %s11798_s28 }
 0x86d   :  { %4879 = vrot.lane.b32.xlu0 %v14129_v18, %s11805_s10  ;;  %4675 = vrot.lane.b32.xlu1 %v14131_v10, %s11803_s3 }
 0x86e   :  { %4962 = vmatpush.bf16.xpose.msrb.mxu0 %v4948_v30  ;;  %v4994_v30 = vsel %vm4421_vm15, %v14198_v47, 0 }
 0x870   :  { %4914 = vmatpush.bf16.xpose.msrb.mxu3 %v4896_v6 }
 0x873   :  { %v5237_v54 = vpop.permute.xlu0 %5236 }
 0x874   :  { %5065 = vmatpush.bf16.xpose.msra.mxu2 %v5047_v28  ;;  %5334 = vrot.lane.b32.xlu2 %v13790_v58, %s11797_s1  ;;  %v5253_v14 = vsel %vm16338_vm5, %v5237_v54, 0  ;;  %vm5696_vm5 = vcmask 523264  }
 0x875   :  { %5383 = vrot.lane.b32.xlu0 %v14214_v39, %s11798_s28  ;;  %5338 = vrot.lane.b32.xlu1 %v13697_v48, %s11797_s1 }
 0x876   :  { %4963 = vmatpush.bf16.xpose.msrb.mxu0 %v4945_v9 }
 0x87c   :  { %5491 = vrot.lane.b32.xlu2 %v13777_v24, %s11778_s5  ;;  %v14238_v24 = vpop.permute.xlu2 %5183 }
 0x87d   :  { %5330 = vrot.lane.b32.xlu0 %v14083_v19, %s11797_s1  ;;  %5232 = vrot.lane.b32.xlu1 %v14214_v39, %s11799_s29 }
 0x884   :  { %5540 = vrot.lane.b32.xlu2 %v13810_v62, %s11797_s1 }
 0x885   :  { %5030 = vrot.lane.b32.xlu0 %v14129_v18, %s11798_s28  ;;  %5228 = vrot.lane.b32.xlu1 %v13888_v35, %s11799_s29 }
 0x88c   :  { %5589 = vrot.lane.b32.xlu2 %v13731_v25, %s11778_s5  ;;  %v14274_v25 = vpop.permute.xlu0 %4928 }
 0x88d   :  { %5489 = vrot.lane.b32.xlu0 %v13697_v48, %s11778_s5  ;;  %5277 = vrot.lane.b32.xlu1 %v14085_v41, %s11804_s0  ;;  %v14256_v46 = vpop.permute.xlu2 %4975 }
 0x894   :  { %5538 = vrot.lane.b32.xlu2 %v13948_v11, %s11797_s1 }
 0x895   :  { %5128 = vrot.lane.b32.xlu0 %v14131_v10, %s11798_s28  ;;  %4977 = vrot.lane.b32.xlu1 %v14131_v10, %s11805_s10  ;;  %v14264_v20 = vpop.permute.xlu2 %5028 }
 0x89c   :  { %5587 = vrot.lane.b32.xlu2 %v13737_v53, %s11778_s5 }
 0x89d   :  { %5434 = vrot.lane.b32.xlu0 %v13775_v23, %s11797_s1  ;;  %5436 = vrot.lane.b32.xlu1 %v13737_v53, %s11797_s1  ;;  %v14272_v48 = vpop.permute.xlu2 %5126  ;;  %v5003_v53 = vsel %vm4421_vm15, %v14056_v16, 0  ;;  %v5000_v16 = vsel %vm4421_vm15, %v14081_v49, 0  ;;  %v5148_v49 = vsel %vm4421_vm15, %v5133_v63, 0  ;;  %v5145_v63 = vsel %vm4421_vm15, %v14248_v38, 0 }
 0x8a4   :  { %5536 = vrot.lane.b32.xlu2 %v14153_v57, %s11797_s1 }
 0x8a5   :  { %5487 = vrot.lane.b32.xlu0 %v13723_v22, %s11778_s5  ;;  %5379 = vrot.lane.b32.xlu1 %v13888_v35, %s11798_s28 }
 0x8a6   :  { %v14287_v44 = vpop.permute.xlu2 %5285  ;;  %v4727_v15 = vpop.permute.xlu0 %4726 }
 0x8a7   :  { %v4576_v36 = vpop.permute.xlu1 %4575  ;;  %9953 = vmatmul.msk.bf16.vlgmr.msra.gmra.mxu0 %vm4421_vm15, %v4727_v15 }
 0x8a8   :  { %9947 = vmatmul.msk.bf16.vlgmr.msrb.gmra.mxu1 %vm4421_vm15, %v4576_v36  ;;  %5160 = vmatpush.bf16.xpose.msra.mxu0 %v5154_v59 }
 0x8a9   :  { %5009 = vmatpush.bf16.xpose.msrb.mxu1 %v5003_v53  ;;  %v5099_v53 = vsel %vm16341_vm11, %v14153_v57, 0  ;;  %v5096_v57 = vsel %vm16325_vm0, %v14214_v39, 0  ;;  %vm16350_vm11 = vmmov %vm16325_vm0 }
 0x8ac   :  { %5585 = vrot.lane.b32.xlu2 %v13775_v23, %s11778_s5 }
 0x8ad   :  { %5485 = vrot.lane.b32.xlu0 %v13790_v58, %s11778_s5  ;;  %5230 = vrot.lane.b32.xlu1 %v13938_v43, %s11799_s29  ;;  %v4997_v58 = vsel %vm4421_vm15, %v14127_v60, 0  ;;  %s16461_s29 = sld [smem:[#allocation97_spill]] }
 0x8ae   :  { %v5235_v22 = vpop.permute.xlu2 %5234  ;;  %v14299_v12 = vpop.permute.xlu0 %5179 }
 0x8af   :  { %v4674_v33 = vpop.permute.xlu1 %4673  ;;  %v5250_v11 = vsel %vm16340_vm2, %v5235_v22, 0  ;;  %vm16349_vm2 = vmmov %vm16325_vm0 }
 0x8b0   :  { %9951 = vmatmul.msk.bf16.vlgmr.msra.gmra.mxu3 %vm4421_vm15, %v4674_v33  ;;  %5161 = vmatpush.bf16.xpose.msra.mxu0 %v5151_v31  ;;  %v4561_v50 = vpop.f32.mrf.mxu0 }
 0x8b1   :  { %5010 = vmatpush.bf16.xpose.msrb.mxu1 %v5000_v16  ;;  %5111 = vmatpush.bf16.xpose.msra.mxu3 %v5105_v55 }
 0x8b3   :  { %s9041_s12 = sshll.u32 %s16461_s29, 4  ;;  %s9042_s12 = int_to_ptr.hbm [resolvable:$true] %s9041_s12 }
 0x8b4   :  { %5481 = vrot.lane.b32.xlu2 %v14083_v19, %s11778_s5  ;;  %v4506_v19 = vpop.f32.mrf.mxu3 }
 0x8b5   :  { %5332 = vrot.lane.b32.xlu0 %v14129_v18, %s11797_s1  ;;  %5181 = vrot.lane.b32.xlu1 %v14129_v18, %s11804_s0 }
 0x8b6   :  { %v14310_v23 = vpop.permute.xlu2 %5387  ;;  %v14315_v34 = vpop.permute.xlu0 %5283 }
 0x8b7   :  { %v4825_v8 = vpop.permute.xlu1 %4824 }
 0x8b8   :  { %9957 = vmatmul.msk.bf16.vlgmr.msrb.gmra.mxu2 %vm4421_vm15, %v4825_v8  ;;  %v4449_v26 = vpop.f32.mrf.mxu2  ;;  %5162 = vmatpush.bf16.xpose.msra.mxu0 %v5148_v49  ;;  %v4563_v54 = vpop.f32.mrf.mxu0 }
 0x8b9   :  { %5011 = vmatpush.bf16.xpose.msrb.mxu1 %v4997_v58  ;;  %5262 = vmatpush.bf16.xpose.msrb.mxu2 %v5256_v51  ;;  %v4507_v28 = vadd.f32 %v4506_v19, %v4449_v26  ;;  %v5207_v26 = vsel %vm4421_vm15, %v14049_v56, 0 }
 0x8ba   :  { %5112 = vmatpush.bf16.xpose.msra.mxu3 %v5102_v42 }
 0x8bb   :  { %v14322_v60 = vadd.f32 %v4561_v50, %v4507_v28  ;;  %v5204_v50 = vsel %vm4421_vm15, %v14210_v13, 0  ;;  %v5201_v13 = vsel %vm4421_vm15, %v14234_v21, 0  ;;  %v5198_v21 = vsel %vm4421_vm15, %v14238_v24, 0  ;;  %v16348_v24 = vld [vmem:[#allocation37_spill] sm:$0xff] }
 0x8bc   :  { %5579 = vrot.lane.b32.xlu2 %v14085_v41, %s11778_s5  ;;  %v4508_v6 = vpop.f32.mrf.mxu3 }
 0x8bd   :  { %5534 = vrot.lane.b32.xlu0 %v14214_v39, %s11797_s1  ;;  %5432 = vrot.lane.b32.xlu1 %v13763_v1, %s11797_s1 }
 0x8be   :  { %v14331_v61 = vpop.permute.xlu2 %5336  ;;  %v14333_v62 = vpop.permute.xlu0 %5281 }
 0x8bf   :  { %v14335_v32 = vpop.permute.xlu1 %4877 }
 0x8c0   :  { %v4451_v9 = vpop.f32.mrf.mxu2  ;;  %5163 = vmatpush.bf16.xpose.msra.mxu0 %v5145_v63 }
 0x8c1   :  { %5012 = vmatpush.bf16.xpose.msrb.mxu1 %v4994_v30  ;;  %5263 = vmatpush.bf16.xpose.msrb.mxu2 %v5253_v14 }
 0x8c2   :  { %5113 = vmatpush.bf16.xpose.msra.mxu3 %v5099_v53 }
 0x8c4   :  { %5532 = vrot.lane.b32.xlu2 %v13938_v43, %s11797_s1  ;;  %v4511_v15 = vpop.f32.mrf.mxu3 }
 0x8c5   :  { %5530 = vrot.lane.b32.xlu0 %v13888_v35, %s11797_s1  ;;  %5381 = vrot.lane.b32.xlu1 %v13938_v43, %s11798_s28 }
 0x8c6   :  { %v14350_v38 = vpop.permute.xlu2 %5385  ;;  %v4729_v47 = vpop.permute.xlu0 %4728 }
 0x8c7   :  { %v4578_v59 = vpop.permute.xlu1 %4577  ;;  %9954 = vmatmul.msk.bf16.gmra.mxu0 %vm4421_vm15, %v4729_v47 }
 0x8c8   :  { %9948 = vmatmul.msk.bf16.gmra.mxu1 %vm4421_vm15, %v4578_v59  ;;  %v4566_v22 = vpop.f32.mrf.mxu0  ;;  %v16345_v59 = vld [vmem:[#allocation39_spill] sm:$0xff] }
 0x8c9   :  { %5264 = vmatpush.bf16.xpose.msrb.mxu2 %v5250_v11 }
 0x8ca   :  { %5114 = vmatpush.bf16.xpose.msra.mxu3 %v5096_v57 }
 0x8cd   :  { %5483 = vrot.lane.b32.xlu0 %v14129_v18, %s11778_s5  ;;  %5279 = vrot.lane.b32.xlu1 %v14131_v10, %s11804_s0 }
 0x8ce   :  { %v4454_v36 = vpop.f32.mrf.mxu2  ;;  %v14360_v33 = vpop.permute.xlu2 %5334 }
 0x8cf   :  { %v4512_v16 = vadd.f32 %v4511_v15, %v4454_v36  ;;  %v5439_v58 = vpop.permute.xlu0 %5438  ;;  %v5341_v49 = vpop.permute.xlu1 %5340 }
 0x8d0   :  { %v5358_v18 = vsel %vm4421_vm15, %v5341_v49, 0  ;;  %v4568_v56 = vpop.f32.mrf.mxu0  ;;  %v5456_v36 = vsel %vm4421_vm15, %v5439_v58, 0  ;;  %v5349_v58 = vsel %vm4421_vm15, %v14360_v33, 0  ;;  %v5404_v33 = vsel %vm16325_vm0, %v14310_v23, 0 }
 0x8d1   :  { %v14362_v31 = vadd.f32 %v4566_v22, %v4512_v16  ;;  %v5296_v23 = vsel %vm4421_vm15, %v14333_v62, 0 }
 0x8d5   :  { %5428 = vrot.lane.b32.xlu1 %v14085_v41, %s11797_s1  ;;  %v4513_v41 = vpop.f32.mrf.mxu3 }
 0x8d6   :  { %v14368_v8 = vpop.permute.xlu2 %5491  ;;  %v4456_v55 = vpop.f32.mrf.mxu2 }
 0x8d7   :  { %v4827_v51 = vpop.permute.xlu0 %4826  ;;  %v5390_v19 = vpop.permute.xlu1 %5389  ;;  %9961 = vmatmul.msk.bf16.vlgmr.msrb.gmra.mxu0 %vm16343_vm1, %v14179_v27  ;;  %v4514_v39 = vadd.f32 %v4513_v41, %v4456_v55  ;;  %v4509_v27 = vadd.f32 %v4508_v6, %v4451_v9  ;;  %vm16352_vm1 = vmmov %vm16325_vm0 }
 0x8d8   :  { %9955 = vmatmul.msk.bf16.vlgmr.msra.gmra.mxu1 %vm16342_vm12, %v14157_v45  ;;  %9958 = vmatmul.msk.bf16.gmra.mxu2 %vm4421_vm15, %v4827_v51  ;;  %vm16351_vm12 = vmmov %vm16325_vm0  ;;  %v5401_v55 = vsel %vm16352_vm1, %v14350_v38, 0  ;;  %v5509_v38 = vsel %vm4421_vm15, %v14368_v8, 0 }
 0x8d9   :  { %5213 = vmatpush.bf16.xpose.msra.mxu1 %v5207_v26  ;;  %5364 = vmatpush.bf16.xpose.msrb.mxu0 %v5358_v18  ;;  %v4574_v63 = vadd.f32 %v4568_v56, %v4514_v39  ;;  %v4572_v6 = vadd.f32 %v4563_v54, %v4509_v27  ;;  %v5305_v54 = vsel %vm4421_vm15, %v14114_v17, 0  ;;  %v5299_v26 = vsel %vm4421_vm15, %v14315_v34, 0  ;;  %vm16361_vm1 = vmmov %vm16325_vm0 }
 0x8da   :  { %v5632_v34 = vmul.f32 0.125, %v14322_v60 }
 0x8db   :  { %v5635_v42 = vmul.f32 0.125, %v4574_v63 }
 0x8dd   :  { %5583 = vrot.lane.b32.xlu1 %v13763_v1, %s11778_s5  ;;  %v14397_v53 = vadd.f32 %v5635_v42, %v16345_v59 }
 0x8de   :  { %v5541_v28 = vpop.permute.xlu2 %5540 }
 0x8df   :  { %v4880_v14 = vpop.permute.xlu0 %4879  ;;  %v4676_v45 = vpop.permute.xlu1 %4675  ;;  %v5706_v9 = vsel %vm5696_vm5, %v14397_v53, -inf  ;;  %v5558_v18 = vsel %vm16350_vm11, %v5541_v28, 0  ;;  %vm16358_vm11 = vmmov %vm16325_vm0 }
 0x8e0   :  { %9952 = vmatmul.msk.bf16.gmra.mxu3 %vm4421_vm15, %v4676_v45  ;;  %v16357_v45 = vld [vmem:[#allocation36_spill] sm:$0xff] }
 0x8e1   :  { %5214 = vmatpush.bf16.xpose.msra.mxu1 %v5204_v50  ;;  %v14458_v63 = vadd.f32 %v5632_v34, %v16357_v45 }
 0x8e3   :  { %v5697_v8 = vsel %vm5696_vm5, %v14458_v63, -inf }
 0x8e5   :  { %5430 = vrot.lane.b32.xlu1 %v14131_v10, %s11797_s1 }
 0x8e6   :  { %v14388_v47 = vpop.permute.xlu2 %5589 }
 0x8e7   :  { %v14385_v30 = vpop.permute.xlu0 %5383  ;;  %v5339_v11 = vpop.permute.xlu1 %5338  ;;  %9962 = vmatmul.msk.bf16.gmra.mxu0 %vm16346_vm9, %v14274_v25  ;;  %vm16354_vm9 = vmmov %vm16325_vm0  ;;  %v5607_v42 = vsel %vm4421_vm15, %v14388_v47, 0 }
 0x8e8   :  { %v5355_v1 = vsel %vm4421_vm15, %v5339_v11, 0  ;;  %9956 = vmatmul.msk.bf16.gmra.mxu1 %vm16344_vm13, %v14276_v7  ;;  %9965 = vmatmul.msk.bf16.vlgmr.msra.gmra.mxu2 %vm4421_vm15, %v14264_v20  ;;  %v5633_v20 = vmul.f32 0.125, %v4572_v6  ;;  %v5352_v7 = vsel %vm4421_vm15, %v14331_v61, 0  ;;  %v5302_v61 = vsel %vm4421_vm15, %v14287_v44, 0  ;;  %vm16353_vm13 = vmmov %vm16325_vm0 }
 0x8e9   :  { %5215 = vmatpush.bf16.xpose.msra.mxu1 %v5201_v13  ;;  %5365 = vmatpush.bf16.xpose.msrb.mxu0 %v5355_v1 }
 0x8ea   :  { %v14418_v22 = vadd.f32 %v5633_v20, %v16348_v24 }
 0x8ec   :  { %v5700_v17 = vsel %vm5696_vm5, %v14418_v22, -inf }
 0x8ed   :  { %5581 = vrot.lane.b32.xlu1 %v14131_v10, %s11778_s5  ;;  %5707 = vmax.xlane.f32.xlu2 %v5706_v9 }
 0x8ee   :  { %v5539_v10 = vpop.permute.xlu2 %5538 }
 0x8ef   :  { %v14409_v15 = vpop.permute.xlu0 %5330  ;;  %v5233_v25 = vpop.permute.xlu1 %5232 }
 0x8f0   :  { %v5247_v16 = vsel %vm16347_vm6, %v5233_v25, 0  ;;  %9959 = vmatmul.msk.bf16.vlgmr.msrb.gmra.mxu3 %vm4421_vm15, %v14335_v32  ;;  %v5407_v32 = vsel %vm16349_vm2, %v5390_v19, 0  ;;  %vm16355_vm6 = vmmov %vm16325_vm0 }
 0x8f1   :  { %5311 = vmatpush.bf16.xpose.msrb.mxu3 %v5305_v54  ;;  %5216 = vmatpush.bf16.xpose.msra.mxu1 %v5198_v21  ;;  %v5398_v56 = vsel %vm16355_vm6, %v14385_v30, 0  ;;  %vm16356_vm2 = vmmov %vm16325_vm0 }
 0x8f2   :  { %5265 = vmatpush.bf16.xpose.msrb.mxu2 %v5247_v16  ;;  %5366 = vmatpush.bf16.xpose.msrb.mxu0 %v5352_v7  ;;  %v4663_v7 = vpop.f32.mrf.mxu2  ;;  %vm16366_vm6 = vmmov %vm16325_vm0 }
 0x8f6   :  { %v5588_v44 = vpop.permute.xlu2 %5587 }
 0x8f7   :  { %v5031_v49 = vpop.permute.xlu0 %5030  ;;  %v5229_v57 = vpop.permute.xlu1 %5228  ;;  %5701 = vmax.xlane.f32.xlu0 %v5700_v17  ;;  %9969 = vmatmul.msk.bf16.vlgmr.msra.gmra.mxu0 %vm4421_vm15, %v14272_v48 }
 0x8f8   :  { %9963 = vmatmul.msk.bf16.vlgmr.msrb.gmra.mxu1 %vm4421_vm15, %v14256_v46  ;;  %9966 = vmatmul.msk.bf16.gmra.mxu2 %vm4421_vm15, %v5031_v49  ;;  %v5555_v46 = vsel %vm16351_vm12, %v5539_v10, 0  ;;  %vm16359_vm12 = vmmov %vm16325_vm0 }
 0x8f9   :  { %5312 = vmatpush.bf16.xpose.msrb.mxu3 %v5302_v61  ;;  %5413 = vmatpush.bf16.xpose.msrb.mxu1 %v5407_v32 }
 0x8fa   :  { %5462 = vmatpush.bf16.xpose.msra.mxu2 %v5456_v36  ;;  %5367 = vmatpush.bf16.xpose.msrb.mxu0 %v5349_v58  ;;  %v4665_v49 = vpop.f32.mrf.mxu2 }
 0x8fe   :  { %v5537_v48 = vpop.permute.xlu2 %5536 }
 0x8ff   :  { %v5490_v51 = vpop.permute.xlu0 %5489  ;;  %v14435_v19 = vpop.permute.xlu1 %5277  ;;  %v5552_v50 = vsel %vm16353_vm13, %v5537_v48, 0  ;;  %vm16362_vm13 = vmmov %vm16325_vm0 }
 0x900   :  { %9960 = vmatmul.msk.bf16.gmra.mxu3 %vm4421_vm15, %v4880_v14  ;;  %v5506_v27 = vsel %vm4421_vm15, %v5490_v51, 0 }
 0x901   :  { %5313 = vmatpush.bf16.xpose.msrb.mxu3 %v5299_v26  ;;  %5414 = vmatpush.bf16.xpose.msrb.mxu1 %v5404_v33 }
 0x902   :  { %5564 = vmatpush.bf16.xpose.msra.mxu0 %v5558_v18 }
 0x907   :  { %v5129_v41 = vpop.permute.xlu0 %5128  ;;  %v4978_v39 = vpop.permute.xlu1 %4977 }
 0x908   :  { %9964 = vmatmul.msk.bf16.gmra.mxu1 %vm4421_vm15, %v4978_v39  ;;  %9973 = vmatmul.msk.bf16.vlgmr.msrb.gmra.mxu2 %vm16354_vm9, %v5229_v57  ;;  %v16360_v57 = vld [vmem:[#allocation40_spill] sm:$0xff]  ;;  %vm16365_vm9 = vmmov %vm16325_vm0 }
 0x909   :  { %9970 = vmatmul.msk.bf16.gmra.mxu0 %vm4421_vm15, %v5129_v41  ;;  %5314 = vmatpush.bf16.xpose.msrb.mxu3 %v5296_v23  ;;  %v16363_v41 = vld [vmem:[#allocation38_spill] sm:$0xff] }
 0x90a   :  { %5565 = vmatpush.bf16.xpose.msra.mxu0 %v5555_v46  ;;  %5415 = vmatpush.bf16.xpose.msrb.mxu1 %v5401_v55 }
 0x90f   :  { %v5435_v62 = vpop.permute.xlu0 %5434  ;;  %v5437_v28 = vpop.permute.xlu1 %5436 }
 0x910   :  { %v5453_v14 = vsel %vm4421_vm15, %v5437_v28, 0  ;;  %9967 = vmatmul.msk.bf16.vlgmr.msra.gmra.mxu3 %vm16356_vm2, %v13888_v35  ;;  %v5450_v60 = vsel %vm4421_vm15, %v5435_v62, 0  ;;  %v5604_v35 = vsel %vm4421_vm15, %v5588_v44, 0  ;;  %v5634_v44 = vmul.f32 0.125, %v14362_v31  ;;  %v4668_v31 = vpop.f32.mrf.mxu2 }
 0x911   :  { %5463 = vmatpush.bf16.xpose.msra.mxu2 %v5453_v14  ;;  %5515 = vmatpush.bf16.xpose.msra.mxu3 %v5509_v38 }
 0x912   :  { %5566 = vmatpush.bf16.xpose.msra.mxu0 %v5552_v50  ;;  %5416 = vmatpush.bf16.xpose.msrb.mxu1 %v5398_v56  ;;  %v14492_v39 = vadd.f32 %v5634_v44, %v16363_v41  ;;  %v16364_v50 = vld [vmem:[#allocation43_spill] sm:$0xff] }
 0x914   :  { %v5703_v38 = vsel %vm5696_vm5, %v14492_v39, -inf }
 0x917   :  { %v5488_v30 = vpop.permute.xlu0 %5487  ;;  %v5380_v11 = vpop.permute.xlu1 %5379  ;;  %5698 = vmax.xlane.f32.xlu1 %v5697_v8 }
 0x918   :  { %9971 = vmatmul.msk.bf16.vlgmr.msra.gmra.mxu1 %vm4421_vm15, %v14299_v12  ;;  %v5503_v1 = vsel %vm4421_vm15, %v5488_v30, 0  ;;  %v5586_v12 = vpop.permute.xlu2 %5585 }
 0x919   :  { %9977 = vmatmul.msk.bf16.vlgmr.msrb.gmra.mxu0 %vm4421_vm15, %v14409_v15  ;;  %5464 = vmatpush.bf16.xpose.msra.mxu2 %v5450_v60  ;;  %v5601_v59 = vsel %vm4421_vm15, %v5586_v12, 0  ;;  %v4670_v60 = vpop.f32.mrf.mxu2 }
 0x91a   :  { %5516 = vmatpush.bf16.xpose.msra.mxu3 %v5506_v27  ;;  %5613 = vmatpush.bf16.xpose.msra.mxu1 %v5607_v42 }
 0x91f   :  { %v5486_v13 = vpop.permute.xlu0 %5485  ;;  %v5231_v47 = vpop.permute.xlu1 %5230 }
 0x920   :  { %9968 = vmatmul.msk.bf16.gmra.mxu3 %vm16358_vm11, %v13938_v43  ;;  %9974 = vmatmul.msk.bf16.gmra.mxu2 %vm16325_vm0, %v5231_v47  ;;  %v5500_v6 = vsel %vm4421_vm15, %v5486_v13, 0  ;;  %v5482_v10 = vpop.permute.xlu2 %5481 }
 0x922   :  { %5517 = vmatpush.bf16.xpose.msra.mxu3 %v5503_v1  ;;  %5614 = vmatpush.bf16.xpose.msra.mxu1 %v5604_v35 }
 0x925   :  { %v4614_v20 = vpop.f32.mrf.mxu1 }
 0x926   :  { %v4664_v36 = vadd.f32 %v4663_v7, %v4614_v20 }
 0x927   :  { %v5333_v9 = vpop.permute.xlu0 %5332  ;;  %v5182_v21 = vpop.permute.xlu1 %5181 }
 0x928   :  { %9972 = vmatmul.msk.bf16.gmra.mxu1 %vm4421_vm15, %v5182_v21  ;;  %v5580_v48 = vpop.permute.xlu2 %5579 }
 0x929   :  { %9978 = vmatmul.msk.bf16.gmra.mxu0 %vm4421_vm15, %v5333_v9 }
 0x92a   :  { %5518 = vmatpush.bf16.xpose.msra.mxu3 %v5500_v6  ;;  %5615 = vmatpush.bf16.xpose.msra.mxu1 %v5601_v59 }
 0x92d   :  { %v4616_v61 = vpop.f32.mrf.mxu1 }
 0x92e   :  { %v4666_v33 = vadd.f32 %v4665_v49, %v4616_v61 }
 0x92f   :  { %v5535_v43 = vpop.permute.xlu0 %5534  ;;  %v5433_v15 = vpop.permute.xlu1 %5432 }
 0x930   :  { %v5549_v25 = vsel %vm16359_vm12, %v5535_v43, 0  ;;  %v5447_v54 = vsel %vm4421_vm15, %v5433_v15, 0  ;;  %9975 = vmatmul.msk.bf16.vlgmr.msrb.gmra.mxu3 %vm4421_vm15, %v14435_v19  ;;  %v4765_v19 = vpop.f32.mrf.mxu0  ;;  %v5533_v45 = vpop.permute.xlu2 %5532 }
 0x931   :  { %5567 = vmatpush.bf16.xpose.msra.mxu0 %v5549_v25  ;;  %5465 = vmatpush.bf16.xpose.msra.mxu2 %v5447_v54  ;;  %v16367_v54 = vld [vmem:[#allocation46_spill] sm:$0xff] }
 0x933   :  { %v4712_v16 = vpop.f32.mrf.mxu3 }
 0x934   :  { %v4722_v24 = vadd.f32 %v4712_v16, %v4664_v36 }
 0x936   :  { %v5636_v17 = vmul.f32 0.125, %v4722_v24 }
 0x937   :  { %v5531_v58 = vpop.permute.xlu0 %5530  ;;  %v5382_v32 = vpop.permute.xlu1 %5381 }
 0x938   :  { %v14484_v18 = vadd.f32 %v5636_v17, %v16360_v57  ;;  %9979 = vmatmul.msk.bf16.vlgmr.msrb.gmra.mxu1 %vm16361_vm1, %v5380_v11  ;;  %v14502_v62 = vpop.f32.mrf.mxu0 }
 0x939   :  { %9985 = vmatmul.msk.bf16.vlgmr.msra.gmra.mxu0 %vm16362_vm13, %v5531_v58 }
 0x93a   :  { %v5709_v51 = vsel %vm5696_vm5, %v14484_v18, -inf }
 0x93b   :  { %5710 = vmax.xlane.f32.xlu0 %v5709_v51  ;;  %v4714_v26 = vpop.f32.mrf.mxu3  ;;  %v4863_v11 = vpop.f32.mrf.mxu2 }
 0x93c   :  { %v4723_v46 = vadd.f32 %v4714_v26, %v4666_v33 }
 0x93e   :  { %v5637_v55 = vmul.f32 0.125, %v4723_v46  ;;  %v16368_v46 = vld [vmem:[#allocation49_spill] sm:$0xff] }
 0x93f   :  { %v5280_v23 = vpop.permute.xlu1 %5279  ;;  %v5484_v12 = vpop.permute.xlu0 %5483 }
 0x940   :  { %9976 = vmatmul.msk.bf16.gmra.mxu3 %vm4421_vm15, %v5280_v23  ;;  %v14496_v34 = vadd.f32 %v5637_v55, %v16364_v50 }
 0x942   :  { %v5712_v56 = vsel %vm5696_vm5, %v14496_v34, -inf }
 0x943   :  { %5704 = vmax.xlane.f32.xlu0 %v5703_v38  ;;  %5713 = vmax.xlane.f32.xlu2 %v5712_v56  ;;  %v14515_v59 = vpop.f32.mrf.mxu2 }
 0x944   :  { %v14507_v8 = vpop.f32.mrf.mxu0 }
 0x945   :  { %v4619_v28 = vpop.f32.mrf.mxu1 }
 0x946   :  { %v4669_v9 = vadd.f32 %v4668_v31, %v4619_v28 }
 0x947   :  { %v5429_v14 = vpop.permute.xlu1 %5428 }
 0x948   :  { %9980 = vmatmul.msk.bf16.gmra.mxu1 %vm16365_vm9, %v5382_v32  ;;  %9981 = vmatmul.msk.bf16.vlgmr.msra.gmra.mxu2 %vm4421_vm15, %v5429_v14 }
 0x949   :  { %9986 = vmatmul.msk.bf16.gmra.mxu0 %vm16366_vm6, %v5533_v45  ;;  %v16369_v45 = vld [vmem:[#allocation45_spill] sm:$0xff] }
 0x94c   :  { %v4772_v1 = vpop.f32.mrf.mxu0 }
 0x94d   :  { %v4621_v42 = vpop.f32.mrf.mxu1 }
 0x94e   :  { %v4671_v16 = vadd.f32 %v4670_v60, %v4621_v42 }
 0x94f   :  { %v5584_v27 = vpop.permute.xlu1 %5583 }
 0x950   :  { %v5598_v30 = vsel %vm4421_vm15, %v5584_v27, 0  ;;  %9983 = vmatmul.msk.bf16.vlgmr.msra.gmra.mxu3 %vm4421_vm15, %v5482_v10 }
 0x951   :  { %5616 = vmatpush.bf16.xpose.msra.mxu1 %v5598_v30  ;;  %v16370_v30 = vld [vmem:[#allocation47_spill] sm:$0xff] }
 0x954   :  { %v4965_v6 = vpop.f32.mrf.mxu0 }
 0x955   :  { %v4814_v35 = vpop.f32.mrf.mxu1 }
 0x956   :  { %v4815_v10 = vadd.f32 %v4814_v35, %v4765_v19 }
 0x957   :  { %v5431_v13 = vpop.permute.xlu1 %5430 }
 0x958   :  { %9982 = vmatmul.msk.bf16.gmra.mxu2 %vm4421_vm15, %v5431_v13  ;;  %9987 = vmatmul.msk.bf16.vlgmr.msra.gmra.mxu1 %vm4421_vm15, %v5580_v48  ;;  %v4873_v33 = vadd.f32 %v4863_v11, %v4815_v10 }
 0x95a   :  { %v5640_v55 = vmul.f32 0.125, %v4873_v33 }
 0x95b   :  { %v14520_v15 = vpop.f32.mrf.mxu2 }
 0x95c   :  { %v14528_v17 = vpop.f32.mrf.mxu0  ;;  %v14541_v60 = vadd.f32 %v5640_v55, %v16369_v45 }
 0x95d   :  { %v14513_v47 = vpop.f32.mrf.mxu1 }
 0x95e   :  { %v5721_v27 = vsel %vm5696_vm5, %v14541_v60, -inf }
 0x95f   :  { %v5582_v25 = vpop.permute.xlu1 %5581 }
 0x960   :  { %9984 = vmatmul.msk.bf16.gmra.mxu3 %vm4421_vm15, %v5484_v12 }
 0x963   :  { %v4717_v21 = vpop.f32.mrf.mxu3  ;;  %v4870_v19 = vpop.f32.mrf.mxu2 }
 0x964   :  { %v4724_v20 = vadd.f32 %v4717_v21, %v4669_v9  ;;  %v4970_v31 = vpop.f32.mrf.mxu0  ;;  %v16371_v21 = vld [vmem:[#allocation42_spill] sm:$0xff] }
 0x965   :  { %v14518_v7 = vpop.f32.mrf.mxu1 }
 0x966   :  { %v5638_v43 = vmul.f32 0.125, %v4724_v20 }
 0x968   :  { %v14523_v36 = vadd.f32 %v5638_v43, %v16367_v54  ;;  %9988 = vmatmul.msk.bf16.gmra.mxu1 %vm4421_vm15, %v5582_v25 }
 0x96a   :  { %v5702_v24 = vpop.xlane.xlu0 %5701  ;;  %v5715_v61 = vsel %vm5696_vm5, %v14523_v36, -inf }
 0x96b   :  { %v5794_v58 = vsub.f32 %v14418_v22, %v5702_v24  ;;  %5716 = vmax.xlane.f32.xlu2 %v5715_v61  ;;  %v4719_v32 = vpop.f32.mrf.mxu3  ;;  %v14552_v13 = vpop.f32.mrf.mxu2 }
 0x96c   :  { %v4725_v49 = vadd.f32 %v4719_v32, %v4671_v16  ;;  %v14556_v9 = vpop.f32.mrf.mxu0  ;;  %v16372_v32 = vld [vmem:[#allocation51_spill] sm:$0xff] }
 0x96d   :  { %v5827_v57 = vmul.f32 1.442695, %v5794_v58  ;;  %v4821_v44 = vpop.f32.mrf.mxu1 }
 0x96e   :  { %v5639_v51 = vmul.f32 0.125, %v4725_v49  ;;  %v4822_v26 = vadd.f32 %v4821_v44, %v4772_v1 }
 0x96f   :  { %11214 = vpow2.f32 %v5827_v57 }
 0x970   :  { %v14532_v48 = vadd.f32 %v5639_v51, %v16368_v46  ;;  %v4876_v41 = vadd.f32 %v4870_v19, %v4822_v26  ;;  %v4817_v46 = vadd.f32 %v14513_v47, %v14502_v62 }
 0x972   :  { %v5718_v23 = vsel %vm5696_vm5, %v14532_v48, -inf  ;;  %v5643_v56 = vmul.f32 0.125, %v4876_v41  ;;  %v4874_v55 = vadd.f32 %v14515_v59, %v4817_v46  ;;  %v5708_v46 = vpop.xlane.xlu2 %5707 }
 0x973   :  { %5719 = vmax.xlane.f32.xlu1 %v5718_v23  ;;  %v4916_v22 = vpop.f32.mrf.mxu3  ;;  %v5069_v24 = vpop.f32.mrf.mxu2 }
 0x974   :  { %v4966_v28 = vadd.f32 %v4965_v6, %v4916_v22  ;;  %v14546_v11 = vadd.f32 %v5643_v56, %v16370_v30  ;;  %v14563_v58 = vpop.f32.mrf.mxu0  ;;  %v4820_v56 = vadd.f32 %v14518_v7, %v14507_v8  ;;  %v16374_v7 = vld [vmem:[#allocation44_spill] sm:$0xff] }
 0x975   :  { %v14536_v50 = vpop.eup %11214  ;;  %v5014_v38 = vpop.f32.mrf.mxu1 }
 0x976   :  { %v5892_v14 = vsel %vm5696_vm5, %v14536_v50, 0.0  ;;  %v5024_v42 = vadd.f32 %v5014_v38, %v4966_v28  ;;  %v5730_v6 = vsel %vm5696_vm5, %v14546_v11, -inf  ;;  %v5641_v38 = vmul.f32 0.125, %v4874_v55  ;;  %v16373_v28 = vld [vmem:[#allocation41_spill] sm:$0xff] }
 0x977   :  { %5893 = vadd.xlane.f32.xlu2 %v5892_v14  ;;  %v4875_v47 = vadd.f32 %v14520_v15, %v4820_v56 }
 0x978   :  { %v5644_v12 = vmul.f32 0.125, %v5024_v42  ;;  %v14588_v14 = vadd.f32 %v5641_v38, %v16373_v28 }
 0x979   :  { %v5642_v30 = vmul.f32 0.125, %v4875_v47 }
 0x97a   :  { %v14559_v20 = vadd.f32 %v5644_v12, %v16371_v21 }
 0x97b   :  { %5722 = vmax.xlane.f32.xlu1 %v5721_v27  ;;  %v14548_v35 = vpop.f32.mrf.mxu3  ;;  %v5072_v41 = vpop.f32.mrf.mxu2  ;;  %v14595_v21 = vadd.f32 %v5642_v30, %v16374_v7  ;;  %v5796_v7 = vsub.f32 %v14397_v53, %v5708_v46 }
 0x97c   :  { %v5733_v10 = vsel %vm5696_vm5, %v14559_v20, -inf  ;;  %v5167_v23 = vpop.f32.mrf.mxu0 }
 0x97d   :  { %v14550_v1 = vpop.f32.mrf.mxu1  ;;  %v5831_v53 = vmul.f32 1.442695, %v5796_v7 }
 0x97f   :  { %5731 = vmax.xlane.f32.xlu2 %v5730_v6  ;;  %v5724_v6 = vsel %vm5696_vm5, %v14588_v14, -inf }
 0x983   :  { %v4921_v43 = vpop.f32.mrf.mxu3  ;;  %v14590_v45 = vpop.f32.mrf.mxu2 }
 0x984   :  { %v4971_v25 = vadd.f32 %v4970_v31, %v4921_v43 }
 0x985   :  { %v5019_v54 = vpop.f32.mrf.mxu1 }
 0x986   :  { %v5026_v16 = vadd.f32 %v5019_v54, %v4971_v25  ;;  %v5170_v42 = vpop.f32.mrf.mxu0  ;;  %v5727_v54 = vsel %vm5696_vm5, %v14595_v21, -inf }
 0x987   :  { %5734 = vmax.xlane.f32.xlu2 %v5733_v10 }
 0x988   :  { %v5646_v61 = vmul.f32 0.125, %v5026_v16 }
 0x98a   :  { %v14566_v49 = vadd.f32 %v5646_v61, %v16372_v32  ;;  %v5699_v57 = vpop.xlane.xlu1 %5698 }
 0x98b   :  { %v5793_v44 = vsub.f32 %v14458_v63, %v5699_v57  ;;  %v14569_v33 = vpop.f32.mrf.mxu3  ;;  %v5267_v16 = vpop.f32.mrf.mxu2 }
 0x98c   :  { %v5739_v19 = vsel %vm5696_vm5, %v14566_v49, -inf }
 0x98d   :  { %v5825_v51 = vmul.f32 1.442695, %v5793_v44  ;;  %v14571_v26 = vpop.f32.mrf.mxu1 }
 0x98e   :  { %v14601_v10 = vpop.f32.mrf.mxu0 }
 0x98f   :  { %11216 = vpow2.f32 %v5825_v51  ;;  %5740 = vmax.xlane.f32.xlu2 %v5739_v19 }
 0x993   :  { %v14578_v22 = vpop.f32.mrf.mxu3  ;;  %v5269_v19 = vpop.f32.mrf.mxu2 }
 0x995   :  { %v14580_v63 = vpop.eup %11216  ;;  %v5218_v31 = vpop.f32.mrf.mxu1 }
 0x996   :  { %v5889_v62 = vsel %vm5696_vm5, %v14580_v63, 0.0  ;;  %v14612_v55 = vpop.f32.mrf.mxu0 }
 0x997   :  { %5890 = vadd.xlane.f32.xlu0 %v5889_v62 }
 0x99b   :  { %v5118_v59 = vpop.f32.mrf.mxu3 }
 0x99c   :  { %v5119_v12 = vadd.f32 %v5118_v59, %v5069_v24  ;;  %v16375_v24 = vld [vmem:[#allocation48_spill] sm:$0xff] }
 0x99d   :  { %v5220_v27 = vpop.f32.mrf.mxu1 }
 0x99e   :  { %v5176_v8 = vadd.f32 %v5167_v23, %v5119_v12  ;;  %v5268_v23 = vadd.f32 %v5267_v16, %v5218_v31  ;;  %v16376_v12 = vld [vmem:[#allocation52_spill] sm:$0xff]  ;;  %v5270_v16 = vadd.f32 %v5269_v19, %v5220_v27  ;;  %v16377_v27 = vld [vmem:[#allocation54_spill] sm:$0xff] }
 0x99f   :  { %5725 = vmax.xlane.f32.xlu0 %v5724_v6 }
 0x9a0   :  { %v5649_v25 = vmul.f32 0.125, %v5176_v8 }
 0x9a2   :  { %v14604_v61 = vadd.f32 %v5649_v25, %v16375_v24  ;;  %v4968_v25 = vadd.f32 %v14528_v17, %v14548_v35 }
 0x9a3   :  { %v5121_v43 = vpop.f32.mrf.mxu3 }
 0x9a4   :  { %v5748_v51 = vsel %vm5696_vm5, %v14604_v61, -inf  ;;  %v5122_v24 = vadd.f32 %v5121_v43, %v5072_v41  ;;  %v5025_v46 = vadd.f32 %v14550_v1, %v4968_v25 }
 0x9a5   :  { %v14597_v15 = vpop.f32.mrf.mxu1 }
 0x9a6   :  { %v5177_v35 = vadd.f32 %v5170_v42, %v5122_v24  ;;  %v5645_v19 = vmul.f32 0.125, %v5025_v46  ;;  %v16379_v24 = vld [vmem:[#allocation56_spill] sm:$0xff] }
 0x9a7   :  { %5728 = vmax.xlane.f32.xlu0 %v5727_v54  ;;  %v14622_v54 = vpop.f32.mrf.mxu2 }
 0x9ab   :  { %v14606_v32 = vpop.f32.mrf.mxu3 }
 0x9ad   :  { %v5225_v57 = vpop.f32.mrf.mxu1 }
 0x9ae   :  { %v14608_v44 = vpop.xlane.xlu0 %5710 }
 0x9af   :  { %5749 = vmax.xlane.f32.xlu0 %v5748_v51 }
 0x9b3   :  { %v5316_v38 = vpop.f32.mrf.mxu3 }
 0x9b4   :  { %v5326_v56 = vadd.f32 %v5316_v38, %v5268_v23  ;;  %v14626_v23 = vpop.f32.mrf.mxu0 }
 0x9b5   :  { %v5418_v62 = vpop.f32.mrf.mxu1 }
 0x9b6   :  { %v5652_v47 = vmul.f32 0.125, %v5326_v56  ;;  %v5705_v28 = vpop.xlane.xlu0 %5704  ;;  %v5714_v30 = vpop.xlane.xlu2 %5713 }
 0x9b7   :  { %v5795_v59 = vsub.f32 %v14492_v39, %v5705_v28  ;;  %v5798_v8 = vsub.f32 %v14496_v34, %v5714_v30  ;;  %v5117_v28 = vadd.f32 %v14578_v22, %v14552_v13  ;;  %v5274_v30 = vpop.f32.mrf.mxu2 }
 0x9b8   :  { %v14616_v6 = vadd.f32 %v5652_v47, %v16376_v12  ;;  %v5275_v46 = vadd.f32 %v5274_v30, %v5225_v57 }
 0x9b9   :  { %v5829_v31 = vmul.f32 1.442695, %v5795_v59  ;;  %v5835_v51 = vmul.f32 1.442695, %v5798_v8  ;;  %v5650_v59 = vmul.f32 0.125, %v5177_v35  ;;  %v5175_v22 = vadd.f32 %v14563_v58, %v5117_v28 }
 0x9ba   :  { %v5757_v39 = vsel %vm5696_vm5, %v14616_v6, -inf  ;;  %v5419_v28 = vadd.f32 %v5418_v62, %v14612_v55 }
 0x9bb   :  { %11218 = vpow2.f32 %v5829_v31  ;;  %v5318_v38 = vpop.f32.mrf.mxu3  ;;  %5758 = vmax.xlane.f32.xlu0 %v5757_v39  ;;  %v16378_v31 = vld [vmem:[#allocation50_spill] sm:$0xff] }
 0x9bc   :  { %11220 = vpow2.f32 %v5835_v51  ;;  %v5327_v34 = vadd.f32 %v5318_v38, %v5270_v16  ;;  %v5374_v7 = vpop.f32.mrf.mxu0  ;;  %v14649_v13 = vadd.f32 %v5645_v19, %v16378_v31  ;;  %v14653_v51 = vadd.f32 %v5650_v59, %v16379_v24 }
 0x9bd   :  { %v14629_v17 = vpop.f32.mrf.mxu1  ;;  %11222 = vpow2.f32 %v5831_v53  ;;  %v5648_v53 = vmul.f32 0.125, %v5175_v22  ;;  %v16382_v22 = vld [vmem:[#allocation53_spill] sm:$0xff] }
 0x9be   :  { %v5653_v56 = vmul.f32 0.125, %v5327_v34  ;;  %v5736_v38 = vsel %vm5696_vm5, %v14649_v13, -inf  ;;  %v4973_v34 = vadd.f32 %v14556_v9, %v14569_v33  ;;  %v5751_v35 = vsel %vm5696_vm5, %v14653_v51, -inf  ;;  %v16380_v9 = vld [vmem:[#allocation55_spill] sm:$0xff] }
 0x9bf   :  { %v14668_v33 = vadd.f32 %v5648_v53, %v16380_v9  ;;  %v16384_v9 = vld [vmem:[#allocation57_spill] sm:$0xff] }
 0x9c0   :  { %v14632_v41 = vadd.f32 %v5653_v56, %v16377_v27  ;;  %v5027_v59 = vadd.f32 %v14571_v26, %v4973_v34 }
 0x9c1   :  { %v14634_v43 = vpop.eup %11218 }
 0x9c2   :  { %v14636_v47 = vpop.eup %11220  ;;  %v5895_v1 = vsel %vm5696_vm5, %v14634_v43, 0.0  ;;  %v5760_v42 = vsel %vm5696_vm5, %v14632_v41, -inf }
 0x9c3   :  { %5896 = vadd.xlane.f32.xlu1 %v5895_v1  ;;  %v14644_v12 = vpop.f32.mrf.mxu3  ;;  %5761 = vmax.xlane.f32.xlu2 %v5760_v42  ;;  %v5904_v8 = vsel %vm5696_vm5, %v14636_v47, 0.0  ;;  %v14655_v39 = vpop.eup %11222  ;;  %v16381_v42 = vld [vmem:[#allocation59_spill] sm:$0xff] }
 0x9c4   :  { %5905 = vadd.xlane.f32.xlu0 %v5904_v8  ;;  %v5898_v27 = vsel %vm5696_vm5, %v14655_v39, 0.0  ;;  %v5797_v8 = vsub.f32 %v14484_v18, %v14608_v44  ;;  %v5124_v18 = vadd.f32 %v14606_v32, %v14590_v45 }
 0x9c5   :  { %v5423_v25 = vpop.f32.mrf.mxu1 }
 0x9c6   :  { %v5424_v16 = vadd.f32 %v5423_v25, %v5374_v7  ;;  %v5647_v7 = vmul.f32 0.125, %v5027_v59  ;;  %v5745_v25 = vsel %vm5696_vm5, %v14668_v33, -inf  ;;  %v5833_v31 = vmul.f32 1.442695, %v5797_v8 }
 0x9c7   :  { %v5421_v59 = vadd.f32 %v14629_v17, %v14626_v23  ;;  %v5273_v17 = vadd.f32 %v14622_v54, %v14597_v15 }
 0x9c8   :  { %v14680_v24 = vadd.f32 %v5647_v7, %v16382_v22  ;;  %11224 = vpow2.f32 %v5833_v31  ;;  %v16386_v31 = vld [vmem:[#allocation62_spill] sm:$0xff] }
 0x9ca   :  { %v5742_v44 = vsel %vm5696_vm5, %v14680_v24, -inf }
 0x9cb   :  { %5737 = vmax.xlane.f32.xlu1 %v5736_v38  ;;  %v5323_v56 = vpop.f32.mrf.mxu3  ;;  %v5467_v58 = vpop.f32.mrf.mxu2  ;;  %5752 = vmax.xlane.f32.xlu2 %v5751_v35  ;;  %v16383_v38 = vld [vmem:[#allocation61_spill] sm:$0xff] }
 0x9cc   :  { %v5329_v19 = vadd.f32 %v5323_v56, %v5275_v46  ;;  %5899 = vadd.xlane.f32.xlu0 %v5898_v27  ;;  %v5477_v57 = vadd.f32 %v5467_v58, %v5419_v28  ;;  %v5178_v56 = vadd.f32 %v14601_v10, %v5124_v18 }
 0x9ce   :  { %v5655_v1 = vmul.f32 0.125, %v5329_v19  ;;  %v5656_v62 = vmul.f32 0.125, %v5477_v57  ;;  %v14694_v27 = vpop.eup %11224  ;;  %v5651_v45 = vmul.f32 0.125, %v5178_v56 }
 0x9cf   :  { %v5901_v32 = vsel %vm5696_vm5, %v14694_v27, 0.0 }
 0x9d0   :  { %v14671_v30 = vadd.f32 %v5655_v1, %v16381_v42  ;;  %v14683_v34 = vadd.f32 %v5656_v62, %v16383_v38  ;;  %v14702_v57 = vadd.f32 %v5651_v45, %v16384_v9  ;;  %v5328_v62 = vadd.f32 %v14644_v12, %v5273_v17 }
 0x9d2   :  { %v5766_v55 = vsel %vm5696_vm5, %v14671_v30, -inf  ;;  %v5769_v46 = vsel %vm5696_vm5, %v14683_v34, -inf }
 0x9d3   :  { %5746 = vmax.xlane.f32.xlu1 %v5745_v25  ;;  %v5469_v26 = vpop.f32.mrf.mxu2 }
 0x9d4   :  { %5767 = vmax.xlane.f32.xlu0 %v5766_v55  ;;  %v5754_v55 = vsel %vm5696_vm5, %v14702_v57, -inf }
 0x9db   :  { %5743 = vmax.xlane.f32.xlu1 %v5742_v44  ;;  %v5472_v53 = vpop.f32.mrf.mxu2  ;;  %v14722_v44 = vpop.f32.mrf.mxu3 }
 0x9dc   :  { %v14691_v35 = vadd.f32 %v5472_v53, %v5424_v16  ;;  %5770 = vmax.xlane.f32.xlu0 %v5769_v46  ;;  %v5478_v16 = vadd.f32 %v5469_v26, %v5421_v59  ;;  %v5654_v46 = vmul.f32 0.125, %v5328_v62  ;;  %v16393_v62 = vld [vmem:[#allocation66_spill] sm:$0xff] }
 0x9de   :  { %v5717_v58 = vpop.xlane.xlu2 %5716  ;;  %v5657_v7 = vmul.f32 0.125, %v5478_v16 }
 0x9df   :  { %v5799_v19 = vsub.f32 %v14523_v36, %v5717_v58  ;;  %v5376_v36 = vpop.f32.mrf.mxu0 }
 0x9e0   :  { %v14717_v22 = vadd.f32 %v5657_v7, %v16386_v31 }
 0x9e1   :  { %v5837_v28 = vmul.f32 1.442695, %v5799_v19 }
 0x9e2   :  { %16387 = vst [vmem:[#allocation37_spill] sm:$0xff] %v14717_v22  ;;  %v5772_v54 = vsel %vm5696_vm5, %v14717_v22, -inf }
 0x9e3   :  { %11226 = vpow2.f32 %v5837_v28  ;;  %5902 = vadd.xlane.f32.xlu1 %v5901_v32  ;;  %v5474_v58 = vpop.f32.mrf.mxu2  ;;  %v16389_v28 = vld [vmem:[#allocation60_spill] sm:$0xff]  ;;  %v14747_v7 = vpop.f32.mrf.mxu3 }
 0x9e4   :  { %v14733_v45 = vadd.f32 %v5654_v46, %v16389_v28  ;;  %v6501_v28 = vsel %vm12525_vm10, %v13713_v40, 0 }
 0x9e6   :  { %v5720_v1 = vpop.xlane.xlu1 %5719  ;;  %16390 = vst [vmem:[#allocation40_spill] sm:$0xff] %v14733_v45 }
 0x9e7   :  { %v5800_v10 = vsub.f32 %v14532_v48, %v5720_v1  ;;  %v5425_v48 = vpop.f32.mrf.mxu1  ;;  %v14729_v12 = vpop.f32.mrf.mxu0 }
 0x9e8   :  { %v5426_v32 = vadd.f32 %v5425_v48, %v5376_v36 }
 0x9e9   :  { %v14705_v42 = vpop.eup %11226  ;;  %v5839_v8 = vmul.f32 1.442695, %v5800_v10 }
 0x9ea   :  { %16385 = vst [vmem:[#allocation39_spill] sm:$0xff] %v14705_v42  ;;  %v14707_v25 = vpop.xlane.xlu2 %5893  ;;  %v5907_v23 = vsel %vm5696_vm5, %v14705_v42, 0.0  ;;  %v5480_v1 = vadd.f32 %v5474_v58, %v5426_v32  ;;  %v6502_v32 = vsel %vm12525_vm10, %v13715_v2, 0 }
 0x9eb   :  { %11228 = vpow2.f32 %v5839_v8  ;;  %5755 = vmax.xlane.f32.xlu1 %v5754_v55  ;;  %5908 = vadd.xlane.f32.xlu2 %v5907_v23  ;;  %vm6005_vm15 = vweird.f32 %v14707_v25 }
 0x9ec   :  { %11230 = vrcp.f32 %v14707_v25  ;;  %v5659_v36 = vmul.f32 0.125, %v5480_v1  ;;  %v6499_v1 = vsel %vm12525_vm10, %v13733_v29, 0 }
 0x9ed   :  { %v6629_v42 = vunpack.c.l.b16 %v6499_v1 }
 0x9ee   :  { %v5723_v26 = vpop.xlane.xlu1 %5722 }
 0x9ef   :  { %v5801_v38 = vsub.f32 %v14541_v60, %v5723_v26  ;;  %v14735_v59 = vpop.f32.mrf.mxu1  ;;  %v14751_v23 = vpop.f32.mrf.mxu0  ;;  %v14756_v26 = vadd.f32 %v5659_v36, %v16393_v62  ;;  %v6633_v36 = vunpack.c.l.b16 %v6501_v28 }
 0x9f1   :  { %v14720_v18 = vpop.eup %11228  ;;  %v5841_v53 = vmul.f32 1.442695, %v5801_v38  ;;  %v6503_v38 = vsel %vm12525_vm10, %v13699_v3, 0 }
 0x9f2   :  { %16388 = vst [vmem:[#allocation36_spill] sm:$0xff] %v14720_v18  ;;  %v5732_v56 = vpop.xlane.xlu2 %5731  ;;  %v5910_v15 = vsel %vm5696_vm5, %v14720_v18, 0.0  ;;  %v14737_v16 = vpop.eup %11230 }
 0x9f3   :  { %11232 = vpow2.f32 %v5841_v53  ;;  %v5804_v60 = vsub.f32 %v14546_v11, %v5732_v56  ;;  %5911 = vadd.xlane.f32.xlu1 %v5910_v15  ;;  %5773 = vmax.xlane.f32.xlu2 %v5772_v54  ;;  %v5763_v11 = vsel %vm5696_vm5, %v14733_v45, -inf  ;;  %v6001_v55 = vmul.f32 %v14737_v16, %v14707_v25 }
 0x9f4   :  { %v6504_v53 = vsel %vm12525_vm10, %v13701_v37, 0  ;;  %v6637_v15 = vunpack.c.l.b16 %v6503_v38 }
 0x9f5   :  { %v5847_v19 = vmul.f32 1.442695, %v5804_v60  ;;  %v6002_v48 = vsub.f32 1.0, %v6001_v55  ;;  %v6639_v54 = vunpack.c.l.b16 %v6504_v53  ;;  %v6638_v60 = vunpack.c.h.b16 %v6503_v38 }
 0x9f6   :  { %v6635_v55 = vunpack.c.l.b16 %v6502_v32  ;;  %v6634_v38 = vunpack.c.h.b16 %v6501_v28 }
 0x9f7   :  { %11234 = vpow2.f32 %v5847_v19  ;;  %v14764_v46 = vpop.f32.mrf.mxu1  ;;  %v6640_v19 = vunpack.c.h.b16 %v6504_v53  ;;  %v6636_v53 = vunpack.c.h.b16 %v6502_v32 }
 0x9f8   :  { %v6645_v18 = vpack.c.b16 %v6635_v55, %v6633_v36 }
 0x9f9   :  { %v14739_v9 = vpop.eup %11232  ;;  %v6648_v62 = vpack.c.b16 %v6640_v19, %v6638_v60  ;;  %v6646_v45 = vpack.c.b16 %v6636_v53, %v6634_v38  ;;  %v6498_v60 = vsel %vm12525_vm10, %v13749_v5, 0  ;;  %v5778_v19 = vsel %vm5696_vm5, %v14756_v26, -inf }
 0x9fa   :  { %16391 = vst [vmem:[#allocation38_spill] sm:$0xff] %v14739_v9  ;;  %v14741_v10 = vpop.xlane.xlu2 %5734  ;;  %v5913_v8 = vsel %vm5696_vm5, %v14739_v9, 0.0  ;;  %v5525_v9 = vpop.f32.mrf.mxu3  ;;  %v6628_v55 = vunpack.c.h.b16 %v6498_v60 }
 0x9fb   :  { %5764 = vmax.xlane.f32.xlu1 %v5763_v11  ;;  %5914 = vadd.xlane.f32.xlu0 %v5913_v8  ;;  %v6647_v8 = vpack.c.b16 %v6639_v54, %v6637_v15  ;;  %v6497_v15 = vsel %vm12525_vm10, %v13747_v52, 0  ;;  %v5574_v54 = vpop.f32.mrf.mxu0 }
 0x9fc   :  { %6686 = vmatpush.bf16.msrb.mxu1 %v6648_v62  ;;  %v6625_v32 = vunpack.c.l.b16 %v6497_v15  ;;  %v6626_v36 = vunpack.c.h.b16 %v6497_v15 }
 0x9fd   :  { %v14753_v17 = vpop.eup %11234  ;;  %6667 = vmatpush.bf16.msrb.mxu0 %v6647_v8 }
 0x9fe   :  { %16392 = vst [vmem:[#allocation43_spill] sm:$0xff] %v14753_v17  ;;  %v5922_v56 = vsel %vm5696_vm5, %v14753_v17, 0.0  ;;  %v6500_v17 = vsel %vm12525_vm10, %v13735_v0, 0  ;;  %vm6006_vm10 = vweird.f32 %v14737_v16 }
 0x9ff   :  { %v6631_v22 = vunpack.c.l.b16 %v6500_v17  ;;  %v5623_v62 = vpop.f32.mrf.mxu1  ;;  %vm6007_vm2 = vmor %vm6005_vm15, %vm6006_vm10 }
 0xa00   :  { %6687 = vmatpush.bf16.msrb.mxu1 %v6646_v45 }
 0xa01   :  { %6668 = vmatpush.bf16.msrb.mxu0 %v6645_v18  ;;  %v6643_v28 = vpack.c.b16 %v6631_v22, %v6629_v42  ;;  %v6011_v22 = vand.u32 2147483648, %v14707_v25  ;;  %v6009_v18 = vand.u32 2147483647, %v14707_v25  ;;  %v5805_v25 = vsub.f32 %v14559_v20, %v14741_v10 }
 0xa02   :  { %v5741_v58 = vpop.xlane.xlu2 %5740 }
 0xa03   :  { %v5807_v11 = vsub.f32 %v14566_v49, %v5741_v58  ;;  %5923 = vadd.xlane.f32.xlu0 %v5922_v56  ;;  %v6630_v49 = vunpack.c.h.b16 %v6499_v1  ;;  %v6632_v56 = vunpack.c.h.b16 %v6500_v17  ;;  %v5575_v58 = vadd.f32 %v5574_v54, %v5525_v9 }
 0xa04   :  { %v6003_v17 = vmul.f32 %v14737_v16, %v6002_v48  ;;  %v6012_v54 = vor.u32 1.1754944e-38, %v6011_v22  ;;  %vm6010_vm11 = vcmp.eq.f32.partialorder %v6009_v18, 8.507059e+37 }
 0xa05   :  { %v5853_v4 = vmul.f32 1.442695, %v5807_v11  ;;  %v6627_v11 = vunpack.c.l.b16 %v6498_v60  ;;  %v6644_v8 = vpack.c.b16 %v6632_v56, %v6630_v49  ;;  %6669 = vmatpush.bf16.msrb.mxu0 %v6643_v28  ;;  %v5630_v31 = vadd.f32 %v5623_v62, %v5575_v58 }
 0xa06   :  { %v6004_v38 = vadd.f32 %v14737_v16, %v6003_v17 }
 0xa07   :  { %11236 = vpow2.f32 %v5853_v4  ;;  %v6641_v9 = vpack.c.b16 %v6627_v11, %v6625_v32  ;;  %6688 = vmatpush.bf16.msrb.mxu1 %v6644_v8  ;;  %v6642_v4 = vpack.c.b16 %v6628_v55, %v6626_v36  ;;  %v5662_v48 = vmul.f32 0.125, %v5630_v31  ;;  %v16395_v11 = vld [vmem:[#allocation68_spill] sm:$0xff] }
 0xa08   :  { %v6008_v53 = vsel %vm6007_vm2, %v14737_v16, %v6004_v38 }
 0xa09   :  { %6670 = vmatpush.bf16.msrb.mxu0 %v6641_v9  ;;  %v14804_v16 = vadd.f32 %v5662_v48, %v16395_v11 }
 0xa0a   :  { %v5891_v1 = vpop.xlane.xlu0 %5890 }
 0xa0b   :  { %11238 = vrcp.f32 %v5891_v1  ;;  %5779 = vmax.xlane.f32.xlu0 %v5778_v19  ;;  %6689 = vmatpush.bf16.msrb.mxu1 %v6642_v4  ;;  %v6013_v19 = vsel %vm6010_vm11, %v6012_v54, %v6008_v53  ;;  %v5996_v28 = vand.u32 2147483648, %v5891_v1  ;;  %v5994_v8 = vand.u32 2147483647, %v5891_v1 }
 0xa0c   :  { %v6014_v36 = vmul.f32 %v14536_v50, %v6013_v19  ;;  %vm5990_vm12 = vweird.f32 %v5891_v1  ;;  %v5787_v20 = vsel %vm5696_vm5, %v14804_v16, -inf }
 0xa0d   :  { %v14792_v42 = vpop.eup %11236  ;;  %v5997_v62 = vor.u32 1.1754944e-38, %v5996_v28  ;;  %vm5995_vm13 = vcmp.eq.f32.partialorder %v5994_v8, 8.507059e+37  ;;  %v5572_v8 = vadd.f32 %v14751_v23, %v14747_v7 }
 0xa0e   :  { %v5931_v15 = vsel %vm5696_vm5, %v14792_v42, 0.0  ;;  %v6466_v4 = vpack.c.bf16 %v6014_v36, %v6014_v36 }
 0xa10   :  { %v6612_v53 = vunpack.c.l.b16 %v6466_v4 }
 0xa11   :  { %v11239_v45 = vpop.eup %11238 }
 0xa12   :  { %v5986_v49 = vmul.f32 %v11239_v45, %v5891_v1  ;;  %v5726_v56 = vpop.xlane.xlu0 %5725  ;;  %vm5991_vm0 = vweird.f32 %v11239_v45  ;;  %v5570_v1 = vadd.f32 %v14729_v12, %v14722_v44 }
 0xa13   :  { %v5802_v60 = vsub.f32 %v14588_v14, %v5726_v56  ;;  %5932 = vadd.xlane.f32.xlu0 %v5931_v15  ;;  %v5849_v14 = vmul.f32 1.442695, %v5805_v25  ;;  %vm5992_vm1 = vmor %vm5990_vm12, %vm5991_vm0 }
 0xa14   :  { %v5987_v58 = vsub.f32 1.0, %v5986_v49 }
 0xa15   :  { %v5843_v32 = vmul.f32 1.442695, %v5802_v60 }
 0xa16   :  { %v5988_v17 = vmul.f32 %v11239_v45, %v5987_v58 }
 0xa17   :  { %11240 = vpow2.f32 %v5843_v32 }
 0xa18   :  { %v5989_v55 = vadd.f32 %v11239_v45, %v5988_v17  ;;  %11242 = vpow2.f32 %v5849_v14  ;;  %v5629_v14 = vadd.f32 %v14764_v46, %v5572_v8 }
 0xa1a   :  { %v5993_v9 = vsel %vm5992_vm1, %v11239_v45, %v5989_v55  ;;  %v5729_v31 = vpop.xlane.xlu0 %5728  ;;  %v5661_v4 = vmul.f32 0.125, %v5629_v14 }
 0xa1b   :  { %v5998_v10 = vsel %vm5995_vm13, %v5997_v62, %v5993_v9  ;;  %v5803_v38 = vsub.f32 %v14595_v21, %v5729_v31  ;;  %5788 = vmax.xlane.f32.xlu0 %v5787_v20  ;;  %v5628_v21 = vadd.f32 %v14735_v59, %v5570_v1  ;;  %v16396_v59 = vld [vmem:[#allocation63_spill] sm:$0xff] }
 0xa1c   :  { %v5999_v22 = vmul.f32 %v14580_v63, %v5998_v10 }
 0xa1d   :  { %v14811_v18 = vpop.eup %11240  ;;  %v5845_v50 = vmul.f32 1.442695, %v5803_v38  ;;  %v5660_v44 = vmul.f32 0.125, %v5628_v21 }
 0xa1e   :  { %v6465_v45 = vpack.c.bf16 %v5999_v22, %v5999_v22  ;;  %v5916_v48 = vsel %vm5696_vm5, %v14811_v18, 0.0  ;;  %v14818_v15 = vpop.eup %11242 }
 0xa1f   :  { %11244 = vpow2.f32 %v5845_v50  ;;  %5917 = vadd.xlane.f32.xlu2 %v5916_v48  ;;  %v5925_v60 = vsel %vm5696_vm5, %v14818_v15, 0.0  ;;  %v14831_v58 = vadd.f32 %v5660_v44, %v16396_v59 }
 0xa20   :  { %v6611_v49 = vunpack.c.l.b16 %v6465_v45  ;;  %v16397_v45 = vld [vmem:[#allocation67_spill] sm:$0xff] }
 0xa21   :  { %v5781_v25 = vsel %vm5696_vm5, %v14831_v58, -inf }
 0xa22   :  { %v6615_v56 = vpack.c.b16 %v6612_v53, %v6611_v49  ;;  %v14824_v12 = vpop.xlane.xlu0 %5749  ;;  %v16398_v49 = vld [vmem:[#allocation64_spill] sm:$0xff] }
 0xa23   :  { %v14856_v21 = vadd.f32 %v5661_v4, %v16398_v49  ;;  %v6510_v49 = vsel %vm12773_vm4, %v13715_v2, 0 }
 0xa24   :  { %9993 = vmatmul.msk.bf16.vlgmr.msrb.gmra.mxu0 %vm5696_vm5, %v6615_v56  ;;  %9995 = vmatmul.msk.bf16.vlgmr.msrb.gmra.mxu1 %vm5696_vm5, %v6615_v56 }
 0xa25   :  { %v14822_v63 = vpop.eup %11244  ;;  %v5784_v8 = vsel %vm5696_vm5, %v14856_v21, -inf }
 0xa26   :  { %v5919_v54 = vsel %vm5696_vm5, %v14822_v63, 0.0 }
 0xa27   :  { %5920 = vadd.xlane.f32.xlu1 %v5919_v54  ;;  %5926 = vadd.xlane.f32.xlu2 %v5925_v60 }
 0xa2e   :  { %v14833_v19 = vpop.xlane.xlu0 %5758 }
 0xa2f   :  { %5782 = vmax.xlane.f32.xlu2 %v5781_v25 }
 0xa36   :  { %v5897_v28 = vpop.xlane.xlu1 %5896  ;;  %v5762_v32 = vpop.xlane.xlu2 %5761 }
 0xa37   :  { %11246 = vrcp.f32 %v5897_v28  ;;  %v14837_v11 = vpop.xlane.xlu0 %5905  ;;  %v5814_v17 = vsub.f32 %v14632_v41, %v5762_v32  ;;  %v5658_v41 = vmul.f32 0.125, %v14691_v35  ;;  %v6026_v1 = vand.u32 2147483648, %v5897_v28 }
 0xa38   :  { %vm6020_vm6 = vweird.f32 %v5897_v28  ;;  %v6024_v35 = vand.u32 2147483647, %v5897_v28  ;;  %vm6065_vm13 = vweird.f32 %v14837_v11 }
 0xa39   :  { %v5867_v36 = vmul.f32 1.442695, %v5814_v17  ;;  %v14853_v48 = vadd.f32 %v5658_v41, %v16397_v45  ;;  %v6027_v59 = vor.u32 1.1754944e-38, %v6026_v1 }
 0xa3a   :  { %vm6025_vm15 = vcmp.eq.f32.partialorder %v6024_v35, 8.507059e+37  ;;  %v6509_v35 = vsel %vm12773_vm4, %v13713_v40, 0 }
 0xa3b   :  { %11248 = vpow2.f32 %v5867_v36  ;;  %v14868_v36 = vsel %vm5696_vm5, %v14853_v48, -inf }
 0xa3c   :  { %11250 = vrcp.f32 %v14837_v11 }
 0xa3d   :  { %v11247_v55 = vpop.eup %11246 }
 0xa3e   :  { %v6016_v62 = vmul.f32 %v11247_v55, %v5897_v28  ;;  %v5738_v9 = vpop.xlane.xlu1 %5737  ;;  %vm6021_vm9 = vweird.f32 %v11247_v55 }
 0xa3f   :  { %v5806_v31 = vsub.f32 %v14649_v13, %v5738_v9  ;;  %v5900_v20 = vpop.xlane.xlu0 %5899  ;;  %vm6022_vm10 = vmor %vm6020_vm6, %vm6021_vm9 }
 0xa40   :  { %v6017_v10 = vsub.f32 1.0, %v6016_v62  ;;  %11252 = vrcp.f32 %v5900_v20  ;;  %v6039_v32 = vand.u32 2147483647, %v5900_v20  ;;  %v6041_v17 = vand.u32 2147483648, %v5900_v20 }
 0xa41   :  { %v5851_v38 = vmul.f32 1.442695, %v5806_v31  ;;  %v14846_v7 = vpop.eup %11248  ;;  %vm6035_vm11 = vweird.f32 %v5900_v20 }
 0xa42   :  { %v6018_v22 = vmul.f32 %v11247_v55, %v6017_v10  ;;  %v5952_v46 = vsel %vm5696_vm5, %v14846_v7, 0.0  ;;  %v14850_v50 = vpop.eup %11250  ;;  %v6511_v10 = vsel %vm12773_vm4, %v13699_v3, 0  ;;  %vm6040_vm0 = vcmp.eq.f32.partialorder %v6039_v32, 8.507059e+37 }
 0xa43   :  { %11254 = vpow2.f32 %v5851_v38  ;;  %5953 = vadd.xlane.f32.xlu0 %v5952_v46  ;;  %v6061_v54 = vmul.f32 %v14850_v50, %v14837_v11  ;;  %v6512_v38 = vsel %vm12773_vm4, %v13701_v37, 0  ;;  %v6042_v4 = vor.u32 1.1754944e-38, %v6041_v17 }
 0xa44   :  { %v6019_v23 = vadd.f32 %v11247_v55, %v6018_v22  ;;  %v6543_v22 = vunpack.c.l.b16 %v6511_v10  ;;  %v6544_v46 = vunpack.c.h.b16 %v6511_v10  ;;  %v6546_v1 = vunpack.c.h.b16 %v6512_v38 }
 0xa45   :  { %v6062_v9 = vsub.f32 1.0, %v6061_v54  ;;  %v6539_v32 = vunpack.c.l.b16 %v6509_v35  ;;  %vm6066_vm1 = vweird.f32 %v14850_v50 }
 0xa46   :  { %v11253_v13 = vpop.eup %11252  ;;  %v5747_v53 = vpop.xlane.xlu1 %5746  ;;  %v6023_v44 = vsel %vm6022_vm10, %v11247_v55, %v6019_v23  ;;  %v5810_v55 = vsub.f32 %v14604_v61, %v14824_v12  ;;  %v6545_v23 = vunpack.c.l.b16 %v6512_v38 }
 0xa47   :  { %v6031_v56 = vmul.f32 %v11253_v13, %v5900_v20  ;;  %v6028_v14 = vsel %vm6025_vm15, %v6027_v59, %v6023_v44  ;;  %vm6036_vm2 = vweird.f32 %v11253_v13  ;;  %v5809_v44 = vsub.f32 %v14668_v33, %v5747_v53 }
 0xa48   :  { %vm6037_vm12 = vmor %vm6035_vm11, %vm6036_vm2  ;;  %v6029_v12 = vmul.f32 %v14634_v43, %v6028_v14  ;;  %v6553_v54 = vpack.c.b16 %v6545_v23, %v6543_v22  ;;  %v6554_v59 = vpack.c.b16 %v6546_v1, %v6544_v46  ;;  %v5859_v17 = vmul.f32 1.442695, %v5810_v55 }
 0xa49   :  { %v14860_v60 = vpop.eup %11254  ;;  %v6032_v25 = vsub.f32 1.0, %v6031_v56  ;;  %v6542_v14 = vunpack.c.h.b16 %v6510_v49  ;;  %v6063_v10 = vmul.f32 %v14850_v50, %v6062_v9  ;;  %v5857_v53 = vmul.f32 1.442695, %v5809_v44 }
 0xa4a   :  { %v5928_v28 = vsel %vm5696_vm5, %v14860_v60, 0.0  ;;  %6573 = vmatpush.bf16.msrb.mxu2 %v6553_v54  ;;  %6592 = vmatpush.bf16.msrb.mxu3 %v6554_v59  ;;  %v6508_v55 = vsel %vm12773_vm4, %v13735_v0, 0  ;;  %v6505_v54 = vsel %vm12773_vm4, %v13747_v52, 0 }
 0xa4b   :  { %v6033_v62 = vmul.f32 %v11253_v13, %v6032_v25  ;;  %5929 = vadd.xlane.f32.xlu1 %v5928_v28  ;;  %v6540_v28 = vunpack.c.h.b16 %v6509_v35  ;;  %v6071_v35 = vand.u32 2147483648, %v14837_v11 }
 0xa4d   :  { %v6034_v41 = vadd.f32 %v11253_v13, %v6033_v62  ;;  %v5527_v62 = vpop.f32.mrf.mxu3 }
 0xa4e   :  { %v5744_v61 = vpop.xlane.xlu1 %5743 }
 0xa4f   :  { %v6038_v20 = vsel %vm6037_vm12, %v11253_v13, %v6034_v41  ;;  %v5808_v45 = vsub.f32 %v14680_v24, %v5744_v61  ;;  %v6541_v13 = vunpack.c.l.b16 %v6510_v49  ;;  %v6467_v24 = vpack.c.bf16 %v6029_v12, %v6029_v12 }
 0xa50   :  { %v6043_v56 = vsel %vm6040_vm0, %v6042_v4, %v6038_v20  ;;  %v6552_v41 = vpack.c.b16 %v6542_v14, %v6540_v28  ;;  %v5576_v4 = vpop.f32.mrf.mxu0  ;;  %v6537_v12 = vunpack.c.l.b16 %v6508_v55  ;;  %v6538_v20 = vunpack.c.h.b16 %v6508_v55 }
 0xa51   :  { %v5855_v43 = vmul.f32 1.442695, %v5808_v45  ;;  %v6044_v25 = vmul.f32 %v14655_v39, %v6043_v56  ;;  %v6551_v33 = vpack.c.b16 %v6541_v13, %v6539_v32  ;;  %v6507_v39 = vsel %vm12773_vm4, %v13733_v29, 0  ;;  %v14911_v32 = vpop.xlane.xlu0 %5767 }
 0xa52   :  { %v6535_v61 = vunpack.c.l.b16 %v6507_v39  ;;  %v6536_v23 = vunpack.c.h.b16 %v6507_v39  ;;  %v5577_v9 = vadd.f32 %v5576_v4, %v5527_v62  ;;  %v6613_v1 = vunpack.c.l.b16 %v6467_v24  ;;  %6593 = vmatpush.bf16.msrb.mxu3 %v6552_v41 }
 0xa53   :  { %11256 = vpow2.f32 %v5855_v43  ;;  %5785 = vmax.xlane.f32.xlu1 %v5784_v8  ;;  %v6468_v38 = vpack.c.bf16 %v6044_v25, %v6044_v25  ;;  %v5753_v8 = vpop.xlane.xlu2 %5752  ;;  %6574 = vmatpush.bf16.msrb.mxu2 %v6551_v33  ;;  %v5813_v45 = vsub.f32 %v14616_v6, %v14833_v19  ;;  %v5625_v43 = vpop.f32.mrf.mxu1  ;;  %v6064_v25 = vadd.f32 %v14850_v50, %v6063_v10 }
 0xa54   :  { %11258 = vpow2.f32 %v5859_v17  ;;  %v6549_v56 = vpack.c.b16 %v6537_v12, %v6535_v61  ;;  %v6550_v44 = vpack.c.b16 %v6538_v20, %v6536_v23  ;;  %v6506_v6 = vsel %vm12773_vm4, %v13749_v5, 0  ;;  %vm14924_vm4 = vmor %vm6065_vm13, %vm6066_vm1 }
 0xa55   :  { %v6614_v22 = vunpack.c.l.b16 %v6468_v38  ;;  %v6531_v19 = vunpack.c.l.b16 %v6505_v54  ;;  %v6533_v17 = vunpack.c.l.b16 %v6506_v6  ;;  %v6532_v24 = vunpack.c.h.b16 %v6505_v54 }
 0xa56   :  { %v14895_v46 = vpop.xlane.xlu1 %5902  ;;  %v6534_v28 = vunpack.c.h.b16 %v6506_v6  ;;  %v6069_v14 = vand.u32 2147483647, %v14837_v11  ;;  %v5631_v62 = vadd.f32 %v5625_v43, %v5577_v9  ;;  %6594 = vmatpush.bf16.msrb.mxu3 %v6550_v44  ;;  %v5865_v41 = vmul.f32 1.442695, %v5813_v45 }
 0xa57   :  { %11260 = vrcp.f32 %v14895_v46  ;;  %v6616_v49 = vpack.c.b16 %v6614_v22, %v6613_v1  ;;  %6575 = vmatpush.bf16.msrb.mxu2 %v6549_v56  ;;  %v6547_v38 = vpack.c.b16 %v6533_v17, %v6531_v19  ;;  %v6068_v11 = vsel %vm14924_vm4, %v14850_v50, %v6064_v25  ;;  %v16402_v25 = vld [vmem:[#allocation69_spill] sm:$0xff] }
 0xa58   :  { %11262 = vpow2.f32 %v5857_v53  ;;  %v6548_v33 = vpack.c.b16 %v6534_v28, %v6532_v24  ;;  %v6072_v39 = vor.u32 1.1754944e-38, %v6071_v35  ;;  %vm6070_vm9 = vcmp.eq.f32.partialorder %v6069_v14, 8.507059e+37 }
 0xa59   :  { %v14905_v59 = vpop.eup %11256  ;;  %9994 = vmatmul.msk.bf16.gmra.mxu0 %vm5696_vm5, %v6616_v49  ;;  %9996 = vmatmul.msk.bf16.gmra.mxu1 %vm5696_vm5, %v6616_v49  ;;  %v5663_v12 = vmul.f32 0.125, %v5631_v62  ;;  %v6056_v50 = vand.u32 2147483648, %v14895_v46  ;;  %v6054_v45 = vand.u32 2147483647, %v14895_v46  ;;  %v5771_v56 = vpop.xlane.xlu0 %5770  ;;  %vm6050_vm10 = vweird.f32 %v14895_v46 }
 0xa5a   :  { %v5934_v13 = vsel %vm5696_vm5, %v14905_v59, 0.0  ;;  %v14920_v31 = vpop.eup %11258  ;;  %v6073_v23 = vsel %vm6070_vm9, %v6072_v39, %v6068_v11  ;;  %6595 = vmatpush.bf16.msrb.mxu3 %v6548_v33  ;;  %v5816_v19 = vsub.f32 %v14671_v30, %v14911_v32  ;;  %v5817_v28 = vsub.f32 %v14683_v34, %v5771_v56 }
 0xa5b   :  { %5776 = vmax.xlane.f32.xlu1 %v14868_v36  ;;  %5935 = vadd.xlane.f32.xlu2 %v5934_v13  ;;  %v5811_v36 = vsub.f32 %v14653_v51, %v5753_v8  ;;  %v5940_v1 = vsel %vm5696_vm5, %v14920_v31, 0.0  ;;  %v6074_v49 = vmul.f32 %v14636_v47, %v6073_v23  ;;  %v6057_v43 = vor.u32 1.1754944e-38, %v6056_v50 }
 0xa5c   :  { %6576 = vmatpush.bf16.msrb.mxu2 %v6547_v38  ;;  %v14948_v6 = vadd.f32 %v5663_v12, %v16402_v25  ;;  %vm6055_vm2 = vcmp.eq.f32.partialorder %v6054_v45, 8.507059e+37  ;;  %v5871_v34 = vmul.f32 1.442695, %v5816_v19  ;;  %v5873_v11 = vmul.f32 1.442695, %v5817_v28  ;;  %v16405_v45 = vld [vmem:[#allocation40_spill] sm:$0xff] }
 0xa5d   :  { %v11261_v53 = vpop.eup %11260  ;;  %v5861_v51 = vmul.f32 1.442695, %v5811_v36 }
 0xa5e   :  { %v6046_v55 = vmul.f32 %v11261_v53, %v14895_v46  ;;  %v5756_v4 = vpop.xlane.xlu1 %5755  ;;  %v14933_v22 = vpop.xlane.xlu2 %5908  ;;  %vm6051_vm6 = vweird.f32 %v11261_v53  ;;  %v6470_v46 = vpack.c.bf16 %v6074_v49, %v6074_v49  ;;  %v5790_v30 = vsel %vm5696_vm5, %v14948_v6, -inf }
 0xa5f   :  { %v14935_v61 = vpop.eup %11262  ;;  %11264 = vrcp.f32 %v14933_v22  ;;  %v5812_v8 = vsub.f32 %v14702_v57, %v5756_v4  ;;  %vm6052_vm15 = vmor %vm6050_vm10, %vm6051_vm6  ;;  %v6086_v36 = vand.u32 2147483648, %v14933_v22  ;;  %vm6080_vm0 = vweird.f32 %v14933_v22 }
 0xa60   :  { %v6047_v9 = vsub.f32 1.0, %v6046_v55  ;;  %11266 = vpow2.f32 %v5865_v41  ;;  %v5937_v35 = vsel %vm5696_vm5, %v14935_v61, 0.0  ;;  %v6518_v41 = vunpack.c.l.b16 %v6470_v46  ;;  %v16407_v46 = vld [vmem:[#allocation39_spill] sm:$0xff] }
 0xa61   :  { %11268 = vpow2.f32 %v5861_v51  ;;  %v5863_v57 = vmul.f32 1.442695, %v5812_v8  ;;  %v6084_v55 = vand.u32 2147483647, %v14933_v22 }
 0xa62   :  { %v6048_v20 = vmul.f32 %v11261_v53, %v6047_v9 }
 0xa63   :  { %5941 = vadd.xlane.f32.xlu1 %v5940_v1  ;;  %5938 = vadd.xlane.f32.xlu2 %v5937_v35  ;;  %vm6085_vm1 = vcmp.eq.f32.partialorder %v6084_v55, 8.507059e+37 }
 0xa64   :  { %v6049_v44 = vadd.f32 %v11261_v53, %v6048_v20  ;;  %v6087_v20 = vor.u32 1.1754944e-38, %v6086_v36 }
 0xa65   :  { %v11265_v54 = vpop.eup %11264 }
 0xa66   :  { %v6053_v13 = vsel %vm6052_vm15, %v11261_v53, %v6049_v44  ;;  %v6076_v47 = vmul.f32 %v11265_v54, %v14933_v22  ;;  %v14953_v17 = vpop.xlane.xlu1 %5911  ;;  %v14955_v24 = vpop.eup %11266  ;;  %vm6081_vm11 = vweird.f32 %v11265_v54 }
 0xa67   :  { %v6058_v14 = vsel %vm6055_vm2, %v6057_v43, %v6053_v13  ;;  %11270 = vrcp.f32 %v14953_v17  ;;  %v5949_v33 = vsel %vm5696_vm5, %v14955_v24, 0.0  ;;  %v14964_v53 = vpop.eup %11268  ;;  %vm14969_vm12 = vmor %vm6080_vm0, %vm6081_vm11  ;;  %v5774_v51 = vpop.xlane.xlu2 %5773  ;;  %v6101_v44 = vand.u32 2147483648, %v14953_v17 }
 0xa68   :  { %v6059_v62 = vmul.f32 %v14694_v27, %v6058_v14  ;;  %v6077_v10 = vsub.f32 1.0, %v6076_v47  ;;  %11272 = vpow2.f32 %v5863_v57  ;;  %v5943_v49 = vsel %vm5696_vm5, %v14964_v53, 0.0 }
 0xa69   :  { %11274 = vpow2.f32 %v5871_v34  ;;  %v6099_v19 = vand.u32 2147483647, %v14953_v17  ;;  %vm6095_vm4 = vweird.f32 %v14953_v17 }
 0xa6a   :  { %v6469_v32 = vpack.c.bf16 %v6059_v62, %v6059_v62  ;;  %v6078_v38 = vmul.f32 %v11265_v54, %v6077_v10  ;;  %11276 = vpow2.f32 %v5873_v11  ;;  %v6102_v62 = vor.u32 1.1754944e-38, %v6101_v44 }
 0xa6b   :  { %5950 = vadd.xlane.f32.xlu1 %v5949_v33  ;;  %5791 = vmax.xlane.f32.xlu2 %v5790_v30  ;;  %vm6100_vm6 = vcmp.eq.f32.partialorder %v6099_v19, 8.507059e+37  ;;  %v16408_v33 = vld [vmem:[#allocation36_spill] sm:$0xff] }
 0xa6c   :  { %v6517_v27 = vunpack.c.l.b16 %v6469_v32  ;;  %v6079_v39 = vadd.f32 %v11265_v54, %v6078_v38 }
 0xa6d   :  { %v11271_v4 = vpop.eup %11270 }
 0xa6e   :  { %v6521_v23 = vpack.c.b16 %v6518_v41, %v6517_v27  ;;  %v6083_v9 = vsel %vm14969_vm12, %v11265_v54, %v6079_v39  ;;  %v6091_v1 = vmul.f32 %v11271_v4, %v14953_v17  ;;  %v5765_v50 = vpop.xlane.xlu1 %5764  ;;  %v14976_v8 = vpop.eup %11272  ;;  %v16406_v54 = vld [vmem:[#allocation37_spill] sm:$0xff]  ;;  %vm6096_vm13 = vweird.f32 %v11271_v4 }
 0xa6f   :  { %v5815_v35 = vsub.f32 %v16405_v45, %v5765_v50  ;;  %v6088_v56 = vsel %vm6085_vm1, %v6087_v20, %v6083_v9  ;;  %v5818_v43 = vsub.f32 %v16406_v54, %v5774_v51  ;;  %v5946_v13 = vsel %vm5696_vm5, %v14976_v8, 0.0  ;;  %v14990_v14 = vpop.eup %11274  ;;  %vm6097_vm9 = vmor %vm6095_vm4, %vm6096_vm13  ;;  %v15003_v12 = vpop.xlane.xlu0 %5914  ;;  %v16409_v50 = vld [vmem:[#allocation74_spill] sm:$0xff] }
 0xa70   :  { %v6092_v22 = vsub.f32 1.0, %v6091_v1  ;;  %9989 = vmatmul.msk.bf16.vlgmr.msrb.gmra.mxu2 %vm5696_vm5, %v6521_v23  ;;  %9991 = vmatmul.msk.bf16.vlgmr.msrb.gmra.mxu3 %vm5696_vm5, %v6521_v23  ;;  %v6089_v28 = vmul.f32 %v16407_v46, %v6088_v56  ;;  %v14992_v30 = vpop.eup %11276  ;;  %v5958_v39 = vsel %vm5696_vm5, %v14990_v14, 0.0  ;;  %vm16410_vm10 = vnez %v16409_v50 }
 0xa71   :  { %v5869_v57 = vmul.f32 1.442695, %v5815_v35  ;;  %v5875_v10 = vmul.f32 1.442695, %v5818_v43  ;;  %v5961_v17 = vsel %vm5696_vm5, %v14992_v30, 0.0  ;;  %v6707_v20 = vsel %vm16410_vm10, %v13699_v3, 0 }
 0xa72   :  { %v6093_v25 = vmul.f32 %v11271_v4, %v6092_v22  ;;  %v6471_v34 = vpack.c.bf16 %v6089_v28, %v6089_v28  ;;  %v6708_v45 = vsel %vm16410_vm10, %v13701_v37, 0  ;;  %v6739_v35 = vunpack.c.l.b16 %v6707_v20 }
 0xa73   :  { %11278 = vpow2.f32 %v5869_v57  ;;  %5947 = vadd.xlane.f32.xlu1 %v5946_v13  ;;  %5944 = vadd.xlane.f32.xlu2 %v5943_v49  ;;  %v6741_v22 = vunpack.c.l.b16 %v6708_v45  ;;  %v6740_v49 = vunpack.c.h.b16 %v6707_v20  ;;  %v6742_v44 = vunpack.c.h.b16 %v6708_v45 }
 0xa74   :  { %v6094_v47 = vadd.f32 %v11271_v4, %v6093_v25  ;;  %11280 = vpow2.f32 %v5875_v10  ;;  %v6519_v55 = vunpack.c.l.b16 %v6471_v34  ;;  %v6705_v25 = vsel %vm16410_vm10, %v13713_v40, 0 }
 0xa75   :  { %11282 = vrcp.f32 %v15003_v12  ;;  %v6749_v54 = vpack.c.b16 %v6741_v22, %v6739_v35  ;;  %v6750_v57 = vpack.c.b16 %v6742_v44, %v6740_v49  ;;  %v6706_v19 = vsel %vm16410_vm10, %v13715_v2, 0 }
 0xa76   :  { %v6098_v32 = vsel %vm6097_vm9, %v11271_v4, %v6094_v47  ;;  %v6735_v13 = vunpack.c.l.b16 %v6705_v25  ;;  %v6737_v47 = vunpack.c.l.b16 %v6706_v19  ;;  %v6736_v46 = vunpack.c.h.b16 %v6705_v25 }
 0xa77   :  { %v6103_v38 = vsel %vm6100_vm6, %v6102_v62, %v6098_v32  ;;  %v15022_v43 = vpop.xlane.xlu0 %5923  ;;  %6769 = vmatpush.bf16.msra.mxu2 %v6749_v54  ;;  %v6738_v28 = vunpack.c.h.b16 %v6706_v19  ;;  %6788 = vmatpush.bf16.msra.mxu3 %v6750_v57  ;;  %v6116_v54 = vand.u32 2147483648, %v15003_v12  ;;  %vm6110_vm2 = vweird.f32 %v15003_v12 }
 0xa78   :  { %v6104_v41 = vmul.f32 %v16408_v33, %v6103_v38  ;;  %v6747_v10 = vpack.c.b16 %v6737_v47, %v6735_v13  ;;  %v6703_v38 = vsel %vm16410_vm10, %v13733_v29, 0  ;;  %v6704_v33 = vsel %vm16410_vm10, %v13735_v0, 0 }
 0xa79   :  { %v14995_v11 = vpop.eup %11278  ;;  %v6748_v32 = vpack.c.b16 %v6738_v28, %v6736_v46  ;;  %11284 = vrcp.f32 %v15022_v43  ;;  %v6733_v34 = vunpack.c.l.b16 %v6704_v33  ;;  %v6114_v57 = vand.u32 2147483647, %v15003_v12 }
 0xa7a   :  { %v5955_v36 = vsel %vm5696_vm5, %v14995_v11, 0.0  ;;  %v6472_v27 = vpack.c.bf16 %v6104_v41, %v6104_v41  ;;  %v15005_v9 = vpop.eup %11280  ;;  %v6731_v41 = vunpack.c.l.b16 %v6703_v38 }
 0xa7b   :  { %5962 = vadd.xlane.f32.xlu1 %v5961_v17  ;;  %5956 = vadd.xlane.f32.xlu0 %v5955_v36  ;;  %v5964_v1 = vsel %vm5696_vm5, %v15005_v9, 0.0  ;;  %v15012_v51 = vpop.eup %11282  ;;  %v6732_v17 = vunpack.c.h.b16 %v6703_v38  ;;  %vm6115_vm0 = vcmp.eq.f32.partialorder %v6114_v57, 8.507059e+37 }
 0xa7c   :  { %5959 = vadd.xlane.f32.xlu2 %v5958_v39  ;;  %v6520_v4 = vunpack.c.l.b16 %v6472_v27  ;;  %v6106_v56 = vmul.f32 %v15012_v51, %v15003_v12  ;;  %6770 = vmatpush.bf16.msra.mxu2 %v6747_v10  ;;  %v6734_v39 = vunpack.c.h.b16 %v6704_v33  ;;  %vm6111_vm15 = vweird.f32 %v15012_v51 }
 0xa7d   :  { %6789 = vmatpush.bf16.msra.mxu3 %v6748_v32  ;;  %vm6112_vm11 = vmor %vm6110_vm2, %vm6111_vm15 }
 0xa7e   :  { %v6522_v23 = vpack.c.b16 %v6520_v4, %v6519_v55  ;;  %v6107_v62 = vsub.f32 1.0, %v6106_v56  ;;  %v6701_v55 = vsel %vm16410_vm10, %v13747_v52, 0  ;;  %v6702_v4 = vsel %vm16410_vm10, %v13749_v5, 0 }
 0xa7f   :  { %v6727_v20 = vunpack.c.l.b16 %v6701_v55  ;;  %v6729_v45 = vunpack.c.l.b16 %v6702_v4  ;;  %v5780_v22 = vpop.xlane.xlu0 %5779  ;;  %v6728_v49 = vunpack.c.h.b16 %v6701_v55  ;;  %v6730_v56 = vunpack.c.h.b16 %v6702_v4  ;;  %v15046_v44 = vpop.eup %11284 }
 0xa80   :  { %9990 = vmatmul.msk.bf16.gmra.mxu2 %vm5696_vm5, %v6522_v23  ;;  %9992 = vmatmul.msk.bf16.gmra.mxu3 %vm5696_vm5, %v6522_v23  ;;  %v6108_v36 = vmul.f32 %v15012_v51, %v6107_v62  ;;  %v6745_v23 = vpack.c.b16 %v6733_v34, %v6731_v41  ;;  %v6151_v47 = vmul.f32 %v15046_v44, %v15022_v43  ;;  %v6117_v62 = vor.u32 1.1754944e-38, %v6116_v54 }
 0xa81   :  { %v6743_v50 = vpack.c.b16 %v6729_v45, %v6727_v20  ;;  %v6744_v25 = vpack.c.b16 %v6730_v56, %v6728_v49  ;;  %vm6156_vm13 = vweird.f32 %v15046_v44  ;;  %vm6155_vm10 = vweird.f32 %v15022_v43 }
 0xa82   :  { %v6109_v35 = vadd.f32 %v15012_v51, %v6108_v36  ;;  %6771 = vmatpush.bf16.msra.mxu2 %v6745_v23  ;;  %v6152_v12 = vsub.f32 1.0, %v6151_v47  ;;  %v5820_v36 = vsub.f32 %v14756_v26, %v5780_v22  ;;  %vm15071_vm15 = vmor %vm6155_vm10, %vm6156_vm13 }
 0xa83   :  { %5965 = vadd.xlane.f32.xlu0 %v5964_v1  ;;  %v6746_v1 = vpack.c.b16 %v6734_v39, %v6732_v17 }
 0xa84   :  { %v6113_v13 = vsel %vm6112_vm11, %v15012_v51, %v6109_v35  ;;  %v16411_v51 = vld [vmem:[#allocation38_spill] sm:$0xff]  ;;  %v6153_v23 = vmul.f32 %v15046_v44, %v6152_v12  ;;  %v5879_v22 = vmul.f32 1.442695, %v5820_v36 }
 0xa85   :  { %6790 = vmatpush.bf16.msra.mxu3 %v6746_v1  ;;  %v6118_v32 = vsel %vm6115_vm0, %v6117_v62, %v6113_v13 }
 0xa86   :  { %6772 = vmatpush.bf16.msra.mxu2 %v6743_v50  ;;  %v6119_v17 = vmul.f32 %v16411_v51, %v6118_v32 }
 0xa87   :  { %v15058_v39 = vpop.xlane.xlu0 %5932 }
 0xa88   :  { %v6473_v26 = vpack.c.bf16 %v6119_v17, %v6119_v17  ;;  %vm6200_vm13 = vweird.f32 %v15058_v39 }
 0xa89   :  { %6791 = vmatpush.bf16.msra.mxu3 %v6744_v25  ;;  %v6154_v25 = vadd.f32 %v15046_v44, %v6153_v23 }
 0xa92   :  { %v5918_v27 = vpop.xlane.xlu2 %5917 }
 0xa93   :  { %11286 = vrcp.f32 %v5918_v27  ;;  %v6131_v33 = vand.u32 2147483648, %v5918_v27  ;;  %v6129_v34 = vand.u32 2147483647, %v5918_v27  ;;  %vm6125_vm1 = vweird.f32 %v5918_v27 }
 0xa95   :  { %v6132_v1 = vor.u32 1.1754944e-38, %v6131_v33  ;;  %vm6130_vm9 = vcmp.eq.f32.partialorder %v6129_v34, 8.507059e+37 }
 0xa99   :  { %v11287_v19 = vpop.eup %11286 }
 0xa9a   :  { %v5921_v46 = vpop.xlane.xlu1 %5920  ;;  %v15054_v28 = vpop.xlane.xlu2 %5926  ;;  %v6121_v10 = vmul.f32 %v11287_v19, %v5918_v27  ;;  %vm6126_vm12 = vweird.f32 %v11287_v19 }
 0xa9b   :  { %11288 = vrcp.f32 %v5921_v46  ;;  %vm6127_vm4 = vmor %vm6125_vm1, %vm6126_vm12  ;;  %v6146_v50 = vand.u32 2147483648, %v5921_v46  ;;  %v6144_v47 = vand.u32 2147483647, %v5921_v46  ;;  %vm6140_vm2 = vweird.f32 %v5921_v46 }
 0xa9c   :  { %v6122_v38 = vsub.f32 1.0, %v6121_v10  ;;  %11290 = vrcp.f32 %v15058_v39  ;;  %vm6170_vm10 = vweird.f32 %v15054_v28 }
 0xa9d   :  { %11292 = vrcp.f32 %v15054_v28  ;;  %v6147_v33 = vor.u32 1.1754944e-38, %v6146_v50  ;;  %vm6145_vm0 = vcmp.eq.f32.partialorder %v6144_v47, 8.507059e+37 }
 0xa9e   :  { %v6123_v41 = vmul.f32 %v11287_v19, %v6122_v38  ;;  %v6713_v38 = vunpack.c.l.b16 %v6473_v26 }
 0xaa0   :  { %v6124_v4 = vadd.f32 %v11287_v19, %v6123_v41  ;;  %v6158_v41 = vsel %vm15071_vm15, %v15046_v44, %v6154_v25 }
 0xaa1   :  { %v11289_v55 = vpop.eup %11288 }
 0xaa2   :  { %v6136_v20 = vmul.f32 %v11289_v55, %v5921_v46  ;;  %v5783_v45 = vpop.xlane.xlu2 %5782  ;;  %v6128_v35 = vsel %vm6127_vm4, %v11287_v19, %v6124_v4  ;;  %vm6141_vm6 = vweird.f32 %v11289_v55  ;;  %v6161_v19 = vand.u32 2147483648, %v15022_v43  ;;  %v15076_v32 = vpop.eup %11290 }
 0xaa3   :  { %v5821_v49 = vsub.f32 %v14831_v58, %v5783_v45  ;;  %v6133_v56 = vsel %vm6130_vm9, %v6132_v1, %v6128_v35  ;;  %vm6142_vm11 = vmor %vm6140_vm2, %vm6141_vm6  ;;  %v15081_v51 = vpop.eup %11292  ;;  %v6196_v46 = vmul.f32 %v15076_v32, %v15058_v39  ;;  %v15096_v35 = vpop.xlane.xlu0 %5788  ;;  %vm6201_vm4 = vweird.f32 %v15076_v32 }
 0xaa4   :  { %v6137_v54 = vsub.f32 1.0, %v6136_v20  ;;  %v6134_v27 = vmul.f32 %v14811_v18, %v6133_v56  ;;  %v6159_v18 = vand.u32 2147483647, %v15022_v43  ;;  %v6162_v17 = vor.u32 1.1754944e-38, %v6161_v19  ;;  %vm15128_vm6 = vmor %vm6200_vm13, %vm6201_vm4 }
 0xaa5   :  { %v5881_v57 = vmul.f32 1.442695, %v5821_v49  ;;  %v6166_v44 = vmul.f32 %v15081_v51, %v15054_v28  ;;  %v6197_v45 = vsub.f32 1.0, %v6196_v46  ;;  %v16414_v49 = vld [vmem:[#allocation43_spill] sm:$0xff]  ;;  %vm6171_vm9 = vweird.f32 %v15081_v51 }
 0xaa6   :  { %v6138_v13 = vmul.f32 %v11289_v55, %v6137_v54  ;;  %v6474_v58 = vpack.c.bf16 %v6134_v27, %v6134_v27  ;;  %vm6160_vm12 = vcmp.eq.f32.partialorder %v6159_v18, 8.507059e+37  ;;  %vm15140_vm15 = vmor %vm6170_vm10, %vm6171_vm9 }
 0xaa7   :  { %11294 = vpow2.f32 %v5881_v57  ;;  %v6163_v23 = vsel %vm6160_vm12, %v6162_v17, %v6158_v41  ;;  %v6198_v27 = vmul.f32 %v15076_v32, %v6197_v45  ;;  %v16415_v57 = vld [vmem:[#allocation75_spill] sm:$0xff]  ;;  %v6204_v45 = vand.u32 2147483647, %v15058_v39 }
 0xaa8   :  { %v6139_v10 = vadd.f32 %v11289_v55, %v6138_v13  ;;  %v6714_v12 = vunpack.c.l.b16 %v6474_v58  ;;  %11296 = vpow2.f32 %v5879_v22  ;;  %v6164_v26 = vmul.f32 %v16414_v49, %v6163_v23 }
 0xaa9   :  { %v6167_v22 = vsub.f32 1.0, %v6166_v44  ;;  %vm16416_vm1 = vnez %v16415_v57  ;;  %v6199_v46 = vadd.f32 %v15076_v32, %v6198_v27  ;;  %v6206_v49 = vand.u32 2147483648, %v15058_v39 }
 0xaaa   :  { %v6143_v34 = vsel %vm6142_vm11, %v11289_v55, %v6139_v10  ;;  %v6717_v36 = vpack.c.b16 %v6714_v12, %v6713_v38  ;;  %v6476_v50 = vpack.c.bf16 %v6164_v26, %v6164_v26  ;;  %v6818_v25 = vsel %vm16416_vm1, %v13701_v37, 0 }
 0xaab   :  { %v6148_v43 = vsel %vm6145_vm0, %v6147_v33, %v6143_v34  ;;  %v6851_v47 = vunpack.c.l.b16 %v6818_v25  ;;  %v6852_v58 = vunpack.c.h.b16 %v6818_v25  ;;  %v6168_v62 = vmul.f32 %v15081_v51, %v6167_v22 }
 0xaac   :  { %9997 = vmatmul.msk.bf16.vlgmr.msra.gmra.mxu2 %vm5696_vm5, %v6717_v36  ;;  %9999 = vmatmul.msk.bf16.vlgmr.msra.gmra.mxu3 %vm5696_vm5, %v6717_v36  ;;  %v6149_v1 = vmul.f32 %v14822_v63, %v6148_v43  ;;  %v6817_v63 = vsel %vm16416_vm1, %v13699_v3, 0  ;;  %v6815_v10 = vsel %vm16416_vm1, %v13713_v40, 0  ;;  %v6816_v38 = vsel %vm16416_vm1, %v13715_v2, 0 }
 0xaad   :  { %v15085_v4 = vpop.eup %11294  ;;  %v6849_v13 = vunpack.c.l.b16 %v6817_v63  ;;  %v6850_v19 = vunpack.c.h.b16 %v6817_v63  ;;  %v6845_v41 = vunpack.c.l.b16 %v6815_v10  ;;  %v6847_v34 = vunpack.c.l.b16 %v6816_v38 }
 0xaae   :  { %v5973_v55 = vsel %vm5696_vm5, %v15085_v4, 0.0  ;;  %v15094_v20 = vpop.eup %11296  ;;  %v6475_v56 = vpack.c.bf16 %v6149_v1, %v6149_v1  ;;  %v6846_v36 = vunpack.c.h.b16 %v6815_v10  ;;  %v6848_v43 = vunpack.c.h.b16 %v6816_v38 }
 0xaaf   :  { %5974 = vadd.xlane.f32.xlu2 %v5973_v55  ;;  %v5970_v54 = vsel %vm5696_vm5, %v15094_v20, 0.0  ;;  %v6859_v12 = vpack.c.b16 %v6851_v47, %v6849_v13  ;;  %v6860_v33 = vpack.c.b16 %v6852_v58, %v6850_v19  ;;  %v6716_v23 = vunpack.c.l.b16 %v6476_v50 }
 0xab0   :  { %v6715_v18 = vunpack.c.l.b16 %v6475_v56  ;;  %v6169_v44 = vadd.f32 %v15081_v51, %v6168_v62  ;;  %v6857_v55 = vpack.c.b16 %v6847_v34, %v6845_v41  ;;  %v6858_v1 = vpack.c.b16 %v6848_v43, %v6846_v36 }
 0xab1   :  { %6879 = vmatpush.bf16.msra.mxu0 %v6859_v12  ;;  %6898 = vmatpush.bf16.msra.mxu1 %v6860_v33  ;;  %v6176_v26 = vand.u32 2147483648, %v15054_v28  ;;  %v6813_v27 = vsel %vm16416_vm1, %v13733_v29, 0  ;;  %v6814_v50 = vsel %vm16416_vm1, %v13735_v0, 0  ;;  %v6203_v47 = vsel %vm15128_vm6, %v15076_v32, %v6199_v46 }
 0xab2   :  { %v6718_v22 = vpack.c.b16 %v6716_v23, %v6715_v18  ;;  %v6841_v39 = vunpack.c.l.b16 %v6813_v27  ;;  %v6843_v25 = vunpack.c.l.b16 %v6814_v50  ;;  %v6842_v13 = vunpack.c.h.b16 %v6813_v27 }
 0xab3   :  { %v6173_v19 = vsel %vm15140_vm15, %v15081_v51, %v6169_v44  ;;  %vm6205_vm2 = vcmp.eq.f32.partialorder %v6204_v45, 8.507059e+37  ;;  %v6207_v18 = vor.u32 1.1754944e-38, %v6206_v49  ;;  %v6177_v10 = vor.u32 1.1754944e-38, %v6176_v26 }
 0xab4   :  { %v5823_v38 = vsub.f32 %v14804_v16, %v15096_v35  ;;  %v6855_v12 = vpack.c.b16 %v6843_v25, %v6841_v39  ;;  %v6811_v51 = vsel %vm16416_vm1, %v13747_v52, 0  ;;  %v6812_v34 = vsel %vm16416_vm1, %v13749_v5, 0 }
 0xab5   :  { %6880 = vmatpush.bf16.msra.mxu0 %v6857_v55  ;;  %6899 = vmatpush.bf16.msra.mxu1 %v6858_v1  ;;  %v6208_v32 = vsel %vm6205_vm2, %v6207_v18, %v6203_v47  ;;  %v6837_v43 = vunpack.c.l.b16 %v6811_v51  ;;  %v6839_v16 = vunpack.c.l.b16 %v6812_v34  ;;  %v6838_v35 = vunpack.c.h.b16 %v6811_v51 }
 0xab6   :  { %v15116_v17 = vpop.xlane.xlu0 %5953  ;;  %v6840_v46 = vunpack.c.h.b16 %v6812_v34  ;;  %v5885_v55 = vmul.f32 1.442695, %v5823_v38  ;;  %v15166_v49 = vmul.f32 %v14792_v42, %v6208_v32  ;;  %v6927_v18 = vsel %vm13366_vm3, %v13699_v3, 0 }
 0xab7   :  { %5971 = vadd.xlane.f32.xlu2 %v5970_v54  ;;  %11298 = vrcp.f32 %v15116_v17  ;;  %v6174_v54 = vand.u32 2147483647, %v15054_v28  ;;  %v6844_v28 = vunpack.c.h.b16 %v6814_v50  ;;  %v6853_v23 = vpack.c.b16 %v6839_v16, %v6837_v43 }
 0xab8   :  { %v6854_v45 = vpack.c.b16 %v6840_v46, %v6838_v35  ;;  %v6479_v39 = vpack.c.bf16 %v15166_v49, %v15166_v49  ;;  %v6959_v38 = vunpack.c.l.b16 %v6927_v18  ;;  %vm6305_vm9 = vweird.f32 %v15116_v17 }
 0xab9   :  { %vm6175_vm11 = vcmp.eq.f32.partialorder %v6174_v54, 8.507059e+37  ;;  %v6856_v33 = vpack.c.b16 %v6844_v28, %v6842_v13  ;;  %6881 = vmatpush.bf16.msra.mxu0 %v6855_v12  ;;  %v6309_v13 = vand.u32 2147483647, %v15116_v17  ;;  %v6311_v28 = vand.u32 2147483648, %v15116_v17 }
 0xaba   :  { %v6178_v41 = vsel %vm6175_vm11, %v6177_v10, %v6173_v19  ;;  %v6928_v10 = vsel %vm13366_vm3, %v13701_v37, 0 }
 0xabb   :  { %6900 = vmatpush.bf16.msra.mxu1 %v6856_v33  ;;  %v6179_v1 = vmul.f32 %v14818_v15, %v6178_v41  ;;  %v6961_v12 = vunpack.c.l.b16 %v6928_v10  ;;  %v6960_v33 = vunpack.c.h.b16 %v6927_v18  ;;  %v6962_v32 = vunpack.c.h.b16 %v6928_v10 }
 0xabc   :  { %9998 = vmatmul.msk.bf16.gmra.mxu2 %vm5696_vm5, %v6718_v22  ;;  %10000 = vmatmul.msk.bf16.gmra.mxu3 %vm5696_vm5, %v6718_v22  ;;  %vm15189_vm6 = vcmp.eq.f32.partialorder %v6309_v13, 8.507059e+37 }
 0xabd   :  { %v15152_v62 = vpop.eup %11298  ;;  %6882 = vmatpush.bf16.msra.mxu0 %v6853_v23  ;;  %v6477_v50 = vpack.c.bf16 %v6179_v1, %v6179_v1 }
 0xabe   :  { %v5930_v58 = vpop.xlane.xlu1 %5929  ;;  %v6301_v36 = vmul.f32 %v15152_v62, %v15116_v17  ;;  %vm6306_vm13 = vweird.f32 %v15152_v62  ;;  %v6925_v17 = vsel %vm13366_vm3, %v13713_v40, 0 }
 0xabf   :  { %11300 = vrcp.f32 %v5930_v58  ;;  %6901 = vmatpush.bf16.msra.mxu1 %v6854_v45  ;;  %v6191_v27 = vand.u32 2147483648, %v5930_v58  ;;  %v6189_v42 = vand.u32 2147483647, %v5930_v58  ;;  %vm6185_vm12 = vweird.f32 %v5930_v58  ;;  %vm15198_vm10 = vmor %vm6305_vm9, %vm6306_vm13 }
 0xac0   :  { %v6302_v57 = vsub.f32 1.0, %v6301_v36  ;;  %11302 = vpow2.f32 %v5885_v55  ;;  %v6823_v43 = vunpack.c.l.b16 %v6477_v50  ;;  %v6970_v45 = vpack.c.b16 %v6962_v32, %v6960_v33 }
 0xac1   :  { %v6192_v47 = vor.u32 1.1754944e-38, %v6191_v27  ;;  %vm6190_vm4 = vcmp.eq.f32.partialorder %v6189_v42, 8.507059e+37  ;;  %v6956_v50 = vunpack.c.h.b16 %v6925_v17 }
 0xac2   :  { %v6303_v15 = vmul.f32 %v15152_v62, %v6302_v57  ;;  %v6926_v57 = vsel %vm13366_vm3, %v13715_v2, 0  ;;  %7008 = vmatpush.bf16.msrb.mxu3 %v6970_v45 }
 0xac3   :  { %v6957_v27 = vunpack.c.l.b16 %v6926_v57 }
 0xac4   :  { %v6304_v41 = vadd.f32 %v15152_v62, %v6303_v15  ;;  %v6958_v15 = vunpack.c.h.b16 %v6926_v57  ;;  %v7038_v57 = vsel %vm13380_vm7, %v13701_v37, 0 }
 0xac5   :  { %v11301_v44 = vpop.eup %11300 }
 0xac6   :  { %v6181_v26 = vmul.f32 %v11301_v44, %v5930_v58  ;;  %v5786_v22 = vpop.xlane.xlu1 %5785  ;;  %vm6186_vm0 = vweird.f32 %v11301_v44  ;;  %v15184_v36 = vpop.eup %11302  ;;  %v6968_v32 = vpack.c.b16 %v6958_v15, %v6956_v50  ;;  %v6921_v15 = vsel %vm13366_vm3, %v13747_v52, 0 }
 0xac7   :  { %v5822_v56 = vsub.f32 %v14856_v21, %v5786_v22  ;;  %vm6187_vm1 = vmor %vm6185_vm12, %vm6186_vm0 }
 0xac8   :  { %v6182_v54 = vsub.f32 1.0, %v6181_v26  ;;  %v6312_v26 = vor.u32 1.1754944e-38, %v6311_v28  ;;  %7009 = vmatpush.bf16.msrb.mxu3 %v6968_v32 }
 0xac9   :  { %v5883_v63 = vmul.f32 1.442695, %v5822_v56 }
 0xaca   :  { %v6183_v25 = vmul.f32 %v11301_v44, %v6182_v54  ;;  %v6955_v54 = vunpack.c.l.b16 %v6925_v17  ;;  %v7037_v17 = vsel %vm13380_vm7, %v13699_v3, 0 }
 0xacb   :  { %11304 = vpow2.f32 %v5883_v63  ;;  %v7070_v50 = vunpack.c.h.b16 %v7037_v17 }
 0xacc   :  { %v6184_v21 = vadd.f32 %v11301_v44, %v6183_v25  ;;  %v6923_v25 = vsel %vm13366_vm3, %v13733_v29, 0  ;;  %v6967_v28 = vpack.c.b16 %v6957_v27, %v6955_v54 }
 0xace   :  { %v6188_v58 = vsel %vm6187_vm1, %v11301_v44, %v6184_v21  ;;  %v5777_v51 = vpop.xlane.xlu1 %5776  ;;  %v15182_v34 = vpop.xlane.xlu2 %5935  ;;  %v6969_v44 = vpack.c.b16 %v6961_v12, %v6959_v38  ;;  %v6951_v21 = vunpack.c.l.b16 %v6923_v25 }
 0xacf   :  { %v6193_v16 = vsel %vm6190_vm4, %v6192_v47, %v6188_v58  ;;  %v5819_v35 = vsub.f32 %v14853_v48, %v5777_v51  ;;  %11306 = vrcp.f32 %v15182_v34  ;;  %v6219_v13 = vand.u32 2147483647, %v15182_v34 }
 0xad0   :  { %v6194_v23 = vmul.f32 %v14860_v60, %v6193_v16  ;;  %v6308_v60 = vsel %vm15198_vm10, %v15152_v62, %v6304_v41  ;;  %6989 = vmatpush.bf16.msrb.mxu2 %v6969_v44  ;;  %v6924_v62 = vsel %vm13366_vm3, %v13735_v0, 0  ;;  %v6221_v41 = vand.u32 2147483648, %v15182_v34 }
 0xad1   :  { %v15194_v55 = vpop.eup %11304  ;;  %v5877_v48 = vmul.f32 1.442695, %v5819_v35  ;;  %v6953_v47 = vunpack.c.l.b16 %v6924_v62  ;;  %v6313_v18 = vsel %vm15189_vm6, %v6312_v26, %v6308_v60  ;;  %v5979_v58 = vsel %vm5696_vm5, %v15184_v36, 0.0 }
 0xad2   :  { %v6478_v22 = vpack.c.bf16 %v6194_v23, %v6194_v23  ;;  %v5976_v56 = vsel %vm5696_vm5, %v15194_v55, 0.0  ;;  %v6952_v16 = vunpack.c.h.b16 %v6923_v25  ;;  %v15242_v46 = vmul.f32 %v14846_v7, %v6313_v18 }
 0xad3   :  { %11308 = vpow2.f32 %v5877_v48  ;;  %5977 = vadd.xlane.f32.xlu1 %v5976_v56  ;;  %vm6215_vm15 = vweird.f32 %v15182_v34  ;;  %vm15245_vm2 = vcmp.eq.f32.partialorder %v6219_v13, 8.507059e+37  ;;  %v6965_v44 = vpack.c.b16 %v6953_v47, %v6951_v21 }
 0xad4   :  { %v6824_v63 = vunpack.c.l.b16 %v6478_v22  ;;  %6990 = vmatpush.bf16.msrb.mxu2 %v6967_v28  ;;  %v6222_v48 = vor.u32 1.1754944e-38, %v6221_v41  ;;  %v7069_v22 = vunpack.c.l.b16 %v7037_v17  ;;  %v7071_v56 = vunpack.c.l.b16 %v7038_v57 }
 0xad5   :  { %v11307_v42 = vpop.eup %11306  ;;  %v6947_v41 = vunpack.c.l.b16 %v6921_v15 }
 0xad6   :  { %v6827_v10 = vpack.c.b16 %v6824_v63, %v6823_v43  ;;  %v6211_v38 = vmul.f32 %v11307_v42, %v15182_v34  ;;  %v15223_v12 = vpop.xlane.xlu1 %5941  ;;  %v15225_v33 = vpop.xlane.xlu2 %5938  ;;  %v15237_v43 = vunpack.c.l.b16 %v6479_v39  ;;  %vm6216_vm11 = vweird.f32 %v11307_v42 }
 0xad7   :  { %11310 = vrcp.f32 %v15223_v12  ;;  %v6954_v39 = vunpack.c.h.b16 %v6924_v62  ;;  %v6249_v45 = vand.u32 2147483647, %v15223_v12  ;;  %vm6245_vm0 = vweird.f32 %v15223_v12  ;;  %vm6217_vm12 = vmor %vm6215_vm15, %vm6216_vm11 }
 0xad8   :  { %v6212_v51 = vsub.f32 1.0, %v6211_v38  ;;  %11312 = vrcp.f32 %v15225_v33  ;;  %10001 = vmatmul.msk.bf16.vlgmr.msra.gmra.mxu0 %vm5696_vm5, %v6827_v10  ;;  %10003 = vmatmul.msk.bf16.vlgmr.msra.gmra.mxu1 %vm5696_vm5, %v6827_v10  ;;  %v6251_v27 = vand.u32 2147483648, %v15223_v12  ;;  %v7072_v63 = vunpack.c.h.b16 %v7038_v57 }
 0xad9   :  { %v15239_v35 = vpop.eup %11308  ;;  %6991 = vmatpush.bf16.msrb.mxu2 %v6965_v44  ;;  %v6966_v26 = vpack.c.b16 %v6954_v39, %v6952_v16  ;;  %vm6230_vm1 = vweird.f32 %v15225_v33  ;;  %v7079_v34 = vpack.c.b16 %v7071_v56, %v7069_v22  ;;  %v6234_v38 = vand.u32 2147483647, %v15225_v33 }
 0xada   :  { %v6213_v1 = vmul.f32 %v11307_v42, %v6212_v51  ;;  %v5967_v49 = vsel %vm5696_vm5, %v15239_v35, 0.0  ;;  %v6236_v32 = vand.u32 2147483648, %v15225_v33  ;;  %v7080_v23 = vpack.c.b16 %v7072_v63, %v7070_v50 }
 0xadb   :  { %5980 = vadd.xlane.f32.xlu1 %v5979_v58  ;;  %5968 = vadd.xlane.f32.xlu0 %v5967_v49  ;;  %vm6235_vm6 = vcmp.eq.f32.partialorder %v6234_v38, 8.507059e+37 }
 0xadc   :  { %v6214_v60 = vadd.f32 %v11307_v42, %v6213_v1  ;;  %7010 = vmatpush.bf16.msrb.mxu3 %v6966_v26  ;;  %7099 = vmatpush.bf16.msrb.mxu0 %v7079_v34  ;;  %v6237_v50 = vor.u32 1.1754944e-38, %v6236_v32 }
 0xadd   :  { %v11311_v54 = vpop.eup %11310  ;;  %7118 = vmatpush.bf16.msrb.mxu1 %v7080_v23 }
 0xade   :  { %v11313_v25 = vpop.eup %11312  ;;  %v6218_v62 = vsel %vm6217_vm12, %v11307_v42, %v6214_v60  ;;  %v6241_v13 = vmul.f32 %v11311_v54, %v15223_v12  ;;  %v15268_v28 = vpop.xlane.xlu1 %5950  ;;  %v6922_v42 = vsel %vm13366_vm3, %v13749_v5, 0  ;;  %vm6246_vm13 = vweird.f32 %v11311_v54 }
 0xadf   :  { %v5792_v21 = vpop.xlane.xlu2 %5791  ;;  %v6223_v47 = vsel %vm15245_vm2, %v6222_v48, %v6218_v62  ;;  %v6226_v18 = vmul.f32 %v11313_v25, %v15225_v33  ;;  %11314 = vrcp.f32 %v15268_v28  ;;  %vm6231_vm4 = vweird.f32 %v11313_v25  ;;  %vm6247_vm9 = vmor %vm6245_vm0, %vm6246_vm13 }
 0xae0   :  { %v6242_v10 = vsub.f32 1.0, %v6241_v13  ;;  %v5824_v51 = vsub.f32 %v14948_v6, %v5792_v21  ;;  %v6224_v16 = vmul.f32 %v14905_v59, %v6223_v47  ;;  %v6949_v1 = vunpack.c.l.b16 %v6922_v42  ;;  %vm6232_vm10 = vmor %vm6230_vm1, %vm6231_vm4 }
 0xae1   :  { %v6227_v58 = vsub.f32 1.0, %v6226_v18  ;;  %v6948_v48 = vunpack.c.h.b16 %v6921_v15  ;;  %vm15281_vm3 = vcmp.eq.f32.partialorder %v6249_v45, 8.507059e+37  ;;  %v6950_v26 = vunpack.c.h.b16 %v6922_v42 }
 0xae2   :  { %v6243_v44 = vmul.f32 %v11311_v54, %v6242_v10  ;;  %v5887_v19 = vmul.f32 1.442695, %v5824_v51  ;;  %v6480_v39 = vpack.c.bf16 %v6224_v16, %v6224_v16  ;;  %v6963_v60 = vpack.c.b16 %v6949_v1, %v6947_v41 }
 0xae3   :  { %v6228_v49 = vmul.f32 %v11313_v25, %v6227_v58  ;;  %v6252_v59 = vor.u32 1.1754944e-38, %v6251_v27  ;;  %v6964_v62 = vpack.c.b16 %v6950_v26, %v6948_v48  ;;  %v6294_v34 = vand.u32 2147483647, %v15268_v28 }
 0xae4   :  { %v6244_v17 = vadd.f32 %v11311_v54, %v6243_v44  ;;  %11316 = vpow2.f32 %v5887_v19  ;;  %6992 = vmatpush.bf16.msrb.mxu2 %v6963_v60  ;;  %v6296_v18 = vand.u32 2147483648, %v15268_v28  ;;  %vm6290_vm2 = vweird.f32 %v15268_v28 }
 0xae5   :  { %v11315_v6 = vpop.eup %11314  ;;  %v6229_v22 = vadd.f32 %v11313_v25, %v6228_v49  ;;  %7011 = vmatpush.bf16.msrb.mxu3 %v6964_v62  ;;  %vm6295_vm0 = vcmp.eq.f32.partialorder %v6294_v34, 8.507059e+37 }
 0xae6   :  { %v6248_v56 = vsel %vm6247_vm9, %v11311_v54, %v6244_v17  ;;  %v6286_v45 = vmul.f32 %v11315_v6, %v15268_v28  ;;  %v15291_v63 = vpop.xlane.xlu1 %5947  ;;  %v6826_v54 = vunpack.c.l.b16 %v6480_v39  ;;  %vm6291_vm15 = vweird.f32 %v11315_v6 }
 0xae7   :  { %v15293_v15 = vpop.xlane.xlu2 %5944  ;;  %v6253_v12 = vsel %vm15281_vm3, %v6252_v59, %v6248_v56  ;;  %v6233_v27 = vsel %vm6232_vm10, %v11313_v25, %v6229_v22  ;;  %11318 = vrcp.f32 %v15291_v63  ;;  %v7035_v25 = vsel %vm13380_vm7, %v13713_v40, 0  ;;  %vm6292_vm11 = vmor %vm6290_vm2, %vm6291_vm15 }
 0xae8   :  { %v6254_v13 = vmul.f32 %v14920_v31, %v6253_v12  ;;  %v6238_v33 = vsel %vm6235_vm6, %v6237_v50, %v6233_v27  ;;  %v6287_v21 = vsub.f32 1.0, %v6286_v45  ;;  %11320 = vrcp.f32 %v15293_v15 }
 0xae9   :  { %v6239_v47 = vmul.f32 %v14935_v61, %v6238_v33  ;;  %v7036_v31 = vsel %vm13380_vm7, %v13715_v2, 0  ;;  %v6486_v61 = vpack.c.bf16 %v15242_v46, %v15242_v46  ;;  %v6828_v41 = vpack.c.b16 %v6826_v54, %v15237_v43 }
 0xaea   :  { %v6482_v42 = vpack.c.bf16 %v6254_v13, %v6254_v13  ;;  %v6288_v10 = vmul.f32 %v11315_v6, %v6287_v21  ;;  %v15309_v38 = vpop.eup %11316  ;;  %v6297_v1 = vor.u32 1.1754944e-38, %v6296_v18  ;;  %v7065_v46 = vunpack.c.l.b16 %v7035_v25 }
 0xaeb   :  { %v6481_v32 = vpack.c.bf16 %v6239_v47, %v6239_v47  ;;  %v5982_v16 = vsel %vm5696_vm5, %v15309_v38, 0.0  ;;  %10002 = vmatmul.msk.bf16.gmra.mxu0 %vm5696_vm5, %v6828_v41  ;;  %10004 = vmatmul.msk.bf16.gmra.mxu1 %vm5696_vm5, %v6828_v41  ;;  %v7067_v49 = vunpack.c.l.b16 %v7036_v31  ;;  %v7066_v28 = vunpack.c.h.b16 %v7035_v25  ;;  %v15366_v41 = vpop.f32.mrf.mxu1 }
 0xaec   :  { %v6934_v58 = vunpack.c.l.b16 %v6482_v42  ;;  %v6289_v51 = vadd.f32 %v11315_v6, %v6288_v10  ;;  %5983 = vadd.xlane.f32.xlu0 %v5982_v16  ;;  %v7068_v26 = vunpack.c.h.b16 %v7036_v31  ;;  %v6279_v56 = vand.u32 2147483647, %v15291_v63  ;;  %v15352_v10 = vpop.f32.mrf.mxu0 }
 0xaed   :  { %v15317_v23 = vpop.eup %11318  ;;  %v6933_v44 = vunpack.c.l.b16 %v6481_v32  ;;  %v7077_v60 = vpack.c.b16 %v7067_v49, %v7065_v46  ;;  %v6281_v45 = vand.u32 2147483648, %v15291_v63  ;;  %v6266_v62 = vand.u32 2147483648, %v15293_v15 }
 0xaee   :  { %v6293_v19 = vsel %vm6292_vm11, %v11315_v6, %v6289_v51  ;;  %v6271_v43 = vmul.f32 %v15317_v23, %v15291_v63  ;;  %v15323_v39 = vpop.xlane.xlu1 %5962  ;;  %v15325_v48 = vpop.eup %11320  ;;  %v7078_v12 = vpack.c.b16 %v7068_v26, %v7066_v28  ;;  %vm6276_vm12 = vweird.f32 %v15317_v23 }
 0xaef   :  { %v6937_v17 = vpack.c.b16 %v6934_v58, %v6933_v44  ;;  %v6298_v57 = vsel %vm6295_vm0, %v6297_v1, %v6293_v19  ;;  %v6256_v6 = vmul.f32 %v15325_v48, %v15293_v15  ;;  %v15331_v50 = vpop.xlane.xlu0 %5956  ;;  %7100 = vmatpush.bf16.msrb.mxu0 %v7077_v60  ;;  %11322 = vrcp.f32 %v15323_v39  ;;  %v15339_v13 = vpop.xlane.xlu2 %5959 }
 0xaf0   :  { %v6299_v59 = vmul.f32 %v14955_v24, %v6298_v57  ;;  %v6272_v22 = vsub.f32 1.0, %v6271_v43  ;;  %vm6275_vm1 = vweird.f32 %v15291_v63  ;;  %v6264_v33 = vand.u32 2147483647, %v15293_v15  ;;  %7119 = vmatpush.bf16.msrb.mxu1 %v7078_v12 }
 0xaf1   :  { %10005 = vmatmul.msk.bf16.vlgmr.msrb.gmra.mxu2 %vm5696_vm5, %v6937_v17  ;;  %v6257_v54 = vsub.f32 1.0, %v6256_v6  ;;  %10007 = vmatmul.msk.bf16.vlgmr.msrb.gmra.mxu3 %vm5696_vm5, %v6937_v17  ;;  %11324 = vrcp.f32 %v15331_v50  ;;  %v6356_v42 = vand.u32 2147483648, %v15323_v39  ;;  %v7044_v31 = vunpack.c.l.b16 %v6486_v61  ;;  %vm15356_vm13 = vmor %vm6275_vm1, %vm6276_vm12 }
 0xaf2   :  { %v6485_v27 = vpack.c.bf16 %v6299_v59, %v6299_v59  ;;  %v6273_v24 = vmul.f32 %v15317_v23, %v6272_v22  ;;  %vm15360_vm4 = vcmp.eq.f32.partialorder %v6279_v56, 8.507059e+37  ;;  %vm6260_vm3 = vweird.f32 %v15293_v15 }
 0xaf3   :  { %v15345_v21 = vpop.f32.mrf.mxu2  ;;  %v15347_v34 = vpop.f32.mrf.mxu3  ;;  %v6258_v25 = vmul.f32 %v15325_v48, %v6257_v54  ;;  %11326 = vrcp.f32 %v15339_v13  ;;  %v6282_v58 = vor.u32 1.1754944e-38, %v6281_v45  ;;  %vm6261_vm9 = vweird.f32 %v15325_v48 }
 0xaf4   :  { %v7043_v47 = vunpack.c.l.b16 %v6485_v27  ;;  %v6274_v18 = vadd.f32 %v15317_v23, %v6273_v24  ;;  %v6267_v51 = vor.u32 1.1754944e-38, %v6266_v62  ;;  %vm6350_vm6 = vweird.f32 %v15323_v39  ;;  %vm15407_vm2 = vmor %vm6260_vm3, %vm6261_vm9 }
 0xaf5   :  { %v15372_v16 = vpop.eup %11322  ;;  %v6259_v44 = vadd.f32 %v15325_v48, %v6258_v25  ;;  %v6354_v1 = vand.u32 2147483647, %v15323_v39  ;;  %v6324_v46 = vand.u32 2147483647, %v15331_v50  ;;  %v7033_v49 = vsel %vm13380_vm7, %v13733_v29, 0 }
 0xaf6   :  { %v6278_v61 = vsel %vm15356_vm13, %v15317_v23, %v6274_v18  ;;  %v15381_v19 = vpack.c.b16 %v7044_v31, %v7043_v47  ;;  %vm15383_vm10 = vcmp.eq.f32.partialorder %v6264_v33, 8.507059e+37  ;;  %v6346_v43 = vmul.f32 %v15372_v16, %v15323_v39 }
 0xaf7   :  { %v15389_v28 = vor.u32 1.1754944e-38, %v6356_v42  ;;  %vm6320_vm15 = vweird.f32 %v15331_v50  ;;  %v6326_v17 = vand.u32 2147483648, %v15331_v50  ;;  %v15393_v57 = vpop.eup %11324  ;;  %v15397_v60 = vsel %vm15360_vm4, %v6282_v58, %v6278_v61  ;;  %v15424_v42 = vpop.xlane.xlu0 %5965 }
 0xaf8   :  { %v6339_v26 = vand.u32 2147483647, %v15339_v13  ;;  %v7034_v59 = vsel %vm13380_vm7, %v13735_v0, 0  ;;  %v7061_v22 = vunpack.c.l.b16 %v7033_v49  ;;  %v6347_v6 = vsub.f32 1.0, %v6346_v43 }
 0xaf9   :  { %v6316_v45 = vmul.f32 %v15393_v57, %v15331_v50  ;;  %vm6335_vm11 = vweird.f32 %v15339_v13  ;;  %v6341_v62 = vand.u32 2147483648, %v15339_v13  ;;  %v7063_v12 = vunpack.c.l.b16 %v7034_v59  ;;  %v11327_v27 = vpop.eup %11326 }
 0xafa   :  { %v6263_v24 = vsel %vm15407_vm2, %v15325_v48, %v6259_v44  ;;  %vm6351_vm0 = vweird.f32 %v15372_v16  ;;  %v7062_v15 = vunpack.c.h.b16 %v7033_v49  ;;  %v7064_v54 = vunpack.c.h.b16 %v7034_v59  ;;  %v15436_v59 = vpop.f32.mrf.mxu0 }
 0xafb   :  { %v15419_v33 = vpop.f32.mrf.mxu2  ;;  %v6348_v47 = vmul.f32 %v15372_v16, %v6347_v6  ;;  %v6317_v18 = vsub.f32 1.0, %v6316_v45  ;;  %vm6321_vm12 = vweird.f32 %v15393_v57  ;;  %v6331_v25 = vmul.f32 %v11327_v27, %v15339_v13  ;;  %v15426_v31 = vpop.f32.mrf.mxu3 }
 0xafc   :  { %v7075_v63 = vpack.c.b16 %v7063_v12, %v7061_v22  ;;  %v7076_v32 = vpack.c.b16 %v7064_v54, %v7062_v15  ;;  %v7031_v48 = vsel %vm13380_vm7, %v13747_v52, 0  ;;  %v7032_v61 = vsel %vm13380_vm7, %v13749_v5, 0  ;;  %v15439_v45 = vpop.f32.mrf.mxu1  ;;  %vm15445_vm7 = vmor %vm6350_vm6, %vm6351_vm0 }
 0xafd   :  { %v6349_v58 = vadd.f32 %v15372_v16, %v6348_v47  ;;  %v6318_v44 = vmul.f32 %v15393_v57, %v6317_v18  ;;  %v6332_v49 = vsub.f32 1.0, %v6331_v25  ;;  %v7057_v43 = vunpack.c.l.b16 %v7031_v48  ;;  %vm15459_vm13 = vmor %vm6320_vm15, %vm6321_vm12 }
 0xafe   :  { %7101 = vmatpush.bf16.msrb.mxu0 %v7075_v63  ;;  %7120 = vmatpush.bf16.msrb.mxu1 %v7076_v32  ;;  %v7059_v22 = vunpack.c.l.b16 %v7032_v61  ;;  %v7058_v56 = vunpack.c.h.b16 %v7031_v48  ;;  %v7060_v6 = vunpack.c.h.b16 %v7032_v61  ;;  %11328 = vrcp.f32 %v15424_v42 }
 0xaff   :  { %v6319_v12 = vadd.f32 %v15393_v57, %v6318_v44  ;;  %v6327_v15 = vor.u32 1.1754944e-38, %v6326_v17  ;;  %v6333_v54 = vmul.f32 %v11327_v27, %v6332_v49  ;;  %vm6336_vm1 = vweird.f32 %v11327_v27 }
 0xb00   :  { %v6268_v47 = vsel %vm15383_vm10, %v6267_v51, %v6263_v24  ;;  %v6353_v18 = vsel %vm15445_vm7, %v15372_v16, %v6349_v58  ;;  %v7073_v25 = vpack.c.b16 %v7059_v22, %v7057_v43  ;;  %v7074_v63 = vpack.c.b16 %v7060_v6, %v7058_v56  ;;  %vm15470_vm9 = vmor %vm6335_vm11, %vm6336_vm1 }
 0xb01   :  { %v6323_v17 = vsel %vm15459_vm13, %v15393_v57, %v6319_v12  ;;  %v6334_v23 = vadd.f32 %v11327_v27, %v6333_v54  ;;  %v6369_v51 = vand.u32 2147483647, %v15424_v42  ;;  %v6371_v24 = vand.u32 2147483648, %v15424_v42 }
 0xb02   :  { %vm6355_vm4 = vcmp.eq.f32.partialorder %v6354_v1, 8.507059e+37  ;;  %vm6325_vm3 = vcmp.eq.f32.partialorder %v6324_v46, 8.507059e+37  ;;  %vm6340_vm6 = vcmp.eq.f32.partialorder %v6339_v26, 8.507059e+37  ;;  %v6342_v16 = vor.u32 1.1754944e-38, %v6341_v62  ;;  %7102 = vmatpush.bf16.msrb.mxu0 %v7073_v25  ;;  %7121 = vmatpush.bf16.msrb.mxu1 %v7074_v63  ;;  %v6677_v49 = vpop.f32.mrf.mxu0 }
 0xb03   :  { %v6358_v32 = vsel %vm6355_vm4, %v15389_v28, %v6353_v18  ;;  %v6328_v57 = vsel %vm6325_vm3, %v6327_v15, %v6323_v17  ;;  %v6338_v48 = vsel %vm15470_vm9, %v11327_v27, %v6334_v23  ;;  %vm6365_vm10 = vweird.f32 %v15424_v42  ;;  %v6583_v58 = vpop.f32.mrf.mxu2 }
 0xb04   :  { %v6269_v1 = vmul.f32 %v14964_v53, %v6268_v47  ;;  %v11329_v46 = vpop.eup %11328  ;;  %v6372_v13 = vor.u32 1.1754944e-38, %v6371_v24  ;;  %v6284_v61 = vmul.f32 %v14976_v8, %v15397_v60  ;;  %v7147_v62 = vsel %vm13415_vm14, %v13699_v3, 0  ;;  %v6602_v60 = vpop.f32.mrf.mxu3 }
 0xb05   :  { %v7148_v28 = vsel %vm13415_vm14, %v13701_v37, 0  ;;  %v6343_v44 = vsel %vm6340_vm6, %v6342_v16, %v6338_v48  ;;  %v6361_v27 = vmul.f32 %v11329_v46, %v15424_v42  ;;  %vm6366_vm15 = vweird.f32 %v11329_v46  ;;  %10009 = vmatmul.msk.bf16.vlgmr.msrb.gmra.mxu0 %vm5696_vm5, %v15381_v19  ;;  %10011 = vmatmul.msk.bf16.vlgmr.msrb.gmra.mxu1 %vm5696_vm5, %v15381_v19  ;;  %v6696_v7 = vpop.f32.mrf.mxu1 }
 0xb06   :  { %vm15488_vm2 = vcmp.eq.f32.partialorder %v6369_v51, 8.507059e+37  ;;  %v6483_v8 = vpack.c.bf16 %v6269_v1, %v6269_v1  ;;  %v6484_v43 = vpack.c.bf16 %v6284_v61, %v6284_v61  ;;  %v7179_v22 = vunpack.c.l.b16 %v7147_v62  ;;  %vm6367_vm11 = vmor %vm6365_vm10, %vm6366_vm15 }
 0xb07   :  { %v7181_v56 = vunpack.c.l.b16 %v7148_v28  ;;  %v7180_v6 = vunpack.c.h.b16 %v7147_v62  ;;  %v6362_v12 = vsub.f32 1.0, %v6361_v27  ;;  %v7182_v54 = vunpack.c.h.b16 %v7148_v28 }
 0xb08   :  { %v6935_v15 = vunpack.c.l.b16 %v6483_v8  ;;  %v15496_v47 = vadd.f32 %v6677_v49, %v6583_v58  ;;  %v6936_v18 = vunpack.c.l.b16 %v6484_v43  ;;  %v15498_v25 = vadd.f32 %v6696_v7, %v6602_v60 }
 0xb09   :  { %v7189_v39 = vpack.c.b16 %v7181_v56, %v7179_v22  ;;  %v7145_v19 = vsel %vm13415_vm14, %v13713_v40, 0  ;;  %v6363_v63 = vmul.f32 %v11329_v46, %v6362_v12  ;;  %v7190_v17 = vpack.c.b16 %v7182_v54, %v7180_v6 }
 0xb0a   :  { %v7146_v23 = vsel %vm13415_vm14, %v13715_v2, 0  ;;  %v7175_v51 = vunpack.c.l.b16 %v7145_v19  ;;  %v6938_v24 = vpack.c.b16 %v6936_v18, %v6935_v15  ;;  %v7176_v16 = vunpack.c.h.b16 %v7145_v19 }
 0xb0b   :  { %7209 = vmatpush.bf16.msra.mxu2 %v7189_v39  ;;  %v7177_v50 = vunpack.c.l.b16 %v7146_v23  ;;  %v7178_v48 = vunpack.c.h.b16 %v7146_v23  ;;  %v6364_v1 = vadd.f32 %v11329_v46, %v6363_v63  ;;  %7228 = vmatpush.bf16.msra.mxu3 %v7190_v17  ;;  %v6329_v61 = vmul.f32 %v14995_v11, %v6328_v57 }
 0xb0c   :  { %v6344_v62 = vmul.f32 %v14990_v14, %v6343_v44  ;;  %v7143_v28 = vsel %vm13415_vm14, %v13733_v29, 0  ;;  %10006 = vmatmul.msk.bf16.gmra.mxu2 %vm5696_vm5, %v6938_v24  ;;  %10008 = vmatmul.msk.bf16.gmra.mxu3 %vm5696_vm5, %v6938_v24  ;;  %v7144_v11 = vsel %vm13415_vm14, %v13735_v0, 0  ;;  %v6359_v49 = vmul.f32 %v14992_v30, %v6358_v32  ;;  %v15535_v24 = vpop.f32.mrf.mxu3 }
 0xb0d   :  { %v7187_v58 = vpack.c.b16 %v7177_v50, %v7175_v51  ;;  %v7188_v27 = vpack.c.b16 %v7178_v48, %v7176_v16  ;;  %v7171_v57 = vunpack.c.l.b16 %v7143_v28  ;;  %v6368_v14 = vsel %vm6367_vm11, %v11329_v46, %v6364_v1  ;;  %v15533_v51 = vpop.f32.mrf.mxu2 }
 0xb0e   :  { %v6487_v44 = vpack.c.bf16 %v6329_v61, %v6329_v61  ;;  %v6488_v8 = vpack.c.bf16 %v6344_v62, %v6344_v62  ;;  %v7173_v60 = vunpack.c.l.b16 %v7144_v11  ;;  %v6373_v42 = vsel %vm15488_vm2, %v6372_v13, %v6368_v14 }
 0xb0f   :  { %7210 = vmatpush.bf16.msra.mxu2 %v7187_v58  ;;  %v7172_v43 = vunpack.c.h.b16 %v7143_v28  ;;  %v7174_v22 = vunpack.c.h.b16 %v7144_v11  ;;  %v6374_v56 = vmul.f32 %v15005_v9, %v6373_v42  ;;  %7229 = vmatpush.bf16.msra.mxu3 %v7188_v27  ;;  %v7141_v46 = vsel %vm13415_vm14, %v13747_v52, 0 }
 0xb10   :  { %v7045_v6 = vunpack.c.l.b16 %v6487_v44  ;;  %v7046_v7 = vunpack.c.l.b16 %v6488_v8  ;;  %v7185_v12 = vpack.c.b16 %v7173_v60, %v7171_v57  ;;  %v7142_v30 = vsel %vm13415_vm14, %v13749_v5, 0 }
 0xb11   :  { %v7186_v15 = vpack.c.b16 %v7174_v22, %v7172_v43  ;;  %v6490_v32 = vpack.c.bf16 %v6374_v56, %v6374_v56  ;;  %v7167_v53 = vunpack.c.l.b16 %v7141_v46  ;;  %v7169_v54 = vunpack.c.l.b16 %v7142_v30 }
 0xb12   :  { %v7048_v13 = vpack.c.b16 %v7046_v7, %v7045_v6  ;;  %v6489_v18 = vpack.c.bf16 %v6359_v49, %v6359_v49  ;;  %v7168_v9 = vunpack.c.h.b16 %v7141_v46  ;;  %v7170_v39 = vunpack.c.h.b16 %v7142_v30 }
 0xb13   :  { %7211 = vmatpush.bf16.msra.mxu2 %v7185_v12  ;;  %7230 = vmatpush.bf16.msra.mxu3 %v7186_v15  ;;  %v7183_v19 = vpack.c.b16 %v7169_v54, %v7167_v53  ;;  %v7154_v63 = vunpack.c.l.b16 %v6490_v32  ;;  %v6673_v50 = vadd.f32 %v15352_v10, %v15345_v21  ;;  %v6692_v16 = vadd.f32 %v15366_v41, %v15347_v34 }
 0xb14   :  { %v7184_v17 = vpack.c.b16 %v7170_v39, %v7168_v9  ;;  %v7153_v23 = vunpack.c.l.b16 %v6489_v18  ;;  %v7257_v41 = vsel %vm13435_vm8, %v13699_v3, 0  ;;  %v7258_v57 = vsel %vm13435_vm8, %v13701_v37, 0 }
 0xb15   :  { %10010 = vmatmul.msk.bf16.gmra.mxu0 %vm5696_vm5, %v7048_v13  ;;  %10012 = vmatmul.msk.bf16.gmra.mxu1 %vm5696_vm5, %v7048_v13  ;;  %v7289_v14 = vunpack.c.l.b16 %v7257_v41  ;;  %v7291_v44 = vunpack.c.l.b16 %v7258_v57  ;;  %v7290_v8 = vunpack.c.h.b16 %v7257_v41  ;;  %v7292_v60 = vunpack.c.h.b16 %v7258_v57  ;;  %v15599_v57 = vpop.f32.mrf.mxu0 }
 0xb16   :  { %v7157_v26 = vpack.c.b16 %v7154_v63, %v7153_v23  ;;  %v7255_v6 = vsel %vm13435_vm8, %v13713_v40, 0  ;;  %v7256_v3 = vsel %vm13435_vm8, %v13715_v2, 0  ;;  %v7253_v37 = vsel %vm13435_vm8, %v13733_v29, 0 }
 0xb17   :  { %7212 = vmatpush.bf16.msra.mxu2 %v7183_v19  ;;  %7231 = vmatpush.bf16.msra.mxu3 %v7184_v17  ;;  %v7299_v42 = vpack.c.b16 %v7291_v44, %v7289_v14  ;;  %v7300_v43 = vpack.c.b16 %v7292_v60, %v7290_v8  ;;  %v7254_v7 = vsel %vm13435_vm8, %v13735_v0, 0  ;;  %v7285_v40 = vunpack.c.l.b16 %v7255_v6  ;;  %v15601_v14 = vpop.f32.mrf.mxu1 }
 0xb18   :  { %v7287_v46 = vunpack.c.l.b16 %v7256_v3  ;;  %v7286_v30 = vunpack.c.h.b16 %v7255_v6  ;;  %v7288_v2 = vunpack.c.h.b16 %v7256_v3  ;;  %v7281_v32 = vunpack.c.l.b16 %v7253_v37 }
 0xb19   :  { %7319 = vmatpush.bf16.msra.mxu0 %v7299_v42  ;;  %7338 = vmatpush.bf16.msra.mxu1 %v7300_v43  ;;  %v7283_v13 = vunpack.c.l.b16 %v7254_v7  ;;  %v7282_v29 = vunpack.c.h.b16 %v7253_v37  ;;  %v7284_v54 = vunpack.c.h.b16 %v7254_v7  ;;  %v7251_v0 = vsel %vm13435_vm8, %v13747_v52, 0 }
 0xb1a   :  { %v7297_v53 = vpack.c.b16 %v7287_v46, %v7285_v40  ;;  %v7298_v18 = vpack.c.b16 %v7288_v2, %v7286_v30  ;;  %v7277_v39 = vunpack.c.l.b16 %v7251_v0 }
 0xb1b   :  { %v7295_v9 = vpack.c.b16 %v7283_v13, %v7281_v32  ;;  %v7296_v23 = vpack.c.b16 %v7284_v54, %v7282_v29 }
 0xb1c   :  { %10013 = vmatmul.msk.bf16.vlgmr.msra.gmra.mxu2 %vm5696_vm5, %v7157_v26  ;;  %10015 = vmatmul.msk.bf16.vlgmr.msra.gmra.mxu3 %vm5696_vm5, %v7157_v26  ;;  %v7278_v26 = vunpack.c.h.b16 %v7251_v0 }
 0xb1d   :  { %7320 = vmatpush.bf16.msra.mxu0 %v7297_v53  ;;  %7339 = vmatpush.bf16.msra.mxu1 %v7298_v18 }
 0xb21   :  { %7321 = vmatpush.bf16.msra.mxu0 %v7295_v9  ;;  %7340 = vmatpush.bf16.msra.mxu1 %v7296_v23 }
 0xb22   :  { %v15541_v48 = vpop.xlane.xlu2 %5974 }
 0xb23   :  { %11330 = vrcp.f32 %v15541_v48  ;;  %v6414_v10 = vand.u32 2147483647, %v15541_v48 }
 0xb25   :  { %vm6415_vm12 = vcmp.eq.f32.partialorder %v6414_v10, 8.507059e+37 }
 0xb29   :  { %v15548_v58 = vpop.eup %11330 }
 0xb2a   :  { %v6406_v21 = vmul.f32 %v15548_v58, %v15541_v48  ;;  %v15556_v34 = vpop.xlane.xlu2 %5971  ;;  %vm6411_vm14 = vweird.f32 %v15548_v58 }
 0xb2b   :  { %11332 = vrcp.f32 %v15556_v34  ;;  %v6401_v7 = vand.u32 2147483648, %v15556_v34  ;;  %vm6395_vm4 = vweird.f32 %v15556_v34  ;;  %v6399_v30 = vand.u32 2147483647, %v15556_v34 }
 0xb2c   :  { %v6407_v49 = vsub.f32 1.0, %v6406_v21 }
 0xb2d   :  { %vm6400_vm10 = vcmp.eq.f32.partialorder %v6399_v30, 8.507059e+37 }
 0xb2e   :  { %v6408_v63 = vmul.f32 %v15548_v58, %v6407_v49 }
 0xb2f   :  { %v6774_v1 = vpop.f32.mrf.mxu2  ;;  %v6793_v61 = vpop.f32.mrf.mxu3 }
 0xb30   :  { %v15543_v62 = vadd.f32 %v6774_v1, %v6673_v50  ;;  %v15545_v28 = vadd.f32 %v6793_v61, %v6692_v16  ;;  %v6409_v1 = vadd.f32 %v15548_v58, %v6408_v63  ;;  %v6416_v61 = vand.u32 2147483648, %v15541_v48 }
 0xb32   :  { %v6417_v42 = vor.u32 1.1754944e-38, %v6416_v61 }
 0xb37   :  { %v15550_v27 = vpop.f32.mrf.mxu2  ;;  %v15552_v11 = vpop.f32.mrf.mxu3 }
 0xb3f   :  { %v6779_v22 = vpop.f32.mrf.mxu2  ;;  %v6798_v56 = vpop.f32.mrf.mxu3 }
 0xb40   :  { %v15578_v12 = vadd.f32 %v6779_v22, %v15496_v47  ;;  %v15581_v15 = vadd.f32 %v6798_v56, %v15498_v25  ;;  %v15586_v47 = vpop.eup %11332  ;;  %v7252_v25 = vsel %vm13435_vm8, %v13749_v5, 0  ;;  %vm6410_vm8 = vweird.f32 %v15541_v48 }
 0xb41   :  { %v7279_v19 = vunpack.c.l.b16 %v7252_v25  ;;  %v7280_v50 = vunpack.c.h.b16 %v7252_v25  ;;  %v6391_v52 = vmul.f32 %v15586_v47, %v15556_v34  ;;  %vm6412_vm0 = vmor %vm6410_vm8, %vm6411_vm14  ;;  %vm6396_vm1 = vweird.f32 %v15586_v47 }
 0xb42   :  { %v6413_v44 = vsel %vm6412_vm0, %v15548_v58, %v6409_v1  ;;  %vm6397_vm9 = vmor %vm6395_vm4, %vm6396_vm1  ;;  %v6402_v34 = vor.u32 1.1754944e-38, %v6401_v7 }
 0xb43   :  { %v7293_v16 = vpack.c.b16 %v7279_v19, %v7277_v39  ;;  %v7294_v5 = vpack.c.b16 %v7280_v50, %v7278_v26  ;;  %v6392_v21 = vsub.f32 1.0, %v6391_v52  ;;  %v6418_v22 = vsel %vm6415_vm12, %v6417_v42, %v6413_v44 }
 0xb44   :  { %v6419_v37 = vmul.f32 %v15085_v4, %v6418_v22 }
 0xb45   :  { %7322 = vmatpush.bf16.msra.mxu0 %v7293_v16  ;;  %7341 = vmatpush.bf16.msra.mxu1 %v7294_v5  ;;  %v6393_v43 = vmul.f32 %v15586_v47, %v6392_v21 }
 0xb46   :  { %v5978_v17 = vpop.xlane.xlu1 %5977  ;;  %v6493_v9 = vpack.c.bf16 %v6419_v37, %v6419_v37 }
 0xb47   :  { %11334 = vrcp.f32 %v5978_v17  ;;  %v6431_v56 = vand.u32 2147483648, %v5978_v17  ;;  %v6429_v3 = vand.u32 2147483647, %v5978_v17  ;;  %v6394_v58 = vadd.f32 %v15586_v47, %v6393_v43 }
 0xb48   :  { %vm6425_vm13 = vweird.f32 %v5978_v17  ;;  %v7263_v50 = vunpack.c.l.b16 %v6493_v9 }
 0xb49   :  { %v6432_v2 = vor.u32 1.1754944e-38, %v6431_v56  ;;  %vm6430_vm6 = vcmp.eq.f32.partialorder %v6429_v3, 8.507059e+37  ;;  %v6398_v54 = vsel %vm6397_vm9, %v15586_v47, %v6394_v58 }
 0xb4d   :  { %v11335_v41 = vpop.eup %11334 }
 0xb4e   :  { %v6421_v8 = vmul.f32 %v11335_v41, %v5978_v17  ;;  %v15604_v60 = vpop.xlane.xlu1 %5980  ;;  %v5969_v49 = vpop.xlane.xlu0 %5968  ;;  %vm6426_vm7 = vweird.f32 %v11335_v41  ;;  %v6403_v17 = vsel %vm6400_vm10, %v6402_v34, %v6398_v54 }
 0xb4f   :  { %11336 = vrcp.f32 %v15604_v60  ;;  %vm6427_vm3 = vmor %vm6425_vm13, %vm6426_vm7  ;;  %v6384_v47 = vand.u32 2147483647, %v5969_v49  ;;  %vm6380_vm2 = vweird.f32 %v5969_v49  ;;  %v6404_v1 = vmul.f32 %v15094_v20, %v6403_v17 }
 0xb50   :  { %v6422_v48 = vsub.f32 1.0, %v6421_v8  ;;  %11338 = vrcp.f32 %v5969_v49  ;;  %v6446_v56 = vand.u32 2147483648, %v15604_v60  ;;  %vm6440_vm0 = vweird.f32 %v15604_v60 }
 0xb51   :  { %vm6385_vm14 = vcmp.eq.f32.partialorder %v6384_v47, 8.507059e+37  ;;  %v6492_v20 = vpack.c.bf16 %v6404_v1, %v6404_v1  ;;  %v10900_v47 = vld [vmem:[#allocation20 + $0xf4] sm:$0xf0]  ;;  %v10899_v1 = vld [vmem:[#allocation20 + $0xf4] sm:$0xf] }
 0xb52   :  { %v6423_v6 = vmul.f32 %v11335_v41, %v6422_v48  ;;  %v6447_v7 = vor.u32 1.1754944e-38, %v6446_v56  ;;  %v10063_v56 = vld [vmem:[#allocation20 + $0x50] sm:$0xf] }
 0xb53   :  { %v7156_v22 = vunpack.c.l.b16 %v6492_v20  ;;  %v10881_v20 = vld [vmem:[#allocation20 + $0x64] sm:$0xf] }
 0xb54   :  { %v6424_v40 = vadd.f32 %v11335_v41, %v6423_v6  ;;  %v6444_v6 = vand.u32 2147483647, %v15604_v60 }
 0xb55   :  { %v15612_v46 = vpop.eup %11336  ;;  %v6884_v32 = vpop.f32.mrf.mxu0 }
 0xb56   :  { %v6903_v13 = vpop.f32.mrf.mxu1  ;;  %v11339_v53 = vpop.eup %11338  ;;  %v6428_v29 = vsel %vm6427_vm3, %v11335_v41, %v6424_v40  ;;  %v15617_v4 = vadd.f32 %v6884_v32, %v15543_v62  ;;  %v6436_v19 = vmul.f32 %v15612_v46, %v15604_v60  ;;  %v6386_v62 = vand.u32 2147483648, %v5969_v49 }
 0xb57   :  { %v6433_v0 = vsel %vm6430_vm6, %v6432_v2, %v6428_v29  ;;  %v6376_v18 = vmul.f32 %v11339_v53, %v5969_v49  ;;  %v15621_v25 = vadd.f32 %v6903_v13, %v15545_v28  ;;  %vm6381_vm15 = vweird.f32 %v11339_v53 }
 0xb58   :  { %v6434_v39 = vmul.f32 %v15194_v55, %v6433_v0  ;;  %v6437_v16 = vsub.f32 1.0, %v6436_v19  ;;  %vm6382_vm11 = vmor %vm6380_vm2, %vm6381_vm15  ;;  %v6387_v55 = vor.u32 1.1754944e-38, %v6386_v62  ;;  %vm6441_vm8 = vweird.f32 %v15612_v46  ;;  %v10884_v62 = vld [vmem:[#allocation20 + $0x74] sm:$0xf0] }
 0xb59   :  { %v6377_v63 = vsub.f32 1.0, %v6376_v18  ;;  %vm6442_vm12 = vmor %vm6440_vm0, %vm6441_vm8  ;;  %vm6445_vm7 = vcmp.eq.f32.partialorder %v6444_v6, 8.507059e+37  ;;  %v10880_v6 = vld [vmem:[#allocation20 + $0x54] sm:$0xf0] }
 0xb5a   :  { %v6494_v23 = vpack.c.bf16 %v6434_v39, %v6434_v39  ;;  %v6438_v44 = vmul.f32 %v15612_v46, %v6437_v16 }
 0xb5b   :  { %v6378_v26 = vmul.f32 %v11339_v53, %v6377_v63 }
 0xb5c   :  { %v7264_v52 = vunpack.c.l.b16 %v6494_v23  ;;  %v6439_v43 = vadd.f32 %v15612_v46, %v6438_v44  ;;  %v10079_v23 = vld [vmem:[#allocation20 + $0x70] sm:$0xf]  ;;  %v10898_v44 = vld [vmem:[#allocation20 + $0xe4] sm:$0xf0] }
 0xb5d   :  { %v6379_v28 = vadd.f32 %v11339_v53, %v6378_v26  ;;  %v15627_v10 = vpop.f32.mrf.mxu0  ;;  %v10143_v26 = vld [vmem:[#allocation20 + $0xf0] sm:$0xf] }
 0xb5e   :  { %v7267_v5 = vpack.c.b16 %v7264_v52, %v7263_v50  ;;  %v15629_v41 = vpop.f32.mrf.mxu1  ;;  %v10883_v50 = vld [vmem:[#allocation20 + $0x74] sm:$0xf]  ;;  %v10081_v52 = vld [vmem:[#allocation20 + $0x78] sm:$0xf0]  ;;  %v10144_v16 = vor.u32 %v10900_v47, %v10143_v26 }
 0xb5f   :  { %v6383_v61 = vsel %vm6382_vm11, %v11339_v53, %v6379_v28  ;;  %v5984_v8 = vpop.xlane.xlu0 %5983  ;;  %v10084_v28 = vor.u32 %v10883_v50, %v10081_v52  ;;  %v10875_v47 = vld [vmem:[#allocation20 + $0x34] sm:$0xf]  ;;  %v10049_v50 = vld [vmem:[#allocation20 + $0x38] sm:$0xf0] }
 0xb60   :  { %v6388_v21 = vsel %vm6385_vm14, %v6387_v55, %v6383_v61  ;;  %10017 = vmatmul.msk.bf16.vlgmr.msra.gmra.mxu0 %vm5696_vm5, %v7267_v5  ;;  %10019 = vmatmul.msk.bf16.vlgmr.msra.gmra.mxu1 %vm5696_vm5, %v7267_v5  ;;  %11340 = vrcp.f32 %v5984_v8  ;;  %v6461_v53 = vand.u32 2147483648, %v5984_v8  ;;  %vm6455_vm13 = vweird.f32 %v5984_v8  ;;  %v10071_v5 = vld [vmem:[#allocation20 + $0x60] sm:$0xf]  ;;  %v10882_v61 = vld [vmem:[#allocation20 + $0x64] sm:$0xf0] }
 0xb61   :  { %v6389_v49 = vmul.f32 %v15239_v35, %v6388_v21  ;;  %v6443_v35 = vsel %vm6442_vm12, %v15612_v46, %v6439_v43  ;;  %v6459_v46 = vand.u32 2147483647, %v5984_v8  ;;  %v10135_v21 = vld [vmem:[#allocation20 + $0xe0] sm:$0xf]  ;;  %7582 = vmatpush.bf16.msrb.mxu3 %v10144_v16  ;;  %7601 = vmatpush.bf16.msrb.mxu0 %v10084_v28  ;;  %v10897_v43 = vld [vmem:[#allocation20 + $0xe4] sm:$0xf] }
 0xb62   :  { %v6448_v13 = vsel %vm6445_vm7, %v6447_v7, %v6443_v35  ;;  %v6462_v18 = vor.u32 1.1754944e-38, %v6461_v53  ;;  %v10896_v35 = vld [vmem:[#allocation20 + $0xd4] sm:$0xf0]  ;;  %v10064_v7 = vor.u32 %v10880_v6, %v10063_v56  ;;  %v10891_v52 = vld [vmem:[#allocation20 + $0xb4] sm:$0xf] }
 0xb63   :  { %v6491_v42 = vpack.c.bf16 %v6389_v49, %v6389_v49  ;;  %v6449_v0 = vmul.f32 %v15184_v36, %v6448_v13  ;;  %vm6460_vm3 = vcmp.eq.f32.partialorder %v6459_v46, 8.507059e+37  ;;  %v10080_v36 = vor.u32 %v10884_v62, %v10079_v23  ;;  %v10878_v46 = vld [vmem:[#allocation20 + $0x44] sm:$0xf0]  ;;  %v10876_v23 = vld [vmem:[#allocation20 + $0x34] sm:$0xf0] }
 0xb64   :  { %v10136_v49 = vor.u32 %v10898_v44, %v10135_v21  ;;  %v10111_v62 = vld [vmem:[#allocation20 + $0xb0] sm:$0xf]  ;;  %v10113_v16 = vld [vmem:[#allocation20 + $0xb8] sm:$0xf0]  ;;  %v10874_v56 = vld [vmem:[#allocation20 + $0x24] sm:$0xf0] }
 0xb65   :  { %v7155_v48 = vunpack.c.l.b16 %v6491_v42  ;;  %v6495_v39 = vpack.c.bf16 %v6449_v0, %v6449_v0  ;;  %7563 = vmatpush.bf16.msrb.mxu2 %v10080_v36  ;;  %v10073_v42 = vld [vmem:[#allocation20 + $0x68] sm:$0xf0]  ;;  %v10892_v36 = vld [vmem:[#allocation20 + $0xb4] sm:$0xf0]  ;;  %v10103_v6 = vld [vmem:[#allocation20 + $0xa0] sm:$0xf] }
 0xb66   :  { %v11341_v58 = vpop.eup %11340  ;;  %7583 = vmatpush.bf16.msrb.mxu3 %v10136_v49 }
 0xb67   :  { %v7158_v3 = vpack.c.b16 %v7156_v22, %v7155_v48  ;;  %v6451_v37 = vmul.f32 %v11341_v58, %v5984_v8  ;;  %vm6456_vm1 = vweird.f32 %v11341_v58  ;;  %v10072_v8 = vor.u32 %v10882_v61, %v10071_v5  ;;  %v10137_v22 = vld [vmem:[#allocation20 + $0xe8] sm:$0xf0]  ;;  %v15655_v61 = vpop.f32.mrf.mxu3 }
 0xb68   :  { %v6889_v40 = vpop.f32.mrf.mxu0  ;;  %v6908_v30 = vpop.f32.mrf.mxu1  ;;  %vm6457_vm4 = vmor %vm6455_vm13, %vm6456_vm1  ;;  %v10076_v48 = vor.u32 %v10881_v20, %v10073_v42  ;;  %v10116_v5 = vor.u32 %v10891_v52, %v10113_v16  ;;  %v10886_v52 = vld [vmem:[#allocation20 + $0x84] sm:$0xf0]  ;;  %v10869_v16 = vld [vmem:[#allocation20 + $0x4] sm:$0xf] }
 0xb69   :  { %10014 = vmatmul.msk.bf16.gmra.mxu2 %vm5696_vm5, %v7158_v3  ;;  %10016 = vmatmul.msk.bf16.gmra.mxu3 %vm5696_vm5, %v7158_v3  ;;  %v6452_v2 = vsub.f32 1.0, %v6451_v37  ;;  %v15644_v32 = vadd.f32 %v6889_v40, %v15578_v12  ;;  %v15647_v60 = vadd.f32 %v6908_v30, %v15581_v15  ;;  %v7265_v15 = vunpack.c.l.b16 %v6495_v39  ;;  %v10879_v37 = vld [vmem:[#allocation20 + $0x54] sm:$0xf]  ;;  %v10065_v40 = vld [vmem:[#allocation20 + $0x58] sm:$0xf0] }
 0xb6a   :  { %v10140_v3 = vor.u32 %v10897_v43, %v10137_v22  ;;  %7564 = vmatpush.bf16.msrb.mxu2 %v10072_v8  ;;  %v10895_v30 = vld [vmem:[#allocation20 + $0xd4] sm:$0xf]  ;;  %7602 = vmatpush.bf16.msrb.mxu0 %v10076_v48  ;;  %v10068_v53 = vor.u32 %v10879_v37, %v10065_v40  ;;  %v10121_v39 = vld [vmem:[#allocation20 + $0xc8] sm:$0xf0]  ;;  %v10039_v22 = vld [vmem:[#allocation20 + $0x20] sm:$0xf] }
 0xb6b   :  { %v6453_v29 = vmul.f32 %v11341_v58, %v6452_v2  ;;  %v10129_v2 = vld [vmem:[#allocation20 + $0xd8] sm:$0xf0]  ;;  %v10041_v37 = vld [vmem:[#allocation20 + $0x28] sm:$0xf0] }
 0xb6c   :  { %v10132_v0 = vor.u32 %v10895_v30, %v10129_v2  ;;  %v10889_v30 = vld [vmem:[#allocation20 + $0xa4] sm:$0xf]  ;;  %v10105_v2 = vld [vmem:[#allocation20 + $0xa8] sm:$0xf0] }
 0xb6d   :  { %v6454_v54 = vadd.f32 %v11341_v58, %v6453_v29  ;;  %v10055_v29 = vld [vmem:[#allocation20 + $0x40] sm:$0xf] }
 0xb6e   :  { %7565 = vmatpush.bf16.msrb.mxu2 %v10064_v7  ;;  %7603 = vmatpush.bf16.msrb.mxu0 %v10068_v53 }
 0xb6f   :  { %v6458_v9 = vsel %vm6457_vm4, %v11341_v58, %v6454_v54  ;;  %v10127_v58 = vld [vmem:[#allocation20 + $0xd0] sm:$0xf]  ;;  %v10119_v54 = vld [vmem:[#allocation20 + $0xc0] sm:$0xf] }
 0xb70   :  { %v6463_v34 = vsel %vm6460_vm3, %v6462_v18, %v6458_v9  ;;  %v10128_v13 = vor.u32 %v10896_v35, %v10127_v58  ;;  %v10894_v18 = vld [vmem:[#allocation20 + $0xc4] sm:$0xf0]  ;;  %v10877_v9 = vld [vmem:[#allocation20 + $0x44] sm:$0xf]  ;;  %v15657_v21 = vpop.f32.mrf.mxu0  ;;  %v15659_v44 = vpop.f32.mrf.mxu1 }
 0xb71   :  { %v6464_v12 = vmul.f32 %v15309_v38, %v6463_v34  ;;  %v10145_v38 = vld [vmem:[#allocation20 + $0xf8] sm:$0xf0]  ;;  %v10057_v34 = vld [vmem:[#allocation20 + $0x48] sm:$0xf0]  ;;  %v10890_v58 = vld [vmem:[#allocation20 + $0xa4] sm:$0xf0] }
 0xb72   :  { %v10148_v55 = vor.u32 %v10899_v1, %v10145_v38  ;;  %7584 = vmatpush.bf16.msrb.mxu3 %v10128_v13  ;;  %v10112_v1 = vor.u32 %v10892_v36, %v10111_v62  ;;  %v10052_v38 = vor.u32 %v10875_v47, %v10049_v50  ;;  %v10873_v35 = vld [vmem:[#allocation20 + $0x24] sm:$0xf]  ;;  %v10104_v7 = vor.u32 %v10890_v58, %v10103_v6  ;;  %v10031_v13 = vld [vmem:[#allocation20 + $0x10] sm:$0xf]  ;;  %v10870_v36 = vld [vmem:[#allocation20 + $0x4] sm:$0xf0] }
 0xb73   :  { %v6496_v19 = vpack.c.bf16 %v6464_v12, %v6464_v12  ;;  %v10893_v12 = vld [vmem:[#allocation20 + $0xc4] sm:$0xf]  ;;  %v10044_v40 = vor.u32 %v10873_v35, %v10041_v37  ;;  %v10087_v47 = vld [vmem:[#allocation20 + $0x80] sm:$0xf] }
 0xb74   :  { %7620 = vmatpush.bf16.msrb.mxu1 %v10148_v55  ;;  %v10124_v26 = vor.u32 %v10893_v12, %v10121_v39  ;;  %v15653_v55 = vpop.f32.mrf.mxu2  ;;  %v15663_v49 = vpop.f32.mrf.mxu3  ;;  %v10871_v12 = vld [vmem:[#allocation20 + $0x14] sm:$0xf]  ;;  %v10033_v39 = vld [vmem:[#allocation20 + $0x18] sm:$0xf0] }
 0xb75   :  { %v7266_v63 = vunpack.c.l.b16 %v6496_v19  ;;  %v10056_v19 = vor.u32 %v10878_v46, %v10055_v29  ;;  %v10108_v46 = vor.u32 %v10889_v30, %v10105_v2  ;;  %v6675_v2 = vadd.f32 %v15436_v59, %v15419_v33 }
 0xb77   :  { %v7268_v17 = vpack.c.b16 %v7266_v63, %v7265_v15  ;;  %v10120_v15 = vor.u32 %v10894_v18, %v10119_v54  ;;  %v10060_v63 = vor.u32 %v10877_v9, %v10057_v34  ;;  %7566 = vmatpush.bf16.msrb.mxu2 %v10056_v19  ;;  %v10872_v54 = vld [vmem:[#allocation20 + $0x14] sm:$0xf0]  ;;  %v10887_v19 = vld [vmem:[#allocation20 + $0x94] sm:$0xf] }
 0xb78   :  { %7621 = vmatpush.bf16.msrb.mxu1 %v10140_v3  ;;  %v10040_v3 = vor.u32 %v10874_v56, %v10039_v22  ;;  %v10888_v18 = vld [vmem:[#allocation20 + $0x94] sm:$0xf0]  ;;  %v10032_v9 = vor.u32 %v10872_v54, %v10031_v13  ;;  %v10089_v22 = vld [vmem:[#allocation20 + $0x88] sm:$0xf0]  ;;  %v6694_v13 = vadd.f32 %v15439_v45, %v15426_v31 }
 0xb79   :  { %10018 = vmatmul.msk.bf16.gmra.mxu0 %vm5696_vm5, %v7268_v17  ;;  %10020 = vmatmul.msk.bf16.gmra.mxu1 %vm5696_vm5, %v7268_v17  ;;  %v10047_v17 = vld [vmem:[#allocation20 + $0x30] sm:$0xf] }
 0xb7a   :  { %v10048_v28 = vor.u32 %v10876_v23, %v10047_v17  ;;  %7585 = vmatpush.bf16.msrb.mxu3 %v10120_v15  ;;  %7604 = vmatpush.bf16.msrb.mxu0 %v10060_v63  ;;  %v10036_v17 = vor.u32 %v10871_v12, %v10033_v39  ;;  %v10097_v23 = vld [vmem:[#allocation20 + $0x98] sm:$0xf0]  ;;  %v6806_v54 = vadd.f32 %v15552_v11, %v6694_v13 }
 0xb7b   :  { %v10100_v62 = vor.u32 %v10887_v19, %v10097_v23  ;;  %v7024_v39 = vadd.f32 %v15663_v49, %v15621_v25 }
 0xb7c   :  { %7622 = vmatpush.bf16.msrb.mxu1 %v10132_v0  ;;  %7567 = vmatpush.bf16.msrb.mxu2 %v10048_v28  ;;  %v15661_v8 = vpop.f32.mrf.mxu2  ;;  %v15671_v48 = vpop.f32.mrf.mxu3  ;;  %v10095_v0 = vld [vmem:[#allocation20 + $0x90] sm:$0xf]  ;;  %v10025_v28 = vld [vmem:[#allocation20 + $0x8] sm:$0xf0] }
 0xb7d   :  { %v10096_v34 = vor.u32 %v10888_v18, %v10095_v0  ;;  %v6916_v18 = vadd.f32 %v15629_v41, %v6806_v54  ;;  %v7023_v12 = vadd.f32 %v15661_v8, %v15617_v4 }
 0xb7e   :  { %7586 = vmatpush.bf16.msrb.mxu3 %v10112_v1  ;;  %7605 = vmatpush.bf16.msrb.mxu0 %v10052_v38  ;;  %v10088_v1 = vor.u32 %v10886_v52, %v10087_v47  ;;  %v10028_v38 = vor.u32 %v10869_v16, %v10025_v28 }
 0xb7f   :  { %v7026_v31 = vadd.f32 %v15671_v48, %v6916_v18 }
 0xb80   :  { %7623 = vmatpush.bf16.msrb.mxu1 %v10124_v26  ;;  %7568 = vmatpush.bf16.msrb.mxu2 %v10040_v3  ;;  %v10023_v26 = vld [vmem:[#allocation20] sm:$0xf] }
 0xb81   :  { %v10024_v50 = vor.u32 %v10870_v36, %v10023_v26 }
 0xb82   :  { %v15665_v20 = vpop.f32.mrf.mxu0  ;;  %v15667_v42 = vpop.f32.mrf.mxu1  ;;  %7587 = vmatpush.bf16.msrb.mxu3 %v10104_v7  ;;  %7606 = vmatpush.bf16.msrb.mxu0 %v10044_v40 }
 0xb83   :  { %v7134_v11 = vadd.f32 %v15667_v42, %v7024_v39 }
 0xb84   :  { %7624 = vmatpush.bf16.msrb.mxu1 %v10116_v5  ;;  %v15669_v43 = vpop.f32.mrf.mxu2  ;;  %7569 = vmatpush.bf16.msrb.mxu2 %v10032_v9  ;;  %v10885_v5 = vld [vmem:[#allocation20 + $0x84] sm:$0xf] }
 0xb85   :  { %v10092_v3 = vor.u32 %v10885_v5, %v10089_v22 }
 0xb86   :  { %7588 = vmatpush.bf16.msrb.mxu3 %v10096_v34  ;;  %7607 = vmatpush.bf16.msrb.mxu0 %v10036_v17 }
 0xb88   :  { %7625 = vmatpush.bf16.msrb.mxu1 %v10108_v46  ;;  %7570 = vmatpush.bf16.msrb.mxu2 %v10024_v50  ;;  %v6805_v46 = vadd.f32 %v15550_v27, %v6675_v2  ;;  %v7133_v27 = vadd.f32 %v15665_v20, %v7023_v12 }
 0xb8a   :  { %v15673_v53 = vpop.f32.mrf.mxu0  ;;  %v15675_v29 = vpop.f32.mrf.mxu1  ;;  %7589 = vmatpush.bf16.msrb.mxu3 %v10088_v1  ;;  %7608 = vmatpush.bf16.msrb.mxu0 %v10028_v38  ;;  %v6915_v0 = vadd.f32 %v15627_v10, %v6805_v46 }
 0xb8b   :  { %v7136_v41 = vadd.f32 %v15675_v29, %v7026_v31  ;;  %v6699_v29 = vadd.f32 %v15601_v14, %v15535_v24 }
 0xb8c   :  { %7626 = vmatpush.bf16.msrb.mxu1 %v10100_v62  ;;  %v7025_v33 = vadd.f32 %v15669_v43, %v6915_v0 }
 0xb8d   :  { %v6810_v50 = vadd.f32 %v15655_v61, %v6699_v29 }
 0xb8e   :  { %v7135_v10 = vadd.f32 %v15673_v53, %v7025_v33  ;;  %v6680_v53 = vadd.f32 %v15599_v57, %v15533_v51  ;;  %v16449_v33 = vld [vmem:[#allocation78_spill] sm:$0xff] }
 0xb8f   :  { %v15677_v15 = vpop.f32.mrf.mxu2  ;;  %v15679_v63 = vpop.f32.mrf.mxu3  ;;  %v6920_v16 = vadd.f32 %v15659_v44, %v6810_v50 }
 0xb90   :  { %7627 = vmatpush.bf16.msrb.mxu1 %v10092_v3  ;;  %v6809_v47 = vadd.f32 %v15653_v55, %v6680_v53  ;;  %v7027_v38 = vadd.f32 %v15677_v15, %v15644_v32  ;;  %v7028_v5 = vadd.f32 %v15679_v63, %v15647_v60 }
 0xb92   :  { %v15681_v56 = vpop.f32.mrf.mxu0  ;;  %v15683_v6 = vpop.f32.mrf.mxu1  ;;  %v6919_v52 = vadd.f32 %v15657_v21, %v6809_v47 }
 0xb93   :  { %v7137_v14 = vadd.f32 %v15681_v56, %v7027_v38  ;;  %v7138_v55 = vadd.f32 %v15683_v6, %v7028_v5  ;;  %v7393_v56 = vld [vmem:[%s16027_s17] sm:$0x3] }
 0xb94   :  { %v7400_v6 = vperm.slane %v7393_v56, 1 }
 0xb97   :  { %v7001_v58 = vpop.f32.mrf.mxu2  ;;  %v7020_v35 = vpop.f32.mrf.mxu3 }
 0xb98   :  { %v7029_v51 = vadd.f32 %v7001_v58, %v6919_v52  ;;  %v7030_v57 = vadd.f32 %v7020_v35, %v6920_v16  ;;  %v16453_v52 = vld [vmem:[#allocation82_spill] sm:$0xff] }
 0xb9a   :  { %v7111_v37 = vpop.f32.mrf.mxu0  ;;  %v7130_v7 = vpop.f32.mrf.mxu1 }
 0xb9b   :  { %v7139_v61 = vadd.f32 %v7111_v37, %v7029_v51  ;;  %v7140_v21 = vadd.f32 %v7130_v7, %v7030_v57  ;;  %v7399_v7 = vperm.slane %v7393_v56, 0 }
 0xb9f   :  { %v7214_v40 = vpop.f32.mrf.mxu2  ;;  %v7233_v30 = vpop.f32.mrf.mxu3 }
 0xba0   :  { %v7243_v19 = vadd.f32 %v7214_v40, %v7133_v27  ;;  %v7244_v17 = vadd.f32 %v7233_v30, %v7134_v11 }
 0xba7   :  { %v7216_v59 = vpop.f32.mrf.mxu2  ;;  %v7235_v45 = vpop.f32.mrf.mxu3 }
 0xba8   :  { %v7245_v4 = vadd.f32 %v7216_v59, %v7135_v10  ;;  %v7246_v8 = vadd.f32 %v7235_v45, %v7136_v41  ;;  %v16450_v59 = vld [vmem:[#allocation77_spill] sm:$0xff] }
 0xbdd   :  { %v7324_v9 = vpop.f32.mrf.mxu0  ;;  %v7343_v34 = vpop.f32.mrf.mxu1 }
 0xbde   :  { %v7353_v49 = vadd.f32 %v7324_v9, %v7243_v19  ;;  %v7354_v43 = vadd.f32 %v7343_v34, %v7244_v17 }
 0xbe5   :  { %v7326_v23 = vpop.f32.mrf.mxu0  ;;  %v7345_v25 = vpop.f32.mrf.mxu1 }
 0xbe6   :  { %v7355_v62 = vadd.f32 %v7326_v23, %v7245_v4  ;;  %v7356_v48 = vadd.f32 %v7345_v25, %v7246_v8  ;;  %v16451_v23 = vld [vmem:[#allocation80_spill] sm:$0xff] }
 0xbe8   :  { %v7394_v26 = vpack.c.bf16 %v7355_v62, %v7353_v49  ;;  %v7395_v36 = vpack.c.bf16 %v7356_v48, %v7354_v43  ;;  %v16452_v49 = vld [vmem:[#allocation79_spill] sm:$0xff] }
 0xbea   :  { %7571 = vmatmul.bf16.vlgmr.msrb.gmra.mxu2 %v7394_v26  ;;  %7590 = vmatmul.bf16.vlgmr.msrb.gmra.mxu3 %v7395_v36 }
 0xbeb   :  { %7609 = vmatmul.bf16.vlgmr.msrb.gmra.mxu0 %v7394_v26  ;;  %7628 = vmatmul.bf16.vlgmr.msrb.gmra.mxu1 %v7395_v36 }
 0xbec   :  { %v7219_v20 = vpop.f32.mrf.mxu2  ;;  %v7238_v42 = vpop.f32.mrf.mxu3 }
 0xbed   :  { %v7247_v3 = vadd.f32 %v7219_v20, %v7137_v14  ;;  %v7248_v44 = vadd.f32 %v7238_v42, %v7138_v55 }
 0xbf4   :  { %v7221_v22 = vpop.f32.mrf.mxu2  ;;  %v7240_v24 = vpop.f32.mrf.mxu3 }
 0xbf5   :  { %v7249_v40 = vadd.f32 %v7221_v22, %v7139_v61  ;;  %v7250_v30 = vadd.f32 %v7240_v24, %v7140_v21  ;;  %v16455_v61 = vld [vmem:[#allocation84_spill] sm:$0xff] }
 0xbf6   :  { %v7329_v28 = vpop.f32.mrf.mxu0  ;;  %v7348_v1 = vpop.f32.mrf.mxu1 }
 0xbf7   :  { %v7357_v32 = vadd.f32 %v7329_v28, %v7247_v3  ;;  %v7358_v15 = vadd.f32 %v7348_v1, %v7248_v44  ;;  %v16454_v28 = vld [vmem:[#allocation81_spill] sm:$0xff]  ;;  %v16456_v3 = vld [vmem:[#allocation83_spill] sm:$0xff] }
 0xbfe   :  { %v7331_v2 = vpop.f32.mrf.mxu0  ;;  %v7350_v13 = vpop.f32.mrf.mxu1 }
 0xbff   :  { %v7359_v46 = vadd.f32 %v7331_v2, %v7249_v40  ;;  %v7360_v60 = vadd.f32 %v7350_v13, %v7250_v30  ;;  %v16457_v2 = vld [vmem:[#allocation76_spill] sm:$0xff] }
 0xc01   :  { %v7396_v63 = vpack.c.bf16 %v7359_v46, %v7357_v32  ;;  %v7397_v58 = vpack.c.bf16 %v7360_v60, %v7358_v15 }
 0xc03   :  { %7576 = vmatmul.bf16.gmra.mxu2 %v7396_v63  ;;  %7595 = vmatmul.bf16.gmra.mxu3 %v7397_v58 }
 0xc04   :  { %7614 = vmatmul.bf16.gmra.mxu0 %v7396_v63  ;;  %7633 = vmatmul.bf16.gmra.mxu1 %v7397_v58 }
 0xc68   :  { %v7610_v35 = vpop.f32.mrf.mxu0  ;;  %v7629_v54 = vpop.f32.mrf.mxu1 }
 0xc69   :  { %v7611_v37 = vadd.f32 %v7610_v35, %v7400_v6 }
 0xc6b   :  { %v7630_v9 = vadd.f32 %v7629_v54, %v7611_v37 }
 0xc6d   :  { %v7572_v0 = vpop.f32.mrf.mxu2  ;;  %v7591_v18 = vpop.f32.mrf.mxu3  ;;  %v7640_v31 = vadd.f32 %v7630_v9, %v16449_v33 }
 0xc6e   :  { %v7573_v34 = vadd.f32 %v7572_v0, %v7399_v7 }
 0xc70   :  { %v7592_v12 = vadd.f32 %v7591_v18, %v7573_v34  ;;  %v7612_v39 = vpop.f32.mrf.mxu0  ;;  %v7631_v10 = vpop.f32.mrf.mxu1 }
 0xc71   :  { %v7613_v27 = vadd.f32 %v7612_v39, %v7400_v6 }
 0xc72   :  { %v7639_v45 = vadd.f32 %v7592_v12, %v16450_v59 }
 0xc73   :  { %v7632_v19 = vadd.f32 %v7631_v10, %v7613_v27 }
 0xc74   :  { %v7649_v11 = vadd.f32 %v7640_v31, %v7639_v45 }
 0xc75   :  { %v7574_v41 = vpop.f32.mrf.mxu2  ;;  %v7593_v4 = vpop.f32.mrf.mxu3  ;;  %v7642_v25 = vadd.f32 %v7632_v19, %v16451_v23  ;;  %v10263_v19 = vld [vmem:[#allocation23 + $0xe0] sm:$0xf]  ;;  %v10963_v23 = vld [vmem:[#allocation23 + $0x1ec] sm:$0xf0] }
 0xc76   :  { %v7575_v17 = vadd.f32 %v7574_v41, %v7399_v7  ;;  %7650 = vadd.xlane.f32.xlu2 %v7649_v11 }
 0xc78   :  { %v7594_v8 = vadd.f32 %v7593_v4, %v7575_v17  ;;  %v10931_v17 = vld [vmem:[#allocation23 + $0xec] sm:$0xf0]  ;;  %v10391_v4 = vld [vmem:[#allocation23 + $0x1e0] sm:$0xf] }
 0xc7a   :  { %v7641_v43 = vadd.f32 %v7594_v8, %v16452_v49  ;;  %v10264_v8 = vor.u32 %v10931_v17, %v10263_v19  ;;  %v10265_v49 = vld [vmem:[#allocation23 + $0xf0] sm:$0xf0]  ;;  %v10947_v19 = vld [vmem:[#allocation23 + $0x16c] sm:$0xf0]  ;;  %v10913_v17 = vld [vmem:[#allocation23 + $0x64] sm:$0xf] }
 0xc7c   :  { %v7652_v62 = vadd.f32 %v7642_v25, %v7641_v43  ;;  %8173 = vmatpush.bf16.msra.mxu2 %v10264_v8 }
 0xc7e   :  { %7653 = vadd.xlane.f32.xlu1 %v7652_v62 }
 0xc81   :  { %v7615_v48 = vpop.f32.mrf.mxu0  ;;  %v7634_v36 = vpop.f32.mrf.mxu1 }
 0xc82   :  { %v7616_v26 = vadd.f32 %v7615_v48, %v7400_v6  ;;  %v10961_v48 = vld [vmem:[#allocation23 + $0x1e4] sm:$0xf] }
 0xc84   :  { %v7635_v53 = vadd.f32 %v7634_v36, %v7616_v26  ;;  %v10393_v26 = vld [vmem:[#allocation23 + $0x1f0] sm:$0xf0] }
 0xc85   :  { %v10396_v36 = vor.u32 %v10961_v48, %v10393_v26  ;;  %v10183_v26 = vld [vmem:[#allocation23 + $0x40] sm:$0xf] }
 0xc86   :  { %v7577_v20 = vpop.f32.mrf.mxu2  ;;  %v7596_v42 = vpop.f32.mrf.mxu3  ;;  %v7644_v16 = vadd.f32 %v7635_v53, %v16453_v52  ;;  %v10375_v53 = vld [vmem:[#allocation23 + $0x1c0] sm:$0xf]  ;;  %v10249_v52 = vld [vmem:[#allocation23 + $0xd0] sm:$0xf0] }
 0xc87   :  { %v7578_v29 = vadd.f32 %v7577_v20, %v7399_v7  ;;  %v10247_v20 = vld [vmem:[#allocation23 + $0xc0] sm:$0xf]  ;;  %8230 = vmatpush.bf16.msra.mxu1 %v10396_v36  ;;  %v10911_v36 = vld [vmem:[#allocation23 + $0x4c] sm:$0xf0] }
 0xc89   :  { %v7597_v47 = vadd.f32 %v7596_v42, %v7578_v29  ;;  %v7617_v50 = vpop.f32.mrf.mxu0  ;;  %v7636_v51 = vpop.f32.mrf.mxu1  ;;  %v10927_v42 = vld [vmem:[#allocation23 + $0xcc] sm:$0xf0] }
 0xc8a   :  { %v7618_v38 = vadd.f32 %v7617_v50, %v7400_v6  ;;  %v10248_v29 = vor.u32 %v10927_v42, %v10247_v20  ;;  %v10925_v50 = vld [vmem:[#allocation23 + $0xc4] sm:$0xf]  ;;  %v10311_v20 = vld [vmem:[#allocation23 + $0x140] sm:$0xf]  ;;  %v10184_v42 = vor.u32 %v10911_v36, %v10183_v26 }
 0xc8b   :  { %v7643_v1 = vadd.f32 %v7597_v47, %v16454_v28  ;;  %v10959_v47 = vld [vmem:[#allocation23 + $0x1cc] sm:$0xf0]  ;;  %v10252_v28 = vor.u32 %v10925_v50, %v10249_v52 }
 0xc8c   :  { %v7637_v22 = vadd.f32 %v7636_v51, %v7618_v38  ;;  %v10377_v38 = vld [vmem:[#allocation23 + $0x1d0] sm:$0xf0]  ;;  %8174 = vmatpush.bf16.msra.mxu2 %v10248_v29  ;;  %v10231_v51 = vld [vmem:[#allocation23 + $0xa0] sm:$0xf]  ;;  %v10909_v29 = vld [vmem:[#allocation23 + $0x44] sm:$0xf] }
 0xc8d   :  { %v7655_v5 = vadd.f32 %v7644_v16, %v7643_v1 }
 0xc8e   :  { %v7579_v57 = vpop.f32.mrf.mxu2  ;;  %v7598_v14 = vpop.f32.mrf.mxu3  ;;  %v7646_v21 = vadd.f32 %v7637_v22, %v16455_v61  ;;  %v10359_v22 = vld [vmem:[#allocation23 + $0x1a0] sm:$0xf]  ;;  %v10233_v61 = vld [vmem:[#allocation23 + $0xb0] sm:$0xf0] }
 0xc8f   :  { %v7580_v24 = vadd.f32 %v7579_v57, %v7399_v7  ;;  %7656 = vadd.xlane.f32.xlu0 %v7655_v5  ;;  %v10923_v57 = vld [vmem:[#allocation23 + $0xac] sm:$0xf0] }
 0xc91   :  { %v7599_v55 = vadd.f32 %v7598_v14, %v7580_v24  ;;  %v10232_v24 = vor.u32 %v10923_v57, %v10231_v51  ;;  %v10955_v14 = vld [vmem:[#allocation23 + $0x1ac] sm:$0xf0]  ;;  %v10167_v57 = vld [vmem:[#allocation23 + $0x20] sm:$0xf] }
 0xc93   :  { %v7645_v44 = vadd.f32 %v7599_v55, %v16456_v3  ;;  %v10921_v55 = vld [vmem:[#allocation23 + $0xa4] sm:$0xf]  ;;  %8175 = vmatpush.bf16.msra.mxu2 %v10232_v24 }
 0xc94   :  { %v10236_v3 = vor.u32 %v10921_v55, %v10233_v61  ;;  %v10295_v55 = vld [vmem:[#allocation23 + $0x120] sm:$0xf]  ;;  %v10939_v61 = vld [vmem:[#allocation23 + $0x12c] sm:$0xf0] }
 0xc95   :  { %v7658_v40 = vadd.f32 %v7646_v21, %v7645_v44 }
 0xc97   :  { %7659 = vadd.xlane.f32.xlu2 %v7658_v40  ;;  %v10361_v40 = vld [vmem:[#allocation23 + $0x1b0] sm:$0xf0] }
 0xce9   :  { %v7651_v30 = vpop.xlane.xlu2 %7650 }
 0xcea   :  { %v7661_v13 = vmul.f32 %v7651_v30, %v16457_v2 }
 0xcec   :  { %v15729_v32 = vsub.f32 %v7639_v45, %v7661_v13  ;;  %v15731_v15 = vsub.f32 %v7640_v31, %v7661_v13 }
 0xcee   :  { %v7673_v46 = vmul.f32 %v15729_v32, %v15729_v32  ;;  %v7674_v60 = vmul.f32 %v15731_v15, %v15731_v15 }
 0xcf0   :  { %v7681_v63 = vadd.f32 %v7674_v60, %v7673_v46  ;;  %v10215_v60 = vld [vmem:[#allocation23 + $0x80] sm:$0xf] }
 0xcf1   :  { %v7654_v58 = vpop.xlane.xlu1 %7653 }
 0xcf2   :  { %v7662_v56 = vmul.f32 %v7654_v58, %v16457_v2  ;;  %7682 = vadd.xlane.f32.xlu1 %v7681_v63  ;;  %v10919_v63 = vld [vmem:[#allocation23 + $0x8c] sm:$0xf0]  ;;  %v10343_v58 = vld [vmem:[#allocation23 + $0x180] sm:$0xf] }
 0xcf4   :  { %v15738_v6 = vsub.f32 %v7641_v43, %v7662_v56  ;;  %v15740_v35 = vsub.f32 %v7642_v25, %v7662_v56  ;;  %v10929_v25 = vld [vmem:[#allocation23 + $0xe4] sm:$0xf]  ;;  %v10392_v43 = vor.u32 %v10963_v23, %v10391_v4  ;;  %v10216_v56 = vor.u32 %v10919_v63, %v10215_v60  ;;  %v10201_v4 = vld [vmem:[#allocation23 + $0x70] sm:$0xf0]  ;;  %v10151_v63 = vld [vmem:[#allocation23] sm:$0xf] }
 0xcf5   :  { %v10268_v62 = vor.u32 %v10929_v25, %v10265_v49  ;;  %v10204_v23 = vor.u32 %v10913_v17, %v10201_v4  ;;  %v10945_v25 = vld [vmem:[#allocation23 + $0x164] sm:$0xf]  ;;  %v10329_v49 = vld [vmem:[#allocation23 + $0x170] sm:$0xf0]  ;;  %v7648_v4 = vld [vmem:[%s16029_s19] sm:$0x3] }
 0xcf6   :  { %v7675_v37 = vmul.f32 %v15738_v6, %v15738_v6  ;;  %v7676_v7 = vmul.f32 %v15740_v35, %v15740_v35  ;;  %8192 = vmatpush.bf16.msra.mxu3 %v10392_v43  ;;  %8176 = vmatpush.bf16.msra.mxu2 %v10216_v56  ;;  %v10332_v43 = vor.u32 %v10945_v25, %v10329_v49  ;;  %v10279_v56 = vld [vmem:[#allocation23 + $0x100] sm:$0xf] }
 0xcf7   :  { %8211 = vmatpush.bf16.msra.mxu0 %v10268_v62 }
 0xcf8   :  { %v7684_v54 = vadd.f32 %v7676_v7, %v7675_v37  ;;  %v10951_v37 = vld [vmem:[#allocation23 + $0x18c] sm:$0xf0]  ;;  %v10917_v7 = vld [vmem:[#allocation23 + $0x84] sm:$0xf] }
 0xcfa   :  { %7685 = vadd.xlane.f32.xlu0 %v7684_v54  ;;  %v10217_v54 = vld [vmem:[#allocation23 + $0x90] sm:$0xf0] }
 0xcfb   :  { %8212 = vmatpush.bf16.msra.mxu0 %v10252_v28 }
 0xcff   :  { %8213 = vmatpush.bf16.msra.mxu0 %v10236_v3  ;;  %v10296_v3 = vor.u32 %v10939_v61, %v10295_v55  ;;  %v10383_v55 = vld [vmem:[#allocation23 + $0x1c8] sm:$0xf] }
 0xd02   :  { %v7657_v0 = vpop.xlane.xlu0 %7656 }
 0xd03   :  { %v7663_v18 = vmul.f32 %v7657_v0, %v16457_v2 }
 0xd05   :  { %v15747_v9 = vsub.f32 %v7643_v1, %v7663_v18  ;;  %v15749_v34 = vsub.f32 %v7644_v16, %v7663_v18  ;;  %v10376_v16 = vor.u32 %v10959_v47, %v10375_v53  ;;  %v10957_v1 = vld [vmem:[#allocation23 + $0x1c4] sm:$0xf]  ;;  %v10344_v18 = vor.u32 %v10951_v37, %v10343_v58  ;;  %v10943_v53 = vld [vmem:[#allocation23 + $0x14c] sm:$0xf0]  ;;  %v10185_v47 = vld [vmem:[#allocation23 + $0x50] sm:$0xf0] }
 0xd06   :  { %v10380_v5 = vor.u32 %v10957_v1, %v10377_v38  ;;  %v10188_v28 = vor.u32 %v10909_v29, %v10185_v47  ;;  %v10941_v1 = vld [vmem:[#allocation23 + $0x144] sm:$0xf]  ;;  %v10313_v38 = vld [vmem:[#allocation23 + $0x150] sm:$0xf0]  ;;  %v10903_v58 = vld [vmem:[#allocation23 + $0xc] sm:$0xf0] }
 0xd07   :  { %v7677_v12 = vmul.f32 %v15747_v9, %v15747_v9  ;;  %v7678_v39 = vmul.f32 %v15749_v34, %v15749_v34  ;;  %8193 = vmatpush.bf16.msra.mxu3 %v10376_v16  ;;  %v10312_v16 = vor.u32 %v10943_v53, %v10311_v20  ;;  %v10316_v51 = vor.u32 %v10941_v1, %v10313_v38  ;;  %v10932_v53 = vld [vmem:[#allocation23 + $0xf4] sm:$0xf0]  ;;  %v10273_v38 = vld [vmem:[#allocation23 + $0xf8] sm:$0xf0] }
 0xd08   :  { %8231 = vmatpush.bf16.msra.mxu1 %v10380_v5 }
 0xd09   :  { %v7687_v33 = vadd.f32 %v7678_v39, %v7677_v12  ;;  %v10220_v12 = vor.u32 %v10917_v7, %v10217_v54  ;;  %v10949_v39 = vld [vmem:[#allocation23 + $0x184] sm:$0xf]  ;;  %v10152_v7 = vor.u32 %v10903_v58, %v10151_v63  ;;  %v10935_v54 = vld [vmem:[#allocation23 + $0x10c] sm:$0xf0]  ;;  %v10257_v63 = vld [vmem:[#allocation23 + $0xd8] sm:$0xf0] }
 0xd0a   :  { %v7660_v31 = vpop.xlane.xlu2 %7659  ;;  %v10958_v58 = vld [vmem:[#allocation23 + $0x1cc] sm:$0xf] }
 0xd0b   :  { %v7664_v59 = vmul.f32 %v7660_v31, %v16457_v2  ;;  %7688 = vadd.xlane.f32.xlu2 %v7687_v33  ;;  %v10345_v33 = vld [vmem:[#allocation23 + $0x190] sm:$0xf0]  ;;  %8214 = vmatpush.bf16.msra.mxu0 %v10220_v12 }
 0xd0c   :  { %v10348_v31 = vor.u32 %v10949_v39, %v10345_v33  ;;  %v10280_v39 = vor.u32 %v10935_v54, %v10279_v56  ;;  %v10153_v33 = vld [vmem:[#allocation23 + $0x10] sm:$0xf0]  ;;  %v10385_v56 = vld [vmem:[#allocation23 + $0x1d8] sm:$0xf0]  ;;  %v10239_v54 = vld [vmem:[#allocation23 + $0xa8] sm:$0xf] }
 0xd0d   :  { %v15756_v45 = vsub.f32 %v7645_v44, %v7664_v59  ;;  %v15758_v27 = vsub.f32 %v7646_v21, %v7664_v59  ;;  %v10360_v21 = vor.u32 %v10955_v14, %v10359_v22  ;;  %v10953_v44 = vld [vmem:[#allocation23 + $0x1a4] sm:$0xf]  ;;  %v10199_v59 = vld [vmem:[#allocation23 + $0x60] sm:$0xf]  ;;  %v10907_v22 = vld [vmem:[#allocation23 + $0x2c] sm:$0xf0] }
 0xd0e   :  { %v10364_v13 = vor.u32 %v10953_v44, %v10361_v40  ;;  %v10168_v14 = vor.u32 %v10907_v22, %v10167_v57  ;;  %v10169_v44 = vld [vmem:[#allocation23 + $0x30] sm:$0xf0]  ;;  %v10937_v40 = vld [vmem:[#allocation23 + $0x124] sm:$0xf] }
 0xd0f   :  { %v7679_v11 = vmul.f32 %v15756_v45, %v15756_v45  ;;  %v7680_v10 = vmul.f32 %v15758_v27, %v15758_v27  ;;  %8194 = vmatpush.bf16.msra.mxu3 %v10360_v21  ;;  %8215 = vmatpush.bf16.msra.mxu0 %v10204_v23  ;;  %v10905_v21 = vld [vmem:[#allocation23 + $0x24] sm:$0xf] }
 0xd10   :  { %8232 = vmatpush.bf16.msra.mxu1 %v10364_v13 }
 0xd11   :  { %v7690_v41 = vadd.f32 %v7680_v10, %v7679_v11  ;;  %v10915_v11 = vld [vmem:[#allocation23 + $0x6c] sm:$0xf0]  ;;  %v10327_v10 = vld [vmem:[#allocation23 + $0x160] sm:$0xf] }
 0xd12   :  { %v10328_v8 = vor.u32 %v10947_v19, %v10327_v10  ;;  %v7647_v19 = vld [vmem:[#allocation22] sm:$0x3] }
 0xd13   :  { %7691 = vadd.xlane.f32.xlu1 %v7690_v41  ;;  %8195 = vmatpush.bf16.msra.mxu3 %v10344_v18  ;;  %v10200_v41 = vor.u32 %v10915_v11, %v10199_v59  ;;  %v10901_v18 = vld [vmem:[#allocation23 + $0x4] sm:$0xf]  ;;  %v10281_v59 = vld [vmem:[#allocation23 + $0x110] sm:$0xf0]  ;;  %v15779_v25 = vperm.slane %v7647_v19, 0  ;;  %v15781_v49 = vperm.slane %v7647_v19, 1 }
 0xd14   :  { %8233 = vmatpush.bf16.msra.mxu1 %v10348_v31  ;;  %8216 = vmatpush.bf16.msra.mxu0 %v10188_v28  ;;  %v10933_v31 = vld [vmem:[#allocation23 + $0x104] sm:$0xf]  ;;  %v10930_v28 = vld [vmem:[#allocation23 + $0xec] sm:$0xf]  ;;  %v10369_v19 = vld [vmem:[#allocation23 + $0x1b8] sm:$0xf0] }
 0xd15   :  { %8177 = vmatpush.bf16.msra.mxu2 %v10200_v41  ;;  %v10156_v41 = vor.u32 %v10901_v18, %v10153_v33  ;;  %v10284_v17 = vor.u32 %v10933_v31, %v10281_v59  ;;  %v10276_v57 = vor.u32 %v10930_v28, %v10273_v38  ;;  %v10924_v18 = vld [vmem:[#allocation23 + $0xb4] sm:$0xf0]  ;;  %v10922_v31 = vld [vmem:[#allocation23 + $0xac] sm:$0xf]  ;;  %v10241_v59 = vld [vmem:[#allocation23 + $0xb8] sm:$0xf0] }
 0xd16   :  { %v10950_v28 = vld [vmem:[#allocation23 + $0x18c] sm:$0xf] }
 0xd17   :  { %8196 = vmatpush.bf16.msra.mxu3 %v10328_v8 }
 0xd18   :  { %8234 = vmatpush.bf16.msra.mxu1 %v10332_v43  ;;  %v15783_v43 = vperm.slane %v7648_v4, 0 }
 0xd19   :  { %8178 = vmatpush.bf16.msra.mxu2 %v10184_v42  ;;  %v10271_v42 = vld [vmem:[#allocation23 + $0xe8] sm:$0xf] }
 0xd1a   :  { %v10272_v47 = vor.u32 %v10932_v53, %v10271_v42 }
 0xd1b   :  { %8197 = vmatpush.bf16.msra.mxu3 %v10312_v16  ;;  %v10964_v16 = vld [vmem:[#allocation23 + $0x1f4] sm:$0xf0] }
 0xd1c   :  { %8235 = vmatpush.bf16.msra.mxu1 %v10316_v51  ;;  %v10401_v51 = vld [vmem:[#allocation23 + $0x1f8] sm:$0xf0] }
 0xd1d   :  { %8179 = vmatpush.bf16.msra.mxu2 %v10168_v14  ;;  %v10928_v14 = vld [vmem:[#allocation23 + $0xd4] sm:$0xf0] }
 0xd1f   :  { %8198 = vmatpush.bf16.msra.mxu3 %v10296_v3 }
 0xd21   :  { %8180 = vmatpush.bf16.msra.mxu2 %v10152_v7  ;;  %v10388_v7 = vor.u32 %v10958_v58, %v10385_v56  ;;  %v10319_v56 = vld [vmem:[#allocation23 + $0x148] sm:$0xf] }
 0xd23   :  { %8199 = vmatpush.bf16.msra.mxu3 %v10280_v39 }
 0xd25   :  { %8249 = vmatpush.bf16.msrb.mxu2 %v10272_v47 }
 0xd65   :  { %v7683_v30 = vpop.xlane.xlu1 %7682 }
 0xd66   :  { %v7693_v46 = vmul.f32 %v7683_v30, %v16457_v2  ;;  %v10297_v30 = vld [vmem:[#allocation23 + $0x130] sm:$0xf0] }
 0xd67   :  { %v10300_v60 = vor.u32 %v10937_v40, %v10297_v30  ;;  %v10960_v40 = vld [vmem:[#allocation23 + $0x1d4] sm:$0xf0]  ;;  %v10926_v30 = vld [vmem:[#allocation23 + $0xcc] sm:$0xf] }
 0xd68   :  { %v15765_v0 = vadd.f32 1e-05, %v7693_v46  ;;  %v10172_v46 = vor.u32 %v10905_v21, %v10169_v44 }
 0xd69   :  { %8236 = vmatpush.bf16.msra.mxu1 %v10300_v60  ;;  %v10384_v60 = vor.u32 %v10960_v40, %v10383_v55  ;;  %v10946_v40 = vld [vmem:[#allocation23 + $0x16c] sm:$0xf] }
 0xd6a   :  { %11342 = vrsqrt.f32 %v15765_v0  ;;  %8217 = vmatpush.bf16.msra.mxu0 %v10172_v46  ;;  %vm7707_vm9 = vweird.f32 %v15765_v0 }
 0xd6d   :  { %v7686_v62 = vpop.xlane.xlu0 %7685  ;;  %8237 = vmatpush.bf16.msra.mxu1 %v10284_v17  ;;  %v10223_v17 = vld [vmem:[#allocation23 + $0x88] sm:$0xf] }
 0xd6e   :  { %v7694_v48 = vmul.f32 %v7686_v62, %v16457_v2  ;;  %8218 = vmatpush.bf16.msra.mxu0 %v10156_v41  ;;  %v10954_v41 = vld [vmem:[#allocation23 + $0x1ac] sm:$0xf] }
 0xd6f   :  { %v10372_v47 = vor.u32 %v10954_v41, %v10369_v19 }
 0xd70   :  { %v11343_v50 = vpop.eup %11342  ;;  %v15769_v52 = vadd.f32 1e-05, %v7694_v48  ;;  %v15787_v48 = vperm.slane %v7648_v4, 1 }
 0xd71   :  { %v7702_v5 = vmul.f32 %v11343_v50, %v15765_v0  ;;  %vm7708_vm5 = vweird.f32 %v11343_v50 }
 0xd72   :  { %11344 = vrsqrt.f32 %v15769_v52  ;;  %vm7709_vm6 = vmor %vm7707_vm9, %vm7708_vm5  ;;  %vm7717_vm15 = vweird.f32 %v15769_v52  ;;  %8287 = vmatpush.bf16.msrb.mxu0 %v10276_v57  ;;  %v10916_v57 = vld [vmem:[#allocation23 + $0x74] sm:$0xf0] }
 0xd73   :  { %v7703_v24 = vmul.f32 %v11343_v50, %v7702_v5  ;;  %v10962_v5 = vld [vmem:[#allocation23 + $0x1ec] sm:$0xf] }
 0xd74   :  { %v10404_v22 = vor.u32 %v10962_v5, %v10401_v51  ;;  %v10353_v5 = vld [vmem:[#allocation23 + $0x198] sm:$0xf0]  ;;  %v10207_v51 = vld [vmem:[#allocation23 + $0x68] sm:$0xf] }
 0xd75   :  { %v7704_v13 = vmul.f32 0.5, %v7703_v24  ;;  %v10255_v24 = vld [vmem:[#allocation23 + $0xc8] sm:$0xf] }
 0xd76   :  { %v10256_v44 = vor.u32 %v10928_v14, %v10255_v24  ;;  %8306 = vmatpush.bf16.msrb.mxu1 %v10404_v22  ;;  %v10335_v22 = vld [vmem:[#allocation23 + $0x168] sm:$0xf]  ;;  %v10948_v24 = vld [vmem:[#allocation23 + $0x174] sm:$0xf0] }
 0xd77   :  { %v7705_v37 = vsub.f32 1.5, %v7704_v13 }
 0xd78   :  { %v11345_v12 = vpop.eup %11344  ;;  %8250 = vmatpush.bf16.msrb.mxu2 %v10256_v44  ;;  %v10209_v44 = vld [vmem:[#allocation23 + $0x78] sm:$0xf0] }
 0xd79   :  { %v7706_v11 = vmul.f32 %v11343_v50, %v7705_v37  ;;  %v7712_v10 = vmul.f32 %v11345_v12, %v15769_v52  ;;  %vm7718_vm10 = vweird.f32 %v11345_v12  ;;  %v10260_v37 = vor.u32 %v10926_v30, %v10257_v63  ;;  %v10912_v63 = vld [vmem:[#allocation23 + $0x54] sm:$0xf0] }
 0xd7a   :  { %vm15790_vm2 = vmor %vm7717_vm15, %vm7718_vm10  ;;  %8307 = vmatpush.bf16.msrb.mxu1 %v10388_v7  ;;  %v10208_v30 = vor.u32 %v10916_v57, %v10207_v51  ;;  %v10936_v57 = vld [vmem:[#allocation23 + $0x114] sm:$0xf0] }
 0xd7b   :  { %v7710_v8 = vsel %vm7709_vm6, %v11343_v50, %v7706_v11  ;;  %v7713_v23 = vmul.f32 %v11345_v12, %v7712_v10  ;;  %v10399_v50 = vld [vmem:[#allocation23 + $0x1e8] sm:$0xf]  ;;  %8288 = vmatpush.bf16.msrb.mxu0 %v10260_v37  ;;  %v10944_v37 = vld [vmem:[#allocation23 + $0x154] sm:$0xf0] }
 0xd7c   :  { %v7741_v62 = vmul.f32 %v7710_v8, %v15729_v32  ;;  %v7742_v26 = vmul.f32 %v7710_v8, %v15731_v15  ;;  %v10400_v52 = vor.u32 %v10964_v16, %v10399_v50  ;;  %v10918_v50 = vld [vmem:[#allocation23 + $0x8c] sm:$0xf]  ;;  %v10225_v16 = vld [vmem:[#allocation23 + $0x98] sm:$0xf0] }
 0xd7d   :  { %v7714_v0 = vmul.f32 0.5, %v7713_v23  ;;  %v10228_v55 = vor.u32 %v10918_v50, %v10225_v16  ;;  %v10938_v50 = vld [vmem:[#allocation23 + $0x12c] sm:$0xf] }
 0xd7e   :  { %v7689_v29 = vpop.xlane.xlu2 %7688  ;;  %v7754_v15 = vmul.f32 %v15779_v25, %v7741_v62  ;;  %v7755_v61 = vmul.f32 %v15781_v49, %v7742_v26  ;;  %8268 = vmatpush.bf16.msrb.mxu3 %v10400_v52  ;;  %v10920_v62 = vld [vmem:[#allocation23 + $0x94] sm:$0xf0]  ;;  %v10351_v26 = vld [vmem:[#allocation23 + $0x188] sm:$0xf]  ;;  %8308 = vmatpush.bf16.msrb.mxu1 %v10372_v47  ;;  %v10177_v47 = vld [vmem:[#allocation23 + $0x38] sm:$0xf0] }
 0xd7f   :  { %v7715_v36 = vsub.f32 1.5, %v7714_v0  ;;  %v7695_v32 = vmul.f32 %v7689_v29, %v16457_v2  ;;  %v10244_v29 = vor.u32 %v10922_v31, %v10241_v59  ;;  %v10224_v52 = vor.u32 %v10920_v62, %v10223_v17  ;;  %v10942_v31 = vld [vmem:[#allocation23 + $0x14c] sm:$0xf]  ;;  %v10321_v59 = vld [vmem:[#allocation23 + $0x158] sm:$0xf0] }
 0xd80   :  { %v15807_v11 = vadd.f32 %v15783_v43, %v7754_v15  ;;  %v15810_v4 = vadd.f32 %v15787_v48, %v7755_v61  ;;  %v10356_v61 = vor.u32 %v10950_v28, %v10353_v5  ;;  %v10908_v17 = vld [vmem:[#allocation23 + $0x34] sm:$0xf0] }
 0xd81   :  { %v7716_v1 = vmul.f32 %v11345_v12, %v7715_v36  ;;  %v15799_v3 = vadd.f32 1e-05, %v7695_v32  ;;  %v10952_v36 = vld [vmem:[#allocation23 + $0x194] sm:$0xf0]  ;;  %8289 = vmatpush.bf16.msrb.mxu0 %v10244_v29  ;;  %v10906_v29 = vld [vmem:[#allocation23 + $0x2c] sm:$0xf] }
 0xd82   :  { %8269 = vmatpush.bf16.msrb.mxu3 %v10384_v60  ;;  %v10352_v38 = vor.u32 %v10952_v36, %v10351_v26  ;;  %v10191_v60 = vld [vmem:[#allocation23 + $0x48] sm:$0xf]  ;;  %8309 = vmatpush.bf16.msrb.mxu1 %v10356_v61  ;;  %v10940_v62 = vld [vmem:[#allocation23 + $0x134] sm:$0xf0]  ;;  %v10902_v61 = vld [vmem:[#allocation23 + $0xc] sm:$0xf] }
 0xd83   :  { %v7720_v21 = vsel %vm15790_vm2, %v11345_v12, %v7716_v1  ;;  %11346 = vrsqrt.f32 %v15799_v3  ;;  %v10367_v12 = vld [vmem:[#allocation23 + $0x1a8] sm:$0xf]  ;;  %vm7727_vm14 = vweird.f32 %v15799_v3  ;;  %v10904_v5 = vld [vmem:[#allocation23 + $0x14] sm:$0xf0] }
 0xd84   :  { %v7743_v13 = vmul.f32 %v7720_v21, %v15738_v6  ;;  %v7744_v46 = vmul.f32 %v7720_v21, %v15740_v35  ;;  %v10240_v6 = vor.u32 %v10924_v18, %v10239_v54  ;;  %v10956_v35 = vld [vmem:[#allocation23 + $0x1b4] sm:$0xf0]  ;;  %v10914_v21 = vld [vmem:[#allocation23 + $0x6c] sm:$0xf] }
 0xd85   :  { %v10368_v10 = vor.u32 %v10956_v35, %v10367_v12  ;;  %8290 = vmatpush.bf16.msrb.mxu0 %v10228_v55  ;;  %v10212_v54 = vor.u32 %v10914_v21, %v10209_v44  ;;  %v10910_v12 = vld [vmem:[#allocation23 + $0x4c] sm:$0xf]  ;;  %v10320_v35 = vor.u32 %v10944_v37, %v10319_v56 }
 0xd86   :  { %v7756_v39 = vmul.f32 %v15779_v25, %v7743_v13  ;;  %v7757_v33 = vmul.f32 %v15781_v49, %v7744_v46  ;;  %v7692_v0 = vpop.xlane.xlu1 %7691  ;;  %8251 = vmatpush.bf16.msrb.mxu2 %v10240_v6  ;;  %v10336_v13 = vor.u32 %v10948_v24, %v10335_v22  ;;  %v10337_v46 = vld [vmem:[#allocation23 + $0x178] sm:$0xf0]  ;;  %v10192_v6 = vor.u32 %v10912_v63, %v10191_v60 }
 0xd87   :  { %v7696_v20 = vmul.f32 %v7692_v0, %v16457_v2  ;;  %8270 = vmatpush.bf16.msrb.mxu3 %v10368_v10  ;;  %v10340_v18 = vor.u32 %v10946_v40, %v10337_v46  ;;  %v10175_v10 = vld [vmem:[#allocation23 + $0x28] sm:$0xf]  ;;  %v10180_v22 = vor.u32 %v10906_v29, %v10177_v47  ;;  %v10447_v29 = vld [vmem:[#allocation25 + $0x50] sm:$0xf]  ;;  %v10976_v47 = vld [vmem:[#allocation25 + $0x54] sm:$0xf0] }
 0xd88   :  { %v15813_v8 = vadd.f32 %v15783_v43, %v7756_v39  ;;  %v15816_v23 = vadd.f32 %v15787_v48, %v7757_v33  ;;  %v10193_v39 = vld [vmem:[#allocation23 + $0x58] sm:$0xf0]  ;;  %v10303_v0 = vld [vmem:[#allocation23 + $0x128] sm:$0xf] }
 0xd89   :  { %v15827_v1 = vpop.eup %11346  ;;  %v15829_v32 = vadd.f32 1e-05, %v7696_v20  ;;  %8291 = vmatpush.bf16.msrb.mxu0 %v10212_v54  ;;  %8310 = vmatpush.bf16.msrb.mxu1 %v10340_v18  ;;  %v10196_v36 = vor.u32 %v10910_v12, %v10193_v39  ;;  %v10324_v20 = vor.u32 %v10942_v31, %v10321_v59  ;;  %v10304_v28 = vor.u32 %v10940_v62, %v10303_v0  ;;  %v10996_v39 = vld [vmem:[#allocation25 + $0xf4] sm:$0xf0] }
 0xd8a   :  { %v15821_v42 = vpack.c.bf16 %v15813_v8, %v15807_v11  ;;  %v15825_v53 = vpack.c.bf16 %v15816_v23, %v15810_v4  ;;  %v7722_v15 = vmul.f32 %v15827_v1, %v15799_v3  ;;  %8252 = vmatpush.bf16.msrb.mxu2 %v10224_v52  ;;  %vm7728_vm11 = vweird.f32 %v15827_v1  ;;  %v10305_v52 = vld [vmem:[#allocation23 + $0x138] sm:$0xf0]  ;;  %v10980_v31 = vld [vmem:[#allocation25 + $0x74] sm:$0xf0] }
 0xd8b   :  { %11348 = vrsqrt.f32 %v15829_v32  ;;  %8271 = vmatpush.bf16.msrb.mxu3 %v10352_v38  ;;  %vm7729_vm8 = vmor %vm7727_vm14, %vm7728_vm11  ;;  %v10176_v3 = vor.u32 %v10908_v17, %v10175_v10  ;;  %v10159_v38 = vld [vmem:[#allocation23 + $0x8] sm:$0xf]  ;;  %v10308_v55 = vor.u32 %v10938_v50, %v10305_v52  ;;  %vm7737_vm12 = vweird.f32 %v15829_v32  ;;  %v10992_v17 = vld [vmem:[#allocation25 + $0xd4] sm:$0xf0] }
 0xd8c   :  { %8181 = vmatmul.bf16.vlgmr.msra.gmra.mxu2 %v15821_v42  ;;  %8200 = vmatmul.bf16.vlgmr.msra.gmra.mxu3 %v15825_v53  ;;  %v7723_v14 = vmul.f32 %v15827_v1, %v7722_v15  ;;  %v10287_v15 = vld [vmem:[#allocation23 + $0x108] sm:$0xf]  ;;  %v10160_v44 = vor.u32 %v10904_v5, %v10159_v38  ;;  %v10495_v50 = vld [vmem:[#allocation25 + $0xb0] sm:$0xf] }
 0xd8d   :  { %8219 = vmatmul.bf16.vlgmr.msra.gmra.mxu0 %v15821_v42  ;;  %8238 = vmatmul.bf16.vlgmr.msra.gmra.mxu1 %v15825_v53  ;;  %v10288_v40 = vor.u32 %v10936_v57, %v10287_v15  ;;  %v10974_v52 = vld [vmem:[#allocation25 + $0x44] sm:$0xf0]  ;;  %v10972_v57 = vld [vmem:[#allocation25 + $0x34] sm:$0xf0] }
 0xd8e   :  { %v7724_v58 = vmul.f32 0.5, %v7723_v14  ;;  %8253 = vmatpush.bf16.msrb.mxu2 %v10208_v30  ;;  %8292 = vmatpush.bf16.msrb.mxu0 %v10196_v36  ;;  %v10934_v30 = vld [vmem:[#allocation23 + $0x10c] sm:$0xf]  ;;  %v10990_v36 = vld [vmem:[#allocation25 + $0xc4] sm:$0xf0] }
 0xd8f   :  { %8272 = vmatpush.bf16.msrb.mxu3 %v10336_v13  ;;  %8311 = vmatpush.bf16.msrb.mxu1 %v10324_v20  ;;  %v10289_v13 = vld [vmem:[#allocation23 + $0x118] sm:$0xf0] }
 0xd90   :  { %v7725_v7 = vsub.f32 1.5, %v7724_v58  ;;  %v10292_v58 = vor.u32 %v10934_v30, %v10289_v13  ;;  %v10415_v30 = vld [vmem:[#allocation25 + $0x10] sm:$0xf] }
 0xd91   :  { %v11349_v33 = vpop.eup %11348 }
 0xd92   :  { %v7726_v41 = vmul.f32 %v15827_v1, %v7725_v7  ;;  %v7732_v19 = vmul.f32 %v11349_v33, %v15829_v32  ;;  %8254 = vmatpush.bf16.msrb.mxu2 %v10192_v6  ;;  %vm7738_vm0 = vweird.f32 %v11349_v33  ;;  %8293 = vmatpush.bf16.msrb.mxu0 %v10180_v22  ;;  %v10994_v6 = vld [vmem:[#allocation25 + $0xe4] sm:$0xf0]  ;;  %v10479_v22 = vld [vmem:[#allocation25 + $0x90] sm:$0xf] }
 0xd93   :  { %8273 = vmatpush.bf16.msrb.mxu3 %v10320_v35  ;;  %vm7739_vm7 = vmor %vm7737_vm12, %vm7738_vm0  ;;  %8312 = vmatpush.bf16.msrb.mxu1 %v10308_v55  ;;  %v10463_v35 = vld [vmem:[#allocation25 + $0x70] sm:$0xf]  ;;  %v10423_v55 = vld [vmem:[#allocation25 + $0x20] sm:$0xf] }
 0xd94   :  { %v7733_v26 = vmul.f32 %v11349_v33, %v7732_v19  ;;  %v7730_v16 = vsel %vm7729_vm8, %v15827_v1, %v7726_v41  ;;  %v10161_v1 = vld [vmem:[#allocation23 + $0x18] sm:$0xf0]  ;;  %v10464_v59 = vor.u32 %v10980_v31, %v10463_v35  ;;  %v10978_v41 = vld [vmem:[#allocation25 + $0x64] sm:$0xf0]  ;;  %v10511_v19 = vld [vmem:[#allocation25 + $0xd0] sm:$0xf] }
 0xd95   :  { %v7745_v24 = vmul.f32 %v7730_v16, %v15747_v9  ;;  %v7746_v21 = vmul.f32 %v7730_v16, %v15749_v34  ;;  %v10164_v9 = vor.u32 %v10902_v61, %v10161_v1  ;;  %v10512_v62 = vor.u32 %v10992_v17, %v10511_v19  ;;  %v10970_v61 = vld [vmem:[#allocation25 + $0x24] sm:$0xf0]  ;;  %v10647_v31 = vld [vmem:[#allocation25 + $0x1e0] sm:$0xf]  ;;  %v10521_v19 = vld [vmem:[#allocation25 + $0xe8] sm:$0xf0] }
 0xd96   :  { %v7734_v51 = vmul.f32 0.5, %v7733_v26  ;;  %8255 = vmatpush.bf16.msrb.mxu2 %v10176_v3  ;;  %v10503_v26 = vld [vmem:[#allocation25 + $0xc0] sm:$0xf]  ;;  %v10448_v16 = vor.u32 %v10976_v47, %v10447_v29  ;;  %v10988_v3 = vld [vmem:[#allocation25 + $0xb4] sm:$0xf0] }
 0xd97   :  { %8274 = vmatpush.bf16.msrb.mxu3 %v10304_v28  ;;  %v7758_v63 = vmul.f32 %v15779_v25, %v7745_v24  ;;  %v7759_v37 = vmul.f32 %v15781_v49, %v7746_v21  ;;  %8294 = vmatpush.bf16.msrb.mxu0 %v10164_v9  ;;  %v10504_v20 = vor.u32 %v10990_v36, %v10503_v26  ;;  %v10439_v28 = vld [vmem:[#allocation25 + $0x40] sm:$0xf]  ;;  %v10591_v29 = vld [vmem:[#allocation25 + $0x170] sm:$0xf]  ;;  %v11012_v47 = vld [vmem:[#allocation25 + $0x174] sm:$0xf0] }
 0xd98   :  { %v7735_v14 = vsub.f32 1.5, %v7734_v51  ;;  %8313 = vmatpush.bf16.msrb.mxu1 %v10292_v58  ;;  %v10496_v38 = vor.u32 %v10988_v3, %v10495_v50  ;;  %v10440_v5 = vor.u32 %v10974_v52, %v10439_v28  ;;  %v10487_v51 = vld [vmem:[#allocation25 + $0xa0] sm:$0xf]  ;;  %v10424_v21 = vor.u32 %v10970_v61, %v10423_v55  ;;  %v10979_v3 = vld [vmem:[#allocation25 + $0x74] sm:$0xf] }
 0xd99   :  { %v15857_v54 = vadd.f32 %v15783_v43, %v7758_v63  ;;  %v10966_v63 = vld [vmem:[#allocation25 + $0x4] sm:$0xf0]  ;;  %v10465_v28 = vld [vmem:[#allocation25 + $0x78] sm:$0xf0]  ;;  %v10639_v52 = vld [vmem:[#allocation25 + $0x1d0] sm:$0xf] }
 0xd9a   :  { %v7736_v46 = vmul.f32 %v11349_v33, %v7735_v14  ;;  %8256 = vmatpush.bf16.msrb.mxu2 %v10160_v44  ;;  %v10984_v14 = vld [vmem:[#allocation25 + $0x94] sm:$0xf0]  ;;  %v10471_v44 = vld [vmem:[#allocation25 + $0x80] sm:$0xf]  ;;  %v11010_v55 = vld [vmem:[#allocation25 + $0x164] sm:$0xf0] }
 0xd9b   :  { %8275 = vmatpush.bf16.msrb.mxu3 %v10288_v40  ;;  %v10480_v1 = vor.u32 %v10984_v14, %v10479_v22  ;;  %v10982_v40 = vld [vmem:[#allocation25 + $0x84] sm:$0xf0]  ;;  %v10583_v14 = vld [vmem:[#allocation25 + $0x160] sm:$0xf] }
 0xd9c   :  { %v7740_v60 = vsel %vm7739_vm7, %v11349_v33, %v7736_v46  ;;  %v10472_v13 = vor.u32 %v10982_v40, %v10471_v44  ;;  %v10968_v46 = vld [vmem:[#allocation25 + $0x14] sm:$0xf0]  ;;  %v10977_v44 = vld [vmem:[#allocation25 + $0x64] sm:$0xf]  ;;  %v10457_v40 = vld [vmem:[#allocation25 + $0x68] sm:$0xf0] }
 0xd9d   :  { %v7747_v34 = vmul.f32 %v7740_v60, %v15756_v45  ;;  %v7748_v56 = vmul.f32 %v7740_v60, %v15758_v27  ;;  %v15863_v45 = vadd.f32 %v15787_v48, %v7759_v37  ;;  %v10416_v9 = vor.u32 %v10968_v46, %v10415_v30  ;;  %v10407_v60 = vld [vmem:[#allocation25] sm:$0xf] }
 0xd9e   :  { %8739 = vmatpush.bf16.msra.mxu2 %v10464_v59  ;;  %v10408_v58 = vor.u32 %v10966_v63, %v10407_v60  ;;  %v11026_v59 = vld [vmem:[#allocation25 + $0x1e4] sm:$0xf0]  ;;  %v10460_v46 = vor.u32 %v10977_v44, %v10457_v40  ;;  %v10989_v63 = vld [vmem:[#allocation25 + $0xc4] sm:$0xf]  ;;  %v10551_v44 = vld [vmem:[#allocation25 + $0x120] sm:$0xf] }
 0xd9f   :  { %v7760_v7 = vmul.f32 %v15779_v25, %v7747_v34  ;;  %v7761_v32 = vmul.f32 %v15781_v49, %v7748_v56  ;;  %v10527_v49 = vld [vmem:[#allocation25 + $0xf0] sm:$0xf]  ;;  %v15879_v34 = vld [vmem:[%s16031_s21] sm:$0xf]  ;;  %v11022_v60 = vld [vmem:[#allocation25 + $0x1c4] sm:$0xf0] }
 0xda0   :  { %v10528_v33 = vor.u32 %v10996_v39, %v10527_v49  ;;  %v10529_v39 = vld [vmem:[#allocation25 + $0xf8] sm:$0xf0] }
 0xda1   :  { %v15860_v18 = vadd.f32 %v15783_v43, %v7760_v7  ;;  %v15866_v27 = vadd.f32 %v15787_v48, %v7761_v32  ;;  %v10519_v43 = vld [vmem:[#allocation25 + $0xe0] sm:$0xf]  ;;  %v10655_v7 = vld [vmem:[#allocation25 + $0x1f0] sm:$0xf]  ;;  %v11028_v32 = vld [vmem:[#allocation25 + $0x1f4] sm:$0xf0] }
 0xda2   :  { %v10455_v48 = vld [vmem:[#allocation25 + $0x60] sm:$0xf]  ;;  %8758 = vmatpush.bf16.msra.mxu3 %v10528_v33  ;;  %v10520_v10 = vor.u32 %v10994_v6, %v10519_v43  ;;  %v10656_v49 = vor.u32 %v11028_v32, %v10655_v7  ;;  %v10575_v7 = vld [vmem:[#allocation25 + $0x150] sm:$0xf] }
 0xda3   :  { %v7842_v12 = vpack.c.bf16 %v15860_v18, %v15857_v54  ;;  %v7843_v25 = vpack.c.bf16 %v15866_v27, %v15863_v45  ;;  %v10456_v0 = vor.u32 %v10978_v41, %v10455_v48  ;;  %v15886_v48 = vperm.slane %v15879_v34, 0  ;;  %v10993_v41 = vld [vmem:[#allocation25 + $0xe4] sm:$0xf] }
 0xda4   :  { %8796 = vmatpush.bf16.msra.mxu1 %v10656_v49  ;;  %v10524_v17 = vor.u32 %v10993_v41, %v10521_v19  ;;  %v10975_v49 = vld [vmem:[#allocation25 + $0x54] sm:$0xf]  ;;  %v10497_v19 = vld [vmem:[#allocation25 + $0xb8] sm:$0xf0] }
 0xda5   :  { %8186 = vmatmul.bf16.gmra.mxu2 %v7842_v12  ;;  %8205 = vmatmul.bf16.gmra.mxu3 %v7843_v25  ;;  %v10987_v41 = vld [vmem:[#allocation25 + $0xb4] sm:$0xf] }
 0xda6   :  { %8224 = vmatmul.bf16.gmra.mxu0 %v7842_v12  ;;  %8243 = vmatmul.bf16.gmra.mxu1 %v7843_v25 }
 0xda7   :  { %8759 = vmatpush.bf16.msra.mxu3 %v10520_v10  ;;  %8740 = vmatpush.bf16.msra.mxu2 %v10456_v0  ;;  %v10648_v10 = vor.u32 %v11026_v59, %v10647_v31  ;;  %v11020_v31 = vld [vmem:[#allocation25 + $0x1b4] sm:$0xf0] }
 0xda9   :  { %8797 = vmatpush.bf16.msra.mxu1 %v10648_v10 }
 0xdab   :  { %8760 = vmatpush.bf16.msra.mxu3 %v10512_v62  ;;  %8741 = vmatpush.bf16.msra.mxu2 %v10448_v16  ;;  %v10592_v16 = vor.u32 %v11012_v47, %v10591_v29  ;;  %v10615_v47 = vld [vmem:[#allocation25 + $0x1a0] sm:$0xf] }
 0xdad   :  { %8777 = vmatpush.bf16.msra.mxu0 %v10592_v16  ;;  %v10985_v16 = vld [vmem:[#allocation25 + $0xa4] sm:$0xf] }
 0xdaf   :  { %8761 = vmatpush.bf16.msra.mxu3 %v10504_v20  ;;  %8742 = vmatpush.bf16.msra.mxu2 %v10440_v5  ;;  %v11024_v5 = vld [vmem:[#allocation25 + $0x1d4] sm:$0xf0] }
 0xdb0   :  { %v10640_v22 = vor.u32 %v11024_v5, %v10639_v52  ;;  %v10559_v5 = vld [vmem:[#allocation25 + $0x130] sm:$0xf] }
 0xdb2   :  { %8798 = vmatpush.bf16.msra.mxu1 %v10640_v22  ;;  %v10433_v22 = vld [vmem:[#allocation25 + $0x38] sm:$0xf0] }
 0xdb3   :  { %8762 = vmatpush.bf16.msra.mxu3 %v10496_v38  ;;  %v10468_v38 = vor.u32 %v10979_v3, %v10465_v28  ;;  %v10489_v3 = vld [vmem:[#allocation25 + $0xa8] sm:$0xf0] }
 0xdb5   :  { %8257 = vmatmul.bf16.vlgmr.msrb.gmra.mxu2 %v15821_v42  ;;  %8276 = vmatmul.bf16.vlgmr.msrb.gmra.mxu3 %v15825_v53 }
 0xdb6   :  { %8295 = vmatmul.bf16.vlgmr.msrb.gmra.mxu0 %v15821_v42  ;;  %8314 = vmatmul.bf16.vlgmr.msrb.gmra.mxu1 %v15825_v53  ;;  %v10986_v42 = vld [vmem:[#allocation25 + $0xa4] sm:$0xf0]  ;;  %v10431_v53 = vld [vmem:[#allocation25 + $0x30] sm:$0xf] }
 0xdb7   :  { %v10488_v15 = vor.u32 %v10986_v42, %v10487_v51  ;;  %v10432_v24 = vor.u32 %v10972_v57, %v10431_v53  ;;  %v10991_v51 = vld [vmem:[#allocation25 + $0xd4] sm:$0xf]  ;;  %v10513_v42 = vld [vmem:[#allocation25 + $0xd8] sm:$0xf0] }
 0xdb9   :  { %8763 = vmatpush.bf16.msra.mxu3 %v10488_v15  ;;  %8743 = vmatpush.bf16.msra.mxu2 %v10432_v24  ;;  %v10516_v24 = vor.u32 %v10991_v51, %v10513_v42  ;;  %v11004_v51 = vld [vmem:[#allocation25 + $0x134] sm:$0xf0]  ;;  %v10971_v42 = vld [vmem:[#allocation25 + $0x34] sm:$0xf] }
 0xdbd   :  { %8764 = vmatpush.bf16.msra.mxu3 %v10480_v1  ;;  %8744 = vmatpush.bf16.msra.mxu2 %v10424_v21  ;;  %v10584_v21 = vor.u32 %v11010_v55, %v10583_v14  ;;  %v11016_v14 = vld [vmem:[#allocation25 + $0x194] sm:$0xf0]  ;;  %v10436_v55 = vor.u32 %v10971_v42, %v10433_v22 }
 0xdbf   :  { %8778 = vmatpush.bf16.msra.mxu0 %v10584_v21  ;;  %v10481_v21 = vld [vmem:[#allocation25 + $0x98] sm:$0xf0] }
 0xdc1   :  { %8765 = vmatpush.bf16.msra.mxu3 %v10472_v13  ;;  %8745 = vmatpush.bf16.msra.mxu2 %v10416_v9  ;;  %v10631_v9 = vld [vmem:[#allocation25 + $0x1c0] sm:$0xf] }
 0xdc5   :  { %8262 = vmatmul.bf16.gmra.mxu2 %v7842_v12  ;;  %8281 = vmatmul.bf16.gmra.mxu3 %v7843_v25 }
 0xdc6   :  { %8300 = vmatmul.bf16.gmra.mxu0 %v7842_v12  ;;  %8319 = vmatmul.bf16.gmra.mxu1 %v7843_v25  ;;  %v10995_v12 = vld [vmem:[#allocation25 + $0xf4] sm:$0xf]  ;;  %v15882_v25 = vperm.slane %v15879_v34, 1 }
 0xdc7   :  { %8746 = vmatpush.bf16.msra.mxu2 %v10408_v58  ;;  %v10532_v43 = vor.u32 %v10995_v12, %v10529_v39  ;;  %v11008_v12 = vld [vmem:[#allocation25 + $0x154] sm:$0xf0]  ;;  %v10449_v39 = vld [vmem:[#allocation25 + $0x58] sm:$0xf0] }
 0xdc8   :  { %v10452_v59 = vor.u32 %v10975_v49, %v10449_v39  ;;  %v10473_v39 = vld [vmem:[#allocation25 + $0x88] sm:$0xf0] }
 0xdc9   :  { %8834 = vmatpush.bf16.msrb.mxu3 %v10532_v43 }
 0xdcb   :  { %8815 = vmatpush.bf16.msrb.mxu2 %v10468_v38  ;;  %v10492_v38 = vor.u32 %v10985_v16, %v10489_v3  ;;  %v10409_v16 = vld [vmem:[#allocation25 + $0x8] sm:$0xf0] }
 0xdcd   :  { %8835 = vmatpush.bf16.msrb.mxu3 %v10524_v17  ;;  %v10567_v17 = vld [vmem:[#allocation25 + $0x140] sm:$0xf] }
 0xdcf   :  { %8816 = vmatpush.bf16.msrb.mxu2 %v10460_v46  ;;  %v10969_v46 = vld [vmem:[#allocation25 + $0x24] sm:$0xf] }
 0xdd1   :  { %8836 = vmatpush.bf16.msrb.mxu3 %v10516_v24  ;;  %v10607_v24 = vld [vmem:[#allocation25 + $0x190] sm:$0xf] }
 0xdd3   :  { %8817 = vmatpush.bf16.msrb.mxu2 %v10452_v59 }
 0xe0a   :  { %v8220_v56 = vpop.f32.mrf.mxu0  ;;  %v8239_v37 = vpop.f32.mrf.mxu1 }
 0xe0b   :  { %v8221_v33 = vadd.f32 %v8220_v56, %v15882_v25  ;;  %v10632_v56 = vor.u32 %v11022_v60, %v10631_v9  ;;  %v10425_v9 = vld [vmem:[#allocation25 + $0x28] sm:$0xf0] }
 0xe0d   :  { %v8240_v62 = vadd.f32 %v8239_v37, %v8221_v33  ;;  %v10505_v37 = vld [vmem:[#allocation25 + $0xc8] sm:$0xf0]  ;;  %8799 = vmatpush.bf16.msra.mxu1 %v10632_v56  ;;  %v11014_v56 = vld [vmem:[#allocation25 + $0x184] sm:$0xf0] }
 0xe0e   :  { %v10508_v32 = vor.u32 %v10989_v63, %v10505_v37  ;;  %v10428_v63 = vor.u32 %v10969_v46, %v10425_v9  ;;  %v10981_v37 = vld [vmem:[#allocation25 + $0x84] sm:$0xf]  ;;  %v10641_v46 = vld [vmem:[#allocation25 + $0x1d8] sm:$0xf0] }
 0xe0f   :  { %v8182_v6 = vpop.f32.mrf.mxu2  ;;  %v8201_v35 = vpop.f32.mrf.mxu3  ;;  %v8326_v15 = vmax.f32 %v8240_v62, 0.0  ;;  %v10500_v62 = vor.u32 %v10987_v41, %v10497_v19  ;;  %v10657_v41 = vld [vmem:[#allocation25 + $0x1f8] sm:$0xf0]  ;;  %v10535_v19 = vld [vmem:[#allocation25 + $0x100] sm:$0xf] }
 0xe10   :  { %v8183_v36 = vadd.f32 %v8182_v6, %v15886_v48  ;;  %v10576_v6 = vor.u32 %v11008_v12, %v10575_v7  ;;  %8837 = vmatpush.bf16.msrb.mxu3 %v10508_v32  ;;  %v11009_v9 = vld [vmem:[#allocation25 + $0x164] sm:$0xf] }
 0xe12   :  { %v8222_v0 = vpop.f32.mrf.mxu0  ;;  %v8241_v20 = vpop.f32.mrf.mxu1  ;;  %v8202_v61 = vadd.f32 %v8201_v35, %v8183_v36  ;;  %v10623_v35 = vld [vmem:[#allocation25 + $0x1b0] sm:$0xf]  ;;  %v10973_v36 = vld [vmem:[#allocation25 + $0x44] sm:$0xf]  ;;  %8779 = vmatpush.bf16.msra.mxu0 %v10576_v6  ;;  %v11000_v6 = vld [vmem:[#allocation25 + $0x114] sm:$0xf0] }
 0xe13   :  { %v8223_v26 = vadd.f32 %v8222_v0, %v15882_v25  ;;  %v10624_v10 = vor.u32 %v11020_v31, %v10623_v35  ;;  %v10967_v35 = vld [vmem:[#allocation25 + $0x14] sm:$0xf]  ;;  %v10417_v31 = vld [vmem:[#allocation25 + $0x18] sm:$0xf0] }
 0xe14   :  { %v8325_v43 = vmax.f32 %v8202_v61, 0.0  ;;  %8838 = vmatpush.bf16.msrb.mxu3 %v10500_v62  ;;  %v10608_v61 = vor.u32 %v11016_v14, %v10607_v24 }
 0xe15   :  { %v8242_v50 = vadd.f32 %v8241_v20, %v8223_v26  ;;  %v11006_v26 = vld [vmem:[#allocation25 + $0x144] sm:$0xf0]  ;;  %v10441_v20 = vld [vmem:[#allocation25 + $0x48] sm:$0xf0]  ;;  %8800 = vmatpush.bf16.msra.mxu1 %v10624_v10  ;;  %v11027_v10 = vld [vmem:[#allocation25 + $0x1f4] sm:$0xf] }
 0xe16   :  { %v10568_v29 = vor.u32 %v11006_v26, %v10567_v17  ;;  %v10444_v28 = vor.u32 %v10973_v36, %v10441_v20  ;;  %v10420_v26 = vor.u32 %v10967_v35, %v10417_v31  ;;  %v10660_v36 = vor.u32 %v11027_v10, %v10657_v41  ;;  %v10998_v20 = vld [vmem:[#allocation25 + $0x104] sm:$0xf0]  ;;  %v10577_v35 = vld [vmem:[#allocation25 + $0x158] sm:$0xf0]  ;;  %v11019_v31 = vld [vmem:[#allocation25 + $0x1b4] sm:$0xf] }
 0xe17   :  { %v8330_v53 = vmax.f32 %v8242_v50, 0.0  ;;  %v8184_v57 = vpop.f32.mrf.mxu2  ;;  %v8203_v13 = vpop.f32.mrf.mxu3  ;;  %v11018_v50 = vld [vmem:[#allocation25 + $0x1a4] sm:$0xf0]  ;;  %v10625_v41 = vld [vmem:[#allocation25 + $0x1b8] sm:$0xf0] }
 0xe18   :  { %v8185_v1 = vadd.f32 %v8184_v57, %v15886_v48  ;;  %v10616_v52 = vor.u32 %v11018_v50, %v10615_v47  ;;  %8780 = vmatpush.bf16.msra.mxu0 %v10568_v29  ;;  %8818 = vmatpush.bf16.msrb.mxu2 %v10444_v28  ;;  %v10560_v57 = vor.u32 %v11004_v51, %v10559_v5  ;;  %v10965_v50 = vld [vmem:[#allocation25 + $0x4] sm:$0xf] }
 0xe19   :  { %v15891_v30 = vpack.c.bf16 %v8330_v53, %v8326_v15  ;;  %8839 = vmatpush.bf16.msrb.mxu3 %v10492_v38  ;;  %v10536_v28 = vor.u32 %v10998_v20, %v10535_v19  ;;  %v10649_v38 = vld [vmem:[#allocation25 + $0x1e8] sm:$0xf0]  ;;  %v10412_v42 = vor.u32 %v10965_v50, %v10409_v16  ;;  %v10628_v19 = vor.u32 %v11019_v31, %v10625_v41  ;;  %v11017_v20 = vld [vmem:[#allocation25 + $0x1a4] sm:$0xf] }
 0xe1a   :  { %v8204_v58 = vadd.f32 %v8203_v13, %v8185_v1  ;;  %8801 = vmatpush.bf16.msra.mxu1 %v10616_v52  ;;  %v10983_v1 = vld [vmem:[#allocation25 + $0x94] sm:$0xf]  ;;  %v11002_v13 = vld [vmem:[#allocation25 + $0x124] sm:$0xf0]  ;;  %v11025_v52 = vld [vmem:[#allocation25 + $0x1e4] sm:$0xf] }
 0xe1b   :  { %8766 = vmatmul.bf16.vlgmr.msra.gmra.mxu3 %v15891_v30  ;;  %v10484_v40 = vor.u32 %v10983_v1, %v10481_v21  ;;  %v10552_v60 = vor.u32 %v11002_v13, %v10551_v44  ;;  %v10652_v51 = vor.u32 %v11025_v52, %v10649_v38  ;;  %v11023_v1 = vld [vmem:[#allocation25 + $0x1d4] sm:$0xf]  ;;  %v10561_v38 = vld [vmem:[#allocation25 + $0x138] sm:$0xf0] }
 0xe1c   :  { %v8329_v33 = vmax.f32 %v8204_v58, 0.0  ;;  %8781 = vmatpush.bf16.msra.mxu0 %v10560_v57  ;;  %8819 = vmatpush.bf16.msrb.mxu2 %v10436_v55  ;;  %v10599_v58 = vld [vmem:[#allocation25 + $0x180] sm:$0xf]  ;;  %v11011_v55 = vld [vmem:[#allocation25 + $0x174] sm:$0xf] }
 0xe1d   :  { %8840 = vmatpush.bf16.msrb.mxu3 %v10484_v40  ;;  %v10600_v49 = vor.u32 %v11014_v56, %v10599_v58  ;;  %v11003_v52 = vld [vmem:[#allocation25 + $0x134] sm:$0xf] }
 0xe1e   :  { %v15894_v0 = vpack.c.bf16 %v8329_v33, %v8325_v43  ;;  %8802 = vmatpush.bf16.msra.mxu1 %v10608_v61  ;;  %v10543_v43 = vld [vmem:[#allocation25 + $0x110] sm:$0xf]  ;;  %v10476_v33 = vor.u32 %v10981_v37, %v10473_v39  ;;  %v10593_v61 = vld [vmem:[#allocation25 + $0x178] sm:$0xf0] }
 0xe1f   :  { %v10544_v59 = vor.u32 %v11000_v6, %v10543_v43  ;;  %v10596_v13 = vor.u32 %v11011_v55, %v10593_v61 }
 0xe20   :  { %8747 = vmatmul.bf16.vlgmr.msra.gmra.mxu2 %v15894_v0  ;;  %8782 = vmatpush.bf16.msra.mxu0 %v10552_v60  ;;  %v10585_v60 = vld [vmem:[#allocation25 + $0x168] sm:$0xf0] }
 0xe21   :  { %8820 = vmatpush.bf16.msrb.mxu2 %v10428_v63  ;;  %8841 = vmatpush.bf16.msrb.mxu3 %v10476_v33  ;;  %v15904_v63 = vperm.slane %v15879_v34, 3  ;;  %v10588_v37 = vor.u32 %v11009_v9, %v10585_v60  ;;  %v10601_v9 = vld [vmem:[#allocation25 + $0x188] sm:$0xf0] }
 0xe22   :  { %8803 = vmatpush.bf16.msra.mxu1 %v10600_v49  ;;  %v11007_v49 = vld [vmem:[#allocation25 + $0x154] sm:$0xf] }
 0xe23   :  { %v8225_v15 = vpop.f32.mrf.mxu0  ;;  %v8244_v53 = vpop.f32.mrf.mxu1  ;;  %v10580_v10 = vor.u32 %v11007_v49, %v10577_v35  ;;  %v10537_v35 = vld [vmem:[#allocation25 + $0x108] sm:$0xf0] }
 0xe24   :  { %v8226_v7 = vadd.f32 %v8225_v15, %v15882_v25  ;;  %8783 = vmatpush.bf16.msra.mxu0 %v10544_v59  ;;  %v15911_v59 = vperm.slane %v15879_v34, 2 }
 0xe25   :  { %8821 = vmatpush.bf16.msrb.mxu2 %v10420_v26 }
 0xe26   :  { %v8245_v29 = vadd.f32 %v8244_v53, %v8226_v7  ;;  %8872 = vmatpush.bf16.msrb.mxu1 %v10660_v36 }
 0xe28   :  { %v8187_v32 = vpop.f32.mrf.mxu2  ;;  %v8206_v12 = vpop.f32.mrf.mxu3  ;;  %v8334_v15 = vmax.f32 %v8245_v29, 0.0  ;;  %8784 = vmatpush.bf16.msra.mxu0 %v10536_v28  ;;  %v10617_v29 = vld [vmem:[#allocation25 + $0x1a8] sm:$0xf0] }
 0xe29   :  { %v8188_v3 = vadd.f32 %v8187_v32, %v15886_v48  ;;  %8822 = vmatpush.bf16.msrb.mxu2 %v10412_v42  ;;  %v11021_v32 = vld [vmem:[#allocation25 + $0x1c4] sm:$0xf]  ;;  %v10620_v28 = vor.u32 %v11017_v20, %v10617_v29 }
 0xe2a   :  { %8873 = vmatpush.bf16.msrb.mxu1 %v10652_v51  ;;  %v10609_v51 = vld [vmem:[#allocation25 + $0x198] sm:$0xf0] }
 0xe2b   :  { %v8227_v17 = vpop.f32.mrf.mxu0  ;;  %v8246_v62 = vpop.f32.mrf.mxu1  ;;  %v8207_v24 = vadd.f32 %v8206_v12, %v8188_v3  ;;  %v10633_v12 = vld [vmem:[#allocation25 + $0x1c8] sm:$0xf0] }
 0xe2c   :  { %v8228_v47 = vadd.f32 %v8227_v17, %v15882_v25  ;;  %8853 = vmatpush.bf16.msrb.mxu0 %v10596_v13  ;;  %v10636_v6 = vor.u32 %v11021_v32, %v10633_v12  ;;  %v11005_v17 = vld [vmem:[#allocation25 + $0x144] sm:$0xf]  ;;  %v10553_v13 = vld [vmem:[#allocation25 + $0x128] sm:$0xf0]  ;;  %v10999_v32 = vld [vmem:[#allocation25 + $0x114] sm:$0xf] }
 0xe2d   :  { %v8333_v58 = vmax.f32 %v8207_v24, 0.0  ;;  %v10545_v12 = vld [vmem:[#allocation25 + $0x118] sm:$0xf0] }
 0xe2e   :  { %v8247_v5 = vadd.f32 %v8246_v62, %v8228_v47  ;;  %v10569_v62 = vld [vmem:[#allocation25 + $0x148] sm:$0xf0] }
 0xe2f   :  { %v10572_v34 = vor.u32 %v11005_v17, %v10569_v62 }
 0xe30   :  { %v8338_v57 = vmax.f32 %v8247_v5, 0.0  ;;  %v8189_v22 = vpop.f32.mrf.mxu2  ;;  %v8208_v53 = vpop.f32.mrf.mxu3  ;;  %8854 = vmatpush.bf16.msrb.mxu0 %v10588_v37  ;;  %v11015_v5 = vld [vmem:[#allocation25 + $0x194] sm:$0xf] }
 0xe31   :  { %v8190_v25 = vadd.f32 %v8189_v22, %v15886_v48  ;;  %v10644_v48 = vor.u32 %v11023_v1, %v10641_v46  ;;  %v10612_v61 = vor.u32 %v11015_v5, %v10609_v51  ;;  %v11001_v1 = vld [vmem:[#allocation25 + $0x124] sm:$0xf] }
 0xe32   :  { %v15901_v14 = vpack.c.bf16 %v8338_v57, %v8334_v15  ;;  %v11013_v46 = vld [vmem:[#allocation25 + $0x184] sm:$0xf] }
 0xe33   :  { %v8209_v21 = vadd.f32 %v8208_v53, %v8190_v25  ;;  %v8296_v44 = vpop.f32.mrf.mxu0  ;;  %v8315_v40 = vpop.f32.mrf.mxu1  ;;  %8874 = vmatpush.bf16.msrb.mxu1 %v10644_v48  ;;  %v10564_v25 = vor.u32 %v11003_v52, %v10561_v38 }
 0xe34   :  { %8771 = vmatmul.bf16.gmra.mxu3 %v15901_v14  ;;  %v8297_v39 = vadd.f32 %v8296_v44, %v15904_v63  ;;  %8855 = vmatpush.bf16.msrb.mxu0 %v10580_v10 }
 0xe35   :  { %v8337_v56 = vmax.f32 %v8209_v21, 0.0 }
 0xe36   :  { %v8316_v47 = vadd.f32 %v8315_v40, %v8297_v39 }
 0xe37   :  { %v15907_v7 = vpack.c.bf16 %v8337_v56, %v8333_v58  ;;  %8875 = vmatpush.bf16.msrb.mxu1 %v10636_v6  ;;  %v10556_v58 = vor.u32 %v11001_v1, %v10553_v13  ;;  %v10604_v56 = vor.u32 %v11013_v46, %v10601_v9  ;;  %v10997_v6 = vld [vmem:[#allocation25 + $0x104] sm:$0xf] }
 0xe38   :  { %v8258_v43 = vpop.f32.mrf.mxu2  ;;  %v8277_v33 = vpop.f32.mrf.mxu3  ;;  %v8328_v42 = vmax.f32 %v8316_v47, 0.0  ;;  %8856 = vmatpush.bf16.msrb.mxu0 %v10572_v34  ;;  %v10540_v62 = vor.u32 %v10997_v6, %v10537_v35 }
 0xe39   :  { %8752 = vmatmul.bf16.gmra.mxu2 %v15907_v7  ;;  %v8259_v16 = vadd.f32 %v8258_v43, %v15911_v59 }
 0xe3b   :  { %v8298_v26 = vpop.f32.mrf.mxu0  ;;  %v8317_v36 = vpop.f32.mrf.mxu1  ;;  %8876 = vmatpush.bf16.msrb.mxu1 %v10628_v19  ;;  %v8278_v53 = vadd.f32 %v8277_v33, %v8259_v16  ;;  %v10548_v33 = vor.u32 %v10999_v32, %v10545_v12 }
 0xe3c   :  { %v8299_v50 = vadd.f32 %v8298_v26, %v15904_v63  ;;  %8857 = vmatpush.bf16.msrb.mxu0 %v10564_v25 }
 0xe3d   :  { %v8327_v60 = vmax.f32 %v8278_v53, 0.0 }
 0xe3e   :  { %v8318_v3 = vadd.f32 %v8317_v36, %v8299_v50 }
 0xe3f   :  { %8877 = vmatpush.bf16.msrb.mxu1 %v10620_v28 }
 0xe40   :  { %v8332_v15 = vmax.f32 %v8318_v3, 0.0  ;;  %v8260_v57 = vpop.f32.mrf.mxu2  ;;  %v8279_v22 = vpop.f32.mrf.mxu3  ;;  %8858 = vmatpush.bf16.msrb.mxu0 %v10556_v58 }
 0xe41   :  { %v8261_v24 = vadd.f32 %v8260_v57, %v15911_v59 }
 0xe42   :  { %v8409_v55 = vpack.c.bf16 %v8332_v15, %v8328_v42 }
 0xe43   :  { %v8280_v21 = vadd.f32 %v8279_v22, %v8261_v24  ;;  %v8301_v44 = vpop.f32.mrf.mxu0  ;;  %v8320_v40 = vpop.f32.mrf.mxu1  ;;  %8878 = vmatpush.bf16.msrb.mxu1 %v10612_v61 }
 0xe44   :  { %8804 = vmatmul.bf16.vlgmr.msra.gmra.mxu1 %v8409_v55  ;;  %8842 = vmatmul.bf16.vlgmr.msrb.gmra.mxu3 %v15891_v30  ;;  %v8302_v49 = vadd.f32 %v8301_v44, %v15904_v63 }
 0xe45   :  { %v8331_v48 = vmax.f32 %v8280_v21, 0.0  ;;  %8859 = vmatpush.bf16.msrb.mxu0 %v10548_v33 }
 0xe46   :  { %v8321_v31 = vadd.f32 %v8320_v40, %v8302_v49 }
 0xe47   :  { %v8408_v37 = vpack.c.bf16 %v8331_v48, %v8327_v60  ;;  %8879 = vmatpush.bf16.msrb.mxu1 %v10604_v56 }
 0xe48   :  { %v8263_v39 = vpop.f32.mrf.mxu2  ;;  %v8282_v43 = vpop.f32.mrf.mxu3  ;;  %v8336_v26 = vmax.f32 %v8321_v31, 0.0 }
 0xe49   :  { %8785 = vmatmul.bf16.vlgmr.msra.gmra.mxu0 %v8408_v37  ;;  %8823 = vmatmul.bf16.vlgmr.msrb.gmra.mxu2 %v15894_v0  ;;  %v8264_v41 = vadd.f32 %v8263_v39, %v15911_v59 }
 0xe4a   :  { %8860 = vmatpush.bf16.msrb.mxu0 %v10540_v62 }
 0xe4b   :  { %v8303_v30 = vpop.f32.mrf.mxu0  ;;  %v8322_v19 = vpop.f32.mrf.mxu1  ;;  %v8283_v29 = vadd.f32 %v8282_v43, %v8264_v41 }
 0xe4c   :  { %v8304_v10 = vadd.f32 %v8303_v30, %v15904_v63 }
 0xe4d   :  { %v8335_v63 = vmax.f32 %v8283_v29, 0.0 }
 0xe4e   :  { %v8323_v17 = vadd.f32 %v8322_v19, %v8304_v10 }
 0xe50   :  { %v8340_v36 = vmax.f32 %v8323_v17, 0.0  ;;  %v8265_v20 = vpop.f32.mrf.mxu2  ;;  %v8284_v50 = vpop.f32.mrf.mxu3 }
 0xe51   :  { %v8266_v0 = vadd.f32 %v8265_v20, %v15911_v59 }
 0xe52   :  { %v8413_v47 = vpack.c.bf16 %v8340_v36, %v8336_v26 }
 0xe53   :  { %v8285_v16 = vadd.f32 %v8284_v50, %v8266_v0 }
 0xe54   :  { %8809 = vmatmul.bf16.gmra.mxu1 %v8413_v47  ;;  %8847 = vmatmul.bf16.gmra.mxu3 %v15901_v14 }
 0xe55   :  { %v8339_v34 = vmax.f32 %v8285_v16, 0.0 }
 0xe57   :  { %v8412_v3 = vpack.c.bf16 %v8339_v34, %v8335_v63 }
 0xe59   :  { %8790 = vmatmul.bf16.gmra.mxu0 %v8412_v3  ;;  %8828 = vmatmul.bf16.gmra.mxu2 %v15907_v7  ;;  %v8405_v7 = vld [vmem:[%s16033_s23] sm:$0x3] }
 0xe5a   :  { %v8415_v61 = vperm.slane %v8405_v7, 0  ;;  %v8416_v44 = vperm.slane %v8405_v7, 1 }
 0xe64   :  { %8880 = vmatmul.bf16.vlgmr.msrb.gmra.mxu1 %v8409_v55 }
 0xe69   :  { %8861 = vmatmul.bf16.vlgmr.msrb.gmra.mxu0 %v8408_v37 }
 0xe74   :  { %8885 = vmatmul.bf16.gmra.mxu1 %v8413_v47 }
 0xe79   :  { %8866 = vmatmul.bf16.gmra.mxu0 %v8412_v3 }
 0xe9e   :  { %v8767_v52 = vpop.f32.mrf.mxu3 }
 0xea3   :  { %v8748_v28 = vpop.f32.mrf.mxu2 }
 0xea4   :  { %v8749_v21 = vadd.f32 %v8748_v28, %v8415_v61 }
 0xea6   :  { %v8769_v5 = vpop.f32.mrf.mxu3  ;;  %v8768_v46 = vadd.f32 %v8767_v52, %v8749_v21 }
 0xeab   :  { %v8750_v59 = vpop.f32.mrf.mxu2 }
 0xeac   :  { %v8751_v56 = vadd.f32 %v8750_v59, %v8415_v61 }
 0xeae   :  { %v8770_v43 = vadd.f32 %v8769_v5, %v8751_v56 }
 0xeb7   :  { %v8772_v57 = vpop.f32.mrf.mxu3 }
 0xebc   :  { %v8753_v51 = vpop.f32.mrf.mxu2 }
 0xebd   :  { %v8754_v19 = vadd.f32 %v8753_v51, %v8415_v61 }
 0xebf   :  { %v8774_v24 = vpop.f32.mrf.mxu3  ;;  %v8773_v29 = vadd.f32 %v8772_v57, %v8754_v19 }
 0xec1   :  { %v8805_v38 = vpop.f32.mrf.mxu1 }
 0xec4   :  { %v8755_v14 = vpop.f32.mrf.mxu2 }
 0xec5   :  { %v8756_v34 = vadd.f32 %v8755_v14, %v8415_v61 }
 0xec6   :  { %v8786_v42 = vpop.f32.mrf.mxu0 }
 0xec7   :  { %v8843_v40 = vpop.f32.mrf.mxu3  ;;  %v8787_v58 = vadd.f32 %v8786_v42, %v8768_v46  ;;  %v8775_v51 = vadd.f32 %v8774_v24, %v8756_v34 }
 0xec9   :  { %v8807_v15 = vpop.f32.mrf.mxu1  ;;  %v8806_v12 = vadd.f32 %v8805_v38, %v8787_v58 }
 0xecb   :  { %v8891_v6 = vadd.f32 %v8806_v12, %v15807_v11 }
 0xecc   :  { %v8824_v55 = vpop.f32.mrf.mxu2 }
 0xecd   :  { %v8825_v9 = vadd.f32 %v8824_v55, %v8416_v44 }
 0xece   :  { %v8788_v22 = vpop.f32.mrf.mxu0 }
 0xecf   :  { %v8844_v37 = vadd.f32 %v8843_v40, %v8825_v9  ;;  %v8845_v39 = vpop.f32.mrf.mxu3  ;;  %v8789_v35 = vadd.f32 %v8788_v22, %v8770_v43 }
 0xed1   :  { %v8810_v53 = vpop.f32.mrf.mxu1  ;;  %v8808_v36 = vadd.f32 %v8807_v15, %v8789_v35 }
 0xed3   :  { %v8893_v16 = vadd.f32 %v8808_v36, %v15813_v8 }
 0xed4   :  { %v8826_v60 = vpop.f32.mrf.mxu2 }
 0xed5   :  { %v8827_v33 = vadd.f32 %v8826_v60, %v8416_v44 }
 0xed6   :  { %v8791_v25 = vpop.f32.mrf.mxu0 }
 0xed7   :  { %v8846_v17 = vadd.f32 %v8845_v39, %v8827_v33  ;;  %v8848_v50 = vpop.f32.mrf.mxu3  ;;  %v8792_v63 = vadd.f32 %v8791_v25, %v8773_v29 }
 0xed9   :  { %v8812_v1 = vpop.f32.mrf.mxu1  ;;  %v8811_v38 = vadd.f32 %v8810_v53, %v8792_v63 }
 0xedb   :  { %v8895_v57 = vadd.f32 %v8811_v38, %v15857_v54  ;;  %v8900_v38 = vld [vmem:[%s16460_s22] sm:$0x3] }
 0xedc   :  { %v8829_v31 = vpop.f32.mrf.mxu2 }
 0xedd   :  { %v8830_v0 = vadd.f32 %v8829_v31, %v8416_v44 }
 0xede   :  { %v8793_v13 = vpop.f32.mrf.mxu0 }
 0xedf   :  { %v8794_v22 = vadd.f32 %v8793_v13, %v8775_v51  ;;  %v8850_v7 = vpop.f32.mrf.mxu3 }
 0xee1   :  { %v8881_v48 = vpop.f32.mrf.mxu1  ;;  %v8813_v55 = vadd.f32 %v8812_v1, %v8794_v22 }
 0xee3   :  { %v8897_v53 = vadd.f32 %v8813_v55, %v15860_v18 }
 0xee4   :  { %v8831_v3 = vpop.f32.mrf.mxu2 }
 0xee5   :  { %v8832_v42 = vadd.f32 %v8831_v3, %v8416_v44 }
 0xee6   :  { %v8862_v32 = vpop.f32.mrf.mxu0 }
 0xee7   :  { %v8863_v49 = vadd.f32 %v8862_v32, %v8844_v37  ;;  %v8851_v25 = vadd.f32 %v8850_v7, %v8832_v42  ;;  %v15979_v7 = vperm.slane %v8900_v38, 1 }
 0xee9   :  { %v8882_v30 = vadd.f32 %v8881_v48, %v8863_v49  ;;  %v8883_v41 = vpop.f32.mrf.mxu1 }
 0xeeb   :  { %v8892_v10 = vadd.f32 %v8882_v30, %v15810_v4  ;;  %v8849_v4 = vadd.f32 %v8848_v50, %v8830_v0 }
 0xeed   :  { %v8901_v62 = vadd.f32 %v8892_v10, %v8891_v6 }
 0xeee   :  { %v8864_v26 = vpop.f32.mrf.mxu0 }
 0xeef   :  { %v8865_v20 = vadd.f32 %v8864_v26, %v8846_v17  ;;  %8902 = vadd.xlane.f32.xlu0 %v8901_v62 }
 0xef1   :  { %v8884_v47 = vadd.f32 %v8883_v41, %v8865_v20  ;;  %v8886_v52 = vpop.f32.mrf.mxu1 }
 0xef3   :  { %v8894_v11 = vadd.f32 %v8884_v47, %v15816_v23 }
 0xef5   :  { %v8904_v28 = vadd.f32 %v8894_v11, %v8893_v16 }
 0xef6   :  { %v8867_v59 = vpop.f32.mrf.mxu0 }
 0xef7   :  { %v8868_v5 = vadd.f32 %v8867_v59, %v8849_v4  ;;  %8905 = vadd.xlane.f32.xlu2 %v8904_v28  ;;  %v8899_v4 = vld [vmem:[%s16034_s24] sm:$0x3]  ;;  %s11806_s24 = smov [#allocation26]  }
 0xef8   :  { %v15973_v42 = vperm.slane %v8899_v4, 0  ;;  %s9039_s25 = sshll.u32 %s11806_s24, 4  ;;  %s9040_s25 = int_to_ptr.vmem [resolvable:$true] %s9039_s25 }
 0xef9   :  { %v8887_v15 = vadd.f32 %v8886_v52, %v8868_v5  ;;  %v8888_v21 = vpop.f32.mrf.mxu1 }
 0xefb   :  { %v8896_v8 = vadd.f32 %v8887_v15, %v15863_v45  ;;  %v15975_v15 = vperm.slane %v8899_v4, 1 }
 0xefd   :  { %v8907_v23 = vadd.f32 %v8896_v8, %v8895_v57 }
 0xefe   :  { %v8869_v14 = vpop.f32.mrf.mxu0 }
 0xeff   :  { %v8870_v61 = vadd.f32 %v8869_v14, %v8851_v25  ;;  %8908 = vadd.xlane.f32.xlu1 %v8907_v23 }
 0xf01   :  { %v8889_v40 = vadd.f32 %v8888_v21, %v8870_v61 }
 0xf03   :  { %v8898_v24 = vadd.f32 %v8889_v40, %v15866_v27 }
 0xf05   :  { %v8910_v44 = vadd.f32 %v8898_v24, %v8897_v53 }
 0xf07   :  { %8911 = vadd.xlane.f32.xlu0 %v8910_v44 }
 0xf62   :  { %v8903_v46 = vpop.xlane.xlu0 %8902 }
 0xf63   :  { %v8913_v54 = vmul.f32 %v8903_v46, %v16457_v2 }
 0xf65   :  { %v8917_v13 = vsub.f32 %v8891_v6, %v8913_v54  ;;  %v8918_v45 = vsub.f32 %v8892_v10, %v8913_v54 }
 0xf67   :  { %v8925_v9 = vmul.f32 %v8917_v13, %v8917_v13  ;;  %v8926_v60 = vmul.f32 %v8918_v45, %v8918_v45 }
 0xf69   :  { %v8933_v48 = vadd.f32 %v8926_v60, %v8925_v9 }
 0xf6a   :  { %v8906_v58 = vpop.xlane.xlu2 %8905 }
 0xf6b   :  { %v8914_v1 = vmul.f32 %v8906_v58, %v16457_v2  ;;  %8934 = vadd.xlane.f32.xlu2 %v8933_v48 }
 0xf6d   :  { %v15938_v56 = vsub.f32 %v8893_v16, %v8914_v1  ;;  %v15940_v37 = vsub.f32 %v8894_v11, %v8914_v1 }
 0xf6f   :  { %v8927_v18 = vmul.f32 %v15938_v56, %v15938_v56  ;;  %v8928_v27 = vmul.f32 %v15940_v37, %v15940_v37 }
 0xf71   :  { %v8936_v32 = vadd.f32 %v8928_v27, %v8927_v18 }
 0xf72   :  { %v8909_v12 = vpop.xlane.xlu1 %8908 }
 0xf73   :  { %v8915_v49 = vmul.f32 %v8909_v12, %v16457_v2  ;;  %8937 = vadd.xlane.f32.xlu1 %v8936_v32 }
 0xf75   :  { %v15947_v39 = vsub.f32 %v8895_v57, %v8915_v49  ;;  %v15949_v43 = vsub.f32 %v8896_v8, %v8915_v49  ;;  %v15977_v8 = vperm.slane %v8900_v38, 0 }
 0xf77   :  { %v8929_v33 = vmul.f32 %v15947_v39, %v15947_v39  ;;  %v8930_v30 = vmul.f32 %v15949_v43, %v15949_v43 }
 0xf79   :  { %v8939_v6 = vadd.f32 %v8930_v30, %v8929_v33 }
 0xf7a   :  { %v8912_v35 = vpop.xlane.xlu0 %8911 }
 0xf7b   :  { %v8916_v31 = vmul.f32 %v8912_v35, %v16457_v2  ;;  %8940 = vadd.xlane.f32.xlu0 %v8939_v6 }
 0xf7d   :  { %v15956_v10 = vsub.f32 %v8897_v53, %v8916_v31  ;;  %v15958_v41 = vsub.f32 %v8898_v24, %v8916_v31 }
 0xf7f   :  { %v8931_v19 = vmul.f32 %v15956_v10, %v15956_v10  ;;  %v8932_v17 = vmul.f32 %v15958_v41, %v15958_v41 }
 0xf81   :  { %v8942_v62 = vadd.f32 %v8932_v17, %v8931_v19 }
 0xf83   :  { %8943 = vadd.xlane.f32.xlu2 %v8942_v62 }
 0xfde   :  { %v8935_v26 = vpop.xlane.xlu2 %8934 }
 0xfdf   :  { %v8945_v36 = vmul.f32 %v8935_v26, %v16457_v2 }
 0xfe1   :  { %v8949_v20 = vadd.f32 1e-05, %v8945_v36 }
 0xfe3   :  { %11350 = vrsqrt.f32 %v8949_v20  ;;  %vm8959_vm13 = vweird.f32 %v8949_v20 }
 0xfe6   :  { %v8938_v29 = vpop.xlane.xlu1 %8937 }
 0xfe7   :  { %v8946_v0 = vmul.f32 %v8938_v29, %v16457_v2 }
 0xfe9   :  { %v11351_v47 = vpop.eup %11350  ;;  %v8950_v50 = vadd.f32 1e-05, %v8946_v0 }
 0xfea   :  { %v8954_v16 = vmul.f32 %v11351_v47, %v8949_v20  ;;  %vm8960_vm1 = vweird.f32 %v11351_v47 }
 0xfeb   :  { %11352 = vrsqrt.f32 %v8950_v50  ;;  %vm8961_vm4 = vmor %vm8959_vm13, %vm8960_vm1  ;;  %vm8969_vm5 = vweird.f32 %v8950_v50 }
 0xfec   :  { %v8955_v63 = vmul.f32 %v11351_v47, %v8954_v16 }
 0xfee   :  { %v8956_v11 = vmul.f32 0.5, %v8955_v63  ;;  %v8941_v34 = vpop.xlane.xlu0 %8940 }
 0xfef   :  { %v8947_v3 = vmul.f32 %v8941_v34, %v16457_v2 }
 0xff0   :  { %v8957_v28 = vsub.f32 1.5, %v8956_v11 }
 0xff1   :  { %v11353_v52 = vpop.eup %11352  ;;  %v8951_v59 = vadd.f32 1e-05, %v8947_v3 }
 0xff2   :  { %v8958_v5 = vmul.f32 %v11351_v47, %v8957_v28  ;;  %v8964_v51 = vmul.f32 %v11353_v52, %v8950_v50  ;;  %vm8970_vm3 = vweird.f32 %v11353_v52 }
 0xff3   :  { %11354 = vrsqrt.f32 %v8951_v59  ;;  %vm8971_vm9 = vmor %vm8969_vm5, %vm8970_vm3  ;;  %vm8979_vm10 = vweird.f32 %v8951_v59 }
 0xff4   :  { %v8962_v57 = vsel %vm8961_vm4, %v11351_v47, %v8958_v5  ;;  %v8965_v22 = vmul.f32 %v11353_v52, %v8964_v51 }
 0xff5   :  { %v8993_v25 = vmul.f32 %v8962_v57, %v8917_v13  ;;  %v8994_v23 = vmul.f32 %v8962_v57, %v8918_v45 }
 0xff6   :  { %v8966_v14 = vmul.f32 0.5, %v8965_v22  ;;  %v8944_v55 = vpop.xlane.xlu2 %8943 }
 0xff7   :  { %v9006_v61 = vmul.f32 %v15973_v42, %v8993_v25  ;;  %v9007_v21 = vmul.f32 %v15975_v15, %v8994_v23  ;;  %v8948_v40 = vmul.f32 %v8944_v55, %v16457_v2 }
 0xff8   :  { %v8967_v53 = vsub.f32 1.5, %v8966_v14 }
 0xff9   :  { %v11355_v24 = vpop.eup %11354  ;;  %v9019_v44 = vadd.f32 %v15977_v8, %v9006_v61  ;;  %v9020_v46 = vadd.f32 %v15979_v7, %v9007_v21  ;;  %v8952_v54 = vadd.f32 1e-05, %v8948_v40 }
 0xffa   :  { %v8968_v9 = vmul.f32 %v11353_v52, %v8967_v53  ;;  %v8974_v13 = vmul.f32 %v11355_v24, %v8951_v59  ;;  %vm8980_vm6 = vweird.f32 %v11355_v24 }
 0xffb   :  { %9027 = vst [vmem:[#allocation26] sm:$0xff] %v9019_v44  ;;  %11356 = vrsqrt.f32 %v8952_v54  ;;  %vm8981_vm15 = vmor %vm8979_vm10, %vm8980_vm6  ;;  %vm8989_vm11 = vweird.f32 %v8952_v54 }
 0xffc   :  { %9028 = vst [vmem:[#allocation26 + $0x8] sm:$0xff] %v9020_v46  ;;  %v8972_v45 = vsel %vm8971_vm9, %v11353_v52, %v8968_v9  ;;  %v8975_v60 = vmul.f32 %v11355_v24, %v8974_v13 }
 0xffd   :  { %v8995_v48 = vmul.f32 %v8972_v45, %v15938_v56  ;;  %v8996_v2 = vmul.f32 %v8972_v45, %v15940_v37 }
 0xffe   :  { %v8976_v58 = vmul.f32 0.5, %v8975_v60 }
 0xfff   :  { %v9008_v1 = vmul.f32 %v15973_v42, %v8995_v48  ;;  %v9009_v18 = vmul.f32 %v15975_v15, %v8996_v2 }
0x1000   :  { %v8977_v27 = vsub.f32 1.5, %v8976_v58 }
0x1001   :  { %v11357_v32 = vpop.eup %11356  ;;  %v9021_v12 = vadd.f32 %v15977_v8, %v9008_v1  ;;  %v9022_v49 = vadd.f32 %v15979_v7, %v9009_v18 }
0x1002   :  { %v8978_v33 = vmul.f32 %v11355_v24, %v8977_v27  ;;  %v8984_v30 = vmul.f32 %v11357_v32, %v8952_v54  ;;  %vm8990_vm2 = vweird.f32 %v11357_v32 }
0x1003   :  { %9029 = vst [vmem:[#allocation26 + $0x10] sm:$0xff] %v9021_v12  ;;  %vm8991_vm14 = vmor %vm8989_vm11, %vm8990_vm2 }
0x1004   :  { %9030 = vst [vmem:[#allocation26 + $0x18] sm:$0xff] %v9022_v49  ;;  %v8982_v56 = vsel %vm8981_vm15, %v11355_v24, %v8978_v33  ;;  %v8985_v37 = vmul.f32 %v11357_v32, %v8984_v30 }
0x1005   :  { %v8997_v6 = vmul.f32 %v8982_v56, %v15947_v39  ;;  %v8998_v35 = vmul.f32 %v8982_v56, %v15949_v43 }
0x1006   :  { %v8986_v31 = vmul.f32 0.5, %v8985_v37 }
0x1007   :  { %v9010_v19 = vmul.f32 %v15973_v42, %v8997_v6  ;;  %v9011_v17 = vmul.f32 %v15975_v15, %v8998_v35 }
0x1008   :  { %v8987_v62 = vsub.f32 1.5, %v8986_v31 }
0x1009   :  { %v9023_v26 = vadd.f32 %v15977_v8, %v9010_v19  ;;  %v9024_v36 = vadd.f32 %v15979_v7, %v9011_v17 }
0x100a   :  { %v8988_v20 = vmul.f32 %v11357_v32, %v8987_v62 }
0x100b   :  { %9031 = vst [vmem:[#allocation26 + $0x20] sm:$0xff] %v9023_v26 }
0x100c   :  { %9032 = vst [vmem:[#allocation26 + $0x28] sm:$0xff] %v9024_v36  ;;  %v8992_v29 = vsel %vm8991_vm14, %v11357_v32, %v8988_v20 }
0x100d   :  { %v8999_v39 = vmul.f32 %v8992_v29, %v15956_v10  ;;  %v9000_v43 = vmul.f32 %v8992_v29, %v15958_v41 }
0x100f   :  { %v9012_v0 = vmul.f32 %v15973_v42, %v8999_v39  ;;  %v9013_v47 = vmul.f32 %v15975_v15, %v9000_v43 }
0x1011   :  { %v9025_v50 = vadd.f32 %v15977_v8, %v9012_v0  ;;  %v9026_v16 = vadd.f32 %v15979_v7, %v9013_v47 }
0x1013   :  { %9033 = vst [vmem:[#allocation26 + $0x30] sm:$0xff] %v9025_v50 }
0x1014   :  { %9034 = vst [vmem:[#allocation26 + $0x38] sm:$0xff] %v9026_v16 }
0x1015   :  { %9047 = dma.vmem_to_hbm [thread:$0]  %s9040_s25, 1024, %s9042_s12, [#allocation4], %s16462_s6, %s16462_s6, %s11778_s5  }
0x1016   :  { %11774 = dma.done.wait [#allocation4], 1024  }
0x1017   :  { %11775 = vsyncadd [#allocation4], 4294966272 }
0x1018   :  { %9052 = vsyncpa [#allocation3], 1 }
0x1019   :  { %9053 = vsyncpa [#allocation6], 1 }
0x101a   :  { %9054 = vsyncpa [#allocation9], 1 }
0x101b   :  { %9055 = vsyncpa [#allocation12], 1 }
0x101c   :  { %9056 = vsyncpa [#allocation15], 1 }
0x101d   :  { %9057 = vsyncpa [#allocation18], 1 }
0x101e   :  { %9058 = vsyncpa [#allocation21], 1 }
0x101f   :  { %9059 = vsyncpa [#allocation24], 1 }
0x1020   :  { %9060 = vsyncpa [#allocation4], 1 }

</bundles_post_ra>
